<compile_context>
chip_gen: v5e
topology: v5e:2x2
jax: 0.10.0
libtpu: 0.0.40
codegen_flags: <defaults>
</compile_context>

<pallas_src>
import functools

import numpy as np
import jax
import jax.numpy as jnp
from jax.experimental import pallas as pl
from jax.experimental.pallas import tpu as pltpu


# ----------------------------------------------------------------------------
# small helpers
# ----------------------------------------------------------------------------
def _round_up(x, m):
    return (x + m - 1) // m * m


def _pad_to(a, shape, value=0.0):
    pads = [(0, s - d) for s, d in zip(shape, a.shape)]
    if any(p[1] for p in pads):
        a = jnp.pad(a, pads, constant_values=value)
    return a


# ----------------------------------------------------------------------------
# Pallas kernels
# ----------------------------------------------------------------------------
def _gemm_kernel(*refs, relu, has_res):
    """o = act((x @ w) * scale + bias [+ res]); K-reduction over grid axis 2."""
    if has_res:
        x_ref, w_ref, s_ref, b_ref, r_ref, o_ref = refs
    else:
        x_ref, w_ref, s_ref, b_ref, o_ref = refs
        r_ref = None

    k = pl.program_id(2)

    @pl.when(k == 0)
    def _():
        o_ref[...] = jnp.zeros_like(o_ref)

    o_ref[...] += jnp.dot(x_ref[...], w_ref[...],
                          preferred_element_type=jnp.float32)

    @pl.when(k == pl.num_programs(2) - 1)
    def _():
        r = o_ref[...] * s_ref[...] + b_ref[...]
        if r_ref is not None:
            r = r + r_ref[...]
        if relu:
            r = jnp.maximum(r, 0.0)
        o_ref[...] = r


def _choose_tiles(M, N, K):
    # M tile (bf16 sublane: multiples of 16; prefer 256 for the 256x256 MXU)
    if M >= 256:
        Mp, tm = _round_up(M, 256), 256
    elif M >= 128:
        Mp, tm = _round_up(M, 128), 128
    else:
        Mp = _round_up(M, 16)
        tm = Mp
    # N tile
    Np = _round_up(N, 128)
    tn = 256 if Np % 256 == 0 else 128
    # K tile
    Kp = _round_up(K, 128)
    tk = next(t for t in (512, 384, 256, 128) if Kp % t == 0)
    return Mp, Np, Kp, tm, tn, tk


def gemm_affine(x, w, scale, bias, *, relu, residual=None):
    """x: (M, K), w: (K, N), scale/bias: (N,), residual: (M, N) or None -> (M, N) f32."""
    M, K = x.shape
    N = w.shape[1]
    Mp, Np, Kp, tm, tn, tk = _choose_tiles(M, N, K)

    xp = _pad_to(x, (M, Kp)).astype(jnp.bfloat16)
    xp = _pad_to(xp, (Mp, Kp))
    wp = _pad_to(w, (Kp, Np)).astype(jnp.bfloat16)
    sp = _pad_to(scale.reshape(1, N).astype(jnp.float32), (1, Np))
    bp = _pad_to(bias.reshape(1, N).astype(jnp.float32), (1, Np))

    in_specs = [
        pl.BlockSpec((tm, tk), lambda i, j, k: (i, k)),
        pl.BlockSpec((tk, tn), lambda i, j, k: (k, j)),
        pl.BlockSpec((1, tn), lambda i, j, k: (0, j)),
        pl.BlockSpec((1, tn), lambda i, j, k: (0, j)),
    ]
    args = [xp, wp, sp, bp]
    has_res = residual is not None
    if has_res:
        rp = _pad_to(residual.astype(jnp.float32), (Mp, Np))
        in_specs.append(pl.BlockSpec((tm, tn), lambda i, j, k: (i, j)))
        args.append(rp)

    out = pl.pallas_call(
        functools.partial(_gemm_kernel, relu=relu, has_res=has_res),
        out_shape=jax.ShapeDtypeStruct((Mp, Np), jnp.float32),
        grid=(Mp // tm, Np // tn, Kp // tk),
        in_specs=in_specs,
        out_specs=pl.BlockSpec((tm, tn), lambda i, j, k: (i, j)),
        compiler_params=pltpu.CompilerParams(
            dimension_semantics=("parallel", "parallel", "arbitrary"),
            vmem_limit_bytes=32 * 1024 * 1024,
        ),
    )(*args)
    return out[:M, :N]


def _maxtap_kernel(x_ref, o_ref):
    # x_ref: (T, tm, C) -> elementwise max over the T taps (pure VPU max tree).
    o_ref[...] = jnp.max(x_ref[...], axis=0)


def max_over_taps(stacked):
    """stacked: (T, M, C) f32 -> (M, C) elementwise max over taps, tiled over M."""
    T, M, C = stacked.shape
    if M >= 512:
        Mp, tm = _round_up(M, 512), 512
    else:
        Mp = _round_up(M, 8)
        tm = Mp
    xp = _pad_to(stacked, (T, Mp, C))
    out = pl.pallas_call(
        _maxtap_kernel,
        out_shape=jax.ShapeDtypeStruct((Mp, C), jnp.float32),
        grid=(Mp // tm,),
        in_specs=[pl.BlockSpec((T, tm, C), lambda i: (0, i, 0))],
        out_specs=pl.BlockSpec((tm, C), lambda i: (i, 0)),
        compiler_params=pltpu.CompilerParams(
            dimension_semantics=("parallel",)),
    )(xp)
    return out[:M, :]


# ----------------------------------------------------------------------------
# JAX glue: NHWC im2col, conv / pool / bilinear wrappers
# ----------------------------------------------------------------------------
def im2col_nhwc(x, kh, kw, stride, padding, dilation):
    """x: (N, H, W, C) -> patches (N*Ho*Wo, kh*kw*C); column layout (kh, kw, c)."""
    n, _, _, c = x.shape
    xp = jnp.pad(x, ((0, 0), (padding, padding), (padding, padding), (0, 0)))
    hp, wp = xp.shape[1], xp.shape[2]
    ho = (hp - (dilation * (kh - 1) + 1)) // stride + 1
    wo = (wp - (dilation * (kw - 1) + 1)) // stride + 1
    taps = []
    for i in range(kh):
        for j in range(kw):
            taps.append(
                xp[:,
                   i * dilation:i * dilation + (ho - 1) * stride + 1:stride,
                   j * dilation:j * dilation + (wo - 1) * stride + 1:stride,
                   :])
    patches = jnp.concatenate(taps, axis=-1)        # (n, ho, wo, kh*kw*c)
    return patches.reshape(n * ho * wo, kh * kw * c), ho, wo


def conv2d_nhwc(x, w, scale, bias, *, stride, padding, dilation, relu,
                residual=None):
    """Conv2d (PyTorch semantics) on NHWC activations, fused with per-channel
    affine (folded eval-mode BN), optional residual add, optional ReLU."""
    cout, cin, kh, kw = w.shape
    n = x.shape[0]
    xb = x.astype(jnp.bfloat16)
    if kh == 1 and kw == 1 and padding == 0 and dilation == 1:
        xs = xb[:, ::stride, ::stride, :] if stride > 1 else xb
        ho, wo = xs.shape[1], xs.shape[2]
        patches = xs.reshape(n * ho * wo, cin)
        wmat = w.reshape(cout, cin).T                       # (Cin, Cout)
    else:
        patches, ho, wo = im2col_nhwc(xb, kh, kw, stride, padding, dilation)
        wmat = w.transpose(2, 3, 1, 0).reshape(kh * kw * cin, cout)
    res = None if residual is None else residual.reshape(n * ho * wo, cout)
    out = gemm_affine(patches, wmat, scale, bias, relu=relu, residual=res)
    return out.reshape(n, ho, wo, cout)


def maxpool2d_nhwc(x, k=3, stride=2, padding=1):
    # Input is post-ReLU (>= 0), so zero padding is equivalent to PyTorch's
    # -inf padding for max pooling.
    n, _, _, c = x.shape
    xp = jnp.pad(x, ((0, 0), (padding, padding), (padding, padding), (0, 0)))
    hp, wp = xp.shape[1], xp.shape[2]
    ho = (hp - k) // stride + 1
    wo = (wp - k) // stride + 1
    taps = [
        xp[:, i:i + (ho - 1) * stride + 1:stride,
              j:j + (wo - 1) * stride + 1:stride, :].reshape(n * ho * wo, c)
        for i in range(k) for j in range(k)
    ]
    stacked = jnp.stack(taps, axis=0)               # (k*k, M, C)
    return max_over_taps(stacked).reshape(n, ho, wo, c)


def _interp_matrix(in_size, out_size):
    # PyTorch bilinear interpolation, align_corners=False (module default).
    scale = in_size / out_size
    dst = np.arange(out_size, dtype=np.float64)
    src = np.maximum((dst + 0.5) * scale - 0.5, 0.0)
    i0 = np.minimum(np.floor(src).astype(np.int64), in_size - 1)
    i1 = np.minimum(i0 + 1, in_size - 1)
    frac = src - i0
    m = np.zeros((out_size, in_size), dtype=np.float32)
    m[np.arange(out_size), i0] += (1.0 - frac).astype(np.float32)
    m[np.arange(out_size), i1] += frac.astype(np.float32)
    return jnp.asarray(m)


def bilinear_resize_to_nchw(x, h_out, w_out):
    """x: NHWC -> bilinear resize (align_corners=False) -> NCHW output."""
    n, h_in, w_in, c = x.shape
    aw = _interp_matrix(w_in, w_out)   # (w_out, w_in)
    ah = _interp_matrix(h_in, h_out)   # (h_out, h_in)
    ones = lambda k: jnp.ones((k,), jnp.float32)
    zeros = lambda k: jnp.zeros((k,), jnp.float32)
    # W interpolation: (n, h, c, w_in) @ aw.T
    t = x.transpose(0, 1, 3, 2).reshape(n * h_in * c, w_in)
    t = gemm_affine(t, aw.T, ones(w_out), zeros(w_out), relu=False)
    t = t.reshape(n, h_in, c, w_out)
    # H interpolation: (n, w_out, c, h_in) @ ah.T
    t = t.transpose(0, 3, 2, 1).reshape(n * w_out * c, h_in)
    t = gemm_affine(t, ah.T, ones(h_out), zeros(h_out), relu=False)
    t = t.reshape(n, w_out, c, h_out)
    return t.transpose(0, 2, 3, 1)                   # (n, c, h_out, w_out)


# ----------------------------------------------------------------------------
# Parameters (deterministic, synthetic) and forward pass
# ----------------------------------------------------------------------------
def make_params(key, out_ch):
    kit = iter(jax.random.split(key, 128))

    def conv_w(cout, cin, k):
        fan_in = cin * k * k
        return jax.random.normal(next(kit), (cout, cin, k, k),
                                 jnp.float32) * np.sqrt(2.0 / fan_in)

    def bn(c):
        # Eval-mode BatchNorm folded to per-channel affine: y = x * scale + bias.
        eps = 1e-5
        gamma = 1.0 + 0.1 * jax.random.normal(next(kit), (c,), jnp.float32)
        beta = 0.1 * jax.random.normal(next(kit), (c,), jnp.float32)
        running_mean = 0.1 * jax.random.normal(next(kit), (c,), jnp.float32)
        running_var = jnp.ones((c,), jnp.float32)
        scale = gamma / jnp.sqrt(running_var + eps)
        bias = beta - running_mean * scale
        return scale, bias

    def block(cin, cout, downsample):
        p = {"conv1_w": conv_w(cout, cin, 3), "bn1": bn(cout),
             "conv2_w": conv_w(cout, cout, 3), "bn2": bn(cout)}
        if downsample:
            p["down_w"] = conv_w(cout, cin, 1)
            p["down_bn"] = bn(cout)
        return p

    return {
        "conv1_w": conv_w(64, 3, 7),
        "bn1": bn(64),
        "layer1": [block(64, 64, False), block(64, 64, False)],
        "layer2": [block(64, 128, True), block(128, 128, False)],
        "layer3": [block(128, 256, True), block(256, 256, False)],
        # output_stride=16: layer4 runs at stride 1 / dilation 2, 1x1 downsample
        "layer4": [block(256, 512, True), block(512, 512, False)],
        # fc -> Conv2d(512, out_ch, 1): weight ~ N(0, 0.01), bias = 0
        "fc_w": 0.01 * jax.random.normal(next(kit), (out_ch, 512, 1, 1),
                                         jnp.float32),
        "fc_b": jnp.zeros((out_ch,), jnp.float32),
    }


def basic_block(x, p, stride, dilation):
    out = conv2d_nhwc(x, p["conv1_w"], p["bn1"][0], p["bn1"][1],
                      stride=stride, padding=dilation, dilation=dilation,
                      relu=True)
    if "down_w" in p:
        identity = conv2d_nhwc(x, p["down_w"], p["down_bn"][0], p["down_bn"][1],
                               stride=stride, padding=0, dilation=1, relu=False)
    else:
        identity = x
    # conv2 + BN2 + residual add + ReLU fused in the GEMM epilogue.
    return conv2d_nhwc(out, p["conv2_w"], p["bn2"][0], p["bn2"][1],
                       stride=1, padding=dilation, dilation=dilation,
                       relu=True, residual=identity)


def resnet18_16s_forward(params, x):
    h_in, w_in = x.shape[2], x.shape[3]
    # NCHW -> NHWC once at the boundary; everything inside stays NHWC.
    out = x.transpose(0, 2, 3, 1)
    # stem
    out = conv2d_nhwc(out, params["conv1_w"], params["bn1"][0], params["bn1"][1],
                      stride=2, padding=3, dilation=1, relu=True)
    out = maxpool2d_nhwc(out, 3, 2, 1)
    # residual stages (layer4 dilated, stride 1, for output_stride=16)
    for layer, stride, dilation in (("layer1", 1, 1), ("layer2", 2, 1),
                                    ("layer3", 2, 1), ("layer4", 1, 2)):
        blocks = params[layer]
        out = basic_block(out, blocks[0], stride, dilation)
        out = basic_block(out, blocks[1], 1, dilation)
    # fc head: 1x1 conv with bias (no BN, no ReLU)
    out_ch = params["fc_w"].shape[0]
    out = conv2d_nhwc(out, params["fc_w"], jnp.ones((out_ch,), jnp.float32),
                      params["fc_b"], stride=1, padding=0, dilation=1,
                      relu=False)
    # upsample back to input spatial size, return NCHW like the PyTorch module
    return bilinear_resize_to_nchw(out, h_in, w_in)


if __name__ == "__main__":
    key = jax.random.PRNGKey(0)
    pkey, xkey = jax.random.split(key)
    out_ch = 16
    params = make_params(pkey, out_ch)
    x = jax.random.normal(xkey, (2, 3, 16, 16), jnp.float32)

    fwd = jax.jit(resnet18_16s_forward)
    y = fwd(params, x)
    y = jax.block_until_ready(y)

    assert y.shape == (2, out_ch, 16, 16), y.shape
    assert bool(jnp.all(jnp.isfinite(y)))
    print("KERNEL_OK")
</pallas_src>

<mosaic_0001>
module attributes {stable_mosaic.version = 11 : i64} {
  func.func @_gemm_kernel(%arg0: i32, %arg1: i32, %arg2: i32, %arg3: memref<128x256xbf16, #tpu.memory_space<vmem>>, %arg4: memref<256x128xbf16, #tpu.memory_space<vmem>>, %arg5: memref<1x128xf32, #tpu.memory_space<vmem>>, %arg6: memref<1x128xf32, #tpu.memory_space<vmem>>, %arg7: memref<128x128xf32, #tpu.memory_space<vmem>>) attributes {dimension_semantics = [#tpu.dimension_semantics<parallel>, #tpu.dimension_semantics<parallel>, #tpu.dimension_semantics<arbitrary>], iteration_bounds = array<i64: 1, 1, 1>, scalar_prefetch = 0 : i64, scratch_operands = 0 : i64, tpu.core_type = #tpu.core_type<tc>, window_params = [{transform_indices = @transform_0, window_bounds = array<i64: 128, 256>}, {transform_indices = @transform_1, window_bounds = array<i64: 256, 128>}, {transform_indices = @transform_2, window_bounds = array<i64: 1, 128>}, {transform_indices = @transform_3, window_bounds = array<i64: 1, 128>}, {transform_indices = @transform_4, window_bounds = array<i64: 128, 128>}]} {
    %c0_i32 = arith.constant 0 : i32
    %0 = arith.cmpi eq, %arg2, %c0_i32 : i32
    %1 = arith.extui %0 : i1 to i32
    %c0_i32_0 = arith.constant 0 : i32
    %2 = arith.cmpi ne, %1, %c0_i32_0 : i32
    scf.if %2 {
      %cst_10 = arith.constant 0.000000e+00 : f32
      %12 = vector.broadcast %cst_10 : f32 to vector<128x128xf32>
      %c0_11 = arith.constant 0 : index
      %c0_12 = arith.constant 0 : index
      %13 = vector.load %arg7[%c0_11, %c0_12] : memref<128x128xf32, #tpu.memory_space<vmem>>, vector<128x128xf32>
      tpu.vector_store %arg7[%c0_11, %c0_12], %12 {strides = array<i32>} : memref<128x128xf32, #tpu.memory_space<vmem>>, vector<128x128xf32>,
    } else {
    }
    %c0 = arith.constant 0 : index
    %c0_1 = arith.constant 0 : index
    %3 = vector.load %arg7[%c0, %c0_1] : memref<128x128xf32, #tpu.memory_space<vmem>>, vector<128x128xf32>
    %c0_2 = arith.constant 0 : index
    %c0_3 = arith.constant 0 : index
    %4 = vector.load %arg3[%c0_2, %c0_3] : memref<128x256xbf16, #tpu.memory_space<vmem>>, vector<128x256xbf16>
    %c0_4 = arith.constant 0 : index
    %c0_5 = arith.constant 0 : index
    %5 = vector.load %arg4[%c0_4, %c0_5] : memref<256x128xbf16, #tpu.memory_space<vmem>>, vector<256x128xbf16>
    %cst = arith.constant dense<0.000000e+00> : vector<128x128xf32>
    %6 = tpu.matmul %4, %5, %cst {dimension_numbers = #tpu.dot_dimension_numbers<[1], [0], [0], [1], [0, 0, 1, 1], [], []>} : vector<128x256xbf16>, vector<256x128xbf16>, vector<128x128xf32> -> vector<128x128xf32>
    %7 = arith.addf %3, %6 : vector<128x128xf32>
    %c0_6 = arith.constant 0 : index
    %c0_7 = arith.constant 0 : index
    %8 = vector.load %arg7[%c0_6, %c0_7] : memref<128x128xf32, #tpu.memory_space<vmem>>, vector<128x128xf32>
    tpu.vector_store %arg7[%c0_6, %c0_7], %7 {strides = array<i32>} : memref<128x128xf32, #tpu.memory_space<vmem>>, vector<128x128xf32>,
    %c0_i32_8 = arith.constant 0 : i32
    %9 = arith.cmpi eq, %arg2, %c0_i32_8 : i32
    %10 = arith.extui %9 : i1 to i32
    %c0_i32_9 = arith.constant 0 : i32
    %11 = arith.cmpi ne, %10, %c0_i32_9 : i32
    scf.if %11 {
      %c0_10 = arith.constant 0 : index
      %c0_11 = arith.constant 0 : index
      %12 = vector.load %arg7[%c0_10, %c0_11] : memref<128x128xf32, #tpu.memory_space<vmem>>, vector<128x128xf32>
      %c0_12 = arith.constant 0 : index
      %c0_13 = arith.constant 0 : index
      %13 = vector.load %arg5[%c0_12, %c0_13] : memref<1x128xf32, #tpu.memory_space<vmem>>, vector<1x128xf32>
      %14 = vector.broadcast %13 : vector<1x128xf32> to vector<128x128xf32>
      %15 = arith.mulf %12, %14 : vector<128x128xf32>
      %c0_14 = arith.constant 0 : index
      %c0_15 = arith.constant 0 : index
      %16 = vector.load %arg6[%c0_14, %c0_15] : memref<1x128xf32, #tpu.memory_space<vmem>>, vector<1x128xf32>
      %17 = vector.broadcast %16 : vector<1x128xf32> to vector<128x128xf32>
      %18 = arith.addf %15, %17 : vector<128x128xf32>
      %cst_16 = arith.constant 0.000000e+00 : f32
      %19 = vector.broadcast %cst_16 : f32 to vector<128x128xf32>
      %20 = arith.maximumf %18, %19 : vector<128x128xf32>
      %c0_17 = arith.constant 0 : index
      %c0_18 = arith.constant 0 : index
      %21 = vector.load %arg7[%c0_17, %c0_18] : memref<128x128xf32, #tpu.memory_space<vmem>>, vector<128x128xf32>
      tpu.vector_store %arg7[%c0_17, %c0_18], %20 {strides = array<i32>} : memref<128x128xf32, #tpu.memory_space<vmem>>, vector<128x128xf32>,
    } else {
    }
    return
  }
  func.func @transform_0(%arg0: i32, %arg1: i32, %arg2: i32) -> (i32, i32) {
    %c0_i32 = arith.constant 0 : i32
    return %arg0, %arg2 : i32, i32
  }
  func.func @transform_1(%arg0: i32, %arg1: i32, %arg2: i32) -> (i32, i32) {
    %c0_i32 = arith.constant 0 : i32
    return %arg2, %arg1 : i32, i32
  }
  func.func @transform_2(%arg0: i32, %arg1: i32, %arg2: i32) -> (i32, i32) {
    %c0_i32 = arith.constant 0 : i32
    %c0_i32_0 = arith.constant 0 : i32
    return %c0_i32, %arg1 : i32, i32
  }
  func.func @transform_3(%arg0: i32, %arg1: i32, %arg2: i32) -> (i32, i32) {
    %c0_i32 = arith.constant 0 : i32
    %c0_i32_0 = arith.constant 0 : i32
    return %c0_i32, %arg1 : i32, i32
  }
  func.func @transform_4(%arg0: i32, %arg1: i32, %arg2: i32) -> (i32, i32) {
    %c0_i32 = arith.constant 0 : i32
    return %arg0, %arg1 : i32, i32
  }
}

module attributes {stable_mosaic.version = 11 : i64} {
  func.func @_maxtap_kernel(%arg0: i32, %arg1: memref<9x32x64xf32, #tpu.memory_space<vmem>>, %arg2: memref<32x64xf32, #tpu.memory_space<vmem>>) attributes {dimension_semantics = [#tpu.dimension_semantics<parallel>], iteration_bounds = array<i64: 1>, scalar_prefetch = 0 : i64, scratch_operands = 0 : i64, tpu.core_type = #tpu.core_type<tc>, window_params = [{transform_indices = @transform_0, window_bounds = array<i64: 9, 32, 64>}, {transform_indices = @transform_1, window_bounds = array<i64: 32, 64>}]} {
    %c0 = arith.constant 0 : index
    %c0_0 = arith.constant 0 : index
    %c0_1 = arith.constant 0 : index
    %0 = vector.load %arg1[%c0, %c0_0, %c0_1] : memref<9x32x64xf32, #tpu.memory_space<vmem>>, vector<9x32x64xf32>
    %cst = arith.constant dense<0xFF800000> : vector<32x64xf32>
    %1 = vector.multi_reduction <maximumf>, %0, %cst [0] : vector<9x32x64xf32> to vector<32x64xf32>
    %c0_2 = arith.constant 0 : index
    %c0_3 = arith.constant 0 : index
    %2 = vector.load %arg2[%c0_2, %c0_3] : memref<32x64xf32, #tpu.memory_space<vmem>>, vector<32x64xf32>
    tpu.vector_store %arg2[%c0_2, %c0_3], %1 {strides = array<i32>} : memref<32x64xf32, #tpu.memory_space<vmem>>, vector<32x64xf32>,
    return
  }
  func.func @transform_0(%arg0: i32) -> (i32, i32, i32) {
    %c0_i32 = arith.constant 0 : i32
    %c0_i32_0 = arith.constant 0 : i32
    %c0_i32_1 = arith.constant 0 : i32
    return %c0_i32, %arg0, %c0_i32_0 : i32, i32, i32
  }
  func.func @transform_1(%arg0: i32) -> (i32, i32) {
    %c0_i32 = arith.constant 0 : i32
    %c0_i32_0 = arith.constant 0 : i32
    return %arg0, %c0_i32 : i32, i32
  }
}

module attributes {stable_mosaic.version = 11 : i64} {
  func.func @_gemm_kernel(%arg0: i32, %arg1: i32, %arg2: i32, %arg3: memref<32x128xbf16, #tpu.memory_space<vmem>>, %arg4: memref<128x128xbf16, #tpu.memory_space<vmem>>, %arg5: memref<1x128xf32, #tpu.memory_space<vmem>>, %arg6: memref<1x128xf32, #tpu.memory_space<vmem>>, %arg7: memref<32x128xf32, #tpu.memory_space<vmem>>) attributes {dimension_semantics = [#tpu.dimension_semantics<parallel>, #tpu.dimension_semantics<parallel>, #tpu.dimension_semantics<arbitrary>], iteration_bounds = array<i64: 1, 1, 5>, scalar_prefetch = 0 : i64, scratch_operands = 0 : i64, tpu.core_type = #tpu.core_type<tc>, window_params = [{transform_indices = @transform_0, window_bounds = array<i64: 32, 128>}, {transform_indices = @transform_1, window_bounds = array<i64: 128, 128>}, {transform_indices = @transform_2, window_bounds = array<i64: 1, 128>}, {transform_indices = @transform_3, window_bounds = array<i64: 1, 128>}, {transform_indices = @transform_4, window_bounds = array<i64: 32, 128>}]} {
    %c0_i32 = arith.constant 0 : i32
    %0 = arith.cmpi eq, %arg2, %c0_i32 : i32
    %1 = arith.extui %0 : i1 to i32
    %c0_i32_0 = arith.constant 0 : i32
    %2 = arith.cmpi ne, %1, %c0_i32_0 : i32
    scf.if %2 {
      %cst_9 = arith.constant 0.000000e+00 : f32
      %12 = vector.broadcast %cst_9 : f32 to vector<32x128xf32>
      %c0_10 = arith.constant 0 : index
      %c0_11 = arith.constant 0 : index
      %13 = vector.load %arg7[%c0_10, %c0_11] : memref<32x128xf32, #tpu.memory_space<vmem>>, vector<32x128xf32>
      tpu.vector_store %arg7[%c0_10, %c0_11], %12 {strides = array<i32>} : memref<32x128xf32, #tpu.memory_space<vmem>>, vector<32x128xf32>,
    } else {
    }
    %c0 = arith.constant 0 : index
    %c0_1 = arith.constant 0 : index
    %3 = vector.load %arg7[%c0, %c0_1] : memref<32x128xf32, #tpu.memory_space<vmem>>, vector<32x128xf32>
    %c0_2 = arith.constant 0 : index
    %c0_3 = arith.constant 0 : index
    %4 = vector.load %arg3[%c0_2, %c0_3] : memref<32x128xbf16, #tpu.memory_space<vmem>>, vector<32x128xbf16>
    %c0_4 = arith.constant 0 : index
    %c0_5 = arith.constant 0 : index
    %5 = vector.load %arg4[%c0_4, %c0_5] : memref<128x128xbf16, #tpu.memory_space<vmem>>, vector<128x128xbf16>
    %cst = arith.constant dense<0.000000e+00> : vector<32x128xf32>
    %6 = tpu.matmul %4, %5, %cst {dimension_numbers = #tpu.dot_dimension_numbers<[1], [0], [0], [1], [0, 0, 1, 1], [], []>} : vector<32x128xbf16>, vector<128x128xbf16>, vector<32x128xf32> -> vector<32x128xf32>
    %7 = arith.addf %3, %6 : vector<32x128xf32>
    %c0_6 = arith.constant 0 : index
    %c0_7 = arith.constant 0 : index
    %8 = vector.load %arg7[%c0_6, %c0_7] : memref<32x128xf32, #tpu.memory_space<vmem>>, vector<32x128xf32>
    tpu.vector_store %arg7[%c0_6, %c0_7], %7 {strides = array<i32>} : memref<32x128xf32, #tpu.memory_space<vmem>>, vector<32x128xf32>,
    %c4_i32 = arith.constant 4 : i32
    %9 = arith.cmpi eq, %arg2, %c4_i32 : i32
    %10 = arith.extui %9 : i1 to i32
    %c0_i32_8 = arith.constant 0 : i32
    %11 = arith.cmpi ne, %10, %c0_i32_8 : i32
    scf.if %11 {
      %c0_9 = arith.constant 0 : index
      %c0_10 = arith.constant 0 : index
      %12 = vector.load %arg7[%c0_9, %c0_10] : memref<32x128xf32, #tpu.memory_space<vmem>>, vector<32x128xf32>
      %c0_11 = arith.constant 0 : index
      %c0_12 = arith.constant 0 : index
      %13 = vector.load %arg5[%c0_11, %c0_12] : memref<1x128xf32, #tpu.memory_space<vmem>>, vector<1x128xf32>
      %14 = vector.broadcast %13 : vector<1x128xf32> to vector<32x128xf32>
      %15 = arith.mulf %12, %14 : vector<32x128xf32>
      %c0_13 = arith.constant 0 : index
      %c0_14 = arith.constant 0 : index
      %16 = vector.load %arg6[%c0_13, %c0_14] : memref<1x128xf32, #tpu.memory_space<vmem>>, vector<1x128xf32>
      %17 = vector.broadcast %16 : vector<1x128xf32> to vector<32x128xf32>
      %18 = arith.addf %15, %17 : vector<32x128xf32>
      %cst_15 = arith.constant 0.000000e+00 : f32
      %19 = vector.broadcast %cst_15 : f32 to vector<32x128xf32>
      %20 = arith.maximumf %18, %19 : vector<32x128xf32>
      %c0_16 = arith.constant 0 : index
      %c0_17 = arith.constant 0 : index
      %21 = vector.load %arg7[%c0_16, %c0_17] : memref<32x128xf32, #tpu.memory_space<vmem>>, vector<32x128xf32>
      tpu.vector_store %arg7[%c0_16, %c0_17], %20 {strides = array<i32>} : memref<32x128xf32, #tpu.memory_space<vmem>>, vector<32x128xf32>,
    } else {
    }
    return
  }
  func.func @transform_0(%arg0: i32, %arg1: i32, %arg2: i32) -> (i32, i32) {
    %c0_i32 = arith.constant 0 : i32
    return %arg0, %arg2 : i32, i32
  }
  func.func @transform_1(%arg0: i32, %arg1: i32, %arg2: i32) -> (i32, i32) {
    %c0_i32 = arith.constant 0 : i32
    return %arg2, %arg1 : i32, i32
  }
  func.func @transform_2(%arg0: i32, %arg1: i32, %arg2: i32) -> (i32, i32) {
    %c0_i32 = arith.constant 0 : i32
    %c0_i32_0 = arith.constant 0 : i32
    return %c0_i32, %arg1 : i32, i32
  }
  func.func @transform_3(%arg0: i32, %arg1: i32, %arg2: i32) -> (i32, i32) {
    %c0_i32 = arith.constant 0 : i32
    %c0_i32_0 = arith.constant 0 : i32
    return %c0_i32, %arg1 : i32, i32
  }
  func.func @transform_4(%arg0: i32, %arg1: i32, %arg2: i32) -> (i32, i32) {
    %c0_i32 = arith.constant 0 : i32
    return %arg0, %arg1 : i32, i32
  }
}

module attributes {stable_mosaic.version = 11 : i64} {
  func.func @_gemm_kernel(%arg0: i32, %arg1: i32, %arg2: i32, %arg3: memref<32x128xbf16, #tpu.memory_space<vmem>>, %arg4: memref<128x128xbf16, #tpu.memory_space<vmem>>, %arg5: memref<1x128xf32, #tpu.memory_space<vmem>>, %arg6: memref<1x128xf32, #tpu.memory_space<vmem>>, %arg7: memref<32x128xf32, #tpu.memory_space<vmem>>, %arg8: memref<32x128xf32, #tpu.memory_space<vmem>>) attributes {dimension_semantics = [#tpu.dimension_semantics<parallel>, #tpu.dimension_semantics<parallel>, #tpu.dimension_semantics<arbitrary>], iteration_bounds = array<i64: 1, 1, 5>, scalar_prefetch = 0 : i64, scratch_operands = 0 : i64, tpu.core_type = #tpu.core_type<tc>, window_params = [{transform_indices = @transform_0, window_bounds = array<i64: 32, 128>}, {transform_indices = @transform_1, window_bounds = array<i64: 128, 128>}, {transform_indices = @transform_2, window_bounds = array<i64: 1, 128>}, {transform_indices = @transform_3, window_bounds = array<i64: 1, 128>}, {transform_indices = @transform_4, window_bounds = array<i64: 32, 128>}, {transform_indices = @transform_5, window_bounds = array<i64: 32, 128>}]} {
    %c0_i32 = arith.constant 0 : i32
    %0 = arith.cmpi eq, %arg2, %c0_i32 : i32
    %1 = arith.extui %0 : i1 to i32
    %c0_i32_0 = arith.constant 0 : i32
    %2 = arith.cmpi ne, %1, %c0_i32_0 : i32
    scf.if %2 {
      %cst_9 = arith.constant 0.000000e+00 : f32
      %12 = vector.broadcast %cst_9 : f32 to vector<32x128xf32>
      %c0_10 = arith.constant 0 : index
      %c0_11 = arith.constant 0 : index
      %13 = vector.load %arg8[%c0_10, %c0_11] : memref<32x128xf32, #tpu.memory_space<vmem>>, vector<32x128xf32>
      tpu.vector_store %arg8[%c0_10, %c0_11], %12 {strides = array<i32>} : memref<32x128xf32, #tpu.memory_space<vmem>>, vector<32x128xf32>,
    } else {
    }
    %c0 = arith.constant 0 : index
    %c0_1 = arith.constant 0 : index
    %3 = vector.load %arg8[%c0, %c0_1] : memref<32x128xf32, #tpu.memory_space<vmem>>, vector<32x128xf32>
    %c0_2 = arith.constant 0 : index
    %c0_3 = arith.constant 0 : index
    %4 = vector.load %arg3[%c0_2, %c0_3] : memref<32x128xbf16, #tpu.memory_space<vmem>>, vector<32x128xbf16>
    %c0_4 = arith.constant 0 : index
    %c0_5 = arith.constant 0 : index
    %5 = vector.load %arg4[%c0_4, %c0_5] : memref<128x128xbf16, #tpu.memory_space<vmem>>, vector<128x128xbf16>
    %cst = arith.constant dense<0.000000e+00> : vector<32x128xf32>
    %6 = tpu.matmul %4, %5, %cst {dimension_numbers = #tpu.dot_dimension_numbers<[1], [0], [0], [1], [0, 0, 1, 1], [], []>} : vector<32x128xbf16>, vector<128x128xbf16>, vector<32x128xf32> -> vector<32x128xf32>
    %7 = arith.addf %3, %6 : vector<32x128xf32>
    %c0_6 = arith.constant 0 : index
    %c0_7 = arith.constant 0 : index
    %8 = vector.load %arg8[%c0_6, %c0_7] : memref<32x128xf32, #tpu.memory_space<vmem>>, vector<32x128xf32>
    tpu.vector_store %arg8[%c0_6, %c0_7], %7 {strides = array<i32>} : memref<32x128xf32, #tpu.memory_space<vmem>>, vector<32x128xf32>,
    %c4_i32 = arith.constant 4 : i32
    %9 = arith.cmpi eq, %arg2, %c4_i32 : i32
    %10 = arith.extui %9 : i1 to i32
    %c0_i32_8 = arith.constant 0 : i32
    %11 = arith.cmpi ne, %10, %c0_i32_8 : i32
    scf.if %11 {
      %c0_9 = arith.constant 0 : index
      %c0_10 = arith.constant 0 : index
      %12 = vector.load %arg8[%c0_9, %c0_10] : memref<32x128xf32, #tpu.memory_space<vmem>>, vector<32x128xf32>
      %c0_11 = arith.constant 0 : index
      %c0_12 = arith.constant 0 : index
      %13 = vector.load %arg5[%c0_11, %c0_12] : memref<1x128xf32, #tpu.memory_space<vmem>>, vector<1x128xf32>
      %14 = vector.broadcast %13 : vector<1x128xf32> to vector<32x128xf32>
      %15 = arith.mulf %12, %14 : vector<32x128xf32>
      %c0_13 = arith.constant 0 : index
      %c0_14 = arith.constant 0 : index
      %16 = vector.load %arg6[%c0_13, %c0_14] : memref<1x128xf32, #tpu.memory_space<vmem>>, vector<1x128xf32>
      %17 = vector.broadcast %16 : vector<1x128xf32> to vector<32x128xf32>
      %18 = arith.addf %15, %17 : vector<32x128xf32>
      %c0_15 = arith.constant 0 : index
      %c0_16 = arith.constant 0 : index
      %19 = vector.load %arg7[%c0_15, %c0_16] : memref<32x128xf32, #tpu.memory_space<vmem>>, vector<32x128xf32>
      %20 = arith.addf %18, %19 : vector<32x128xf32>
      %cst_17 = arith.constant 0.000000e+00 : f32
      %21 = vector.broadcast %cst_17 : f32 to vector<32x128xf32>
      %22 = arith.maximumf %20, %21 : vector<32x128xf32>
      %c0_18 = arith.constant 0 : index
      %c0_19 = arith.constant 0 : index
      %23 = vector.load %arg8[%c0_18, %c0_19] : memref<32x128xf32, #tpu.memory_space<vmem>>, vector<32x128xf32>
      tpu.vector_store %arg8[%c0_18, %c0_19], %22 {strides = array<i32>} : memref<32x128xf32, #tpu.memory_space<vmem>>, vector<32x128xf32>,
    } else {
    }
    return
  }
  func.func @transform_0(%arg0: i32, %arg1: i32, %arg2: i32) -> (i32, i32) {
    %c0_i32 = arith.constant 0 : i32
    return %arg0, %arg2 : i32, i32
  }
  func.func @transform_1(%arg0: i32, %arg1: i32, %arg2: i32) -> (i32, i32) {
    %c0_i32 = arith.constant 0 : i32
    return %arg2, %arg1 : i32, i32
  }
  func.func @transform_2(%arg0: i32, %arg1: i32, %arg2: i32) -> (i32, i32) {
    %c0_i32 = arith.constant 0 : i32
    %c0_i32_0 = arith.constant 0 : i32
    return %c0_i32, %arg1 : i32, i32
  }
  func.func @transform_3(%arg0: i32, %arg1: i32, %arg2: i32) -> (i32, i32) {
    %c0_i32 = arith.constant 0 : i32
    %c0_i32_0 = arith.constant 0 : i32
    return %c0_i32, %arg1 : i32, i32
  }
  func.func @transform_4(%arg0: i32, %arg1: i32, %arg2: i32) -> (i32, i32) {
    %c0_i32 = arith.constant 0 : i32
    return %arg0, %arg1 : i32, i32
  }
  func.func @transform_5(%arg0: i32, %arg1: i32, %arg2: i32) -> (i32, i32) {
    %c0_i32 = arith.constant 0 : i32
    return %arg0, %arg1 : i32, i32
  }
}

module attributes {stable_mosaic.version = 11 : i64} {
  func.func @_gemm_kernel(%arg0: i32, %arg1: i32, %arg2: i32, %arg3: memref<16x128xbf16, #tpu.memory_space<vmem>>, %arg4: memref<128x128xbf16, #tpu.memory_space<vmem>>, %arg5: memref<1x128xf32, #tpu.memory_space<vmem>>, %arg6: memref<1x128xf32, #tpu.memory_space<vmem>>, %arg7: memref<16x128xf32, #tpu.memory_space<vmem>>) attributes {dimension_semantics = [#tpu.dimension_semantics<parallel>, #tpu.dimension_semantics<parallel>, #tpu.dimension_semantics<arbitrary>], iteration_bounds = array<i64: 1, 1, 5>, scalar_prefetch = 0 : i64, scratch_operands = 0 : i64, tpu.core_type = #tpu.core_type<tc>, window_params = [{transform_indices = @transform_0, window_bounds = array<i64: 16, 128>}, {transform_indices = @transform_1, window_bounds = array<i64: 128, 128>}, {transform_indices = @transform_2, window_bounds = array<i64: 1, 128>}, {transform_indices = @transform_3, window_bounds = array<i64: 1, 128>}, {transform_indices = @transform_4, window_bounds = array<i64: 16, 128>}]} {
    %c0_i32 = arith.constant 0 : i32
    %0 = arith.cmpi eq, %arg2, %c0_i32 : i32
    %1 = arith.extui %0 : i1 to i32
    %c0_i32_0 = arith.constant 0 : i32
    %2 = arith.cmpi ne, %1, %c0_i32_0 : i32
    scf.if %2 {
      %cst_9 = arith.constant 0.000000e+00 : f32
      %12 = vector.broadcast %cst_9 : f32 to vector<16x128xf32>
      %c0_10 = arith.constant 0 : index
      %c0_11 = arith.constant 0 : index
      %13 = vector.load %arg7[%c0_10, %c0_11] : memref<16x128xf32, #tpu.memory_space<vmem>>, vector<16x128xf32>
      tpu.vector_store %arg7[%c0_10, %c0_11], %12 {strides = array<i32>} : memref<16x128xf32, #tpu.memory_space<vmem>>, vector<16x128xf32>,
    } else {
    }
    %c0 = arith.constant 0 : index
    %c0_1 = arith.constant 0 : index
    %3 = vector.load %arg7[%c0, %c0_1] : memref<16x128xf32, #tpu.memory_space<vmem>>, vector<16x128xf32>
    %c0_2 = arith.constant 0 : index
    %c0_3 = arith.constant 0 : index
    %4 = vector.load %arg3[%c0_2, %c0_3] : memref<16x128xbf16, #tpu.memory_space<vmem>>, vector<16x128xbf16>
    %c0_4 = arith.constant 0 : index
    %c0_5 = arith.constant 0 : index
    %5 = vector.load %arg4[%c0_4, %c0_5] : memref<128x128xbf16, #tpu.memory_space<vmem>>, vector<128x128xbf16>
    %cst = arith.constant dense<0.000000e+00> : vector<16x128xf32>
    %6 = tpu.matmul %4, %5, %cst {dimension_numbers = #tpu.dot_dimension_numbers<[1], [0], [0], [1], [0, 0, 1, 1], [], []>} : vector<16x128xbf16>, vector<128x128xbf16>, vector<16x128xf32> -> vector<16x128xf32>
    %7 = arith.addf %3, %6 : vector<16x128xf32>
    %c0_6 = arith.constant 0 : index
    %c0_7 = arith.constant 0 : index
    %8 = vector.load %arg7[%c0_6, %c0_7] : memref<16x128xf32, #tpu.memory_space<vmem>>, vector<16x128xf32>
    tpu.vector_store %arg7[%c0_6, %c0_7], %7 {strides = array<i32>} : memref<16x128xf32, #tpu.memory_space<vmem>>, vector<16x128xf32>,
    %c4_i32 = arith.constant 4 : i32
    %9 = arith.cmpi eq, %arg2, %c4_i32 : i32
    %10 = arith.extui %9 : i1 to i32
    %c0_i32_8 = arith.constant 0 : i32
    %11 = arith.cmpi ne, %10, %c0_i32_8 : i32
    scf.if %11 {
      %c0_9 = arith.constant 0 : index
      %c0_10 = arith.constant 0 : index
      %12 = vector.load %arg7[%c0_9, %c0_10] : memref<16x128xf32, #tpu.memory_space<vmem>>, vector<16x128xf32>
      %c0_11 = arith.constant 0 : index
      %c0_12 = arith.constant 0 : index
      %13 = vector.load %arg5[%c0_11, %c0_12] : memref<1x128xf32, #tpu.memory_space<vmem>>, vector<1x128xf32>
      %14 = vector.broadcast %13 : vector<1x128xf32> to vector<16x128xf32>
      %15 = arith.mulf %12, %14 : vector<16x128xf32>
      %c0_13 = arith.constant 0 : index
      %c0_14 = arith.constant 0 : index
      %16 = vector.load %arg6[%c0_13, %c0_14] : memref<1x128xf32, #tpu.memory_space<vmem>>, vector<1x128xf32>
      %17 = vector.broadcast %16 : vector<1x128xf32> to vector<16x128xf32>
      %18 = arith.addf %15, %17 : vector<16x128xf32>
      %cst_15 = arith.constant 0.000000e+00 : f32
      %19 = vector.broadcast %cst_15 : f32 to vector<16x128xf32>
      %20 = arith.maximumf %18, %19 : vector<16x128xf32>
      %c0_16 = arith.constant 0 : index
      %c0_17 = arith.constant 0 : index
      %21 = vector.load %arg7[%c0_16, %c0_17] : memref<16x128xf32, #tpu.memory_space<vmem>>, vector<16x128xf32>
      tpu.vector_store %arg7[%c0_16, %c0_17], %20 {strides = array<i32>} : memref<16x128xf32, #tpu.memory_space<vmem>>, vector<16x128xf32>,
    } else {
    }
    return
  }
  func.func @transform_0(%arg0: i32, %arg1: i32, %arg2: i32) -> (i32, i32) {
    %c0_i32 = arith.constant 0 : i32
    return %arg0, %arg2 : i32, i32
  }
  func.func @transform_1(%arg0: i32, %arg1: i32, %arg2: i32) -> (i32, i32) {
    %c0_i32 = arith.constant 0 : i32
    return %arg2, %arg1 : i32, i32
  }
  func.func @transform_2(%arg0: i32, %arg1: i32, %arg2: i32) -> (i32, i32) {
    %c0_i32 = arith.constant 0 : i32
    %c0_i32_0 = arith.constant 0 : i32
    return %c0_i32, %arg1 : i32, i32
  }
  func.func @transform_3(%arg0: i32, %arg1: i32, %arg2: i32) -> (i32, i32) {
    %c0_i32 = arith.constant 0 : i32
    %c0_i32_0 = arith.constant 0 : i32
    return %c0_i32, %arg1 : i32, i32
  }
  func.func @transform_4(%arg0: i32, %arg1: i32, %arg2: i32) -> (i32, i32) {
    %c0_i32 = arith.constant 0 : i32
    return %arg0, %arg1 : i32, i32
  }
}

module attributes {stable_mosaic.version = 11 : i64} {
  func.func @_gemm_kernel(%arg0: i32, %arg1: i32, %arg2: i32, %arg3: memref<16x128xbf16, #tpu.memory_space<vmem>>, %arg4: memref<128x128xbf16, #tpu.memory_space<vmem>>, %arg5: memref<1x128xf32, #tpu.memory_space<vmem>>, %arg6: memref<1x128xf32, #tpu.memory_space<vmem>>, %arg7: memref<16x128xf32, #tpu.memory_space<vmem>>) attributes {dimension_semantics = [#tpu.dimension_semantics<parallel>, #tpu.dimension_semantics<parallel>, #tpu.dimension_semantics<arbitrary>], iteration_bounds = array<i64: 1, 1, 1>, scalar_prefetch = 0 : i64, scratch_operands = 0 : i64, tpu.core_type = #tpu.core_type<tc>, window_params = [{transform_indices = @transform_0, window_bounds = array<i64: 16, 128>}, {transform_indices = @transform_1, window_bounds = array<i64: 128, 128>}, {transform_indices = @transform_2, window_bounds = array<i64: 1, 128>}, {transform_indices = @transform_3, window_bounds = array<i64: 1, 128>}, {transform_indices = @transform_4, window_bounds = array<i64: 16, 128>}]} {
    %c0_i32 = arith.constant 0 : i32
    %0 = arith.cmpi eq, %arg2, %c0_i32 : i32
    %1 = arith.extui %0 : i1 to i32
    %c0_i32_0 = arith.constant 0 : i32
    %2 = arith.cmpi ne, %1, %c0_i32_0 : i32
    scf.if %2 {
      %cst_10 = arith.constant 0.000000e+00 : f32
      %12 = vector.broadcast %cst_10 : f32 to vector<16x128xf32>
      %c0_11 = arith.constant 0 : index
      %c0_12 = arith.constant 0 : index
      %13 = vector.load %arg7[%c0_11, %c0_12] : memref<16x128xf32, #tpu.memory_space<vmem>>, vector<16x128xf32>
      tpu.vector_store %arg7[%c0_11, %c0_12], %12 {strides = array<i32>} : memref<16x128xf32, #tpu.memory_space<vmem>>, vector<16x128xf32>,
    } else {
    }
    %c0 = arith.constant 0 : index
    %c0_1 = arith.constant 0 : index
    %3 = vector.load %arg7[%c0, %c0_1] : memref<16x128xf32, #tpu.memory_space<vmem>>, vector<16x128xf32>
    %c0_2 = arith.constant 0 : index
    %c0_3 = arith.constant 0 : index
    %4 = vector.load %arg3[%c0_2, %c0_3] : memref<16x128xbf16, #tpu.memory_space<vmem>>, vector<16x128xbf16>
    %c0_4 = arith.constant 0 : index
    %c0_5 = arith.constant 0 : index
    %5 = vector.load %arg4[%c0_4, %c0_5] : memref<128x128xbf16, #tpu.memory_space<vmem>>, vector<128x128xbf16>
    %cst = arith.constant dense<0.000000e+00> : vector<16x128xf32>
    %6 = tpu.matmul %4, %5, %cst {dimension_numbers = #tpu.dot_dimension_numbers<[1], [0], [0], [1], [0, 0, 1, 1], [], []>} : vector<16x128xbf16>, vector<128x128xbf16>, vector<16x128xf32> -> vector<16x128xf32>
    %7 = arith.addf %3, %6 : vector<16x128xf32>
    %c0_6 = arith.constant 0 : index
    %c0_7 = arith.constant 0 : index
    %8 = vector.load %arg7[%c0_6, %c0_7] : memref<16x128xf32, #tpu.memory_space<vmem>>, vector<16x128xf32>
    tpu.vector_store %arg7[%c0_6, %c0_7], %7 {strides = array<i32>} : memref<16x128xf32, #tpu.memory_space<vmem>>, vector<16x128xf32>,
    %c0_i32_8 = arith.constant 0 : i32
    %9 = arith.cmpi eq, %arg2, %c0_i32_8 : i32
    %10 = arith.extui %9 : i1 to i32
    %c0_i32_9 = arith.constant 0 : i32
    %11 = arith.cmpi ne, %10, %c0_i32_9 : i32
    scf.if %11 {
      %c0_10 = arith.constant 0 : index
      %c0_11 = arith.constant 0 : index
      %12 = vector.load %arg7[%c0_10, %c0_11] : memref<16x128xf32, #tpu.memory_space<vmem>>, vector<16x128xf32>
      %c0_12 = arith.constant 0 : index
      %c0_13 = arith.constant 0 : index
      %13 = vector.load %arg5[%c0_12, %c0_13] : memref<1x128xf32, #tpu.memory_space<vmem>>, vector<1x128xf32>
      %14 = vector.broadcast %13 : vector<1x128xf32> to vector<16x128xf32>
      %15 = arith.mulf %12, %14 : vector<16x128xf32>
      %c0_14 = arith.constant 0 : index
      %c0_15 = arith.constant 0 : index
      %16 = vector.load %arg6[%c0_14, %c0_15] : memref<1x128xf32, #tpu.memory_space<vmem>>, vector<1x128xf32>
      %17 = vector.broadcast %16 : vector<1x128xf32> to vector<16x128xf32>
      %18 = arith.addf %15, %17 : vector<16x128xf32>
      %c0_16 = arith.constant 0 : index
      %c0_17 = arith.constant 0 : index
      %19 = vector.load %arg7[%c0_16, %c0_17] : memref<16x128xf32, #tpu.memory_space<vmem>>, vector<16x128xf32>
      tpu.vector_store %arg7[%c0_16, %c0_17], %18 {strides = array<i32>} : memref<16x128xf32, #tpu.memory_space<vmem>>, vector<16x128xf32>,
    } else {
    }
    return
  }
  func.func @transform_0(%arg0: i32, %arg1: i32, %arg2: i32) -> (i32, i32) {
    %c0_i32 = arith.constant 0 : i32
    return %arg0, %arg2 : i32, i32
  }
  func.func @transform_1(%arg0: i32, %arg1: i32, %arg2: i32) -> (i32, i32) {
    %c0_i32 = arith.constant 0 : i32
    return %arg2, %arg1 : i32, i32
  }
  func.func @transform_2(%arg0: i32, %arg1: i32, %arg2: i32) -> (i32, i32) {
    %c0_i32 = arith.constant 0 : i32
    %c0_i32_0 = arith.constant 0 : i32
    return %c0_i32, %arg1 : i32, i32
  }
  func.func @transform_3(%arg0: i32, %arg1: i32, %arg2: i32) -> (i32, i32) {
    %c0_i32 = arith.constant 0 : i32
    %c0_i32_0 = arith.constant 0 : i32
    return %c0_i32, %arg1 : i32, i32
  }
  func.func @transform_4(%arg0: i32, %arg1: i32, %arg2: i32) -> (i32, i32) {
    %c0_i32 = arith.constant 0 : i32
    return %arg0, %arg1 : i32, i32
  }
}

module attributes {stable_mosaic.version = 11 : i64} {
  func.func @_gemm_kernel(%arg0: i32, %arg1: i32, %arg2: i32, %arg3: memref<16x384xbf16, #tpu.memory_space<vmem>>, %arg4: memref<384x128xbf16, #tpu.memory_space<vmem>>, %arg5: memref<1x128xf32, #tpu.memory_space<vmem>>, %arg6: memref<1x128xf32, #tpu.memory_space<vmem>>, %arg7: memref<16x128xf32, #tpu.memory_space<vmem>>, %arg8: memref<16x128xf32, #tpu.memory_space<vmem>>) attributes {dimension_semantics = [#tpu.dimension_semantics<parallel>, #tpu.dimension_semantics<parallel>, #tpu.dimension_semantics<arbitrary>], iteration_bounds = array<i64: 1, 1, 3>, scalar_prefetch = 0 : i64, scratch_operands = 0 : i64, tpu.core_type = #tpu.core_type<tc>, window_params = [{transform_indices = @transform_0, window_bounds = array<i64: 16, 384>}, {transform_indices = @transform_1, window_bounds = array<i64: 384, 128>}, {transform_indices = @transform_2, window_bounds = array<i64: 1, 128>}, {transform_indices = @transform_3, window_bounds = array<i64: 1, 128>}, {transform_indices = @transform_4, window_bounds = array<i64: 16, 128>}, {transform_indices = @transform_5, window_bounds = array<i64: 16, 128>}]} {
    %c0_i32 = arith.constant 0 : i32
    %0 = arith.cmpi eq, %arg2, %c0_i32 : i32
    %1 = arith.extui %0 : i1 to i32
    %c0_i32_0 = arith.constant 0 : i32
    %2 = arith.cmpi ne, %1, %c0_i32_0 : i32
    scf.if %2 {
      %cst_9 = arith.constant 0.000000e+00 : f32
      %12 = vector.broadcast %cst_9 : f32 to vector<16x128xf32>
      %c0_10 = arith.constant 0 : index
      %c0_11 = arith.constant 0 : index
      %13 = vector.load %arg8[%c0_10, %c0_11] : memref<16x128xf32, #tpu.memory_space<vmem>>, vector<16x128xf32>
      tpu.vector_store %arg8[%c0_10, %c0_11], %12 {strides = array<i32>} : memref<16x128xf32, #tpu.memory_space<vmem>>, vector<16x128xf32>,
    } else {
    }
    %c0 = arith.constant 0 : index
    %c0_1 = arith.constant 0 : index
    %3 = vector.load %arg8[%c0, %c0_1] : memref<16x128xf32, #tpu.memory_space<vmem>>, vector<16x128xf32>
    %c0_2 = arith.constant 0 : index
    %c0_3 = arith.constant 0 : index
    %4 = vector.load %arg3[%c0_2, %c0_3] : memref<16x384xbf16, #tpu.memory_space<vmem>>, vector<16x384xbf16>
    %c0_4 = arith.constant 0 : index
    %c0_5 = arith.constant 0 : index
    %5 = vector.load %arg4[%c0_4, %c0_5] : memref<384x128xbf16, #tpu.memory_space<vmem>>, vector<384x128xbf16>
    %cst = arith.constant dense<0.000000e+00> : vector<16x128xf32>
    %6 = tpu.matmul %4, %5, %cst {dimension_numbers = #tpu.dot_dimension_numbers<[1], [0], [0], [1], [0, 0, 1, 1], [], []>} : vector<16x384xbf16>, vector<384x128xbf16>, vector<16x128xf32> -> vector<16x128xf32>
    %7 = arith.addf %3, %6 : vector<16x128xf32>
    %c0_6 = arith.constant 0 : index
    %c0_7 = arith.constant 0 : index
    %8 = vector.load %arg8[%c0_6, %c0_7] : memref<16x128xf32, #tpu.memory_space<vmem>>, vector<16x128xf32>
    tpu.vector_store %arg8[%c0_6, %c0_7], %7 {strides = array<i32>} : memref<16x128xf32, #tpu.memory_space<vmem>>, vector<16x128xf32>,
    %c2_i32 = arith.constant 2 : i32
    %9 = arith.cmpi eq, %arg2, %c2_i32 : i32
    %10 = arith.extui %9 : i1 to i32
    %c0_i32_8 = arith.constant 0 : i32
    %11 = arith.cmpi ne, %10, %c0_i32_8 : i32
    scf.if %11 {
      %c0_9 = arith.constant 0 : index
      %c0_10 = arith.constant 0 : index
      %12 = vector.load %arg8[%c0_9, %c0_10] : memref<16x128xf32, #tpu.memory_space<vmem>>, vector<16x128xf32>
      %c0_11 = arith.constant 0 : index
      %c0_12 = arith.constant 0 : index
      %13 = vector.load %arg5[%c0_11, %c0_12] : memref<1x128xf32, #tpu.memory_space<vmem>>, vector<1x128xf32>
      %14 = vector.broadcast %13 : vector<1x128xf32> to vector<16x128xf32>
      %15 = arith.mulf %12, %14 : vector<16x128xf32>
      %c0_13 = arith.constant 0 : index
      %c0_14 = arith.constant 0 : index
      %16 = vector.load %arg6[%c0_13, %c0_14] : memref<1x128xf32, #tpu.memory_space<vmem>>, vector<1x128xf32>
      %17 = vector.broadcast %16 : vector<1x128xf32> to vector<16x128xf32>
      %18 = arith.addf %15, %17 : vector<16x128xf32>
      %c0_15 = arith.constant 0 : index
      %c0_16 = arith.constant 0 : index
      %19 = vector.load %arg7[%c0_15, %c0_16] : memref<16x128xf32, #tpu.memory_space<vmem>>, vector<16x128xf32>
      %20 = arith.addf %18, %19 : vector<16x128xf32>
      %cst_17 = arith.constant 0.000000e+00 : f32
      %21 = vector.broadcast %cst_17 : f32 to vector<16x128xf32>
      %22 = arith.maximumf %20, %21 : vector<16x128xf32>
      %c0_18 = arith.constant 0 : index
      %c0_19 = arith.constant 0 : index
      %23 = vector.load %arg8[%c0_18, %c0_19] : memref<16x128xf32, #tpu.memory_space<vmem>>, vector<16x128xf32>
      tpu.vector_store %arg8[%c0_18, %c0_19], %22 {strides = array<i32>} : memref<16x128xf32, #tpu.memory_space<vmem>>, vector<16x128xf32>,
    } else {
    }
    return
  }
  func.func @transform_0(%arg0: i32, %arg1: i32, %arg2: i32) -> (i32, i32) {
    %c0_i32 = arith.constant 0 : i32
    return %arg0, %arg2 : i32, i32
  }
  func.func @transform_1(%arg0: i32, %arg1: i32, %arg2: i32) -> (i32, i32) {
    %c0_i32 = arith.constant 0 : i32
    return %arg2, %arg1 : i32, i32
  }
  func.func @transform_2(%arg0: i32, %arg1: i32, %arg2: i32) -> (i32, i32) {
    %c0_i32 = arith.constant 0 : i32
    %c0_i32_0 = arith.constant 0 : i32
    return %c0_i32, %arg1 : i32, i32
  }
  func.func @transform_3(%arg0: i32, %arg1: i32, %arg2: i32) -> (i32, i32) {
    %c0_i32 = arith.constant 0 : i32
    %c0_i32_0 = arith.constant 0 : i32
    return %c0_i32, %arg1 : i32, i32
  }
  func.func @transform_4(%arg0: i32, %arg1: i32, %arg2: i32) -> (i32, i32) {
    %c0_i32 = arith.constant 0 : i32
    return %arg0, %arg1 : i32, i32
  }
  func.func @transform_5(%arg0: i32, %arg1: i32, %arg2: i32) -> (i32, i32) {
    %c0_i32 = arith.constant 0 : i32
    return %arg0, %arg1 : i32, i32
  }
}

module attributes {stable_mosaic.version = 11 : i64} {
  func.func @_gemm_kernel(%arg0: i32, %arg1: i32, %arg2: i32, %arg3: memref<16x384xbf16, #tpu.memory_space<vmem>>, %arg4: memref<384x128xbf16, #tpu.memory_space<vmem>>, %arg5: memref<1x128xf32, #tpu.memory_space<vmem>>, %arg6: memref<1x128xf32, #tpu.memory_space<vmem>>, %arg7: memref<16x128xf32, #tpu.memory_space<vmem>>) attributes {dimension_semantics = [#tpu.dimension_semantics<parallel>, #tpu.dimension_semantics<parallel>, #tpu.dimension_semantics<arbitrary>], iteration_bounds = array<i64: 1, 1, 3>, scalar_prefetch = 0 : i64, scratch_operands = 0 : i64, tpu.core_type = #tpu.core_type<tc>, window_params = [{transform_indices = @transform_0, window_bounds = array<i64: 16, 384>}, {transform_indices = @transform_1, window_bounds = array<i64: 384, 128>}, {transform_indices = @transform_2, window_bounds = array<i64: 1, 128>}, {transform_indices = @transform_3, window_bounds = array<i64: 1, 128>}, {transform_indices = @transform_4, window_bounds = array<i64: 16, 128>}]} {
    %c0_i32 = arith.constant 0 : i32
    %0 = arith.cmpi eq, %arg2, %c0_i32 : i32
    %1 = arith.extui %0 : i1 to i32
    %c0_i32_0 = arith.constant 0 : i32
    %2 = arith.cmpi ne, %1, %c0_i32_0 : i32
    scf.if %2 {
      %cst_9 = arith.constant 0.000000e+00 : f32
      %12 = vector.broadcast %cst_9 : f32 to vector<16x128xf32>
      %c0_10 = arith.constant 0 : index
      %c0_11 = arith.constant 0 : index
      %13 = vector.load %arg7[%c0_10, %c0_11] : memref<16x128xf32, #tpu.memory_space<vmem>>, vector<16x128xf32>
      tpu.vector_store %arg7[%c0_10, %c0_11], %12 {strides = array<i32>} : memref<16x128xf32, #tpu.memory_space<vmem>>, vector<16x128xf32>,
    } else {
    }
    %c0 = arith.constant 0 : index
    %c0_1 = arith.constant 0 : index
    %3 = vector.load %arg7[%c0, %c0_1] : memref<16x128xf32, #tpu.memory_space<vmem>>, vector<16x128xf32>
    %c0_2 = arith.constant 0 : index
    %c0_3 = arith.constant 0 : index
    %4 = vector.load %arg3[%c0_2, %c0_3] : memref<16x384xbf16, #tpu.memory_space<vmem>>, vector<16x384xbf16>
    %c0_4 = arith.constant 0 : index
    %c0_5 = arith.constant 0 : index
    %5 = vector.load %arg4[%c0_4, %c0_5] : memref<384x128xbf16, #tpu.memory_space<vmem>>, vector<384x128xbf16>
    %cst = arith.constant dense<0.000000e+00> : vector<16x128xf32>
    %6 = tpu.matmul %4, %5, %cst {dimension_numbers = #tpu.dot_dimension_numbers<[1], [0], [0], [1], [0, 0, 1, 1], [], []>} : vector<16x384xbf16>, vector<384x128xbf16>, vector<16x128xf32> -> vector<16x128xf32>
    %7 = arith.addf %3, %6 : vector<16x128xf32>
    %c0_6 = arith.constant 0 : index
    %c0_7 = arith.constant 0 : index
    %8 = vector.load %arg7[%c0_6, %c0_7] : memref<16x128xf32, #tpu.memory_space<vmem>>, vector<16x128xf32>
    tpu.vector_store %arg7[%c0_6, %c0_7], %7 {strides = array<i32>} : memref<16x128xf32, #tpu.memory_space<vmem>>, vector<16x128xf32>,
    %c2_i32 = arith.constant 2 : i32
    %9 = arith.cmpi eq, %arg2, %c2_i32 : i32
    %10 = arith.extui %9 : i1 to i32
    %c0_i32_8 = arith.constant 0 : i32
    %11 = arith.cmpi ne, %10, %c0_i32_8 : i32
    scf.if %11 {
      %c0_9 = arith.constant 0 : index
      %c0_10 = arith.constant 0 : index
      %12 = vector.load %arg7[%c0_9, %c0_10] : memref<16x128xf32, #tpu.memory_space<vmem>>, vector<16x128xf32>
      %c0_11 = arith.constant 0 : index
      %c0_12 = arith.constant 0 : index
      %13 = vector.load %arg5[%c0_11, %c0_12] : memref<1x128xf32, #tpu.memory_space<vmem>>, vector<1x128xf32>
      %14 = vector.broadcast %13 : vector<1x128xf32> to vector<16x128xf32>
      %15 = arith.mulf %12, %14 : vector<16x128xf32>
      %c0_13 = arith.constant 0 : index
      %c0_14 = arith.constant 0 : index
      %16 = vector.load %arg6[%c0_13, %c0_14] : memref<1x128xf32, #tpu.memory_space<vmem>>, vector<1x128xf32>
      %17 = vector.broadcast %16 : vector<1x128xf32> to vector<16x128xf32>
      %18 = arith.addf %15, %17 : vector<16x128xf32>
      %cst_15 = arith.constant 0.000000e+00 : f32
      %19 = vector.broadcast %cst_15 : f32 to vector<16x128xf32>
      %20 = arith.maximumf %18, %19 : vector<16x128xf32>
      %c0_16 = arith.constant 0 : index
      %c0_17 = arith.constant 0 : index
      %21 = vector.load %arg7[%c0_16, %c0_17] : memref<16x128xf32, #tpu.memory_space<vmem>>, vector<16x128xf32>
      tpu.vector_store %arg7[%c0_16, %c0_17], %20 {strides = array<i32>} : memref<16x128xf32, #tpu.memory_space<vmem>>, vector<16x128xf32>,
    } else {
    }
    return
  }
  func.func @transform_0(%arg0: i32, %arg1: i32, %arg2: i32) -> (i32, i32) {
    %c0_i32 = arith.constant 0 : i32
    return %arg0, %arg2 : i32, i32
  }
  func.func @transform_1(%arg0: i32, %arg1: i32, %arg2: i32) -> (i32, i32) {
    %c0_i32 = arith.constant 0 : i32
    return %arg2, %arg1 : i32, i32
  }
  func.func @transform_2(%arg0: i32, %arg1: i32, %arg2: i32) -> (i32, i32) {
    %c0_i32 = arith.constant 0 : i32
    %c0_i32_0 = arith.constant 0 : i32
    return %c0_i32, %arg1 : i32, i32
  }
  func.func @transform_3(%arg0: i32, %arg1: i32, %arg2: i32) -> (i32, i32) {
    %c0_i32 = arith.constant 0 : i32
    %c0_i32_0 = arith.constant 0 : i32
    return %c0_i32, %arg1 : i32, i32
  }
  func.func @transform_4(%arg0: i32, %arg1: i32, %arg2: i32) -> (i32, i32) {
    %c0_i32 = arith.constant 0 : i32
    return %arg0, %arg1 : i32, i32
  }
}

module attributes {stable_mosaic.version = 11 : i64} {
  func.func @_gemm_kernel(%arg0: i32, %arg1: i32, %arg2: i32, %arg3: memref<16x384xbf16, #tpu.memory_space<vmem>>, %arg4: memref<384x256xbf16, #tpu.memory_space<vmem>>, %arg5: memref<1x256xf32, #tpu.memory_space<vmem>>, %arg6: memref<1x256xf32, #tpu.memory_space<vmem>>, %arg7: memref<16x256xf32, #tpu.memory_space<vmem>>) attributes {dimension_semantics = [#tpu.dimension_semantics<parallel>, #tpu.dimension_semantics<parallel>, #tpu.dimension_semantics<arbitrary>], iteration_bounds = array<i64: 1, 1, 3>, scalar_prefetch = 0 : i64, scratch_operands = 0 : i64, tpu.core_type = #tpu.core_type<tc>, window_params = [{transform_indices = @transform_0, window_bounds = array<i64: 16, 384>}, {transform_indices = @transform_1, window_bounds = array<i64: 384, 256>}, {transform_indices = @transform_2, window_bounds = array<i64: 1, 256>}, {transform_indices = @transform_3, window_bounds = array<i64: 1, 256>}, {transform_indices = @transform_4, window_bounds = array<i64: 16, 256>}]} {
    %c0_i32 = arith.constant 0 : i32
    %0 = arith.cmpi eq, %arg2, %c0_i32 : i32
    %1 = arith.extui %0 : i1 to i32
    %c0_i32_0 = arith.constant 0 : i32
    %2 = arith.cmpi ne, %1, %c0_i32_0 : i32
    scf.if %2 {
      %cst_9 = arith.constant 0.000000e+00 : f32
      %12 = vector.broadcast %cst_9 : f32 to vector<16x256xf32>
      %c0_10 = arith.constant 0 : index
      %c0_11 = arith.constant 0 : index
      %13 = vector.load %arg7[%c0_10, %c0_11] : memref<16x256xf32, #tpu.memory_space<vmem>>, vector<16x256xf32>
      tpu.vector_store %arg7[%c0_10, %c0_11], %12 {strides = array<i32>} : memref<16x256xf32, #tpu.memory_space<vmem>>, vector<16x256xf32>,
    } else {
    }
    %c0 = arith.constant 0 : index
    %c0_1 = arith.constant 0 : index
    %3 = vector.load %arg7[%c0, %c0_1] : memref<16x256xf32, #tpu.memory_space<vmem>>, vector<16x256xf32>
    %c0_2 = arith.constant 0 : index
    %c0_3 = arith.constant 0 : index
    %4 = vector.load %arg3[%c0_2, %c0_3] : memref<16x384xbf16, #tpu.memory_space<vmem>>, vector<16x384xbf16>
    %c0_4 = arith.constant 0 : index
    %c0_5 = arith.constant 0 : index
    %5 = vector.load %arg4[%c0_4, %c0_5] : memref<384x256xbf16, #tpu.memory_space<vmem>>, vector<384x256xbf16>
    %cst = arith.constant dense<0.000000e+00> : vector<16x256xf32>
    %6 = tpu.matmul %4, %5, %cst {dimension_numbers = #tpu.dot_dimension_numbers<[1], [0], [0], [1], [0, 0, 1, 1], [], []>} : vector<16x384xbf16>, vector<384x256xbf16>, vector<16x256xf32> -> vector<16x256xf32>
    %7 = arith.addf %3, %6 : vector<16x256xf32>
    %c0_6 = arith.constant 0 : index
    %c0_7 = arith.constant 0 : index
    %8 = vector.load %arg7[%c0_6, %c0_7] : memref<16x256xf32, #tpu.memory_space<vmem>>, vector<16x256xf32>
    tpu.vector_store %arg7[%c0_6, %c0_7], %7 {strides = array<i32>} : memref<16x256xf32, #tpu.memory_space<vmem>>, vector<16x256xf32>,
    %c2_i32 = arith.constant 2 : i32
    %9 = arith.cmpi eq, %arg2, %c2_i32 : i32
    %10 = arith.extui %9 : i1 to i32
    %c0_i32_8 = arith.constant 0 : i32
    %11 = arith.cmpi ne, %10, %c0_i32_8 : i32
    scf.if %11 {
      %c0_9 = arith.constant 0 : index
      %c0_10 = arith.constant 0 : index
      %12 = vector.load %arg7[%c0_9, %c0_10] : memref<16x256xf32, #tpu.memory_space<vmem>>, vector<16x256xf32>
      %c0_11 = arith.constant 0 : index
      %c0_12 = arith.constant 0 : index
      %13 = vector.load %arg5[%c0_11, %c0_12] : memref<1x256xf32, #tpu.memory_space<vmem>>, vector<1x256xf32>
      %14 = vector.broadcast %13 : vector<1x256xf32> to vector<16x256xf32>
      %15 = arith.mulf %12, %14 : vector<16x256xf32>
      %c0_13 = arith.constant 0 : index
      %c0_14 = arith.constant 0 : index
      %16 = vector.load %arg6[%c0_13, %c0_14] : memref<1x256xf32, #tpu.memory_space<vmem>>, vector<1x256xf32>
      %17 = vector.broadcast %16 : vector<1x256xf32> to vector<16x256xf32>
      %18 = arith.addf %15, %17 : vector<16x256xf32>
      %cst_15 = arith.constant 0.000000e+00 : f32
      %19 = vector.broadcast %cst_15 : f32 to vector<16x256xf32>
      %20 = arith.maximumf %18, %19 : vector<16x256xf32>
      %c0_16 = arith.constant 0 : index
      %c0_17 = arith.constant 0 : index
      %21 = vector.load %arg7[%c0_16, %c0_17] : memref<16x256xf32, #tpu.memory_space<vmem>>, vector<16x256xf32>
      tpu.vector_store %arg7[%c0_16, %c0_17], %20 {strides = array<i32>} : memref<16x256xf32, #tpu.memory_space<vmem>>, vector<16x256xf32>,
    } else {
    }
    return
  }
  func.func @transform_0(%arg0: i32, %arg1: i32, %arg2: i32) -> (i32, i32) {
    %c0_i32 = arith.constant 0 : i32
    return %arg0, %arg2 : i32, i32
  }
  func.func @transform_1(%arg0: i32, %arg1: i32, %arg2: i32) -> (i32, i32) {
    %c0_i32 = arith.constant 0 : i32
    return %arg2, %arg1 : i32, i32
  }
  func.func @transform_2(%arg0: i32, %arg1: i32, %arg2: i32) -> (i32, i32) {
    %c0_i32 = arith.constant 0 : i32
    %c0_i32_0 = arith.constant 0 : i32
    return %c0_i32, %arg1 : i32, i32
  }
  func.func @transform_3(%arg0: i32, %arg1: i32, %arg2: i32) -> (i32, i32) {
    %c0_i32 = arith.constant 0 : i32
    %c0_i32_0 = arith.constant 0 : i32
    return %c0_i32, %arg1 : i32, i32
  }
  func.func @transform_4(%arg0: i32, %arg1: i32, %arg2: i32) -> (i32, i32) {
    %c0_i32 = arith.constant 0 : i32
    return %arg0, %arg1 : i32, i32
  }
}

module attributes {stable_mosaic.version = 11 : i64} {
  func.func @_gemm_kernel(%arg0: i32, %arg1: i32, %arg2: i32, %arg3: memref<16x128xbf16, #tpu.memory_space<vmem>>, %arg4: memref<128x256xbf16, #tpu.memory_space<vmem>>, %arg5: memref<1x256xf32, #tpu.memory_space<vmem>>, %arg6: memref<1x256xf32, #tpu.memory_space<vmem>>, %arg7: memref<16x256xf32, #tpu.memory_space<vmem>>) attributes {dimension_semantics = [#tpu.dimension_semantics<parallel>, #tpu.dimension_semantics<parallel>, #tpu.dimension_semantics<arbitrary>], iteration_bounds = array<i64: 1, 1, 1>, scalar_prefetch = 0 : i64, scratch_operands = 0 : i64, tpu.core_type = #tpu.core_type<tc>, window_params = [{transform_indices = @transform_0, window_bounds = array<i64: 16, 128>}, {transform_indices = @transform_1, window_bounds = array<i64: 128, 256>}, {transform_indices = @transform_2, window_bounds = array<i64: 1, 256>}, {transform_indices = @transform_3, window_bounds = array<i64: 1, 256>}, {transform_indices = @transform_4, window_bounds = array<i64: 16, 256>}]} {
    %c0_i32 = arith.constant 0 : i32
    %0 = arith.cmpi eq, %arg2, %c0_i32 : i32
    %1 = arith.extui %0 : i1 to i32
    %c0_i32_0 = arith.constant 0 : i32
    %2 = arith.cmpi ne, %1, %c0_i32_0 : i32
    scf.if %2 {
      %cst_10 = arith.constant 0.000000e+00 : f32
      %12 = vector.broadcast %cst_10 : f32 to vector<16x256xf32>
      %c0_11 = arith.constant 0 : index
      %c0_12 = arith.constant 0 : index
      %13 = vector.load %arg7[%c0_11, %c0_12] : memref<16x256xf32, #tpu.memory_space<vmem>>, vector<16x256xf32>
      tpu.vector_store %arg7[%c0_11, %c0_12], %12 {strides = array<i32>} : memref<16x256xf32, #tpu.memory_space<vmem>>, vector<16x256xf32>,
    } else {
    }
    %c0 = arith.constant 0 : index
    %c0_1 = arith.constant 0 : index
    %3 = vector.load %arg7[%c0, %c0_1] : memref<16x256xf32, #tpu.memory_space<vmem>>, vector<16x256xf32>
    %c0_2 = arith.constant 0 : index
    %c0_3 = arith.constant 0 : index
    %4 = vector.load %arg3[%c0_2, %c0_3] : memref<16x128xbf16, #tpu.memory_space<vmem>>, vector<16x128xbf16>
    %c0_4 = arith.constant 0 : index
    %c0_5 = arith.constant 0 : index
    %5 = vector.load %arg4[%c0_4, %c0_5] : memref<128x256xbf16, #tpu.memory_space<vmem>>, vector<128x256xbf16>
    %cst = arith.constant dense<0.000000e+00> : vector<16x256xf32>
    %6 = tpu.matmul %4, %5, %cst {dimension_numbers = #tpu.dot_dimension_numbers<[1], [0], [0], [1], [0, 0, 1, 1], [], []>} : vector<16x128xbf16>, vector<128x256xbf16>, vector<16x256xf32> -> vector<16x256xf32>
    %7 = arith.addf %3, %6 : vector<16x256xf32>
    %c0_6 = arith.constant 0 : index
    %c0_7 = arith.constant 0 : index
    %8 = vector.load %arg7[%c0_6, %c0_7] : memref<16x256xf32, #tpu.memory_space<vmem>>, vector<16x256xf32>
    tpu.vector_store %arg7[%c0_6, %c0_7], %7 {strides = array<i32>} : memref<16x256xf32, #tpu.memory_space<vmem>>, vector<16x256xf32>,
    %c0_i32_8 = arith.constant 0 : i32
    %9 = arith.cmpi eq, %arg2, %c0_i32_8 : i32
    %10 = arith.extui %9 : i1 to i32
    %c0_i32_9 = arith.constant 0 : i32
    %11 = arith.cmpi ne, %10, %c0_i32_9 : i32
    scf.if %11 {
      %c0_10 = arith.constant 0 : index
      %c0_11 = arith.constant 0 : index
      %12 = vector.load %arg7[%c0_10, %c0_11] : memref<16x256xf32, #tpu.memory_space<vmem>>, vector<16x256xf32>
      %c0_12 = arith.constant 0 : index
      %c0_13 = arith.constant 0 : index
      %13 = vector.load %arg5[%c0_12, %c0_13] : memref<1x256xf32, #tpu.memory_space<vmem>>, vector<1x256xf32>
      %14 = vector.broadcast %13 : vector<1x256xf32> to vector<16x256xf32>
      %15 = arith.mulf %12, %14 : vector<16x256xf32>
      %c0_14 = arith.constant 0 : index
      %c0_15 = arith.constant 0 : index
      %16 = vector.load %arg6[%c0_14, %c0_15] : memref<1x256xf32, #tpu.memory_space<vmem>>, vector<1x256xf32>
      %17 = vector.broadcast %16 : vector<1x256xf32> to vector<16x256xf32>
      %18 = arith.addf %15, %17 : vector<16x256xf32>
      %c0_16 = arith.constant 0 : index
      %c0_17 = arith.constant 0 : index
      %19 = vector.load %arg7[%c0_16, %c0_17] : memref<16x256xf32, #tpu.memory_space<vmem>>, vector<16x256xf32>
      tpu.vector_store %arg7[%c0_16, %c0_17], %18 {strides = array<i32>} : memref<16x256xf32, #tpu.memory_space<vmem>>, vector<16x256xf32>,
    } else {
    }
    return
  }
  func.func @transform_0(%arg0: i32, %arg1: i32, %arg2: i32) -> (i32, i32) {
    %c0_i32 = arith.constant 0 : i32
    return %arg0, %arg2 : i32, i32
  }
  func.func @transform_1(%arg0: i32, %arg1: i32, %arg2: i32) -> (i32, i32) {
    %c0_i32 = arith.constant 0 : i32
    return %arg2, %arg1 : i32, i32
  }
  func.func @transform_2(%arg0: i32, %arg1: i32, %arg2: i32) -> (i32, i32) {
    %c0_i32 = arith.constant 0 : i32
    %c0_i32_0 = arith.constant 0 : i32
    return %c0_i32, %arg1 : i32, i32
  }
  func.func @transform_3(%arg0: i32, %arg1: i32, %arg2: i32) -> (i32, i32) {
    %c0_i32 = arith.constant 0 : i32
    %c0_i32_0 = arith.constant 0 : i32
    return %c0_i32, %arg1 : i32, i32
  }
  func.func @transform_4(%arg0: i32, %arg1: i32, %arg2: i32) -> (i32, i32) {
    %c0_i32 = arith.constant 0 : i32
    return %arg0, %arg1 : i32, i32
  }
}

module attributes {stable_mosaic.version = 11 : i64} {
  func.func @_gemm_kernel(%arg0: i32, %arg1: i32, %arg2: i32, %arg3: memref<16x384xbf16, #tpu.memory_space<vmem>>, %arg4: memref<384x256xbf16, #tpu.memory_space<vmem>>, %arg5: memref<1x256xf32, #tpu.memory_space<vmem>>, %arg6: memref<1x256xf32, #tpu.memory_space<vmem>>, %arg7: memref<16x256xf32, #tpu.memory_space<vmem>>, %arg8: memref<16x256xf32, #tpu.memory_space<vmem>>) attributes {dimension_semantics = [#tpu.dimension_semantics<parallel>, #tpu.dimension_semantics<parallel>, #tpu.dimension_semantics<arbitrary>], iteration_bounds = array<i64: 1, 1, 6>, scalar_prefetch = 0 : i64, scratch_operands = 0 : i64, tpu.core_type = #tpu.core_type<tc>, window_params = [{transform_indices = @transform_0, window_bounds = array<i64: 16, 384>}, {transform_indices = @transform_1, window_bounds = array<i64: 384, 256>}, {transform_indices = @transform_2, window_bounds = array<i64: 1, 256>}, {transform_indices = @transform_3, window_bounds = array<i64: 1, 256>}, {transform_indices = @transform_4, window_bounds = array<i64: 16, 256>}, {transform_indices = @transform_5, window_bounds = array<i64: 16, 256>}]} {
    %c0_i32 = arith.constant 0 : i32
    %0 = arith.cmpi eq, %arg2, %c0_i32 : i32
    %1 = arith.extui %0 : i1 to i32
    %c0_i32_0 = arith.constant 0 : i32
    %2 = arith.cmpi ne, %1, %c0_i32_0 : i32
    scf.if %2 {
      %cst_9 = arith.constant 0.000000e+00 : f32
      %12 = vector.broadcast %cst_9 : f32 to vector<16x256xf32>
      %c0_10 = arith.constant 0 : index
      %c0_11 = arith.constant 0 : index
      %13 = vector.load %arg8[%c0_10, %c0_11] : memref<16x256xf32, #tpu.memory_space<vmem>>, vector<16x256xf32>
      tpu.vector_store %arg8[%c0_10, %c0_11], %12 {strides = array<i32>} : memref<16x256xf32, #tpu.memory_space<vmem>>, vector<16x256xf32>,
    } else {
    }
    %c0 = arith.constant 0 : index
    %c0_1 = arith.constant 0 : index
    %3 = vector.load %arg8[%c0, %c0_1] : memref<16x256xf32, #tpu.memory_space<vmem>>, vector<16x256xf32>
    %c0_2 = arith.constant 0 : index
    %c0_3 = arith.constant 0 : index
    %4 = vector.load %arg3[%c0_2, %c0_3] : memref<16x384xbf16, #tpu.memory_space<vmem>>, vector<16x384xbf16>
    %c0_4 = arith.constant 0 : index
    %c0_5 = arith.constant 0 : index
    %5 = vector.load %arg4[%c0_4, %c0_5] : memref<384x256xbf16, #tpu.memory_space<vmem>>, vector<384x256xbf16>
    %cst = arith.constant dense<0.000000e+00> : vector<16x256xf32>
    %6 = tpu.matmul %4, %5, %cst {dimension_numbers = #tpu.dot_dimension_numbers<[1], [0], [0], [1], [0, 0, 1, 1], [], []>} : vector<16x384xbf16>, vector<384x256xbf16>, vector<16x256xf32> -> vector<16x256xf32>
    %7 = arith.addf %3, %6 : vector<16x256xf32>
    %c0_6 = arith.constant 0 : index
    %c0_7 = arith.constant 0 : index
    %8 = vector.load %arg8[%c0_6, %c0_7] : memref<16x256xf32, #tpu.memory_space<vmem>>, vector<16x256xf32>
    tpu.vector_store %arg8[%c0_6, %c0_7], %7 {strides = array<i32>} : memref<16x256xf32, #tpu.memory_space<vmem>>, vector<16x256xf32>,
    %c5_i32 = arith.constant 5 : i32
    %9 = arith.cmpi eq, %arg2, %c5_i32 : i32
    %10 = arith.extui %9 : i1 to i32
    %c0_i32_8 = arith.constant 0 : i32
    %11 = arith.cmpi ne, %10, %c0_i32_8 : i32
    scf.if %11 {
      %c0_9 = arith.constant 0 : index
      %c0_10 = arith.constant 0 : index
      %12 = vector.load %arg8[%c0_9, %c0_10] : memref<16x256xf32, #tpu.memory_space<vmem>>, vector<16x256xf32>
      %c0_11 = arith.constant 0 : index
      %c0_12 = arith.constant 0 : index
      %13 = vector.load %arg5[%c0_11, %c0_12] : memref<1x256xf32, #tpu.memory_space<vmem>>, vector<1x256xf32>
      %14 = vector.broadcast %13 : vector<1x256xf32> to vector<16x256xf32>
      %15 = arith.mulf %12, %14 : vector<16x256xf32>
      %c0_13 = arith.constant 0 : index
      %c0_14 = arith.constant 0 : index
      %16 = vector.load %arg6[%c0_13, %c0_14] : memref<1x256xf32, #tpu.memory_space<vmem>>, vector<1x256xf32>
      %17 = vector.broadcast %16 : vector<1x256xf32> to vector<16x256xf32>
      %18 = arith.addf %15, %17 : vector<16x256xf32>
      %c0_15 = arith.constant 0 : index
      %c0_16 = arith.constant 0 : index
      %19 = vector.load %arg7[%c0_15, %c0_16] : memref<16x256xf32, #tpu.memory_space<vmem>>, vector<16x256xf32>
      %20 = arith.addf %18, %19 : vector<16x256xf32>
      %cst_17 = arith.constant 0.000000e+00 : f32
      %21 = vector.broadcast %cst_17 : f32 to vector<16x256xf32>
      %22 = arith.maximumf %20, %21 : vector<16x256xf32>
      %c0_18 = arith.constant 0 : index
      %c0_19 = arith.constant 0 : index
      %23 = vector.load %arg8[%c0_18, %c0_19] : memref<16x256xf32, #tpu.memory_space<vmem>>, vector<16x256xf32>
      tpu.vector_store %arg8[%c0_18, %c0_19], %22 {strides = array<i32>} : memref<16x256xf32, #tpu.memory_space<vmem>>, vector<16x256xf32>,
    } else {
    }
    return
  }
  func.func @transform_0(%arg0: i32, %arg1: i32, %arg2: i32) -> (i32, i32) {
    %c0_i32 = arith.constant 0 : i32
    return %arg0, %arg2 : i32, i32
  }
  func.func @transform_1(%arg0: i32, %arg1: i32, %arg2: i32) -> (i32, i32) {
    %c0_i32 = arith.constant 0 : i32
    return %arg2, %arg1 : i32, i32
  }
  func.func @transform_2(%arg0: i32, %arg1: i32, %arg2: i32) -> (i32, i32) {
    %c0_i32 = arith.constant 0 : i32
    %c0_i32_0 = arith.constant 0 : i32
    return %c0_i32, %arg1 : i32, i32
  }
  func.func @transform_3(%arg0: i32, %arg1: i32, %arg2: i32) -> (i32, i32) {
    %c0_i32 = arith.constant 0 : i32
    %c0_i32_0 = arith.constant 0 : i32
    return %c0_i32, %arg1 : i32, i32
  }
  func.func @transform_4(%arg0: i32, %arg1: i32, %arg2: i32) -> (i32, i32) {
    %c0_i32 = arith.constant 0 : i32
    return %arg0, %arg1 : i32, i32
  }
  func.func @transform_5(%arg0: i32, %arg1: i32, %arg2: i32) -> (i32, i32) {
    %c0_i32 = arith.constant 0 : i32
    return %arg0, %arg1 : i32, i32
  }
}

module attributes {stable_mosaic.version = 11 : i64} {
  func.func @_gemm_kernel(%arg0: i32, %arg1: i32, %arg2: i32, %arg3: memref<16x384xbf16, #tpu.memory_space<vmem>>, %arg4: memref<384x256xbf16, #tpu.memory_space<vmem>>, %arg5: memref<1x256xf32, #tpu.memory_space<vmem>>, %arg6: memref<1x256xf32, #tpu.memory_space<vmem>>, %arg7: memref<16x256xf32, #tpu.memory_space<vmem>>) attributes {dimension_semantics = [#tpu.dimension_semantics<parallel>, #tpu.dimension_semantics<parallel>, #tpu.dimension_semantics<arbitrary>], iteration_bounds = array<i64: 1, 1, 6>, scalar_prefetch = 0 : i64, scratch_operands = 0 : i64, tpu.core_type = #tpu.core_type<tc>, window_params = [{transform_indices = @transform_0, window_bounds = array<i64: 16, 384>}, {transform_indices = @transform_1, window_bounds = array<i64: 384, 256>}, {transform_indices = @transform_2, window_bounds = array<i64: 1, 256>}, {transform_indices = @transform_3, window_bounds = array<i64: 1, 256>}, {transform_indices = @transform_4, window_bounds = array<i64: 16, 256>}]} {
    %c0_i32 = arith.constant 0 : i32
    %0 = arith.cmpi eq, %arg2, %c0_i32 : i32
    %1 = arith.extui %0 : i1 to i32
    %c0_i32_0 = arith.constant 0 : i32
    %2 = arith.cmpi ne, %1, %c0_i32_0 : i32
    scf.if %2 {
      %cst_9 = arith.constant 0.000000e+00 : f32
      %12 = vector.broadcast %cst_9 : f32 to vector<16x256xf32>
      %c0_10 = arith.constant 0 : index
      %c0_11 = arith.constant 0 : index
      %13 = vector.load %arg7[%c0_10, %c0_11] : memref<16x256xf32, #tpu.memory_space<vmem>>, vector<16x256xf32>
      tpu.vector_store %arg7[%c0_10, %c0_11], %12 {strides = array<i32>} : memref<16x256xf32, #tpu.memory_space<vmem>>, vector<16x256xf32>,
    } else {
    }
    %c0 = arith.constant 0 : index
    %c0_1 = arith.constant 0 : index
    %3 = vector.load %arg7[%c0, %c0_1] : memref<16x256xf32, #tpu.memory_space<vmem>>, vector<16x256xf32>
    %c0_2 = arith.constant 0 : index
    %c0_3 = arith.constant 0 : index
    %4 = vector.load %arg3[%c0_2, %c0_3] : memref<16x384xbf16, #tpu.memory_space<vmem>>, vector<16x384xbf16>
    %c0_4 = arith.constant 0 : index
    %c0_5 = arith.constant 0 : index
    %5 = vector.load %arg4[%c0_4, %c0_5] : memref<384x256xbf16, #tpu.memory_space<vmem>>, vector<384x256xbf16>
    %cst = arith.constant dense<0.000000e+00> : vector<16x256xf32>
    %6 = tpu.matmul %4, %5, %cst {dimension_numbers = #tpu.dot_dimension_numbers<[1], [0], [0], [1], [0, 0, 1, 1], [], []>} : vector<16x384xbf16>, vector<384x256xbf16>, vector<16x256xf32> -> vector<16x256xf32>
    %7 = arith.addf %3, %6 : vector<16x256xf32>
    %c0_6 = arith.constant 0 : index
    %c0_7 = arith.constant 0 : index
    %8 = vector.load %arg7[%c0_6, %c0_7] : memref<16x256xf32, #tpu.memory_space<vmem>>, vector<16x256xf32>
    tpu.vector_store %arg7[%c0_6, %c0_7], %7 {strides = array<i32>} : memref<16x256xf32, #tpu.memory_space<vmem>>, vector<16x256xf32>,
    %c5_i32 = arith.constant 5 : i32
    %9 = arith.cmpi eq, %arg2, %c5_i32 : i32
    %10 = arith.extui %9 : i1 to i32
    %c0_i32_8 = arith.constant 0 : i32
    %11 = arith.cmpi ne, %10, %c0_i32_8 : i32
    scf.if %11 {
      %c0_9 = arith.constant 0 : index
      %c0_10 = arith.constant 0 : index
      %12 = vector.load %arg7[%c0_9, %c0_10] : memref<16x256xf32, #tpu.memory_space<vmem>>, vector<16x256xf32>
      %c0_11 = arith.constant 0 : index
      %c0_12 = arith.constant 0 : index
      %13 = vector.load %arg5[%c0_11, %c0_12] : memref<1x256xf32, #tpu.memory_space<vmem>>, vector<1x256xf32>
      %14 = vector.broadcast %13 : vector<1x256xf32> to vector<16x256xf32>
      %15 = arith.mulf %12, %14 : vector<16x256xf32>
      %c0_13 = arith.constant 0 : index
      %c0_14 = arith.constant 0 : index
      %16 = vector.load %arg6[%c0_13, %c0_14] : memref<1x256xf32, #tpu.memory_space<vmem>>, vector<1x256xf32>
      %17 = vector.broadcast %16 : vector<1x256xf32> to vector<16x256xf32>
      %18 = arith.addf %15, %17 : vector<16x256xf32>
      %cst_15 = arith.constant 0.000000e+00 : f32
      %19 = vector.broadcast %cst_15 : f32 to vector<16x256xf32>
      %20 = arith.maximumf %18, %19 : vector<16x256xf32>
      %c0_16 = arith.constant 0 : index
      %c0_17 = arith.constant 0 : index
      %21 = vector.load %arg7[%c0_16, %c0_17] : memref<16x256xf32, #tpu.memory_space<vmem>>, vector<16x256xf32>
      tpu.vector_store %arg7[%c0_16, %c0_17], %20 {strides = array<i32>} : memref<16x256xf32, #tpu.memory_space<vmem>>, vector<16x256xf32>,
    } else {
    }
    return
  }
  func.func @transform_0(%arg0: i32, %arg1: i32, %arg2: i32) -> (i32, i32) {
    %c0_i32 = arith.constant 0 : i32
    return %arg0, %arg2 : i32, i32
  }
  func.func @transform_1(%arg0: i32, %arg1: i32, %arg2: i32) -> (i32, i32) {
    %c0_i32 = arith.constant 0 : i32
    return %arg2, %arg1 : i32, i32
  }
  func.func @transform_2(%arg0: i32, %arg1: i32, %arg2: i32) -> (i32, i32) {
    %c0_i32 = arith.constant 0 : i32
    %c0_i32_0 = arith.constant 0 : i32
    return %c0_i32, %arg1 : i32, i32
  }
  func.func @transform_3(%arg0: i32, %arg1: i32, %arg2: i32) -> (i32, i32) {
    %c0_i32 = arith.constant 0 : i32
    %c0_i32_0 = arith.constant 0 : i32
    return %c0_i32, %arg1 : i32, i32
  }
  func.func @transform_4(%arg0: i32, %arg1: i32, %arg2: i32) -> (i32, i32) {
    %c0_i32 = arith.constant 0 : i32
    return %arg0, %arg1 : i32, i32
  }
}

module attributes {stable_mosaic.version = 11 : i64} {
  func.func @_gemm_kernel(%arg0: i32, %arg1: i32, %arg2: i32, %arg3: memref<16x384xbf16, #tpu.memory_space<vmem>>, %arg4: memref<384x256xbf16, #tpu.memory_space<vmem>>, %arg5: memref<1x256xf32, #tpu.memory_space<vmem>>, %arg6: memref<1x256xf32, #tpu.memory_space<vmem>>, %arg7: memref<16x256xf32, #tpu.memory_space<vmem>>) attributes {dimension_semantics = [#tpu.dimension_semantics<parallel>, #tpu.dimension_semantics<parallel>, #tpu.dimension_semantics<arbitrary>], iteration_bounds = array<i64: 1, 2, 6>, scalar_prefetch = 0 : i64, scratch_operands = 0 : i64, tpu.core_type = #tpu.core_type<tc>, window_params = [{transform_indices = @transform_0, window_bounds = array<i64: 16, 384>}, {transform_indices = @transform_1, window_bounds = array<i64: 384, 256>}, {transform_indices = @transform_2, window_bounds = array<i64: 1, 256>}, {transform_indices = @transform_3, window_bounds = array<i64: 1, 256>}, {transform_indices = @transform_4, window_bounds = array<i64: 16, 256>}]} {
    %c0_i32 = arith.constant 0 : i32
    %0 = arith.cmpi eq, %arg2, %c0_i32 : i32
    %1 = arith.extui %0 : i1 to i32
    %c0_i32_0 = arith.constant 0 : i32
    %2 = arith.cmpi ne, %1, %c0_i32_0 : i32
    scf.if %2 {
      %cst_9 = arith.constant 0.000000e+00 : f32
      %12 = vector.broadcast %cst_9 : f32 to vector<16x256xf32>
      %c0_10 = arith.constant 0 : index
      %c0_11 = arith.constant 0 : index
      %13 = vector.load %arg7[%c0_10, %c0_11] : memref<16x256xf32, #tpu.memory_space<vmem>>, vector<16x256xf32>
      tpu.vector_store %arg7[%c0_10, %c0_11], %12 {strides = array<i32>} : memref<16x256xf32, #tpu.memory_space<vmem>>, vector<16x256xf32>,
    } else {
    }
    %c0 = arith.constant 0 : index
    %c0_1 = arith.constant 0 : index
    %3 = vector.load %arg7[%c0, %c0_1] : memref<16x256xf32, #tpu.memory_space<vmem>>, vector<16x256xf32>
    %c0_2 = arith.constant 0 : index
    %c0_3 = arith.constant 0 : index
    %4 = vector.load %arg3[%c0_2, %c0_3] : memref<16x384xbf16, #tpu.memory_space<vmem>>, vector<16x384xbf16>
    %c0_4 = arith.constant 0 : index
    %c0_5 = arith.constant 0 : index
    %5 = vector.load %arg4[%c0_4, %c0_5] : memref<384x256xbf16, #tpu.memory_space<vmem>>, vector<384x256xbf16>
    %cst = arith.constant dense<0.000000e+00> : vector<16x256xf32>
    %6 = tpu.matmul %4, %5, %cst {dimension_numbers = #tpu.dot_dimension_numbers<[1], [0], [0], [1], [0, 0, 1, 1], [], []>} : vector<16x384xbf16>, vector<384x256xbf16>, vector<16x256xf32> -> vector<16x256xf32>
    %7 = arith.addf %3, %6 : vector<16x256xf32>
    %c0_6 = arith.constant 0 : index
    %c0_7 = arith.constant 0 : index
    %8 = vector.load %arg7[%c0_6, %c0_7] : memref<16x256xf32, #tpu.memory_space<vmem>>, vector<16x256xf32>
    tpu.vector_store %arg7[%c0_6, %c0_7], %7 {strides = array<i32>} : memref<16x256xf32, #tpu.memory_space<vmem>>, vector<16x256xf32>,
    %c5_i32 = arith.constant 5 : i32
    %9 = arith.cmpi eq, %arg2, %c5_i32 : i32
    %10 = arith.extui %9 : i1 to i32
    %c0_i32_8 = arith.constant 0 : i32
    %11 = arith.cmpi ne, %10, %c0_i32_8 : i32
    scf.if %11 {
      %c0_9 = arith.constant 0 : index
      %c0_10 = arith.constant 0 : index
      %12 = vector.load %arg7[%c0_9, %c0_10] : memref<16x256xf32, #tpu.memory_space<vmem>>, vector<16x256xf32>
      %c0_11 = arith.constant 0 : index
      %c0_12 = arith.constant 0 : index
      %13 = vector.load %arg5[%c0_11, %c0_12] : memref<1x256xf32, #tpu.memory_space<vmem>>, vector<1x256xf32>
      %14 = vector.broadcast %13 : vector<1x256xf32> to vector<16x256xf32>
      %15 = arith.mulf %12, %14 : vector<16x256xf32>
      %c0_13 = arith.constant 0 : index
      %c0_14 = arith.constant 0 : index
      %16 = vector.load %arg6[%c0_13, %c0_14] : memref<1x256xf32, #tpu.memory_space<vmem>>, vector<1x256xf32>
      %17 = vector.broadcast %16 : vector<1x256xf32> to vector<16x256xf32>
      %18 = arith.addf %15, %17 : vector<16x256xf32>
      %cst_15 = arith.constant 0.000000e+00 : f32
      %19 = vector.broadcast %cst_15 : f32 to vector<16x256xf32>
      %20 = arith.maximumf %18, %19 : vector<16x256xf32>
      %c0_16 = arith.constant 0 : index
      %c0_17 = arith.constant 0 : index
      %21 = vector.load %arg7[%c0_16, %c0_17] : memref<16x256xf32, #tpu.memory_space<vmem>>, vector<16x256xf32>
      tpu.vector_store %arg7[%c0_16, %c0_17], %20 {strides = array<i32>} : memref<16x256xf32, #tpu.memory_space<vmem>>, vector<16x256xf32>,
    } else {
    }
    return
  }
  func.func @transform_0(%arg0: i32, %arg1: i32, %arg2: i32) -> (i32, i32) {
    %c0_i32 = arith.constant 0 : i32
    return %arg0, %arg2 : i32, i32
  }
  func.func @transform_1(%arg0: i32, %arg1: i32, %arg2: i32) -> (i32, i32) {
    %c0_i32 = arith.constant 0 : i32
    return %arg2, %arg1 : i32, i32
  }
  func.func @transform_2(%arg0: i32, %arg1: i32, %arg2: i32) -> (i32, i32) {
    %c0_i32 = arith.constant 0 : i32
    %c0_i32_0 = arith.constant 0 : i32
    return %c0_i32, %arg1 : i32, i32
  }
  func.func @transform_3(%arg0: i32, %arg1: i32, %arg2: i32) -> (i32, i32) {
    %c0_i32 = arith.constant 0 : i32
    %c0_i32_0 = arith.constant 0 : i32
    return %c0_i32, %arg1 : i32, i32
  }
  func.func @transform_4(%arg0: i32, %arg1: i32, %arg2: i32) -> (i32, i32) {
    %c0_i32 = arith.constant 0 : i32
    return %arg0, %arg1 : i32, i32
  }
}

module attributes {stable_mosaic.version = 11 : i64} {
  func.func @_gemm_kernel(%arg0: i32, %arg1: i32, %arg2: i32, %arg3: memref<16x256xbf16, #tpu.memory_space<vmem>>, %arg4: memref<256x256xbf16, #tpu.memory_space<vmem>>, %arg5: memref<1x256xf32, #tpu.memory_space<vmem>>, %arg6: memref<1x256xf32, #tpu.memory_space<vmem>>, %arg7: memref<16x256xf32, #tpu.memory_space<vmem>>) attributes {dimension_semantics = [#tpu.dimension_semantics<parallel>, #tpu.dimension_semantics<parallel>, #tpu.dimension_semantics<arbitrary>], iteration_bounds = array<i64: 1, 2, 1>, scalar_prefetch = 0 : i64, scratch_operands = 0 : i64, tpu.core_type = #tpu.core_type<tc>, window_params = [{transform_indices = @transform_0, window_bounds = array<i64: 16, 256>}, {transform_indices = @transform_1, window_bounds = array<i64: 256, 256>}, {transform_indices = @transform_2, window_bounds = array<i64: 1, 256>}, {transform_indices = @transform_3, window_bounds = array<i64: 1, 256>}, {transform_indices = @transform_4, window_bounds = array<i64: 16, 256>}]} {
    %c0_i32 = arith.constant 0 : i32
    %0 = arith.cmpi eq, %arg2, %c0_i32 : i32
    %1 = arith.extui %0 : i1 to i32
    %c0_i32_0 = arith.constant 0 : i32
    %2 = arith.cmpi ne, %1, %c0_i32_0 : i32
    scf.if %2 {
      %cst_10 = arith.constant 0.000000e+00 : f32
      %12 = vector.broadcast %cst_10 : f32 to vector<16x256xf32>
      %c0_11 = arith.constant 0 : index
      %c0_12 = arith.constant 0 : index
      %13 = vector.load %arg7[%c0_11, %c0_12] : memref<16x256xf32, #tpu.memory_space<vmem>>, vector<16x256xf32>
      tpu.vector_store %arg7[%c0_11, %c0_12], %12 {strides = array<i32>} : memref<16x256xf32, #tpu.memory_space<vmem>>, vector<16x256xf32>,
    } else {
    }
    %c0 = arith.constant 0 : index
    %c0_1 = arith.constant 0 : index
    %3 = vector.load %arg7[%c0, %c0_1] : memref<16x256xf32, #tpu.memory_space<vmem>>, vector<16x256xf32>
    %c0_2 = arith.constant 0 : index
    %c0_3 = arith.constant 0 : index
    %4 = vector.load %arg3[%c0_2, %c0_3] : memref<16x256xbf16, #tpu.memory_space<vmem>>, vector<16x256xbf16>
    %c0_4 = arith.constant 0 : index
    %c0_5 = arith.constant 0 : index
    %5 = vector.load %arg4[%c0_4, %c0_5] : memref<256x256xbf16, #tpu.memory_space<vmem>>, vector<256x256xbf16>
    %cst = arith.constant dense<0.000000e+00> : vector<16x256xf32>
    %6 = tpu.matmul %4, %5, %cst {dimension_numbers = #tpu.dot_dimension_numbers<[1], [0], [0], [1], [0, 0, 1, 1], [], []>} : vector<16x256xbf16>, vector<256x256xbf16>, vector<16x256xf32> -> vector<16x256xf32>
    %7 = arith.addf %3, %6 : vector<16x256xf32>
    %c0_6 = arith.constant 0 : index
    %c0_7 = arith.constant 0 : index
    %8 = vector.load %arg7[%c0_6, %c0_7] : memref<16x256xf32, #tpu.memory_space<vmem>>, vector<16x256xf32>
    tpu.vector_store %arg7[%c0_6, %c0_7], %7 {strides = array<i32>} : memref<16x256xf32, #tpu.memory_space<vmem>>, vector<16x256xf32>,
    %c0_i32_8 = arith.constant 0 : i32
    %9 = arith.cmpi eq, %arg2, %c0_i32_8 : i32
    %10 = arith.extui %9 : i1 to i32
    %c0_i32_9 = arith.constant 0 : i32
    %11 = arith.cmpi ne, %10, %c0_i32_9 : i32
    scf.if %11 {
      %c0_10 = arith.constant 0 : index
      %c0_11 = arith.constant 0 : index
      %12 = vector.load %arg7[%c0_10, %c0_11] : memref<16x256xf32, #tpu.memory_space<vmem>>, vector<16x256xf32>
      %c0_12 = arith.constant 0 : index
      %c0_13 = arith.constant 0 : index
      %13 = vector.load %arg5[%c0_12, %c0_13] : memref<1x256xf32, #tpu.memory_space<vmem>>, vector<1x256xf32>
      %14 = vector.broadcast %13 : vector<1x256xf32> to vector<16x256xf32>
      %15 = arith.mulf %12, %14 : vector<16x256xf32>
      %c0_14 = arith.constant 0 : index
      %c0_15 = arith.constant 0 : index
      %16 = vector.load %arg6[%c0_14, %c0_15] : memref<1x256xf32, #tpu.memory_space<vmem>>, vector<1x256xf32>
      %17 = vector.broadcast %16 : vector<1x256xf32> to vector<16x256xf32>
      %18 = arith.addf %15, %17 : vector<16x256xf32>
      %c0_16 = arith.constant 0 : index
      %c0_17 = arith.constant 0 : index
      %19 = vector.load %arg7[%c0_16, %c0_17] : memref<16x256xf32, #tpu.memory_space<vmem>>, vector<16x256xf32>
      tpu.vector_store %arg7[%c0_16, %c0_17], %18 {strides = array<i32>} : memref<16x256xf32, #tpu.memory_space<vmem>>, vector<16x256xf32>,
    } else {
    }
    return
  }
  func.func @transform_0(%arg0: i32, %arg1: i32, %arg2: i32) -> (i32, i32) {
    %c0_i32 = arith.constant 0 : i32
    return %arg0, %arg2 : i32, i32
  }
  func.func @transform_1(%arg0: i32, %arg1: i32, %arg2: i32) -> (i32, i32) {
    %c0_i32 = arith.constant 0 : i32
    return %arg2, %arg1 : i32, i32
  }
  func.func @transform_2(%arg0: i32, %arg1: i32, %arg2: i32) -> (i32, i32) {
    %c0_i32 = arith.constant 0 : i32
    %c0_i32_0 = arith.constant 0 : i32
    return %c0_i32, %arg1 : i32, i32
  }
  func.func @transform_3(%arg0: i32, %arg1: i32, %arg2: i32) -> (i32, i32) {
    %c0_i32 = arith.constant 0 : i32
    %c0_i32_0 = arith.constant 0 : i32
    return %c0_i32, %arg1 : i32, i32
  }
  func.func @transform_4(%arg0: i32, %arg1: i32, %arg2: i32) -> (i32, i32) {
    %c0_i32 = arith.constant 0 : i32
    return %arg0, %arg1 : i32, i32
  }
}

module attributes {stable_mosaic.version = 11 : i64} {
  func.func @_gemm_kernel(%arg0: i32, %arg1: i32, %arg2: i32, %arg3: memref<16x512xbf16, #tpu.memory_space<vmem>>, %arg4: memref<512x256xbf16, #tpu.memory_space<vmem>>, %arg5: memref<1x256xf32, #tpu.memory_space<vmem>>, %arg6: memref<1x256xf32, #tpu.memory_space<vmem>>, %arg7: memref<16x256xf32, #tpu.memory_space<vmem>>, %arg8: memref<16x256xf32, #tpu.memory_space<vmem>>) attributes {dimension_semantics = [#tpu.dimension_semantics<parallel>, #tpu.dimension_semantics<parallel>, #tpu.dimension_semantics<arbitrary>], iteration_bounds = array<i64: 1, 2, 9>, scalar_prefetch = 0 : i64, scratch_operands = 0 : i64, tpu.core_type = #tpu.core_type<tc>, window_params = [{transform_indices = @transform_0, window_bounds = array<i64: 16, 512>}, {transform_indices = @transform_1, window_bounds = array<i64: 512, 256>}, {transform_indices = @transform_2, window_bounds = array<i64: 1, 256>}, {transform_indices = @transform_3, window_bounds = array<i64: 1, 256>}, {transform_indices = @transform_4, window_bounds = array<i64: 16, 256>}, {transform_indices = @transform_5, window_bounds = array<i64: 16, 256>}]} {
    %c0_i32 = arith.constant 0 : i32
    %0 = arith.cmpi eq, %arg2, %c0_i32 : i32
    %1 = arith.extui %0 : i1 to i32
    %c0_i32_0 = arith.constant 0 : i32
    %2 = arith.cmpi ne, %1, %c0_i32_0 : i32
    scf.if %2 {
      %cst_9 = arith.constant 0.000000e+00 : f32
      %12 = vector.broadcast %cst_9 : f32 to vector<16x256xf32>
      %c0_10 = arith.constant 0 : index
      %c0_11 = arith.constant 0 : index
      %13 = vector.load %arg8[%c0_10, %c0_11] : memref<16x256xf32, #tpu.memory_space<vmem>>, vector<16x256xf32>
      tpu.vector_store %arg8[%c0_10, %c0_11], %12 {strides = array<i32>} : memref<16x256xf32, #tpu.memory_space<vmem>>, vector<16x256xf32>,
    } else {
    }
    %c0 = arith.constant 0 : index
    %c0_1 = arith.constant 0 : index
    %3 = vector.load %arg8[%c0, %c0_1] : memref<16x256xf32, #tpu.memory_space<vmem>>, vector<16x256xf32>
    %c0_2 = arith.constant 0 : index
    %c0_3 = arith.constant 0 : index
    %4 = vector.load %arg3[%c0_2, %c0_3] : memref<16x512xbf16, #tpu.memory_space<vmem>>, vector<16x512xbf16>
    %c0_4 = arith.constant 0 : index
    %c0_5 = arith.constant 0 : index
    %5 = vector.load %arg4[%c0_4, %c0_5] : memref<512x256xbf16, #tpu.memory_space<vmem>>, vector<512x256xbf16>
    %cst = arith.constant dense<0.000000e+00> : vector<16x256xf32>
    %6 = tpu.matmul %4, %5, %cst {dimension_numbers = #tpu.dot_dimension_numbers<[1], [0], [0], [1], [0, 0, 1, 1], [], []>} : vector<16x512xbf16>, vector<512x256xbf16>, vector<16x256xf32> -> vector<16x256xf32>
    %7 = arith.addf %3, %6 : vector<16x256xf32>
    %c0_6 = arith.constant 0 : index
    %c0_7 = arith.constant 0 : index
    %8 = vector.load %arg8[%c0_6, %c0_7] : memref<16x256xf32, #tpu.memory_space<vmem>>, vector<16x256xf32>
    tpu.vector_store %arg8[%c0_6, %c0_7], %7 {strides = array<i32>} : memref<16x256xf32, #tpu.memory_space<vmem>>, vector<16x256xf32>,
    %c8_i32 = arith.constant 8 : i32
    %9 = arith.cmpi eq, %arg2, %c8_i32 : i32
    %10 = arith.extui %9 : i1 to i32
    %c0_i32_8 = arith.constant 0 : i32
    %11 = arith.cmpi ne, %10, %c0_i32_8 : i32
    scf.if %11 {
      %c0_9 = arith.constant 0 : index
      %c0_10 = arith.constant 0 : index
      %12 = vector.load %arg8[%c0_9, %c0_10] : memref<16x256xf32, #tpu.memory_space<vmem>>, vector<16x256xf32>
      %c0_11 = arith.constant 0 : index
      %c0_12 = arith.constant 0 : index
      %13 = vector.load %arg5[%c0_11, %c0_12] : memref<1x256xf32, #tpu.memory_space<vmem>>, vector<1x256xf32>
      %14 = vector.broadcast %13 : vector<1x256xf32> to vector<16x256xf32>
      %15 = arith.mulf %12, %14 : vector<16x256xf32>
      %c0_13 = arith.constant 0 : index
      %c0_14 = arith.constant 0 : index
      %16 = vector.load %arg6[%c0_13, %c0_14] : memref<1x256xf32, #tpu.memory_space<vmem>>, vector<1x256xf32>
      %17 = vector.broadcast %16 : vector<1x256xf32> to vector<16x256xf32>
      %18 = arith.addf %15, %17 : vector<16x256xf32>
      %c0_15 = arith.constant 0 : index
      %c0_16 = arith.constant 0 : index
      %19 = vector.load %arg7[%c0_15, %c0_16] : memref<16x256xf32, #tpu.memory_space<vmem>>, vector<16x256xf32>
      %20 = arith.addf %18, %19 : vector<16x256xf32>
      %cst_17 = arith.constant 0.000000e+00 : f32
      %21 = vector.broadcast %cst_17 : f32 to vector<16x256xf32>
      %22 = arith.maximumf %20, %21 : vector<16x256xf32>
      %c0_18 = arith.constant 0 : index
      %c0_19 = arith.constant 0 : index
      %23 = vector.load %arg8[%c0_18, %c0_19] : memref<16x256xf32, #tpu.memory_space<vmem>>, vector<16x256xf32>
      tpu.vector_store %arg8[%c0_18, %c0_19], %22 {strides = array<i32>} : memref<16x256xf32, #tpu.memory_space<vmem>>, vector<16x256xf32>,
    } else {
    }
    return
  }
  func.func @transform_0(%arg0: i32, %arg1: i32, %arg2: i32) -> (i32, i32) {
    %c0_i32 = arith.constant 0 : i32
    return %arg0, %arg2 : i32, i32
  }
  func.func @transform_1(%arg0: i32, %arg1: i32, %arg2: i32) -> (i32, i32) {
    %c0_i32 = arith.constant 0 : i32
    return %arg2, %arg1 : i32, i32
  }
  func.func @transform_2(%arg0: i32, %arg1: i32, %arg2: i32) -> (i32, i32) {
    %c0_i32 = arith.constant 0 : i32
    %c0_i32_0 = arith.constant 0 : i32
    return %c0_i32, %arg1 : i32, i32
  }
  func.func @transform_3(%arg0: i32, %arg1: i32, %arg2: i32) -> (i32, i32) {
    %c0_i32 = arith.constant 0 : i32
    %c0_i32_0 = arith.constant 0 : i32
    return %c0_i32, %arg1 : i32, i32
  }
  func.func @transform_4(%arg0: i32, %arg1: i32, %arg2: i32) -> (i32, i32) {
    %c0_i32 = arith.constant 0 : i32
    return %arg0, %arg1 : i32, i32
  }
  func.func @transform_5(%arg0: i32, %arg1: i32, %arg2: i32) -> (i32, i32) {
    %c0_i32 = arith.constant 0 : i32
    return %arg0, %arg1 : i32, i32
  }
}

module attributes {stable_mosaic.version = 11 : i64} {
  func.func @_gemm_kernel(%arg0: i32, %arg1: i32, %arg2: i32, %arg3: memref<16x512xbf16, #tpu.memory_space<vmem>>, %arg4: memref<512x256xbf16, #tpu.memory_space<vmem>>, %arg5: memref<1x256xf32, #tpu.memory_space<vmem>>, %arg6: memref<1x256xf32, #tpu.memory_space<vmem>>, %arg7: memref<16x256xf32, #tpu.memory_space<vmem>>) attributes {dimension_semantics = [#tpu.dimension_semantics<parallel>, #tpu.dimension_semantics<parallel>, #tpu.dimension_semantics<arbitrary>], iteration_bounds = array<i64: 1, 2, 9>, scalar_prefetch = 0 : i64, scratch_operands = 0 : i64, tpu.core_type = #tpu.core_type<tc>, window_params = [{transform_indices = @transform_0, window_bounds = array<i64: 16, 512>}, {transform_indices = @transform_1, window_bounds = array<i64: 512, 256>}, {transform_indices = @transform_2, window_bounds = array<i64: 1, 256>}, {transform_indices = @transform_3, window_bounds = array<i64: 1, 256>}, {transform_indices = @transform_4, window_bounds = array<i64: 16, 256>}]} {
    %c0_i32 = arith.constant 0 : i32
    %0 = arith.cmpi eq, %arg2, %c0_i32 : i32
    %1 = arith.extui %0 : i1 to i32
    %c0_i32_0 = arith.constant 0 : i32
    %2 = arith.cmpi ne, %1, %c0_i32_0 : i32
    scf.if %2 {
      %cst_9 = arith.constant 0.000000e+00 : f32
      %12 = vector.broadcast %cst_9 : f32 to vector<16x256xf32>
      %c0_10 = arith.constant 0 : index
      %c0_11 = arith.constant 0 : index
      %13 = vector.load %arg7[%c0_10, %c0_11] : memref<16x256xf32, #tpu.memory_space<vmem>>, vector<16x256xf32>
      tpu.vector_store %arg7[%c0_10, %c0_11], %12 {strides = array<i32>} : memref<16x256xf32, #tpu.memory_space<vmem>>, vector<16x256xf32>,
    } else {
    }
    %c0 = arith.constant 0 : index
    %c0_1 = arith.constant 0 : index
    %3 = vector.load %arg7[%c0, %c0_1] : memref<16x256xf32, #tpu.memory_space<vmem>>, vector<16x256xf32>
    %c0_2 = arith.constant 0 : index
    %c0_3 = arith.constant 0 : index
    %4 = vector.load %arg3[%c0_2, %c0_3] : memref<16x512xbf16, #tpu.memory_space<vmem>>, vector<16x512xbf16>
    %c0_4 = arith.constant 0 : index
    %c0_5 = arith.constant 0 : index
    %5 = vector.load %arg4[%c0_4, %c0_5] : memref<512x256xbf16, #tpu.memory_space<vmem>>, vector<512x256xbf16>
    %cst = arith.constant dense<0.000000e+00> : vector<16x256xf32>
    %6 = tpu.matmul %4, %5, %cst {dimension_numbers = #tpu.dot_dimension_numbers<[1], [0], [0], [1], [0, 0, 1, 1], [], []>} : vector<16x512xbf16>, vector<512x256xbf16>, vector<16x256xf32> -> vector<16x256xf32>
    %7 = arith.addf %3, %6 : vector<16x256xf32>
    %c0_6 = arith.constant 0 : index
    %c0_7 = arith.constant 0 : index
    %8 = vector.load %arg7[%c0_6, %c0_7] : memref<16x256xf32, #tpu.memory_space<vmem>>, vector<16x256xf32>
    tpu.vector_store %arg7[%c0_6, %c0_7], %7 {strides = array<i32>} : memref<16x256xf32, #tpu.memory_space<vmem>>, vector<16x256xf32>,
    %c8_i32 = arith.constant 8 : i32
    %9 = arith.cmpi eq, %arg2, %c8_i32 : i32
    %10 = arith.extui %9 : i1 to i32
    %c0_i32_8 = arith.constant 0 : i32
    %11 = arith.cmpi ne, %10, %c0_i32_8 : i32
    scf.if %11 {
      %c0_9 = arith.constant 0 : index
      %c0_10 = arith.constant 0 : index
      %12 = vector.load %arg7[%c0_9, %c0_10] : memref<16x256xf32, #tpu.memory_space<vmem>>, vector<16x256xf32>
      %c0_11 = arith.constant 0 : index
      %c0_12 = arith.constant 0 : index
      %13 = vector.load %arg5[%c0_11, %c0_12] : memref<1x256xf32, #tpu.memory_space<vmem>>, vector<1x256xf32>
      %14 = vector.broadcast %13 : vector<1x256xf32> to vector<16x256xf32>
      %15 = arith.mulf %12, %14 : vector<16x256xf32>
      %c0_13 = arith.constant 0 : index
      %c0_14 = arith.constant 0 : index
      %16 = vector.load %arg6[%c0_13, %c0_14] : memref<1x256xf32, #tpu.memory_space<vmem>>, vector<1x256xf32>
      %17 = vector.broadcast %16 : vector<1x256xf32> to vector<16x256xf32>
      %18 = arith.addf %15, %17 : vector<16x256xf32>
      %cst_15 = arith.constant 0.000000e+00 : f32
      %19 = vector.broadcast %cst_15 : f32 to vector<16x256xf32>
      %20 = arith.maximumf %18, %19 : vector<16x256xf32>
      %c0_16 = arith.constant 0 : index
      %c0_17 = arith.constant 0 : index
      %21 = vector.load %arg7[%c0_16, %c0_17] : memref<16x256xf32, #tpu.memory_space<vmem>>, vector<16x256xf32>
      tpu.vector_store %arg7[%c0_16, %c0_17], %20 {strides = array<i32>} : memref<16x256xf32, #tpu.memory_space<vmem>>, vector<16x256xf32>,
    } else {
    }
    return
  }
  func.func @transform_0(%arg0: i32, %arg1: i32, %arg2: i32) -> (i32, i32) {
    %c0_i32 = arith.constant 0 : i32
    return %arg0, %arg2 : i32, i32
  }
  func.func @transform_1(%arg0: i32, %arg1: i32, %arg2: i32) -> (i32, i32) {
    %c0_i32 = arith.constant 0 : i32
    return %arg2, %arg1 : i32, i32
  }
  func.func @transform_2(%arg0: i32, %arg1: i32, %arg2: i32) -> (i32, i32) {
    %c0_i32 = arith.constant 0 : i32
    %c0_i32_0 = arith.constant 0 : i32
    return %c0_i32, %arg1 : i32, i32
  }
  func.func @transform_3(%arg0: i32, %arg1: i32, %arg2: i32) -> (i32, i32) {
    %c0_i32 = arith.constant 0 : i32
    %c0_i32_0 = arith.constant 0 : i32
    return %c0_i32, %arg1 : i32, i32
  }
  func.func @transform_4(%arg0: i32, %arg1: i32, %arg2: i32) -> (i32, i32) {
    %c0_i32 = arith.constant 0 : i32
    return %arg0, %arg1 : i32, i32
  }
}

module attributes {stable_mosaic.version = 11 : i64} {
  func.func @_gemm_kernel(%arg0: i32, %arg1: i32, %arg2: i32, %arg3: memref<16x512xbf16, #tpu.memory_space<vmem>>, %arg4: memref<512x128xbf16, #tpu.memory_space<vmem>>, %arg5: memref<1x128xf32, #tpu.memory_space<vmem>>, %arg6: memref<1x128xf32, #tpu.memory_space<vmem>>, %arg7: memref<16x128xf32, #tpu.memory_space<vmem>>) attributes {dimension_semantics = [#tpu.dimension_semantics<parallel>, #tpu.dimension_semantics<parallel>, #tpu.dimension_semantics<arbitrary>], iteration_bounds = array<i64: 1, 1, 1>, scalar_prefetch = 0 : i64, scratch_operands = 0 : i64, tpu.core_type = #tpu.core_type<tc>, window_params = [{transform_indices = @transform_0, window_bounds = array<i64: 16, 512>}, {transform_indices = @transform_1, window_bounds = array<i64: 512, 128>}, {transform_indices = @transform_2, window_bounds = array<i64: 1, 128>}, {transform_indices = @transform_3, window_bounds = array<i64: 1, 128>}, {transform_indices = @transform_4, window_bounds = array<i64: 16, 128>}]} {
    %c0_i32 = arith.constant 0 : i32
    %0 = arith.cmpi eq, %arg2, %c0_i32 : i32
    %1 = arith.extui %0 : i1 to i32
    %c0_i32_0 = arith.constant 0 : i32
    %2 = arith.cmpi ne, %1, %c0_i32_0 : i32
    scf.if %2 {
      %cst_10 = arith.constant 0.000000e+00 : f32
      %12 = vector.broadcast %cst_10 : f32 to vector<16x128xf32>
      %c0_11 = arith.constant 0 : index
      %c0_12 = arith.constant 0 : index
      %13 = vector.load %arg7[%c0_11, %c0_12] : memref<16x128xf32, #tpu.memory_space<vmem>>, vector<16x128xf32>
      tpu.vector_store %arg7[%c0_11, %c0_12], %12 {strides = array<i32>} : memref<16x128xf32, #tpu.memory_space<vmem>>, vector<16x128xf32>,
    } else {
    }
    %c0 = arith.constant 0 : index
    %c0_1 = arith.constant 0 : index
    %3 = vector.load %arg7[%c0, %c0_1] : memref<16x128xf32, #tpu.memory_space<vmem>>, vector<16x128xf32>
    %c0_2 = arith.constant 0 : index
    %c0_3 = arith.constant 0 : index
    %4 = vector.load %arg3[%c0_2, %c0_3] : memref<16x512xbf16, #tpu.memory_space<vmem>>, vector<16x512xbf16>
    %c0_4 = arith.constant 0 : index
    %c0_5 = arith.constant 0 : index
    %5 = vector.load %arg4[%c0_4, %c0_5] : memref<512x128xbf16, #tpu.memory_space<vmem>>, vector<512x128xbf16>
    %cst = arith.constant dense<0.000000e+00> : vector<16x128xf32>
    %6 = tpu.matmul %4, %5, %cst {dimension_numbers = #tpu.dot_dimension_numbers<[1], [0], [0], [1], [0, 0, 1, 1], [], []>} : vector<16x512xbf16>, vector<512x128xbf16>, vector<16x128xf32> -> vector<16x128xf32>
    %7 = arith.addf %3, %6 : vector<16x128xf32>
    %c0_6 = arith.constant 0 : index
    %c0_7 = arith.constant 0 : index
    %8 = vector.load %arg7[%c0_6, %c0_7] : memref<16x128xf32, #tpu.memory_space<vmem>>, vector<16x128xf32>
    tpu.vector_store %arg7[%c0_6, %c0_7], %7 {strides = array<i32>} : memref<16x128xf32, #tpu.memory_space<vmem>>, vector<16x128xf32>,
    %c0_i32_8 = arith.constant 0 : i32
    %9 = arith.cmpi eq, %arg2, %c0_i32_8 : i32
    %10 = arith.extui %9 : i1 to i32
    %c0_i32_9 = arith.constant 0 : i32
    %11 = arith.cmpi ne, %10, %c0_i32_9 : i32
    scf.if %11 {
      %c0_10 = arith.constant 0 : index
      %c0_11 = arith.constant 0 : index
      %12 = vector.load %arg7[%c0_10, %c0_11] : memref<16x128xf32, #tpu.memory_space<vmem>>, vector<16x128xf32>
      %c0_12 = arith.constant 0 : index
      %c0_13 = arith.constant 0 : index
      %13 = vector.load %arg5[%c0_12, %c0_13] : memref<1x128xf32, #tpu.memory_space<vmem>>, vector<1x128xf32>
      %14 = vector.broadcast %13 : vector<1x128xf32> to vector<16x128xf32>
      %15 = arith.mulf %12, %14 : vector<16x128xf32>
      %c0_14 = arith.constant 0 : index
      %c0_15 = arith.constant 0 : index
      %16 = vector.load %arg6[%c0_14, %c0_15] : memref<1x128xf32, #tpu.memory_space<vmem>>, vector<1x128xf32>
      %17 = vector.broadcast %16 : vector<1x128xf32> to vector<16x128xf32>
      %18 = arith.addf %15, %17 : vector<16x128xf32>
      %c0_16 = arith.constant 0 : index
      %c0_17 = arith.constant 0 : index
      %19 = vector.load %arg7[%c0_16, %c0_17] : memref<16x128xf32, #tpu.memory_space<vmem>>, vector<16x128xf32>
      tpu.vector_store %arg7[%c0_16, %c0_17], %18 {strides = array<i32>} : memref<16x128xf32, #tpu.memory_space<vmem>>, vector<16x128xf32>,
    } else {
    }
    return
  }
  func.func @transform_0(%arg0: i32, %arg1: i32, %arg2: i32) -> (i32, i32) {
    %c0_i32 = arith.constant 0 : i32
    return %arg0, %arg2 : i32, i32
  }
  func.func @transform_1(%arg0: i32, %arg1: i32, %arg2: i32) -> (i32, i32) {
    %c0_i32 = arith.constant 0 : i32
    return %arg2, %arg1 : i32, i32
  }
  func.func @transform_2(%arg0: i32, %arg1: i32, %arg2: i32) -> (i32, i32) {
    %c0_i32 = arith.constant 0 : i32
    %c0_i32_0 = arith.constant 0 : i32
    return %c0_i32, %arg1 : i32, i32
  }
  func.func @transform_3(%arg0: i32, %arg1: i32, %arg2: i32) -> (i32, i32) {
    %c0_i32 = arith.constant 0 : i32
    %c0_i32_0 = arith.constant 0 : i32
    return %c0_i32, %arg1 : i32, i32
  }
  func.func @transform_4(%arg0: i32, %arg1: i32, %arg2: i32) -> (i32, i32) {
    %c0_i32 = arith.constant 0 : i32
    return %arg0, %arg1 : i32, i32
  }
}

module attributes {stable_mosaic.version = 11 : i64} {
  func.func @_gemm_kernel(%arg0: i32, %arg1: i32, %arg2: i32, %arg3: memref<32x128xbf16, #tpu.memory_space<vmem>>, %arg4: memref<128x128xbf16, #tpu.memory_space<vmem>>, %arg5: memref<1x128xf32, #tpu.memory_space<vmem>>, %arg6: memref<1x128xf32, #tpu.memory_space<vmem>>, %arg7: memref<32x128xf32, #tpu.memory_space<vmem>>) attributes {dimension_semantics = [#tpu.dimension_semantics<parallel>, #tpu.dimension_semantics<parallel>, #tpu.dimension_semantics<arbitrary>], iteration_bounds = array<i64: 1, 1, 1>, scalar_prefetch = 0 : i64, scratch_operands = 0 : i64, tpu.core_type = #tpu.core_type<tc>, window_params = [{transform_indices = @transform_0, window_bounds = array<i64: 32, 128>}, {transform_indices = @transform_1, window_bounds = array<i64: 128, 128>}, {transform_indices = @transform_2, window_bounds = array<i64: 1, 128>}, {transform_indices = @transform_3, window_bounds = array<i64: 1, 128>}, {transform_indices = @transform_4, window_bounds = array<i64: 32, 128>}]} {
    %c0_i32 = arith.constant 0 : i32
    %0 = arith.cmpi eq, %arg2, %c0_i32 : i32
    %1 = arith.extui %0 : i1 to i32
    %c0_i32_0 = arith.constant 0 : i32
    %2 = arith.cmpi ne, %1, %c0_i32_0 : i32
    scf.if %2 {
      %cst_10 = arith.constant 0.000000e+00 : f32
      %12 = vector.broadcast %cst_10 : f32 to vector<32x128xf32>
      %c0_11 = arith.constant 0 : index
      %c0_12 = arith.constant 0 : index
      %13 = vector.load %arg7[%c0_11, %c0_12] : memref<32x128xf32, #tpu.memory_space<vmem>>, vector<32x128xf32>
      tpu.vector_store %arg7[%c0_11, %c0_12], %12 {strides = array<i32>} : memref<32x128xf32, #tpu.memory_space<vmem>>, vector<32x128xf32>,
    } else {
    }
    %c0 = arith.constant 0 : index
    %c0_1 = arith.constant 0 : index
    %3 = vector.load %arg7[%c0, %c0_1] : memref<32x128xf32, #tpu.memory_space<vmem>>, vector<32x128xf32>
    %c0_2 = arith.constant 0 : index
    %c0_3 = arith.constant 0 : index
    %4 = vector.load %arg3[%c0_2, %c0_3] : memref<32x128xbf16, #tpu.memory_space<vmem>>, vector<32x128xbf16>
    %c0_4 = arith.constant 0 : index
    %c0_5 = arith.constant 0 : index
    %5 = vector.load %arg4[%c0_4, %c0_5] : memref<128x128xbf16, #tpu.memory_space<vmem>>, vector<128x128xbf16>
    %cst = arith.constant dense<0.000000e+00> : vector<32x128xf32>
    %6 = tpu.matmul %4, %5, %cst {dimension_numbers = #tpu.dot_dimension_numbers<[1], [0], [0], [1], [0, 0, 1, 1], [], []>} : vector<32x128xbf16>, vector<128x128xbf16>, vector<32x128xf32> -> vector<32x128xf32>
    %7 = arith.addf %3, %6 : vector<32x128xf32>
    %c0_6 = arith.constant 0 : index
    %c0_7 = arith.constant 0 : index
    %8 = vector.load %arg7[%c0_6, %c0_7] : memref<32x128xf32, #tpu.memory_space<vmem>>, vector<32x128xf32>
    tpu.vector_store %arg7[%c0_6, %c0_7], %7 {strides = array<i32>} : memref<32x128xf32, #tpu.memory_space<vmem>>, vector<32x128xf32>,
    %c0_i32_8 = arith.constant 0 : i32
    %9 = arith.cmpi eq, %arg2, %c0_i32_8 : i32
    %10 = arith.extui %9 : i1 to i32
    %c0_i32_9 = arith.constant 0 : i32
    %11 = arith.cmpi ne, %10, %c0_i32_9 : i32
    scf.if %11 {
      %c0_10 = arith.constant 0 : index
      %c0_11 = arith.constant 0 : index
      %12 = vector.load %arg7[%c0_10, %c0_11] : memref<32x128xf32, #tpu.memory_space<vmem>>, vector<32x128xf32>
      %c0_12 = arith.constant 0 : index
      %c0_13 = arith.constant 0 : index
      %13 = vector.load %arg5[%c0_12, %c0_13] : memref<1x128xf32, #tpu.memory_space<vmem>>, vector<1x128xf32>
      %14 = vector.broadcast %13 : vector<1x128xf32> to vector<32x128xf32>
      %15 = arith.mulf %12, %14 : vector<32x128xf32>
      %c0_14 = arith.constant 0 : index
      %c0_15 = arith.constant 0 : index
      %16 = vector.load %arg6[%c0_14, %c0_15] : memref<1x128xf32, #tpu.memory_space<vmem>>, vector<1x128xf32>
      %17 = vector.broadcast %16 : vector<1x128xf32> to vector<32x128xf32>
      %18 = arith.addf %15, %17 : vector<32x128xf32>
      %c0_16 = arith.constant 0 : index
      %c0_17 = arith.constant 0 : index
      %19 = vector.load %arg7[%c0_16, %c0_17] : memref<32x128xf32, #tpu.memory_space<vmem>>, vector<32x128xf32>
      tpu.vector_store %arg7[%c0_16, %c0_17], %18 {strides = array<i32>} : memref<32x128xf32, #tpu.memory_space<vmem>>, vector<32x128xf32>,
    } else {
    }
    return
  }
  func.func @transform_0(%arg0: i32, %arg1: i32, %arg2: i32) -> (i32, i32) {
    %c0_i32 = arith.constant 0 : i32
    return %arg0, %arg2 : i32, i32
  }
  func.func @transform_1(%arg0: i32, %arg1: i32, %arg2: i32) -> (i32, i32) {
    %c0_i32 = arith.constant 0 : i32
    return %arg2, %arg1 : i32, i32
  }
  func.func @transform_2(%arg0: i32, %arg1: i32, %arg2: i32) -> (i32, i32) {
    %c0_i32 = arith.constant 0 : i32
    %c0_i32_0 = arith.constant 0 : i32
    return %c0_i32, %arg1 : i32, i32
  }
  func.func @transform_3(%arg0: i32, %arg1: i32, %arg2: i32) -> (i32, i32) {
    %c0_i32 = arith.constant 0 : i32
    %c0_i32_0 = arith.constant 0 : i32
    return %c0_i32, %arg1 : i32, i32
  }
  func.func @transform_4(%arg0: i32, %arg1: i32, %arg2: i32) -> (i32, i32) {
    %c0_i32 = arith.constant 0 : i32
    return %arg0, %arg1 : i32, i32
  }
}

module attributes {stable_mosaic.version = 11 : i64} {
  func.func @_gemm_kernel(%arg0: i32, %arg1: i32, %arg2: i32, %arg3: memref<256x128xbf16, #tpu.memory_space<vmem>>, %arg4: memref<128x128xbf16, #tpu.memory_space<vmem>>, %arg5: memref<1x128xf32, #tpu.memory_space<vmem>>, %arg6: memref<1x128xf32, #tpu.memory_space<vmem>>, %arg7: memref<256x128xf32, #tpu.memory_space<vmem>>) attributes {dimension_semantics = [#tpu.dimension_semantics<parallel>, #tpu.dimension_semantics<parallel>, #tpu.dimension_semantics<arbitrary>], iteration_bounds = array<i64: 2, 1, 1>, scalar_prefetch = 0 : i64, scratch_operands = 0 : i64, tpu.core_type = #tpu.core_type<tc>, window_params = [{transform_indices = @transform_0, window_bounds = array<i64: 256, 128>}, {transform_indices = @transform_1, window_bounds = array<i64: 128, 128>}, {transform_indices = @transform_2, window_bounds = array<i64: 1, 128>}, {transform_indices = @transform_3, window_bounds = array<i64: 1, 128>}, {transform_indices = @transform_4, window_bounds = array<i64: 256, 128>}]} {
    %c0_i32 = arith.constant 0 : i32
    %0 = arith.cmpi eq, %arg2, %c0_i32 : i32
    %1 = arith.extui %0 : i1 to i32
    %c0_i32_0 = arith.constant 0 : i32
    %2 = arith.cmpi ne, %1, %c0_i32_0 : i32
    scf.if %2 {
      %cst_10 = arith.constant 0.000000e+00 : f32
      %12 = vector.broadcast %cst_10 : f32 to vector<256x128xf32>
      %c0_11 = arith.constant 0 : index
      %c0_12 = arith.constant 0 : index
      %13 = vector.load %arg7[%c0_11, %c0_12] : memref<256x128xf32, #tpu.memory_space<vmem>>, vector<256x128xf32>
      tpu.vector_store %arg7[%c0_11, %c0_12], %12 {strides = array<i32>} : memref<256x128xf32, #tpu.memory_space<vmem>>, vector<256x128xf32>,
    } else {
    }
    %c0 = arith.constant 0 : index
    %c0_1 = arith.constant 0 : index
    %3 = vector.load %arg7[%c0, %c0_1] : memref<256x128xf32, #tpu.memory_space<vmem>>, vector<256x128xf32>
    %c0_2 = arith.constant 0 : index
    %c0_3 = arith.constant 0 : index
    %4 = vector.load %arg3[%c0_2, %c0_3] : memref<256x128xbf16, #tpu.memory_space<vmem>>, vector<256x128xbf16>
    %c0_4 = arith.constant 0 : index
    %c0_5 = arith.constant 0 : index
    %5 = vector.load %arg4[%c0_4, %c0_5] : memref<128x128xbf16, #tpu.memory_space<vmem>>, vector<128x128xbf16>
    %cst = arith.constant dense<0.000000e+00> : vector<256x128xf32>
    %6 = tpu.matmul %4, %5, %cst {dimension_numbers = #tpu.dot_dimension_numbers<[1], [0], [0], [1], [0, 0, 1, 1], [], []>} : vector<256x128xbf16>, vector<128x128xbf16>, vector<256x128xf32> -> vector<256x128xf32>
    %7 = arith.addf %3, %6 : vector<256x128xf32>
    %c0_6 = arith.constant 0 : index
    %c0_7 = arith.constant 0 : index
    %8 = vector.load %arg7[%c0_6, %c0_7] : memref<256x128xf32, #tpu.memory_space<vmem>>, vector<256x128xf32>
    tpu.vector_store %arg7[%c0_6, %c0_7], %7 {strides = array<i32>} : memref<256x128xf32, #tpu.memory_space<vmem>>, vector<256x128xf32>,
    %c0_i32_8 = arith.constant 0 : i32
    %9 = arith.cmpi eq, %arg2, %c0_i32_8 : i32
    %10 = arith.extui %9 : i1 to i32
    %c0_i32_9 = arith.constant 0 : i32
    %11 = arith.cmpi ne, %10, %c0_i32_9 : i32
    scf.if %11 {
      %c0_10 = arith.constant 0 : index
      %c0_11 = arith.constant 0 : index
      %12 = vector.load %arg7[%c0_10, %c0_11] : memref<256x128xf32, #tpu.memory_space<vmem>>, vector<256x128xf32>
      %c0_12 = arith.constant 0 : index
      %c0_13 = arith.constant 0 : index
      %13 = vector.load %arg5[%c0_12, %c0_13] : memref<1x128xf32, #tpu.memory_space<vmem>>, vector<1x128xf32>
      %14 = vector.broadcast %13 : vector<1x128xf32> to vector<256x128xf32>
      %15 = arith.mulf %12, %14 : vector<256x128xf32>
      %c0_14 = arith.constant 0 : index
      %c0_15 = arith.constant 0 : index
      %16 = vector.load %arg6[%c0_14, %c0_15] : memref<1x128xf32, #tpu.memory_space<vmem>>, vector<1x128xf32>
      %17 = vector.broadcast %16 : vector<1x128xf32> to vector<256x128xf32>
      %18 = arith.addf %15, %17 : vector<256x128xf32>
      %c0_16 = arith.constant 0 : index
      %c0_17 = arith.constant 0 : index
      %19 = vector.load %arg7[%c0_16, %c0_17] : memref<256x128xf32, #tpu.memory_space<vmem>>, vector<256x128xf32>
      tpu.vector_store %arg7[%c0_16, %c0_17], %18 {strides = array<i32>} : memref<256x128xf32, #tpu.memory_space<vmem>>, vector<256x128xf32>,
    } else {
    }
    return
  }
  func.func @transform_0(%arg0: i32, %arg1: i32, %arg2: i32) -> (i32, i32) {
    %c0_i32 = arith.constant 0 : i32
    return %arg0, %arg2 : i32, i32
  }
  func.func @transform_1(%arg0: i32, %arg1: i32, %arg2: i32) -> (i32, i32) {
    %c0_i32 = arith.constant 0 : i32
    return %arg2, %arg1 : i32, i32
  }
  func.func @transform_2(%arg0: i32, %arg1: i32, %arg2: i32) -> (i32, i32) {
    %c0_i32 = arith.constant 0 : i32
    %c0_i32_0 = arith.constant 0 : i32
    return %c0_i32, %arg1 : i32, i32
  }
  func.func @transform_3(%arg0: i32, %arg1: i32, %arg2: i32) -> (i32, i32) {
    %c0_i32 = arith.constant 0 : i32
    %c0_i32_0 = arith.constant 0 : i32
    return %c0_i32, %arg1 : i32, i32
  }
  func.func @transform_4(%arg0: i32, %arg1: i32, %arg2: i32) -> (i32, i32) {
    %c0_i32 = arith.constant 0 : i32
    return %arg0, %arg1 : i32, i32
  }
}

</mosaic_0001>

<bundles_post_ra>
// kernel: resnet18_16s_forward.24
= control target key start
LH: loop header
LB: loop body
LE: loop exit
PB: predicated region body
PF: predicated region fallthrough
CT: control target
= control target key end

     0   :  { %s940_s1 = inlined_call_operand.vmem [shape: bf16[256,128], index: 1, kind: input, shape index: {}]   ;;  %s941_s0 = inlined_call_operand.vmem [shape: bf16[128,256], index: 0, kind: input, shape index: {}]   ;;  %s942_s2 = inlined_call_operand.vmem [shape: f32[1,128], index: 2, kind: input, shape index: {}]   ;;  %s943_s3 = inlined_call_operand.vmem [shape: f32[1,128], index: 3, kind: input, shape index: {}]   ;;  %s944_s4 = inlined_call_operand.vmem [shape: f32[128,128], index: 4, kind: output, shape index: {}]  }
   0x1   :  { %v653_v0 = vld [vmem:[%s940_s1 + $0x38] sm:$0xff]  ;;  %v652_v2 = vld [vmem:[%s940_s1 + $0x30] sm:$0xff]  ;;  %v651_v4 = vld [vmem:[%s940_s1 + $0x28] sm:$0xff] }
   0x2   :  { %v661_v1 = vld [vmem:[%s940_s1 + $0x78] sm:$0xff]  ;;  %277 = vmatpush.bf16.msra.mxu0 %v653_v0  ;;  %662 = vmatpush.bf16.msra.mxu2 %v653_v0  ;;  %v660_v3 = vld [vmem:[%s940_s1 + $0x70] sm:$0xff]  ;;  %v659_v5 = vld [vmem:[%s940_s1 + $0x68] sm:$0xff] }
   0x3   :  { %326 = vmatpush.bf16.msra.mxu1 %v661_v1  ;;  %670 = vmatpush.bf16.msra.mxu3 %v661_v1  ;;  %v650_v6 = vld [vmem:[%s940_s1 + $0x20] sm:$0xff]  ;;  %v649_v8 = vld [vmem:[%s940_s1 + $0x18] sm:$0xff]  ;;  %v648_v10 = vld [vmem:[%s940_s1 + $0x10] sm:$0xff] }
   0x4   :  { %v658_v7 = vld [vmem:[%s940_s1 + $0x60] sm:$0xff]  ;;  %v657_v9 = vld [vmem:[%s940_s1 + $0x58] sm:$0xff]  ;;  %v656_v11 = vld [vmem:[%s940_s1 + $0x50] sm:$0xff] }
   0x5   :  { %v647_v12 = vld [vmem:[%s940_s1 + $0x8] sm:$0xff]  ;;  %v646_v14 = vld [vmem:[%s940_s1] sm:$0xff]  ;;  %v512_v28 = vld [vmem:[%s941_s0 + $0x10] sm:$0xf] }
   0x6   :  { %278 = vmatpush.bf16.msra.mxu0 %v652_v2  ;;  %663 = vmatpush.bf16.msra.mxu2 %v652_v2  ;;  %v655_v13 = vld [vmem:[%s940_s1 + $0x48] sm:$0xff]  ;;  %v654_v15 = vld [vmem:[%s940_s1 + $0x40] sm:$0xff]  ;;  %v633_v29 = vld [vmem:[%s941_s0 + $0x14] sm:$0xf0] }
   0x7   :  { %327 = vmatpush.bf16.msra.mxu1 %v660_v3  ;;  %671 = vmatpush.bf16.msra.mxu3 %v660_v3  ;;  %v504_v16 = vld [vmem:[%s941_s0] sm:$0xf]  ;;  %v631_v17 = vld [vmem:[%s941_s0 + $0x4] sm:$0xf0]  ;;  %v630_v20 = vld [vmem:[%s941_s0 + $0x4] sm:$0xf]  ;;  %v513_v36 = vor.u32 %v633_v29, %v512_v28 }
   0x8   :  { %v536_v18 = vld [vmem:[%s941_s0 + $0x40] sm:$0xf]  ;;  %v639_v19 = vld [vmem:[%s941_s0 + $0x44] sm:$0xf0]  ;;  %v506_v21 = vld [vmem:[%s941_s0 + $0x8] sm:$0xf0]  ;;  %v505_v24 = vor.u32 %v631_v17, %v504_v16 }
   0x9   :  { %v638_v22 = vld [vmem:[%s941_s0 + $0x44] sm:$0xf]  ;;  %v538_v23 = vld [vmem:[%s941_s0 + $0x48] sm:$0xf0]  ;;  %v537_v25 = vor.u32 %v639_v19, %v536_v18  ;;  %v509_v26 = vor.u32 %v630_v20, %v506_v21  ;;  %v544_v30 = vld [vmem:[%s941_s0 + $0x50] sm:$0xf] }
   0xa   :  { %279 = vmatpush.bf16.msra.mxu0 %v651_v4  ;;  %664 = vmatpush.bf16.msra.mxu2 %v651_v4  ;;  %v541_v27 = vor.u32 %v638_v22, %v538_v23  ;;  %v641_v31 = vld [vmem:[%s941_s0 + $0x54] sm:$0xf0]  ;;  %v632_v32 = vld [vmem:[%s941_s0 + $0x14] sm:$0xf]  ;;  %v514_v33 = vld [vmem:[%s941_s0 + $0x18] sm:$0xf0] }
   0xb   :  { %328 = vmatpush.bf16.msra.mxu1 %v659_v5  ;;  %672 = vmatpush.bf16.msra.mxu3 %v659_v5  ;;  %v640_v34 = vld [vmem:[%s941_s0 + $0x54] sm:$0xf]  ;;  %v546_v35 = vld [vmem:[%s941_s0 + $0x58] sm:$0xf0]  ;;  %v545_v37 = vor.u32 %v641_v31, %v544_v30  ;;  %v517_v38 = vor.u32 %v632_v32, %v514_v33  ;;  %v520_v40 = vld [vmem:[%s941_s0 + $0x20] sm:$0xf] }
   0xc   :  { %v549_v39 = vor.u32 %v640_v34, %v546_v35  ;;  %v635_v41 = vld [vmem:[%s941_s0 + $0x24] sm:$0xf0]  ;;  %v552_v42 = vld [vmem:[%s941_s0 + $0x60] sm:$0xf]  ;;  %v634_v44 = vld [vmem:[%s941_s0 + $0x24] sm:$0xf] }
   0xd   :  { %v643_v43 = vld [vmem:[%s941_s0 + $0x64] sm:$0xf0]  ;;  %v522_v45 = vld [vmem:[%s941_s0 + $0x28] sm:$0xf0]  ;;  %v642_v46 = vld [vmem:[%s941_s0 + $0x64] sm:$0xf]  ;;  %v521_v48 = vor.u32 %v635_v41, %v520_v40 }
   0xe   :  { %280 = vmatpush.bf16.msra.mxu0 %v650_v6  ;;  %665 = vmatpush.bf16.msra.mxu2 %v650_v6  ;;  %v554_v47 = vld [vmem:[%s941_s0 + $0x68] sm:$0xf0]  ;;  %v553_v49 = vor.u32 %v643_v43, %v552_v42  ;;  %v525_v50 = vor.u32 %v634_v44, %v522_v45  ;;  %v528_v52 = vld [vmem:[%s941_s0 + $0x30] sm:$0xf]  ;;  %v637_v53 = vld [vmem:[%s941_s0 + $0x34] sm:$0xf0] }
   0xf   :  { %329 = vmatpush.bf16.msra.mxu1 %v658_v7  ;;  %673 = vmatpush.bf16.msra.mxu3 %v658_v7  ;;  %v557_v51 = vor.u32 %v642_v46, %v554_v47  ;;  %v560_v54 = vld [vmem:[%s941_s0 + $0x70] sm:$0xf]  ;;  %v645_v55 = vld [vmem:[%s941_s0 + $0x74] sm:$0xf0]  ;;  %v636_v56 = vld [vmem:[%s941_s0 + $0x34] sm:$0xf]  ;;  %v529_v60 = vor.u32 %v637_v53, %v528_v52 }
  0x10   :  { %v530_v57 = vld [vmem:[%s941_s0 + $0x38] sm:$0xf0]  ;;  %v644_v58 = vld [vmem:[%s941_s0 + $0x74] sm:$0xf]  ;;  %v561_v61 = vor.u32 %v645_v55, %v560_v54  ;;  %v853_v3 = vld [vmem:[%s942_s2] ss:$0 sm:$0xff] }
  0x11   :  { %v562_v59 = vld [vmem:[%s941_s0 + $0x78] sm:$0xf0]  ;;  %v533_v62 = vor.u32 %v636_v56, %v530_v57  ;;  %v858_v4 = vld [vmem:[%s943_s3] ss:$0 sm:$0xff] }
  0x12   :  { %281 = vmatpush.bf16.msra.mxu0 %v649_v8  ;;  %666 = vmatpush.bf16.msra.mxu2 %v649_v8  ;;  %v565_v63 = vor.u32 %v644_v58, %v562_v59 }
  0x13   :  { %330 = vmatpush.bf16.msra.mxu1 %v657_v9  ;;  %674 = vmatpush.bf16.msra.mxu3 %v657_v9 }
  0x16   :  { %282 = vmatpush.bf16.msra.mxu0 %v648_v10  ;;  %667 = vmatpush.bf16.msra.mxu2 %v648_v10 }
  0x17   :  { %331 = vmatpush.bf16.msra.mxu1 %v656_v11  ;;  %675 = vmatpush.bf16.msra.mxu3 %v656_v11 }
  0x1a   :  { %283 = vmatpush.bf16.msra.mxu0 %v647_v12  ;;  %668 = vmatpush.bf16.msra.mxu2 %v647_v12 }
  0x1b   :  { %332 = vmatpush.bf16.msra.mxu1 %v655_v13  ;;  %676 = vmatpush.bf16.msra.mxu3 %v655_v13 }
  0x1e   :  { %284 = vmatpush.bf16.msra.mxu0 %v646_v14  ;;  %669 = vmatpush.bf16.msra.mxu2 %v646_v14 }
  0x1f   :  { %333 = vmatpush.bf16.msra.mxu1 %v654_v15  ;;  %677 = vmatpush.bf16.msra.mxu3 %v654_v15 }
  0x21   :  { %285 = vmatmul.bf16.vlgmr.msra.gmra.mxu0 %v505_v24  ;;  %305 = vmatmul.bf16.vlgmr.msra.gmra.mxu2 %v537_v25 }
  0x22   :  { %334 = vmatmul.bf16.vlgmr.msra.gmra.mxu1 %v509_v26  ;;  %354 = vmatmul.bf16.vlgmr.msra.gmra.mxu3 %v541_v27 }
  0x31   :  { %290 = vmatmul.bf16.gmra.mxu0 %v513_v36  ;;  %310 = vmatmul.bf16.gmra.mxu2 %v545_v37 }
  0x32   :  { %339 = vmatmul.bf16.gmra.mxu1 %v517_v38  ;;  %359 = vmatmul.bf16.gmra.mxu3 %v549_v39 }
  0x41   :  { %295 = vmatmul.bf16.gmra.mxu0 %v521_v48  ;;  %315 = vmatmul.bf16.gmra.mxu2 %v553_v49 }
  0x42   :  { %344 = vmatmul.bf16.gmra.mxu1 %v525_v50  ;;  %364 = vmatmul.bf16.gmra.mxu3 %v557_v51 }
  0x51   :  { %300 = vmatmul.bf16.gmra.mxu0 %v529_v60  ;;  %320 = vmatmul.bf16.gmra.mxu2 %v561_v61 }
  0x52   :  { %349 = vmatmul.bf16.gmra.mxu1 %v533_v62  ;;  %369 = vmatmul.bf16.gmra.mxu3 %v565_v63 }
  0x9e   :  { %v286_v0 = vpop.f32.mrf.mxu0 }
  0x9f   :  { %v335_v1 = vpop.f32.mrf.mxu1 }
  0xa0   :  { %v336_v2 = vadd.f32 %v335_v1, %v286_v0 }
  0xa2   :  { %v430_v5 = vmul.f32 %v853_v3, %v336_v2 }
  0xa4   :  { %v306_v6 = vpop.f32.mrf.mxu2  ;;  %v450_v8 = vadd.f32 %v858_v4, %v430_v5 }
  0xa5   :  { %v355_v7 = vpop.f32.mrf.mxu3 }
  0xa6   :  { %v356_v9 = vadd.f32 %v355_v7, %v306_v6  ;;  %v288_v10 = vpop.f32.mrf.mxu0  ;;  %v466_v12 = vmax.f32 %v450_v8, 0.0 }
  0xa7   :  { %v337_v11 = vpop.f32.mrf.mxu1 }
  0xa8   :  { %v338_v13 = vadd.f32 %v337_v11, %v288_v10  ;;  %482 = vst [vmem:[%s944_s4] sm:$0xff] %v466_v12  ;;  %v438_v14 = vmul.f32 %v853_v3, %v356_v9 }
  0xaa   :  { %v458_v15 = vadd.f32 %v858_v4, %v438_v14  ;;  %v431_v16 = vmul.f32 %v853_v3, %v338_v13 }
  0xac   :  { %v308_v17 = vpop.f32.mrf.mxu2  ;;  %v474_v19 = vmax.f32 %v458_v15, 0.0  ;;  %v451_v20 = vadd.f32 %v858_v4, %v431_v16 }
  0xad   :  { %v357_v18 = vpop.f32.mrf.mxu3 }
  0xae   :  { %v358_v21 = vadd.f32 %v357_v18, %v308_v17  ;;  %v291_v22 = vpop.f32.mrf.mxu0  ;;  %490 = vst [vmem:[%s944_s4 + $0x40] sm:$0xff] %v474_v19  ;;  %v467_v24 = vmax.f32 %v451_v20, 0.0 }
  0xaf   :  { %v340_v23 = vpop.f32.mrf.mxu1 }
  0xb0   :  { %v341_v25 = vadd.f32 %v340_v23, %v291_v22  ;;  %483 = vst [vmem:[%s944_s4 + $0x8] sm:$0xff] %v467_v24  ;;  %v439_v26 = vmul.f32 %v853_v3, %v358_v21 }
  0xb2   :  { %v459_v27 = vadd.f32 %v858_v4, %v439_v26  ;;  %v432_v28 = vmul.f32 %v853_v3, %v341_v25 }
  0xb4   :  { %v311_v29 = vpop.f32.mrf.mxu2  ;;  %v475_v31 = vmax.f32 %v459_v27, 0.0  ;;  %v452_v32 = vadd.f32 %v858_v4, %v432_v28 }
  0xb5   :  { %v360_v30 = vpop.f32.mrf.mxu3 }
  0xb6   :  { %v361_v33 = vadd.f32 %v360_v30, %v311_v29  ;;  %v293_v34 = vpop.f32.mrf.mxu0  ;;  %491 = vst [vmem:[%s944_s4 + $0x48] sm:$0xff] %v475_v31  ;;  %v468_v36 = vmax.f32 %v452_v32, 0.0 }
  0xb7   :  { %v342_v35 = vpop.f32.mrf.mxu1 }
  0xb8   :  { %v343_v37 = vadd.f32 %v342_v35, %v293_v34  ;;  %484 = vst [vmem:[%s944_s4 + $0x10] sm:$0xff] %v468_v36  ;;  %v440_v38 = vmul.f32 %v853_v3, %v361_v33 }
  0xba   :  { %v460_v39 = vadd.f32 %v858_v4, %v440_v38  ;;  %v433_v40 = vmul.f32 %v853_v3, %v343_v37 }
  0xbc   :  { %v313_v41 = vpop.f32.mrf.mxu2  ;;  %v476_v43 = vmax.f32 %v460_v39, 0.0  ;;  %v453_v44 = vadd.f32 %v858_v4, %v433_v40 }
  0xbd   :  { %v362_v42 = vpop.f32.mrf.mxu3 }
  0xbe   :  { %v363_v45 = vadd.f32 %v362_v42, %v313_v41  ;;  %v296_v46 = vpop.f32.mrf.mxu0  ;;  %492 = vst [vmem:[%s944_s4 + $0x50] sm:$0xff] %v476_v43  ;;  %v469_v48 = vmax.f32 %v453_v44, 0.0 }
  0xbf   :  { %v345_v47 = vpop.f32.mrf.mxu1 }
  0xc0   :  { %v346_v49 = vadd.f32 %v345_v47, %v296_v46  ;;  %485 = vst [vmem:[%s944_s4 + $0x18] sm:$0xff] %v469_v48  ;;  %v441_v50 = vmul.f32 %v853_v3, %v363_v45 }
  0xc2   :  { %v461_v51 = vadd.f32 %v858_v4, %v441_v50  ;;  %v434_v52 = vmul.f32 %v853_v3, %v346_v49 }
  0xc4   :  { %v316_v53 = vpop.f32.mrf.mxu2  ;;  %v477_v55 = vmax.f32 %v461_v51, 0.0  ;;  %v454_v56 = vadd.f32 %v858_v4, %v434_v52 }
  0xc5   :  { %v365_v54 = vpop.f32.mrf.mxu3 }
  0xc6   :  { %v366_v57 = vadd.f32 %v365_v54, %v316_v53  ;;  %v298_v58 = vpop.f32.mrf.mxu0  ;;  %493 = vst [vmem:[%s944_s4 + $0x58] sm:$0xff] %v477_v55  ;;  %v470_v60 = vmax.f32 %v454_v56, 0.0 }
  0xc7   :  { %v347_v59 = vpop.f32.mrf.mxu1 }
  0xc8   :  { %v348_v61 = vadd.f32 %v347_v59, %v298_v58  ;;  %486 = vst [vmem:[%s944_s4 + $0x20] sm:$0xff] %v470_v60  ;;  %v442_v62 = vmul.f32 %v853_v3, %v366_v57 }
  0xca   :  { %v462_v63 = vadd.f32 %v858_v4, %v442_v62  ;;  %v435_v0 = vmul.f32 %v853_v3, %v348_v61 }
  0xcc   :  { %v318_v1 = vpop.f32.mrf.mxu2  ;;  %v478_v5 = vmax.f32 %v462_v63, 0.0  ;;  %v455_v6 = vadd.f32 %v858_v4, %v435_v0 }
  0xcd   :  { %v367_v2 = vpop.f32.mrf.mxu3 }
  0xce   :  { %v368_v7 = vadd.f32 %v367_v2, %v318_v1  ;;  %v301_v8 = vpop.f32.mrf.mxu0  ;;  %494 = vst [vmem:[%s944_s4 + $0x60] sm:$0xff] %v478_v5  ;;  %v471_v10 = vmax.f32 %v455_v6, 0.0 }
  0xcf   :  { %v350_v9 = vpop.f32.mrf.mxu1 }
  0xd0   :  { %v351_v11 = vadd.f32 %v350_v9, %v301_v8  ;;  %487 = vst [vmem:[%s944_s4 + $0x28] sm:$0xff] %v471_v10  ;;  %v443_v12 = vmul.f32 %v853_v3, %v368_v7 }
  0xd2   :  { %v463_v13 = vadd.f32 %v858_v4, %v443_v12  ;;  %v436_v14 = vmul.f32 %v853_v3, %v351_v11 }
  0xd4   :  { %v321_v15 = vpop.f32.mrf.mxu2  ;;  %v479_v17 = vmax.f32 %v463_v13, 0.0  ;;  %v456_v18 = vadd.f32 %v858_v4, %v436_v14 }
  0xd5   :  { %v370_v16 = vpop.f32.mrf.mxu3 }
  0xd6   :  { %v371_v19 = vadd.f32 %v370_v16, %v321_v15  ;;  %v303_v20 = vpop.f32.mrf.mxu0  ;;  %495 = vst [vmem:[%s944_s4 + $0x68] sm:$0xff] %v479_v17  ;;  %v472_v22 = vmax.f32 %v456_v18, 0.0 }
  0xd7   :  { %v352_v21 = vpop.f32.mrf.mxu1 }
  0xd8   :  { %v353_v23 = vadd.f32 %v352_v21, %v303_v20  ;;  %488 = vst [vmem:[%s944_s4 + $0x30] sm:$0xff] %v472_v22  ;;  %v444_v24 = vmul.f32 %v853_v3, %v371_v19 }
  0xda   :  { %v464_v25 = vadd.f32 %v858_v4, %v444_v24  ;;  %v437_v26 = vmul.f32 %v853_v3, %v353_v23 }
  0xdc   :  { %v323_v27 = vpop.f32.mrf.mxu2  ;;  %v480_v29 = vmax.f32 %v464_v25, 0.0  ;;  %v457_v30 = vadd.f32 %v858_v4, %v437_v26 }
  0xdd   :  { %v372_v28 = vpop.f32.mrf.mxu3 }
  0xde   :  { %v373_v31 = vadd.f32 %v372_v28, %v323_v27  ;;  %496 = vst [vmem:[%s944_s4 + $0x70] sm:$0xff] %v480_v29  ;;  %v473_v32 = vmax.f32 %v457_v30, 0.0 }
  0xe0   :  { %489 = vst [vmem:[%s944_s4 + $0x38] sm:$0xff] %v473_v32  ;;  %v445_v33 = vmul.f32 %v853_v3, %v373_v31 }
  0xe2   :  { %v465_v34 = vadd.f32 %v858_v4, %v445_v33 }
  0xe4   :  { %v481_v35 = vmax.f32 %v465_v34, 0.0 }
  0xe6   :  { %497 = vst [vmem:[%s944_s4 + $0x78] sm:$0xff] %v481_v35 }

// kernel: resnet18_16s_forward.25
= control target key start
LH: loop header
LB: loop body
LE: loop exit
PB: predicated region body
PF: predicated region fallthrough
CT: control target
= control target key end

     0   :  { %vm44_vm0 = vcmask 523264   ;;  %s291_s0 = inlined_call_operand.vmem [shape: f32[9,32,64], index: 0, kind: input, shape index: {}]   ;;  %s292_s1 = inlined_call_operand.vmem [shape: f32[32,64], index: 1, kind: output, shape index: {}]  }
   0x1   :  { %v8_v0 = vld [vmem:[%s291_s0] sm:$0xff]  ;;  %v9_v11 = vld [vmem:[%s291_s0 + $0x8] sm:$0xff]  ;;  %v10_v27 = vld [vmem:[%s291_s0 + $0x10] sm:$0xff] }
   0x2   :  { %v12_v1 = vld [vmem:[%s291_s0 + $0x20] sm:$0xff]  ;;  %v45_v4 = vsel %vm44_vm0, %v8_v0, -inf  ;;  %v13_v12 = vld [vmem:[%s291_s0 + $0x28] sm:$0xff]  ;;  %v62_v16 = vsel %vm44_vm0, %v9_v11, -inf  ;;  %v14_v28 = vld [vmem:[%s291_s0 + $0x30] sm:$0xff]  ;;  %v79_v33 = vsel %vm44_vm0, %v10_v27, -inf }
   0x3   :  { %v16_v2 = vld [vmem:[%s291_s0 + $0x40] sm:$0xff]  ;;  %v46_v5 = vsel %vm44_vm0, %v12_v1, -inf  ;;  %v17_v13 = vld [vmem:[%s291_s0 + $0x48] sm:$0xff]  ;;  %v63_v17 = vsel %vm44_vm0, %v13_v12, -inf  ;;  %v18_v29 = vld [vmem:[%s291_s0 + $0x50] sm:$0xff]  ;;  %v80_v34 = vsel %vm44_vm0, %v14_v28, -inf }
   0x4   :  { %v20_v3 = vld [vmem:[%s291_s0 + $0x60] sm:$0xff]  ;;  %v48_v6 = vsel %vm44_vm0, %v16_v2, -inf  ;;  %v47_v9 = vmax.f32 %v45_v4, %v46_v5  ;;  %v21_v15 = vld [vmem:[%s291_s0 + $0x68] sm:$0xff]  ;;  %v65_v18 = vsel %vm44_vm0, %v17_v13, -inf  ;;  %v64_v23 = vmax.f32 %v62_v16, %v63_v17  ;;  %v22_v32 = vld [vmem:[%s291_s0 + $0x70] sm:$0xff] }
   0x5   :  { %v24_v7 = vld [vmem:[%s291_s0 + $0x80] sm:$0xff]  ;;  %v50_v10 = vsel %vm44_vm0, %v20_v3, -inf  ;;  %v25_v22 = vld [vmem:[%s291_s0 + $0x88] sm:$0xff]  ;;  %v67_v26 = vsel %vm44_vm0, %v21_v15, -inf  ;;  %v82_v35 = vsel %vm44_vm0, %v18_v29, -inf  ;;  %v26_v39 = vld [vmem:[%s291_s0 + $0x90] sm:$0xff]  ;;  %v81_v40 = vmax.f32 %v79_v33, %v80_v34 }
   0x6   :  { %v28_v8 = vld [vmem:[%s291_s0 + $0xa0] sm:$0xff]  ;;  %v49_v14 = vmax.f32 %v47_v9, %v48_v6  ;;  %v52_v21 = vsel %vm44_vm0, %v24_v7, -inf  ;;  %v29_v30 = vld [vmem:[%s291_s0 + $0xa8] sm:$0xff]  ;;  %v66_v31 = vmax.f32 %v64_v23, %v65_v18  ;;  %v69_v38 = vsel %vm44_vm0, %v25_v22, -inf  ;;  %v11_v45 = vld [vmem:[%s291_s0 + $0x18] sm:$0xff] }
   0x7   :  { %v32_v19 = vld [vmem:[%s291_s0 + $0xc0] sm:$0xff]  ;;  %v54_v25 = vsel %vm44_vm0, %v28_v8, -inf  ;;  %v33_v37 = vld [vmem:[%s291_s0 + $0xc8] sm:$0xff]  ;;  %v84_v44 = vsel %vm44_vm0, %v22_v32, -inf  ;;  %v15_v46 = vld [vmem:[%s291_s0 + $0x38] sm:$0xff]  ;;  %v71_v50 = vsel %vm44_vm0, %v29_v30, -inf  ;;  %v83_v52 = vmax.f32 %v81_v40, %v82_v35 }
   0x8   :  { %v36_v20 = vld [vmem:[%s291_s0 + $0xe0] sm:$0xff]  ;;  %v51_v24 = vmax.f32 %v49_v14, %v50_v10  ;;  %v56_v41 = vsel %vm44_vm0, %v32_v19, -inf  ;;  %v68_v43 = vmax.f32 %v66_v31, %v67_v26  ;;  %v19_v47 = vld [vmem:[%s291_s0 + $0x58] sm:$0xff]  ;;  %v30_v51 = vld [vmem:[%s291_s0 + $0xb0] sm:$0xff]  ;;  %v96_v54 = vsel %vm44_vm0, %v11_v45, -inf }
   0x9   :  { %v58_v42 = vsel %vm44_vm0, %v36_v20, -inf  ;;  %v40_v48 = vld [vmem:[%s291_s0 + $0x100] sm:$0xff]  ;;  %v23_v53 = vld [vmem:[%s291_s0 + $0x78] sm:$0xff]  ;;  %v37_v55 = vld [vmem:[%s291_s0 + $0xe8] sm:$0xff]  ;;  %v86_v57 = vsel %vm44_vm0, %v26_v39, -inf  ;;  %v97_v58 = vsel %vm44_vm0, %v15_v46, -inf  ;;  %v85_v63 = vmax.f32 %v83_v52, %v84_v44 }
   0xa   :  { %v53_v36 = vmax.f32 %v51_v24, %v52_v21  ;;  %v70_v56 = vmax.f32 %v68_v43, %v69_v38  ;;  %v99_v59 = vsel %vm44_vm0, %v19_v47, -inf  ;;  %v73_v61 = vsel %vm44_vm0, %v33_v37, -inf  ;;  %v34_v62 = vld [vmem:[%s291_s0 + $0xd0] sm:$0xff]  ;;  %v27_v0 = vld [vmem:[%s291_s0 + $0x98] sm:$0xff]  ;;  %v41_v3 = vld [vmem:[%s291_s0 + $0x108] sm:$0xff] }
   0xb   :  { %v98_v1 = vmax.f32 %v96_v54, %v97_v58  ;;  %v60_v2 = vsel %vm44_vm0, %v40_v48, -inf  ;;  %v88_v5 = vsel %vm44_vm0, %v30_v51, -inf  ;;  %v101_v6 = vsel %vm44_vm0, %v23_v53, -inf  ;;  %v38_v9 = vld [vmem:[%s291_s0 + $0xf0] sm:$0xff]  ;;  %v31_v11 = vld [vmem:[%s291_s0 + $0xb8] sm:$0xff] }
   0xc   :  { %v55_v49 = vmax.f32 %v53_v36, %v54_v25  ;;  %v72_v4 = vmax.f32 %v70_v56, %v71_v50  ;;  %v75_v8 = vsel %vm44_vm0, %v37_v55, -inf  ;;  %v87_v10 = vmax.f32 %v85_v63, %v86_v57  ;;  %v42_v18 = vld [vmem:[%s291_s0 + $0x110] sm:$0xff]  ;;  %v35_v20 = vld [vmem:[%s291_s0 + $0xd8] sm:$0xff] }
   0xd   :  { %v100_v12 = vmax.f32 %v98_v1, %v99_v59  ;;  %v90_v14 = vsel %vm44_vm0, %v34_v62, -inf  ;;  %v103_v15 = vsel %vm44_vm0, %v27_v0, -inf  ;;  %v77_v17 = vsel %vm44_vm0, %v41_v3, -inf  ;;  %v39_v26 = vld [vmem:[%s291_s0 + $0xf8] sm:$0xff] }
   0xe   :  { %v57_v60 = vmax.f32 %v55_v49, %v56_v41  ;;  %v74_v13 = vmax.f32 %v72_v4, %v73_v61  ;;  %v89_v19 = vmax.f32 %v87_v10, %v88_v5  ;;  %v92_v23 = vsel %vm44_vm0, %v38_v9, -inf  ;;  %v43_v32 = vld [vmem:[%s291_s0 + $0x118] sm:$0xff] }
   0xf   :  { %v102_v21 = vmax.f32 %v100_v12, %v101_v6  ;;  %v105_v24 = vsel %vm44_vm0, %v31_v11, -inf  ;;  %v94_v29 = vsel %vm44_vm0, %v42_v18, -inf  ;;  %v107_v30 = vsel %vm44_vm0, %v35_v20, -inf }
  0x10   :  { %v59_v7 = vmax.f32 %v57_v60, %v58_v42  ;;  %v76_v22 = vmax.f32 %v74_v13, %v75_v8  ;;  %v91_v25 = vmax.f32 %v89_v19, %v90_v14  ;;  %v109_v34 = vsel %vm44_vm0, %v39_v26, -inf }
  0x11   :  { %v104_v27 = vmax.f32 %v102_v21, %v103_v15  ;;  %v111_v37 = vsel %vm44_vm0, %v43_v32, -inf }
  0x12   :  { %v61_v16 = vmax.f32 %v59_v7, %v60_v2  ;;  %v78_v28 = vmax.f32 %v76_v22, %v77_v17  ;;  %v93_v31 = vmax.f32 %v91_v25, %v92_v23 }
  0x13   :  { %v106_v33 = vmax.f32 %v104_v27, %v105_v24 }
  0x14   :  { %113 = vst.msk [vmem:[%s292_s1] sm:$0xff] %vm44_vm0, %v61_v16  ;;  %v95_v35 = vmax.f32 %v93_v31, %v94_v29 }
  0x15   :  { %114 = vst.msk [vmem:[%s292_s1 + $0x8] sm:$0xff] %vm44_vm0, %v78_v28  ;;  %v108_v36 = vmax.f32 %v106_v33, %v107_v30 }
  0x16   :  { %115 = vst.msk [vmem:[%s292_s1 + $0x10] sm:$0xff] %vm44_vm0, %v95_v35 }
  0x17   :  { %v110_v38 = vmax.f32 %v108_v36, %v109_v34 }
  0x19   :  { %v112_v39 = vmax.f32 %v110_v38, %v111_v37 }
  0x1b   :  { %116 = vst.msk [vmem:[%s292_s1 + $0x18] sm:$0xff] %vm44_vm0, %v112_v39 }

// kernel: resnet18_16s_forward.26
= control target key start
LH: loop header
LB: loop body
LE: loop exit
PB: predicated region body
PF: predicated region fallthrough
CT: control target
= control target key end

     0   :  { %s805_s15 = smov 0   ;;  %s807_s16 = smov 0   ;;  %s955_s0 = inlined_call_operand.vmem [shape: bf16[32,640], index: 0, kind: input, shape index: {}]   ;;  %s956_s1 = inlined_call_operand.vmem [shape: bf16[640,128], index: 1, kind: input, shape index: {}]   ;;  %s957_s2 = inlined_call_operand.vmem [shape: f32[1,128], index: 2, kind: input, shape index: {}]   ;;  %s958_s3 = inlined_call_operand.vmem [shape: f32[1,128], index: 3, kind: input, shape index: {}]   ;;  %s959_s4 = inlined_call_operand.vmem [shape: f32[32,128], index: 4, kind: output, shape index: {}]  }
   0x1   :  { %s809_s17 = smov 0   ;;  %s811_s18 = smov 0  }
   0x2   :  { %s813_s19 = smov 0  }
   0x3 LB: > { %s26_s20 = sadd.s32 1, %s773_s18  ;;  %p49_p1 = scmp.ne.s32.totalorder %s765_s16, %s761_s15  ;;  %s777_s19 = sphi %s813_s19, %s14_s19   ;;  %s773_s18 = sphi %s811_s18, %s963_s18   ;;  %s769_s17 = sphi %s809_s17, %s962_s17   ;;  %s765_s16 = sphi %s807_s16, %s961_s16   ;;  %s761_s15 = sphi %s805_s15, %s960_s15  }
   0x4   : > { %p27_p0 = scmp.ge.s32.totalorder %s26_s20, 5  ;;  %p50_p2 = scmp.eq.s32.totalorder %s777_s19, 0 }
   0x5   : > { %s42_s22 = sadd.s32 1, %s765_s16  ;;  %p625_p5 = scmp.ge.s32.totalorder %s777_s19, 5 }
   0x6   : > { %s965_s20 = smov (%p27_p0, %s26_s20), 0  ;;  %p51_p3 = por %p50_p2, %p49_p1 }
   0x7   : > { %s38_s21 = ssub.s32 %s773_s18, %s965_s20  ;;  %195 = sbr.rel (%p625_p5) target bundleno = 20 (0x14), region = 24 }
   0x8   : > { %p40_p4 = scmp.eq.s32.totalorder %s38_s21, 0 }
   0xa   : > { %s840_s23 = scalar_select %p40_p4, %s765_s16, %s42_s22  }
   0xc   : > { %198 = sbr.rel (!%p51_p3) target bundleno = 20 (0x14), region = 28  ;;  %s200_s24 = sand.u32 (%p51_p3), 1, %s765_s16  }
   0xd   : > { %s627_s25 = sshll.u32 (%p51_p3), %s773_s18, 2  ;;  %s626_s26 = sshll.u32 (%p51_p3), %s200_s24, 4 }
   0xe   : > { %s207_s29 = scalar_lea.vmem (%p51_p3), %s955_s0, %s627_s25  ;;  %s202_s30 = scalar_lea.vmem (%p51_p3), [#allocation2], %s626_s26 }
   0xf   : > { %v224_v0 = vld [vmem:[%s207_s29] sm:$0xf] (%p51_p3)  ;;  %v226_v1 = vld [vmem:[%s207_s29 + $0x14] sm:$0xf] (%p51_p3)  ;;  %v228_v2 = vld [vmem:[%s207_s29 + $0x28] sm:$0xf] (%p51_p3) }
  0x10   : > { %225 = vst [vmem:[%s202_s30] sm:$0xf] (%p51_p3), %v224_v0  ;;  %v230_v3 = vld [vmem:[%s207_s29 + $0x3c] sm:$0xf] (%p51_p3) }
  0x11   : > { %227 = vst [vmem:[%s202_s30 + $0x4] sm:$0xf] %v226_v1 }
  0x12   : > { %229 = vst [vmem:[%s202_s30 + $0x8] sm:$0xf] %v228_v2 }
  0x13   : > { %231 = vst [vmem:[%s202_s30 + $0xc] sm:$0xf] %v230_v3 }
  0x14 PF: > { %p628_p6 = scmp.ge.s32.totalorder %s777_s19, 1  ;;  %p274_p7 = scmp.lt.s32.totalorder %s777_s19, 6 }
  0x16   : > { %p275_p8 = pnand %p628_p6, %p274_p7 }
  0x17   : > { %s281_s5 = sand.u32 (!%p275_p8), 1, %s761_s15   ;;  %s630_s6 = sshll.u32 (!%p275_p8), %s769_s17, 4 }
  0x18   : > { %278 = sbr.rel (%p275_p8) target bundleno = 223 (0xdf), region = 73  ;;  %s852_s7 = sshll.u32 (!%p275_p8), %s281_s5, 4 }
  0x19   : > { %p325_p9 = scmp.lt.s32.totalorder (!%p275_p8), %s630_s6, 79  ;;  %s283_s12 = scalar_lea.vmem (!%p275_p8), [#allocation2], %s852_s7 }
  0x1a   : > { %p632_p10 = scmp.ne.s32.totalorder (!%p275_p8), %s769_s17, 0 }
  0x1d   : > { %s967_s6 = smov (!%p325_p9, %s630_s6), 79  ;;  %351 = sbr.rel (%p632_p10) target bundleno = 39 (0x27), region = 81 }
  0x1e   : > { %s631_s8 = sshll.u32 %s967_s6, 2 }
  0x1f   : > { %s857_s11 = scalar_lea.vmem %s956_s1, %s631_s8 }
  0x22   : > { %v779_v4 = vmov 0.0  }
  0x23   : > { %352 = vst [vmem:[%s959_s4] sm:$0xff] %v779_v4 }
  0x24   : > { %353 = vst [vmem:[%s959_s4 + $0x8] sm:$0xff] %v779_v4 }
  0x25   : > { %354 = vst [vmem:[%s959_s4 + $0x10] sm:$0xff] %v779_v4 }
  0x26   : > { %355 = vst [vmem:[%s959_s4 + $0x18] sm:$0xff] %v779_v4 }
  0x27 PF: > { %v687_v5 = vld [vmem:[%s857_s11 + $0x38] sm:$0xff]  ;;  %v686_v6 = vld [vmem:[%s857_s11 + $0x30] sm:$0xff]  ;;  %v685_v7 = vld [vmem:[%s857_s11 + $0x28] sm:$0xff]  ;;  %p673_p11 = scmp.ne.s32.totalorder %s769_s17, 4 }
  0x28   : > { %440 = vmatpush.bf16.msra.mxu0 %v687_v5  ;;  %688 = vmatpush.bf16.msra.mxu1 %v687_v5  ;;  %v684_v8 = vld [vmem:[%s857_s11 + $0x20] sm:$0xff]  ;;  %v683_v9 = vld [vmem:[%s857_s11 + $0x18] sm:$0xff]  ;;  %v682_v10 = vld [vmem:[%s857_s11 + $0x10] sm:$0xff] }
  0x29   : > { %v681_v11 = vld [vmem:[%s857_s11 + $0x8] sm:$0xff]  ;;  %v680_v12 = vld [vmem:[%s857_s11] sm:$0xff] }
  0x2a   : > { %v678_v13 = vld [vmem:[%s283_s12] sm:$0xff]  ;;  %v679_v14 = vld [vmem:[%s283_s12 + $0x8] sm:$0xff] }
  0x2b   : > { %v356_v15 = vld [vmem:[%s959_s4] sm:$0xff]  ;;  %v357_v21 = vld [vmem:[%s959_s4 + $0x8] sm:$0xff] }
  0x2c   : > { %441 = vmatpush.bf16.msra.mxu0 %v686_v6  ;;  %689 = vmatpush.bf16.msra.mxu1 %v686_v6  ;;  %v358_v16 = vld [vmem:[%s959_s4 + $0x10] sm:$0xff] }
  0x2d   : > { %v359_v22 = vld [vmem:[%s959_s4 + $0x18] sm:$0xff] }
  0x30   : > { %442 = vmatpush.bf16.msra.mxu0 %v685_v7  ;;  %690 = vmatpush.bf16.msra.mxu1 %v685_v7 }
  0x34   : > { %443 = vmatpush.bf16.msra.mxu0 %v684_v8  ;;  %691 = vmatpush.bf16.msra.mxu1 %v684_v8 }
  0x38   : > { %444 = vmatpush.bf16.msra.mxu0 %v683_v9  ;;  %692 = vmatpush.bf16.msra.mxu1 %v683_v9 }
  0x3c   : > { %445 = vmatpush.bf16.msra.mxu0 %v682_v10  ;;  %693 = vmatpush.bf16.msra.mxu1 %v682_v10 }
  0x40   : > { %446 = vmatpush.bf16.msra.mxu0 %v681_v11  ;;  %694 = vmatpush.bf16.msra.mxu1 %v681_v11 }
  0x44   : > { %447 = vmatpush.bf16.msra.mxu0 %v680_v12  ;;  %695 = vmatpush.bf16.msra.mxu1 %v680_v12 }
  0x47   : > { %448 = vmatmul.bf16.vlgmr.msra.gmra.mxu0 %v678_v13  ;;  %453 = vmatmul.bf16.vlgmr.msra.gmra.mxu1 %v679_v14 }
  0xc4   : > { %v449_v17 = vpop.f32.mrf.mxu0  ;;  %v454_v18 = vpop.f32.mrf.mxu1 }
  0xc5   : > { %v459_v19 = vadd.f32 %v449_v17, %v356_v15  ;;  %v461_v20 = vadd.f32 %v454_v18, %v358_v16 }
  0xc7   : > { %463 = vst [vmem:[%s959_s4] sm:$0xff] %v459_v19 }
  0xc8   : > { %465 = vst [vmem:[%s959_s4 + $0x10] sm:$0xff] %v461_v20 }
  0xcc   : > { %v451_v23 = vpop.f32.mrf.mxu0  ;;  %v456_v24 = vpop.f32.mrf.mxu1  ;;  %470 = sbr.rel (%p673_p11) target bundleno = 223 (0xdf), region = 85 }
  0xcd   : > { %v460_v25 = vadd.f32 %v451_v23, %v357_v21  ;;  %v462_v26 = vadd.f32 %v456_v24, %v359_v22 }
  0xcf   : > { %464 = vst [vmem:[%s959_s4 + $0x8] sm:$0xff] %v460_v25 }
  0xd0   : > { %466 = vst [vmem:[%s959_s4 + $0x18] sm:$0xff] %v462_v26 }
  0xd1   : > { %v471_v27 = vld [vmem:[%s959_s4] sm:$0xff]  ;;  %v473_v33 = vld [vmem:[%s959_s4 + $0x10] sm:$0xff] }
  0xd2   : > { %v737_v28 = vld [vmem:[%s957_s2] ss:$0 sm:$0xff] }
  0xd3   : > { %v738_v29 = vld [vmem:[%s958_s3] ss:$0 sm:$0xff]  ;;  %v479_v31 = vmul.f32 %v737_v28, %v471_v27  ;;  %v481_v35 = vmul.f32 %v737_v28, %v473_v33 }
  0xd5   : > { %v487_v37 = vadd.f32 %v738_v29, %v479_v31  ;;  %v489_v39 = vadd.f32 %v738_v29, %v481_v35 }
  0xd6   : > { %v472_v30 = vld [vmem:[%s959_s4 + $0x8] sm:$0xff] }
  0xd7   : > { %v480_v32 = vmul.f32 %v737_v28, %v472_v30  ;;  %v474_v34 = vld [vmem:[%s959_s4 + $0x18] sm:$0xff]  ;;  %v491_v41 = vmax.f32 %v487_v37, 0.0  ;;  %v493_v43 = vmax.f32 %v489_v39, 0.0 }
  0xd8   : > { %v482_v36 = vmul.f32 %v737_v28, %v474_v34 }
  0xd9   : > { %v488_v38 = vadd.f32 %v738_v29, %v480_v32  ;;  %495 = vst [vmem:[%s959_s4] sm:$0xff] %v491_v41 }
  0xda   : > { %v490_v40 = vadd.f32 %v738_v29, %v482_v36  ;;  %497 = vst [vmem:[%s959_s4 + $0x10] sm:$0xff] %v493_v43 }
  0xdb   : > { %v492_v42 = vmax.f32 %v488_v38, 0.0 }
  0xdc   : > { %v494_v44 = vmax.f32 %v490_v40, 0.0 }
  0xdd   : > { %496 = vst [vmem:[%s959_s4 + $0x8] sm:$0xff] %v492_v42 }
  0xde   : > { %498 = vst [vmem:[%s959_s4 + $0x18] sm:$0xff] %v494_v44 }
  0xdf PF: > { %s14_s19 = sadd.s32 1, %s777_s19   ;;  %s960_s15 = smov %s765_s16 }
  0xe0   : > { %p11_p12 = scmp.ge.s32.totalorder %s14_s19, 7   ;;  %s961_s16 = smov %s840_s23 }
  0xe1   : > { %s962_s17 = smov %s773_s18  ;;  %s963_s18 = smov %s965_s20 }
  0xe2   :  { %13 = sbr.rel (!%p11_p12) target bundleno = 3 (0x3), region = 129 }

// kernel: resnet18_16s_forward.27
= control target key start
LH: loop header
LB: loop body
LE: loop exit
PB: predicated region body
PF: predicated region fallthrough
CT: control target
= control target key end

     0   :  { %s897_s18 = smov 0   ;;  %s899_s19 = smov 0   ;;  %s1059_s0 = inlined_call_operand.vmem [shape: bf16[32,640], index: 0, kind: input, shape index: {}]   ;;  %s1060_s1 = inlined_call_operand.vmem [shape: bf16[640,128], index: 1, kind: input, shape index: {}]   ;;  %s1061_s2 = inlined_call_operand.vmem [shape: f32[1,128], index: 2, kind: input, shape index: {}]   ;;  %s1062_s3 = inlined_call_operand.vmem [shape: f32[1,128], index: 3, kind: input, shape index: {}]   ;;  %s1063_s4 = inlined_call_operand.vmem [shape: f32[32,128], index: 4, kind: input, shape index: {}]   ;;  %s1064_s5 = inlined_call_operand.vmem [shape: f32[32,128], index: 5, kind: output, shape index: {}]  }
   0x1   :  { %s901_s20 = smov 0   ;;  %s903_s21 = smov 0  }
   0x2   :  { %s905_s22 = smov 0  }
   0x3 LB: > { %s27_s23 = sadd.s32 1, %s860_s21  ;;  %p50_p1 = scmp.ne.s32.totalorder %s852_s19, %s848_s18  ;;  %s864_s22 = sphi %s905_s22, %s15_s22   ;;  %s860_s21 = sphi %s903_s21, %s1068_s21   ;;  %s856_s20 = sphi %s901_s20, %s1067_s20   ;;  %s852_s19 = sphi %s899_s19, %s1066_s19   ;;  %s848_s18 = sphi %s897_s18, %s1065_s18  }
   0x4   : > { %p28_p0 = scmp.ge.s32.totalorder %s27_s23, 5  ;;  %p51_p2 = scmp.eq.s32.totalorder %s864_s22, 0 }
   0x5   : > { %s43_s25 = sadd.s32 1, %s852_s19  ;;  %p712_p5 = scmp.ge.s32.totalorder %s864_s22, 5 }
   0x6   : > { %s1070_s23 = smov (%p28_p0, %s27_s23), 0  ;;  %p52_p3 = por %p51_p2, %p50_p1 }
   0x7   : > { %s39_s24 = ssub.s32 %s860_s21, %s1070_s23  ;;  %236 = sbr.rel (%p712_p5) target bundleno = 20 (0x14), region = 28 }
   0x8   : > { %p41_p4 = scmp.eq.s32.totalorder %s39_s24, 0 }
   0xa   : > { %s932_s26 = scalar_select %p41_p4, %s852_s19, %s43_s25  }
   0xc   : > { %239 = sbr.rel (!%p52_p3) target bundleno = 20 (0x14), region = 32  ;;  %s241_s27 = sand.u32 (%p52_p3), 1, %s852_s19  }
   0xd   : > { %s714_s28 = sshll.u32 (%p52_p3), %s860_s21, 2  ;;  %s713_s29 = sshll.u32 (%p52_p3), %s241_s27, 4 }
   0xe   : > { %s248_s7 = scalar_lea.vmem (%p52_p3), %s1059_s0, %s714_s28  ;;  %s243_s8 = scalar_lea.vmem (%p52_p3), [#allocation2], %s713_s29 }
   0xf   : > { %v265_v0 = vld [vmem:[%s248_s7] sm:$0xf] (%p52_p3)  ;;  %v267_v1 = vld [vmem:[%s248_s7 + $0x14] sm:$0xf] (%p52_p3)  ;;  %v269_v2 = vld [vmem:[%s248_s7 + $0x28] sm:$0xf] (%p52_p3) }
  0x10   : > { %266 = vst [vmem:[%s243_s8] sm:$0xf] (%p52_p3), %v265_v0  ;;  %v271_v3 = vld [vmem:[%s248_s7 + $0x3c] sm:$0xf] (%p52_p3) }
  0x11   : > { %268 = vst [vmem:[%s243_s8 + $0x4] sm:$0xf] %v267_v1 }
  0x12   : > { %270 = vst [vmem:[%s243_s8 + $0x8] sm:$0xf] %v269_v2 }
  0x13   : > { %272 = vst [vmem:[%s243_s8 + $0xc] sm:$0xf] %v271_v3 }
  0x14 PF: > { %p715_p6 = scmp.ge.s32.totalorder %s864_s22, 1  ;;  %p315_p7 = scmp.lt.s32.totalorder %s864_s22, 6 }
  0x16   : > { %p316_p8 = pnand %p715_p6, %p315_p7 }
  0x17   : > { %s322_s9 = sand.u32 (!%p316_p8), 1, %s848_s18   ;;  %s717_s10 = sshll.u32 (!%p316_p8), %s856_s20, 4 }
  0x18   : > { %319 = sbr.rel (%p316_p8) target bundleno = 225 (0xe1), region = 77  ;;  %s944_s11 = sshll.u32 (!%p316_p8), %s322_s9, 4 }
  0x19   : > { %p376_p9 = scmp.lt.s32.totalorder (!%p316_p8), %s717_s10, 79  ;;  %s324_s16 = scalar_lea.vmem (!%p316_p8), [#allocation2], %s944_s11 }
  0x1a   : > { %p719_p10 = scmp.ne.s32.totalorder (!%p316_p8), %s856_s20, 0 }
  0x1d   : > { %s1072_s10 = smov (!%p376_p9, %s717_s10), 79  ;;  %411 = sbr.rel (%p719_p10) target bundleno = 39 (0x27), region = 85 }
  0x1e   : > { %s718_s12 = sshll.u32 %s1072_s10, 2 }
  0x1f   : > { %s949_s15 = scalar_lea.vmem %s1060_s1, %s718_s12 }
  0x22   : > { %v866_v4 = vmov 0.0  }
  0x23   : > { %412 = vst [vmem:[%s1064_s5] sm:$0xff] %v866_v4 }
  0x24   : > { %413 = vst [vmem:[%s1064_s5 + $0x8] sm:$0xff] %v866_v4 }
  0x25   : > { %414 = vst [vmem:[%s1064_s5 + $0x10] sm:$0xff] %v866_v4 }
  0x26   : > { %415 = vst [vmem:[%s1064_s5 + $0x18] sm:$0xff] %v866_v4 }
  0x27 PF: > { %v774_v5 = vld [vmem:[%s949_s15 + $0x38] sm:$0xff]  ;;  %v773_v6 = vld [vmem:[%s949_s15 + $0x30] sm:$0xff]  ;;  %v772_v7 = vld [vmem:[%s949_s15 + $0x28] sm:$0xff]  ;;  %p760_p11 = scmp.ne.s32.totalorder %s856_s20, 4 }
  0x28   : > { %500 = vmatpush.bf16.msra.mxu0 %v774_v5  ;;  %775 = vmatpush.bf16.msra.mxu1 %v774_v5  ;;  %v771_v8 = vld [vmem:[%s949_s15 + $0x20] sm:$0xff]  ;;  %v770_v9 = vld [vmem:[%s949_s15 + $0x18] sm:$0xff]  ;;  %v769_v10 = vld [vmem:[%s949_s15 + $0x10] sm:$0xff] }
  0x29   : > { %v768_v11 = vld [vmem:[%s949_s15 + $0x8] sm:$0xff]  ;;  %v767_v12 = vld [vmem:[%s949_s15] sm:$0xff] }
  0x2a   : > { %v765_v13 = vld [vmem:[%s324_s16] sm:$0xff]  ;;  %v766_v14 = vld [vmem:[%s324_s16 + $0x8] sm:$0xff] }
  0x2b   : > { %v416_v15 = vld [vmem:[%s1064_s5] sm:$0xff]  ;;  %v417_v21 = vld [vmem:[%s1064_s5 + $0x8] sm:$0xff] }
  0x2c   : > { %501 = vmatpush.bf16.msra.mxu0 %v773_v6  ;;  %776 = vmatpush.bf16.msra.mxu1 %v773_v6  ;;  %v418_v16 = vld [vmem:[%s1064_s5 + $0x10] sm:$0xff] }
  0x2d   : > { %v419_v22 = vld [vmem:[%s1064_s5 + $0x18] sm:$0xff] }
  0x30   : > { %502 = vmatpush.bf16.msra.mxu0 %v772_v7  ;;  %777 = vmatpush.bf16.msra.mxu1 %v772_v7 }
  0x34   : > { %503 = vmatpush.bf16.msra.mxu0 %v771_v8  ;;  %778 = vmatpush.bf16.msra.mxu1 %v771_v8 }
  0x38   : > { %504 = vmatpush.bf16.msra.mxu0 %v770_v9  ;;  %779 = vmatpush.bf16.msra.mxu1 %v770_v9 }
  0x3c   : > { %505 = vmatpush.bf16.msra.mxu0 %v769_v10  ;;  %780 = vmatpush.bf16.msra.mxu1 %v769_v10 }
  0x40   : > { %506 = vmatpush.bf16.msra.mxu0 %v768_v11  ;;  %781 = vmatpush.bf16.msra.mxu1 %v768_v11 }
  0x44   : > { %507 = vmatpush.bf16.msra.mxu0 %v767_v12  ;;  %782 = vmatpush.bf16.msra.mxu1 %v767_v12 }
  0x47   : > { %508 = vmatmul.bf16.vlgmr.msra.gmra.mxu0 %v765_v13  ;;  %513 = vmatmul.bf16.vlgmr.msra.gmra.mxu1 %v766_v14 }
  0xc4   : > { %v509_v17 = vpop.f32.mrf.mxu0  ;;  %v514_v18 = vpop.f32.mrf.mxu1 }
  0xc5   : > { %v519_v19 = vadd.f32 %v509_v17, %v416_v15  ;;  %v521_v20 = vadd.f32 %v514_v18, %v418_v16 }
  0xc7   : > { %523 = vst [vmem:[%s1064_s5] sm:$0xff] %v519_v19 }
  0xc8   : > { %525 = vst [vmem:[%s1064_s5 + $0x10] sm:$0xff] %v521_v20 }
  0xcc   : > { %v511_v23 = vpop.f32.mrf.mxu0  ;;  %v516_v24 = vpop.f32.mrf.mxu1  ;;  %530 = sbr.rel (%p760_p11) target bundleno = 225 (0xe1), region = 89 }
  0xcd   : > { %v520_v25 = vadd.f32 %v511_v23, %v417_v21  ;;  %v522_v26 = vadd.f32 %v516_v24, %v419_v22 }
  0xcf   : > { %524 = vst [vmem:[%s1064_s5 + $0x8] sm:$0xff] %v520_v25 }
  0xd0   : > { %526 = vst [vmem:[%s1064_s5 + $0x18] sm:$0xff] %v522_v26 }
  0xd1   : > { %v531_v27 = vld [vmem:[%s1064_s5] sm:$0xff]  ;;  %v533_v32 = vld [vmem:[%s1064_s5 + $0x10] sm:$0xff]  ;;  %v552_v38 = vld [vmem:[%s1063_s4 + $0x8] sm:$0xff] }
  0xd2   : > { %v824_v28 = vld [vmem:[%s1061_s2] ss:$0 sm:$0xff]  ;;  %v553_v39 = vld [vmem:[%s1063_s4 + $0x10] sm:$0xff]  ;;  %v554_v43 = vld [vmem:[%s1063_s4 + $0x18] sm:$0xff] }
  0xd3   : > { %v825_v29 = vld [vmem:[%s1062_s3] ss:$0 sm:$0xff]  ;;  %v539_v30 = vmul.f32 %v824_v28, %v531_v27  ;;  %v541_v35 = vmul.f32 %v824_v28, %v533_v32 }
  0xd4   : > { %v551_v33 = vld [vmem:[%s1063_s4] sm:$0xff] }
  0xd5   : > { %v547_v37 = vadd.f32 %v825_v29, %v539_v30  ;;  %v549_v42 = vadd.f32 %v825_v29, %v541_v35 }
  0xd6   : > { %v532_v31 = vld [vmem:[%s1064_s5 + $0x8] sm:$0xff] }
  0xd7   : > { %v540_v34 = vmul.f32 %v824_v28, %v532_v31  ;;  %v534_v36 = vld [vmem:[%s1064_s5 + $0x18] sm:$0xff]  ;;  %v555_v44 = vadd.f32 %v551_v33, %v547_v37  ;;  %v557_v47 = vadd.f32 %v553_v39, %v549_v42 }
  0xd8   : > { %v542_v40 = vmul.f32 %v824_v28, %v534_v36 }
  0xd9   : > { %v548_v41 = vadd.f32 %v825_v29, %v540_v34  ;;  %v559_v48 = vmax.f32 %v555_v44, 0.0  ;;  %v561_v51 = vmax.f32 %v557_v47, 0.0 }
  0xda   : > { %v550_v45 = vadd.f32 %v825_v29, %v542_v40 }
  0xdb   : > { %v556_v46 = vadd.f32 %v552_v38, %v548_v41  ;;  %563 = vst [vmem:[%s1064_s5] sm:$0xff] %v559_v48 }
  0xdc   : > { %v558_v49 = vadd.f32 %v554_v43, %v550_v45  ;;  %565 = vst [vmem:[%s1064_s5 + $0x10] sm:$0xff] %v561_v51 }
  0xdd   : > { %v560_v50 = vmax.f32 %v556_v46, 0.0 }
  0xde   : > { %v562_v52 = vmax.f32 %v558_v49, 0.0 }
  0xdf   : > { %564 = vst [vmem:[%s1064_s5 + $0x8] sm:$0xff] %v560_v50 }
  0xe0   : > { %566 = vst [vmem:[%s1064_s5 + $0x18] sm:$0xff] %v562_v52 }
  0xe1 PF: > { %s15_s22 = sadd.s32 1, %s864_s22   ;;  %s1065_s18 = smov %s852_s19 }
  0xe2   : > { %p12_p12 = scmp.ge.s32.totalorder %s15_s22, 7   ;;  %s1066_s19 = smov %s932_s26 }
  0xe3   : > { %s1067_s20 = smov %s860_s21  ;;  %s1068_s21 = smov %s1070_s23 }
  0xe4   :  { %14 = sbr.rel (!%p12_p12) target bundleno = 3 (0x3), region = 136 }

// kernel: resnet18_16s_forward.30
= control target key start
LH: loop header
LB: loop body
LE: loop exit
PB: predicated region body
PF: predicated region fallthrough
CT: control target
= control target key end

     0   :  { %s753_s15 = smov 0   ;;  %s755_s16 = smov 0   ;;  %s856_s0 = inlined_call_operand.vmem [shape: bf16[16,640], index: 0, kind: input, shape index: {}]   ;;  %s857_s1 = inlined_call_operand.vmem [shape: bf16[640,128], index: 1, kind: input, shape index: {}]   ;;  %s858_s2 = inlined_call_operand.vmem [shape: f32[1,128], index: 2, kind: input, shape index: {}]   ;;  %s859_s3 = inlined_call_operand.vmem [shape: f32[1,128], index: 3, kind: input, shape index: {}]   ;;  %s860_s4 = inlined_call_operand.vmem [shape: f32[16,128], index: 4, kind: output, shape index: {}]  }
   0x1   :  { %s757_s17 = smov 0   ;;  %s759_s18 = smov 0  }
   0x2   :  { %s761_s19 = smov 0  }
   0x3 LB: > { %s26_s20 = sadd.s32 1, %s721_s18  ;;  %p49_p1 = scmp.ne.s32.totalorder %s713_s16, %s709_s15  ;;  %s725_s19 = sphi %s761_s19, %s14_s19   ;;  %s721_s18 = sphi %s759_s18, %s864_s18   ;;  %s717_s17 = sphi %s757_s17, %s863_s17   ;;  %s713_s16 = sphi %s755_s16, %s862_s16   ;;  %s709_s15 = sphi %s753_s15, %s861_s15  }
   0x4   : > { %p27_p0 = scmp.ge.s32.totalorder %s26_s20, 5  ;;  %p50_p2 = scmp.eq.s32.totalorder %s725_s19, 0 }
   0x5   : > { %s42_s22 = sadd.s32 1, %s713_s16  ;;  %p586_p5 = scmp.ge.s32.totalorder %s725_s19, 5 }
   0x6   : > { %s866_s20 = smov (%p27_p0, %s26_s20), 0  ;;  %p51_p3 = por %p50_p2, %p49_p1 }
   0x7   : > { %s38_s21 = ssub.s32 %s721_s18, %s866_s20  ;;  %195 = sbr.rel (%p586_p5) target bundleno = 18 (0x12), region = 24 }
   0x8   : > { %p40_p4 = scmp.eq.s32.totalorder %s38_s21, 0 }
   0xa   : > { %s788_s23 = scalar_select %p40_p4, %s713_s16, %s42_s22  }
   0xc   : > { %198 = sbr.rel (!%p51_p3) target bundleno = 18 (0x12), region = 28  ;;  %s200_s24 = sand.u32 (%p51_p3), 1, %s713_s16  }
   0xd   : > { %s588_s25 = sshll.u32 (%p51_p3), %s721_s18, 2  ;;  %s587_s26 = sshll.u32 (%p51_p3), %s200_s24, 3 }
   0xe   : > { %s207_s29 = scalar_lea.vmem (%p51_p3), %s856_s0, %s588_s25  ;;  %s202_s30 = scalar_lea.vmem (%p51_p3), [#allocation2], %s587_s26 }
   0xf   : > { %v224_v0 = vld [vmem:[%s207_s29] sm:$0xf] (%p51_p3)  ;;  %v226_v1 = vld [vmem:[%s207_s29 + $0x14] sm:$0xf] (%p51_p3) }
  0x10   : > { %225 = vst [vmem:[%s202_s30] sm:$0xf] (%p51_p3), %v224_v0 }
  0x11   : > { %227 = vst [vmem:[%s202_s30 + $0x4] sm:$0xf] %v226_v1 }
  0x12 PF: > { %p589_p6 = scmp.ge.s32.totalorder %s725_s19, 1  ;;  %p266_p7 = scmp.lt.s32.totalorder %s725_s19, 6 }
  0x14   : > { %p267_p8 = pnand %p589_p6, %p266_p7 }
  0x15   : > { %s273_s5 = sand.u32 (!%p267_p8), 1, %s709_s15   ;;  %s591_s6 = sshll.u32 (!%p267_p8), %s717_s17, 4 }
  0x16   : > { %270 = sbr.rel (%p267_p8) target bundleno = 218 (0xda), region = 73  ;;  %s590_s7 = sshll.u32 (!%p267_p8), %s273_s5, 3 }
  0x17   : > { %p317_p9 = scmp.lt.s32.totalorder (!%p267_p8), %s591_s6, 79  ;;  %s275_s12 = scalar_lea.vmem (!%p267_p8), [#allocation2], %s590_s7 }
  0x18   : > { %p593_p10 = scmp.ne.s32.totalorder (!%p267_p8), %s717_s17, 0 }
  0x1b   : > { %s868_s6 = smov (!%p317_p9, %s591_s6), 79  ;;  %343 = sbr.rel (%p593_p10) target bundleno = 35 (0x23), region = 81 }
  0x1c   : > { %s592_s8 = sshll.u32 %s868_s6, 2 }
  0x1d   : > { %s323_s11 = scalar_lea.vmem %s857_s1, %s592_s8 }
  0x20   : > { %v727_v2 = vmov 0.0  }
  0x21   : > { %344 = vst [vmem:[%s860_s4] sm:$0xff] %v727_v2 }
  0x22   : > { %345 = vst [vmem:[%s860_s4 + $0x8] sm:$0xff] %v727_v2 }
  0x23 PF: > { %v643_v3 = vld [vmem:[%s323_s11 + $0x38] sm:$0xff]  ;;  %v642_v4 = vld [vmem:[%s323_s11 + $0x30] sm:$0xff]  ;;  %v641_v5 = vld [vmem:[%s323_s11 + $0x28] sm:$0xff]  ;;  %p630_p11 = scmp.ne.s32.totalorder %s717_s17, 4 }
  0x24   : > { %420 = vmatpush.bf16.msra.mxu0 %v643_v3  ;;  %v640_v6 = vld [vmem:[%s323_s11 + $0x20] sm:$0xff]  ;;  %v639_v7 = vld [vmem:[%s323_s11 + $0x18] sm:$0xff]  ;;  %v638_v8 = vld [vmem:[%s323_s11 + $0x10] sm:$0xff] }
  0x25   : > { %v637_v9 = vld [vmem:[%s323_s11 + $0x8] sm:$0xff]  ;;  %v636_v10 = vld [vmem:[%s323_s11] sm:$0xff] }
  0x26   : > { %v635_v11 = vld [vmem:[%s275_s12] sm:$0xff] }
  0x28   : > { %421 = vmatpush.bf16.msra.mxu0 %v642_v4  ;;  %v346_v12 = vld [vmem:[%s860_s4] sm:$0xff] }
  0x29   : > { %v347_v15 = vld [vmem:[%s860_s4 + $0x8] sm:$0xff] }
  0x2c   : > { %422 = vmatpush.bf16.msra.mxu0 %v641_v5 }
  0x30   : > { %423 = vmatpush.bf16.msra.mxu0 %v640_v6 }
  0x34   : > { %424 = vmatpush.bf16.msra.mxu0 %v639_v7 }
  0x38   : > { %425 = vmatpush.bf16.msra.mxu0 %v638_v8 }
  0x3c   : > { %426 = vmatpush.bf16.msra.mxu0 %v637_v9 }
  0x40   : > { %427 = vmatpush.bf16.msra.mxu0 %v636_v10 }
  0x43   : > { %428 = vmatmul.bf16.vlgmr.msra.gmra.mxu0 %v635_v11 }
  0xc0   : > { %v429_v13 = vpop.f32.mrf.mxu0 }
  0xc1   : > { %v434_v14 = vadd.f32 %v429_v13, %v346_v12 }
  0xc3   : > { %436 = vst [vmem:[%s860_s4] sm:$0xff] %v434_v14 }
  0xc7   : > { %441 = sbr.rel (%p630_p11) target bundleno = 218 (0xda), region = 85 }
  0xc8   : > { %v431_v16 = vpop.f32.mrf.mxu0 }
  0xc9   : > { %v435_v17 = vadd.f32 %v431_v16, %v347_v15 }
  0xcb   : > { %437 = vst [vmem:[%s860_s4 + $0x8] sm:$0xff] %v435_v17 }
  0xcc   : > { %v442_v18 = vld [vmem:[%s860_s4] sm:$0xff] }
  0xcd   : > { %v685_v19 = vld [vmem:[%s858_s2] ss:$0 sm:$0xff] }
  0xce   : > { %v686_v20 = vld [vmem:[%s859_s3] ss:$0 sm:$0xff]  ;;  %v448_v22 = vmul.f32 %v685_v19, %v442_v18 }
  0xd0   : > { %v454_v24 = vadd.f32 %v686_v20, %v448_v22 }
  0xd2   : > { %v443_v21 = vld [vmem:[%s860_s4 + $0x8] sm:$0xff]  ;;  %v456_v26 = vmax.f32 %v454_v24, 0.0 }
  0xd3   : > { %v449_v23 = vmul.f32 %v685_v19, %v443_v21 }
  0xd4   : > { %458 = vst [vmem:[%s860_s4] sm:$0xff] %v456_v26 }
  0xd5   : > { %v455_v25 = vadd.f32 %v686_v20, %v449_v23 }
  0xd7   : > { %v457_v27 = vmax.f32 %v455_v25, 0.0 }
  0xd9   : > { %459 = vst [vmem:[%s860_s4 + $0x8] sm:$0xff] %v457_v27 }
  0xda PF: > { %s14_s19 = sadd.s32 1, %s725_s19   ;;  %s861_s15 = smov %s713_s16 }
  0xdb   : > { %p11_p12 = scmp.ge.s32.totalorder %s14_s19, 7   ;;  %s862_s16 = smov %s788_s23 }
  0xdc   : > { %s863_s17 = smov %s721_s18  ;;  %s864_s18 = smov %s866_s20 }
  0xdd   :  { %13 = sbr.rel (!%p11_p12) target bundleno = 3 (0x3), region = 129 }

// kernel: resnet18_16s_forward.31
= control target key start
LH: loop header
LB: loop body
LE: loop exit
PB: predicated region body
PF: predicated region fallthrough
CT: control target
= control target key end

     0   :  { %s250_s1 = inlined_call_operand.vmem [shape: bf16[128,128], index: 1, kind: input, shape index: {}]   ;;  %s251_s2 = inlined_call_operand.vmem [shape: f32[1,128], index: 2, kind: input, shape index: {}]   ;;  %s252_s3 = inlined_call_operand.vmem [shape: f32[1,128], index: 3, kind: input, shape index: {}]   ;;  %s253_s0 = inlined_call_operand.vmem [shape: bf16[16,128], index: 0, kind: input, shape index: {}]   ;;  %s254_s4 = inlined_call_operand.vmem [shape: f32[16,128], index: 4, kind: output, shape index: {}]  }
   0x1   :  { %v182_v0 = vld [vmem:[%s250_s1 + $0x38] sm:$0xff]  ;;  %v181_v1 = vld [vmem:[%s250_s1 + $0x30] sm:$0xff]  ;;  %v180_v2 = vld [vmem:[%s250_s1 + $0x28] sm:$0xff] }
   0x2   :  { %97 = vmatpush.bf16.msra.mxu0 %v182_v0  ;;  %v179_v3 = vld [vmem:[%s250_s1 + $0x20] sm:$0xff]  ;;  %v178_v4 = vld [vmem:[%s250_s1 + $0x18] sm:$0xff]  ;;  %v177_v5 = vld [vmem:[%s250_s1 + $0x10] sm:$0xff] }
   0x3   :  { %v176_v6 = vld [vmem:[%s250_s1 + $0x8] sm:$0xff]  ;;  %v175_v7 = vld [vmem:[%s250_s1] sm:$0xff] }
   0x4   :  { %v174_v8 = vld [vmem:[%s253_s0] sm:$0xff] }
   0x5   :  { %v184_v9 = vld [vmem:[%s251_s2] ss:$0 sm:$0xff] }
   0x6   :  { %98 = vmatpush.bf16.msra.mxu0 %v181_v1  ;;  %v185_v11 = vld [vmem:[%s252_s3] ss:$0 sm:$0xff] }
   0xa   :  { %99 = vmatpush.bf16.msra.mxu0 %v180_v2 }
   0xe   :  { %100 = vmatpush.bf16.msra.mxu0 %v179_v3 }
  0x12   :  { %101 = vmatpush.bf16.msra.mxu0 %v178_v4 }
  0x16   :  { %102 = vmatpush.bf16.msra.mxu0 %v177_v5 }
  0x1a   :  { %103 = vmatpush.bf16.msra.mxu0 %v176_v6 }
  0x1e   :  { %104 = vmatpush.bf16.msra.mxu0 %v175_v7 }
  0x21   :  { %105 = vmatmul.bf16.vlgmr.msra.gmra.mxu0 %v174_v8 }
  0x9e   :  { %v106_v10 = vpop.f32.mrf.mxu0 }
  0x9f   :  { %v124_v12 = vmul.f32 %v184_v9, %v106_v10 }
  0xa1   :  { %v130_v13 = vadd.f32 %v185_v11, %v124_v12 }
  0xa3   :  { %132 = vst [vmem:[%s254_s4] sm:$0xff] %v130_v13 }
  0xa6   :  { %v108_v14 = vpop.f32.mrf.mxu0 }
  0xa7   :  { %v125_v15 = vmul.f32 %v184_v9, %v108_v14 }
  0xa9   :  { %v131_v16 = vadd.f32 %v185_v11, %v125_v15 }
  0xab   :  { %133 = vst [vmem:[%s254_s4 + $0x8] sm:$0xff] %v131_v16 }

// kernel: resnet18_16s_forward.32
= control target key start
LH: loop header
LB: loop body
LE: loop exit
PB: predicated region body
PF: predicated region fallthrough
CT: control target
= control target key end

     0   :  { %s1098_s18 = smov 0   ;;  %s1100_s19 = smov 0   ;;  %s1241_s0 = inlined_call_operand.vmem [shape: bf16[16,1152], index: 0, kind: input, shape index: {}]   ;;  %s1242_s1 = inlined_call_operand.vmem [shape: bf16[1152,128], index: 1, kind: input, shape index: {}]   ;;  %s1243_s2 = inlined_call_operand.vmem [shape: f32[1,128], index: 2, kind: input, shape index: {}]   ;;  %s1244_s3 = inlined_call_operand.vmem [shape: f32[1,128], index: 3, kind: input, shape index: {}]   ;;  %s1245_s4 = inlined_call_operand.vmem [shape: f32[16,128], index: 4, kind: input, shape index: {}]   ;;  %s1246_s5 = inlined_call_operand.vmem [shape: f32[16,128], index: 5, kind: output, shape index: {}]  }
   0x1   :  { %s1102_s20 = smov 0   ;;  %s1104_s21 = smov 0  }
   0x2   :  { %s1106_s22 = smov 0  }
   0x3 LB: > { %s27_s23 = sadd.s32 1, %s1061_s21  ;;  %p50_p1 = scmp.ne.s32.totalorder %s1053_s19, %s1049_s18  ;;  %s1065_s22 = sphi %s1106_s22, %s15_s22   ;;  %s1061_s21 = sphi %s1104_s21, %s1250_s21   ;;  %s1057_s20 = sphi %s1102_s20, %s1249_s20   ;;  %s1053_s19 = sphi %s1100_s19, %s1248_s19   ;;  %s1049_s18 = sphi %s1098_s18, %s1247_s18  }
   0x4   : > { %p28_p0 = scmp.ge.s32.totalorder %s27_s23, 3  ;;  %p51_p2 = scmp.eq.s32.totalorder %s1065_s22, 0 }
   0x5   : > { %s43_s25 = sadd.s32 1, %s1053_s19  ;;  %p832_p5 = scmp.ge.s32.totalorder %s1065_s22, 3 }
   0x6   : > { %s1252_s23 = smov (%p28_p0, %s27_s23), 0  ;;  %p52_p3 = por %p51_p2, %p50_p1 }
   0x7   : > { %s39_s24 = ssub.s32 %s1061_s21, %s1252_s23  ;;  %236 = sbr.rel (%p832_p5) target bundleno = 21 (0x15), region = 28 }
   0x8   : > { %p41_p4 = scmp.eq.s32.totalorder %s39_s24, 0 }
   0xa   : > { %s1133_s26 = scalar_select %p41_p4, %s1053_s19, %s43_s25  }
   0xc   : > { %239 = sbr.rel (!%p52_p3) target bundleno = 21 (0x15), region = 32  ;;  %s241_s27 = sand.u32 (%p52_p3), 1, %s1053_s19  }
   0xd   : > { %s954_s28 = smul.u32 (%p52_p3), 12, %s1061_s21 }
   0xe   : > { %s982_s29 = smul.u32 (%p52_p3), 24, %s241_s27 }
   0xf   : > { %s249_s7 = scalar_lea.vmem (%p52_p3), %s1241_s0, %s954_s28 }
  0x10   : > { %v264_v0 = vld [vmem:[%s249_s7] sm:$0xff] (%p52_p3)  ;;  %v834_v2 = vld [vmem:[%s249_s7 + $0x8] sm:$0xf] (%p52_p3)  ;;  %s243_s8 = scalar_lea.vmem (%p52_p3), [#allocation2], %s982_s29  ;;  %v836_v3 = vld [vmem:[%s249_s7 + $0x2c] sm:$0xf] (%p52_p3) }
  0x11   : > { %v266_v1 = vld [vmem:[%s249_s7 + $0x24] sm:$0xff]  ;;  %265 = vst [vmem:[%s243_s8] sm:$0xff] %v264_v0 }
  0x12   : > { %267 = vst [vmem:[%s243_s8 + $0xc] sm:$0xff] %v266_v1 }
  0x13   : > { %835 = vst [vmem:[%s243_s8 + $0x8] sm:$0xf] %v834_v2 }
  0x14   : > { %837 = vst [vmem:[%s243_s8 + $0x14] sm:$0xf] %v836_v3 }
  0x15 PF: > { %p838_p6 = scmp.ge.s32.totalorder %s1065_s22, 1  ;;  %p296_p7 = scmp.lt.s32.totalorder %s1065_s22, 4 }
  0x17   : > { %p297_p8 = pnand %p838_p6, %p296_p7 }
  0x18   : > { %s303_s9 = sand.u32 (!%p297_p8), 1, %s1049_s18   ;;  %s357_s10 = smul.u32 (!%p297_p8), 48, %s1057_s20 }
  0x19   : > { %300 = sbr.rel (%p297_p8) target bundleno = 233 (0xe9), region = 62  ;;  %p840_p10 = scmp.ne.s32.totalorder (!%p297_p8), %s1057_s20, 0 }
  0x1a   : > { %s983_s11 = smul.u32 (!%p297_p8), 24, %s303_s9  ;;  %p358_p9 = scmp.lt.s32.totalorder (!%p297_p8), %s357_s10, 143 }
  0x1c   : > { %s1150_s16 = scalar_lea.vmem (!%p297_p8), [#allocation2], %s983_s11 }
  0x1e   : > { %s1254_s10 = smov (!%p358_p9, %s357_s10), 143  ;;  %393 = sbr.rel (%p840_p10) target bundleno = 38 (0x26), region = 70 }
  0x1f   : > { %s839_s12 = sshll.u32 %s1254_s10, 2 }
  0x20   : > { %s1148_s15 = scalar_lea.vmem %s1242_s1, %s839_s12 }
  0x23   : > { %v1067_v4 = vmov 0.0  }
  0x24   : > { %394 = vst [vmem:[%s1246_s5] sm:$0xff] %v1067_v4 }
  0x25   : > { %395 = vst [vmem:[%s1246_s5 + $0x8] sm:$0xff] %v1067_v4 }
  0x26 PF: > { %v965_v5 = vld [vmem:[%s1148_s15 + $0x38] sm:$0xff]  ;;  %v964_v8 = vld [vmem:[%s1148_s15 + $0x30] sm:$0xff]  ;;  %v963_v11 = vld [vmem:[%s1148_s15 + $0x28] sm:$0xff]  ;;  %p949_p11 = scmp.ne.s32.totalorder %s1057_s20, 2 }
  0x27   : > { %v973_v6 = vld [vmem:[%s1148_s15 + $0x78] sm:$0xff]  ;;  %610 = vmatpush.bf16.msra.mxu0 %v965_v5  ;;  %v972_v9 = vld [vmem:[%s1148_s15 + $0x70] sm:$0xff]  ;;  %v971_v12 = vld [vmem:[%s1148_s15 + $0x68] sm:$0xff] }
  0x28   : > { %v981_v7 = vld [vmem:[%s1148_s15 + $0xb8] sm:$0xff]  ;;  %624 = vmatpush.bf16.msra.mxu1 %v973_v6  ;;  %v980_v10 = vld [vmem:[%s1148_s15 + $0xb0] sm:$0xff]  ;;  %v979_v13 = vld [vmem:[%s1148_s15 + $0xa8] sm:$0xff] }
  0x29   : > { %638 = vmatpush.bf16.msra.mxu2 %v981_v7  ;;  %v962_v14 = vld [vmem:[%s1148_s15 + $0x20] sm:$0xff]  ;;  %v961_v17 = vld [vmem:[%s1148_s15 + $0x18] sm:$0xff]  ;;  %v960_v20 = vld [vmem:[%s1148_s15 + $0x10] sm:$0xff] }
  0x2a   : > { %v970_v15 = vld [vmem:[%s1148_s15 + $0x60] sm:$0xff]  ;;  %v969_v18 = vld [vmem:[%s1148_s15 + $0x58] sm:$0xff]  ;;  %v968_v21 = vld [vmem:[%s1148_s15 + $0x50] sm:$0xff] }
  0x2b   : > { %611 = vmatpush.bf16.msra.mxu0 %v964_v8  ;;  %v978_v16 = vld [vmem:[%s1148_s15 + $0xa0] sm:$0xff]  ;;  %v977_v19 = vld [vmem:[%s1148_s15 + $0x98] sm:$0xff]  ;;  %v976_v22 = vld [vmem:[%s1148_s15 + $0x90] sm:$0xff] }
  0x2c   : > { %625 = vmatpush.bf16.msra.mxu1 %v972_v9  ;;  %v959_v23 = vld [vmem:[%s1148_s15 + $0x8] sm:$0xff]  ;;  %v958_v26 = vld [vmem:[%s1148_s15] sm:$0xff] }
  0x2d   : > { %639 = vmatpush.bf16.msra.mxu2 %v980_v10  ;;  %v967_v24 = vld [vmem:[%s1148_s15 + $0x48] sm:$0xff]  ;;  %v966_v27 = vld [vmem:[%s1148_s15 + $0x40] sm:$0xff] }
  0x2e   : > { %v975_v25 = vld [vmem:[%s1148_s15 + $0x88] sm:$0xff]  ;;  %v843_v28 = vld [vmem:[%s1150_s16] sm:$0xf]  ;;  %v955_v30 = vld [vmem:[%s1150_s16 + $0x4] sm:$0xf] }
  0x2f   : > { %612 = vmatpush.bf16.msra.mxu0 %v963_v11  ;;  %v956_v29 = vld [vmem:[%s1150_s16 + $0x8] sm:$0xf0]  ;;  %v845_v31 = vld [vmem:[%s1150_s16 + $0xc] sm:$0xf0]  ;;  %v851_v33 = vld [vmem:[%s1150_s16 + $0x8] sm:$0xf] }
  0x30   : > { %626 = vmatpush.bf16.msra.mxu1 %v971_v12  ;;  %v974_v32 = vld [vmem:[%s1148_s15 + $0x80] sm:$0xff]  ;;  %v957_v34 = vld [vmem:[%s1150_s16 + $0x10] sm:$0xf0]  ;;  %v844_v35 = vor.u32 %v956_v29, %v843_v28  ;;  %v848_v36 = vor.u32 %v955_v30, %v845_v31 }
  0x31   : > { %640 = vmatpush.bf16.msra.mxu2 %v979_v13  ;;  %v852_v37 = vor.u32 %v957_v34, %v851_v33  ;;  %v396_v41 = vld [vmem:[%s1246_s5] sm:$0xff]  ;;  %v397_v48 = vld [vmem:[%s1246_s5 + $0x8] sm:$0xff] }
  0x33   : > { %613 = vmatpush.bf16.msra.mxu0 %v962_v14 }
  0x34   : > { %627 = vmatpush.bf16.msra.mxu1 %v970_v15 }
  0x35   : > { %641 = vmatpush.bf16.msra.mxu2 %v978_v16 }
  0x37   : > { %614 = vmatpush.bf16.msra.mxu0 %v961_v17 }
  0x38   : > { %628 = vmatpush.bf16.msra.mxu1 %v969_v18 }
  0x39   : > { %642 = vmatpush.bf16.msra.mxu2 %v977_v19 }
  0x3b   : > { %615 = vmatpush.bf16.msra.mxu0 %v960_v20 }
  0x3c   : > { %629 = vmatpush.bf16.msra.mxu1 %v968_v21 }
  0x3d   : > { %643 = vmatpush.bf16.msra.mxu2 %v976_v22 }
  0x3f   : > { %616 = vmatpush.bf16.msra.mxu0 %v959_v23 }
  0x40   : > { %630 = vmatpush.bf16.msra.mxu1 %v967_v24 }
  0x41   : > { %644 = vmatpush.bf16.msra.mxu2 %v975_v25 }
  0x43   : > { %617 = vmatpush.bf16.msra.mxu0 %v958_v26 }
  0x44   : > { %631 = vmatpush.bf16.msra.mxu1 %v966_v27 }
  0x45   : > { %645 = vmatpush.bf16.msra.mxu2 %v974_v32 }
  0x46   : > { %618 = vmatmul.bf16.vlgmr.msra.gmra.mxu0 %v844_v35 }
  0x47   : > { %632 = vmatmul.bf16.vlgmr.msra.gmra.mxu1 %v848_v36 }
  0x48   : > { %646 = vmatmul.bf16.vlgmr.msra.gmra.mxu2 %v852_v37 }
  0xc3   : > { %v619_v38 = vpop.f32.mrf.mxu0 }
  0xc4   : > { %v633_v39 = vpop.f32.mrf.mxu1 }
  0xc5   : > { %v634_v40 = vadd.f32 %v633_v39, %v619_v38 }
  0xcb   : > { %v647_v42 = vpop.f32.mrf.mxu2  ;;  %v621_v45 = vpop.f32.mrf.mxu0 }
  0xcc   : > { %v648_v43 = vadd.f32 %v647_v42, %v634_v40  ;;  %v635_v46 = vpop.f32.mrf.mxu1 }
  0xcd   : > { %v636_v47 = vadd.f32 %v635_v46, %v621_v45 }
  0xce   : > { %v652_v44 = vadd.f32 %v648_v43, %v396_v41 }
  0xd0   : > { %654 = vst [vmem:[%s1246_s5] sm:$0xff] %v652_v44 }
  0xd3   : > { %v649_v49 = vpop.f32.mrf.mxu2 }
  0xd4   : > { %v650_v50 = vadd.f32 %v649_v49, %v636_v47  ;;  %659 = sbr.rel (%p949_p11) target bundleno = 233 (0xe9), region = 74 }
  0xd6   : > { %v653_v51 = vadd.f32 %v650_v50, %v397_v48 }
  0xd8   : > { %655 = vst [vmem:[%s1246_s5 + $0x8] sm:$0xff] %v653_v51 }
  0xd9   : > { %v660_v52 = vld [vmem:[%s1246_s5] sm:$0xff]  ;;  %v675_v60 = vld [vmem:[%s1245_s4 + $0x8] sm:$0xff] }
  0xda   : > { %v1025_v53 = vld [vmem:[%s1243_s2] ss:$0 sm:$0xff] }
  0xdb   : > { %v1026_v54 = vld [vmem:[%s1244_s3] ss:$0 sm:$0xff]  ;;  %v666_v55 = vmul.f32 %v1025_v53, %v660_v52 }
  0xdc   : > { %v674_v57 = vld [vmem:[%s1245_s4] sm:$0xff] }
  0xdd   : > { %v672_v59 = vadd.f32 %v1026_v54, %v666_v55 }
  0xdf   : > { %v661_v56 = vld [vmem:[%s1246_s5 + $0x8] sm:$0xff]  ;;  %v676_v62 = vadd.f32 %v674_v57, %v672_v59 }
  0xe0   : > { %v667_v58 = vmul.f32 %v1025_v53, %v661_v56 }
  0xe1   : > { %v678_v0 = vmax.f32 %v676_v62, 0.0 }
  0xe2   : > { %v673_v61 = vadd.f32 %v1026_v54, %v667_v58 }
  0xe3   : > { %680 = vst [vmem:[%s1246_s5] sm:$0xff] %v678_v0 }
  0xe4   : > { %v677_v63 = vadd.f32 %v675_v60, %v673_v61 }
  0xe6   : > { %v679_v1 = vmax.f32 %v677_v63, 0.0 }
  0xe8   : > { %681 = vst [vmem:[%s1246_s5 + $0x8] sm:$0xff] %v679_v1 }
  0xe9 PF: > { %s15_s22 = sadd.s32 1, %s1065_s22   ;;  %s1247_s18 = smov %s1053_s19 }
  0xea   : > { %p12_p12 = scmp.ge.s32.totalorder %s15_s22, 5   ;;  %s1248_s19 = smov %s1133_s26 }
  0xeb   : > { %s1249_s20 = smov %s1061_s21  ;;  %s1250_s21 = smov %s1252_s23 }
  0xec   :  { %14 = sbr.rel (!%p12_p12) target bundleno = 3 (0x3), region = 127 }

// kernel: resnet18_16s_forward.33
= control target key start
LH: loop header
LB: loop body
LE: loop exit
PB: predicated region body
PF: predicated region fallthrough
CT: control target
= control target key end

     0   :  { %s1010_s15 = smov 0   ;;  %s1012_s16 = smov 0   ;;  %s1147_s0 = inlined_call_operand.vmem [shape: bf16[16,1152], index: 0, kind: input, shape index: {}]   ;;  %s1148_s1 = inlined_call_operand.vmem [shape: bf16[1152,128], index: 1, kind: input, shape index: {}]   ;;  %s1149_s2 = inlined_call_operand.vmem [shape: f32[1,128], index: 2, kind: input, shape index: {}]   ;;  %s1150_s3 = inlined_call_operand.vmem [shape: f32[1,128], index: 3, kind: input, shape index: {}]   ;;  %s1151_s4 = inlined_call_operand.vmem [shape: f32[16,128], index: 4, kind: output, shape index: {}]  }
   0x1   :  { %s1014_s17 = smov 0   ;;  %s1016_s18 = smov 0  }
   0x2   :  { %s1018_s19 = smov 0  }
   0x3 LB: > { %s26_s20 = sadd.s32 1, %s978_s18  ;;  %p49_p1 = scmp.ne.s32.totalorder %s970_s16, %s966_s15  ;;  %s982_s19 = sphi %s1018_s19, %s14_s19   ;;  %s978_s18 = sphi %s1016_s18, %s1155_s18   ;;  %s974_s17 = sphi %s1014_s17, %s1154_s17   ;;  %s970_s16 = sphi %s1012_s16, %s1153_s16   ;;  %s966_s15 = sphi %s1010_s15, %s1152_s15  }
   0x4   : > { %p27_p0 = scmp.ge.s32.totalorder %s26_s20, 3  ;;  %p50_p2 = scmp.eq.s32.totalorder %s982_s19, 0 }
   0x5   : > { %s42_s22 = sadd.s32 1, %s970_s16  ;;  %p749_p5 = scmp.ge.s32.totalorder %s982_s19, 3 }
   0x6   : > { %s1157_s20 = smov (%p27_p0, %s26_s20), 0  ;;  %p51_p3 = por %p50_p2, %p49_p1 }
   0x7   : > { %s38_s21 = ssub.s32 %s978_s18, %s1157_s20  ;;  %195 = sbr.rel (%p749_p5) target bundleno = 21 (0x15), region = 24 }
   0x8   : > { %p40_p4 = scmp.eq.s32.totalorder %s38_s21, 0 }
   0xa   : > { %s1045_s23 = scalar_select %p40_p4, %s970_s16, %s42_s22  }
   0xc   : > { %198 = sbr.rel (!%p51_p3) target bundleno = 21 (0x15), region = 28  ;;  %s200_s24 = sand.u32 (%p51_p3), 1, %s970_s16  }
   0xd   : > { %s871_s25 = smul.u32 (%p51_p3), 12, %s978_s18 }
   0xe   : > { %s899_s26 = smul.u32 (%p51_p3), 24, %s200_s24 }
   0xf   : > { %s208_s29 = scalar_lea.vmem (%p51_p3), %s1147_s0, %s871_s25 }
  0x10   : > { %v223_v0 = vld [vmem:[%s208_s29] sm:$0xff] (%p51_p3)  ;;  %v751_v2 = vld [vmem:[%s208_s29 + $0x8] sm:$0xf] (%p51_p3)  ;;  %s202_s30 = scalar_lea.vmem (%p51_p3), [#allocation2], %s899_s26  ;;  %v753_v3 = vld [vmem:[%s208_s29 + $0x2c] sm:$0xf] (%p51_p3) }
  0x11   : > { %v225_v1 = vld [vmem:[%s208_s29 + $0x24] sm:$0xff]  ;;  %224 = vst [vmem:[%s202_s30] sm:$0xff] %v223_v0 }
  0x12   : > { %226 = vst [vmem:[%s202_s30 + $0xc] sm:$0xff] %v225_v1 }
  0x13   : > { %752 = vst [vmem:[%s202_s30 + $0x8] sm:$0xf] %v751_v2 }
  0x14   : > { %754 = vst [vmem:[%s202_s30 + $0x14] sm:$0xf] %v753_v3 }
  0x15 PF: > { %p755_p6 = scmp.ge.s32.totalorder %s982_s19, 1  ;;  %p255_p7 = scmp.lt.s32.totalorder %s982_s19, 4 }
  0x17   : > { %p256_p8 = pnand %p755_p6, %p255_p7 }
  0x18   : > { %s262_s5 = sand.u32 (!%p256_p8), 1, %s966_s15   ;;  %s306_s6 = smul.u32 (!%p256_p8), 48, %s974_s17 }
  0x19   : > { %259 = sbr.rel (%p256_p8) target bundleno = 231 (0xe7), region = 58  ;;  %p757_p10 = scmp.ne.s32.totalorder (!%p256_p8), %s974_s17, 0 }
  0x1a   : > { %s900_s7 = smul.u32 (!%p256_p8), 24, %s262_s5  ;;  %p307_p9 = scmp.lt.s32.totalorder (!%p256_p8), %s306_s6, 143 }
  0x1c   : > { %s1062_s12 = scalar_lea.vmem (!%p256_p8), [#allocation2], %s900_s7 }
  0x1e   : > { %s1159_s6 = smov (!%p307_p9, %s306_s6), 143  ;;  %333 = sbr.rel (%p757_p10) target bundleno = 38 (0x26), region = 66 }
  0x1f   : > { %s756_s8 = sshll.u32 %s1159_s6, 2 }
  0x20   : > { %s1060_s11 = scalar_lea.vmem %s1148_s1, %s756_s8 }
  0x23   : > { %v984_v4 = vmov 0.0  }
  0x24   : > { %334 = vst [vmem:[%s1151_s4] sm:$0xff] %v984_v4 }
  0x25   : > { %335 = vst [vmem:[%s1151_s4 + $0x8] sm:$0xff] %v984_v4 }
  0x26 PF: > { %v882_v5 = vld [vmem:[%s1060_s11 + $0x38] sm:$0xff]  ;;  %v881_v8 = vld [vmem:[%s1060_s11 + $0x30] sm:$0xff]  ;;  %v880_v11 = vld [vmem:[%s1060_s11 + $0x28] sm:$0xff]  ;;  %p866_p11 = scmp.ne.s32.totalorder %s974_s17, 2 }
  0x27   : > { %v890_v6 = vld [vmem:[%s1060_s11 + $0x78] sm:$0xff]  ;;  %550 = vmatpush.bf16.msra.mxu0 %v882_v5  ;;  %v889_v9 = vld [vmem:[%s1060_s11 + $0x70] sm:$0xff]  ;;  %v888_v12 = vld [vmem:[%s1060_s11 + $0x68] sm:$0xff] }
  0x28   : > { %v898_v7 = vld [vmem:[%s1060_s11 + $0xb8] sm:$0xff]  ;;  %564 = vmatpush.bf16.msra.mxu1 %v890_v6  ;;  %v897_v10 = vld [vmem:[%s1060_s11 + $0xb0] sm:$0xff]  ;;  %v896_v13 = vld [vmem:[%s1060_s11 + $0xa8] sm:$0xff] }
  0x29   : > { %578 = vmatpush.bf16.msra.mxu2 %v898_v7  ;;  %v879_v14 = vld [vmem:[%s1060_s11 + $0x20] sm:$0xff]  ;;  %v878_v17 = vld [vmem:[%s1060_s11 + $0x18] sm:$0xff]  ;;  %v877_v20 = vld [vmem:[%s1060_s11 + $0x10] sm:$0xff] }
  0x2a   : > { %v887_v15 = vld [vmem:[%s1060_s11 + $0x60] sm:$0xff]  ;;  %v886_v18 = vld [vmem:[%s1060_s11 + $0x58] sm:$0xff]  ;;  %v885_v21 = vld [vmem:[%s1060_s11 + $0x50] sm:$0xff] }
  0x2b   : > { %551 = vmatpush.bf16.msra.mxu0 %v881_v8  ;;  %v895_v16 = vld [vmem:[%s1060_s11 + $0xa0] sm:$0xff]  ;;  %v894_v19 = vld [vmem:[%s1060_s11 + $0x98] sm:$0xff]  ;;  %v893_v22 = vld [vmem:[%s1060_s11 + $0x90] sm:$0xff] }
  0x2c   : > { %565 = vmatpush.bf16.msra.mxu1 %v889_v9  ;;  %v876_v23 = vld [vmem:[%s1060_s11 + $0x8] sm:$0xff]  ;;  %v875_v26 = vld [vmem:[%s1060_s11] sm:$0xff] }
  0x2d   : > { %579 = vmatpush.bf16.msra.mxu2 %v897_v10  ;;  %v884_v24 = vld [vmem:[%s1060_s11 + $0x48] sm:$0xff]  ;;  %v883_v27 = vld [vmem:[%s1060_s11 + $0x40] sm:$0xff] }
  0x2e   : > { %v892_v25 = vld [vmem:[%s1060_s11 + $0x88] sm:$0xff]  ;;  %v760_v28 = vld [vmem:[%s1062_s12] sm:$0xf]  ;;  %v872_v30 = vld [vmem:[%s1062_s12 + $0x4] sm:$0xf] }
  0x2f   : > { %552 = vmatpush.bf16.msra.mxu0 %v880_v11  ;;  %v873_v29 = vld [vmem:[%s1062_s12 + $0x8] sm:$0xf0]  ;;  %v762_v31 = vld [vmem:[%s1062_s12 + $0xc] sm:$0xf0]  ;;  %v768_v33 = vld [vmem:[%s1062_s12 + $0x8] sm:$0xf] }
  0x30   : > { %566 = vmatpush.bf16.msra.mxu1 %v888_v12  ;;  %v891_v32 = vld [vmem:[%s1060_s11 + $0x80] sm:$0xff]  ;;  %v874_v34 = vld [vmem:[%s1062_s12 + $0x10] sm:$0xf0]  ;;  %v761_v35 = vor.u32 %v873_v29, %v760_v28  ;;  %v765_v36 = vor.u32 %v872_v30, %v762_v31 }
  0x31   : > { %580 = vmatpush.bf16.msra.mxu2 %v896_v13  ;;  %v769_v37 = vor.u32 %v874_v34, %v768_v33  ;;  %v336_v41 = vld [vmem:[%s1151_s4] sm:$0xff]  ;;  %v337_v48 = vld [vmem:[%s1151_s4 + $0x8] sm:$0xff] }
  0x33   : > { %553 = vmatpush.bf16.msra.mxu0 %v879_v14 }
  0x34   : > { %567 = vmatpush.bf16.msra.mxu1 %v887_v15 }
  0x35   : > { %581 = vmatpush.bf16.msra.mxu2 %v895_v16 }
  0x37   : > { %554 = vmatpush.bf16.msra.mxu0 %v878_v17 }
  0x38   : > { %568 = vmatpush.bf16.msra.mxu1 %v886_v18 }
  0x39   : > { %582 = vmatpush.bf16.msra.mxu2 %v894_v19 }
  0x3b   : > { %555 = vmatpush.bf16.msra.mxu0 %v877_v20 }
  0x3c   : > { %569 = vmatpush.bf16.msra.mxu1 %v885_v21 }
  0x3d   : > { %583 = vmatpush.bf16.msra.mxu2 %v893_v22 }
  0x3f   : > { %556 = vmatpush.bf16.msra.mxu0 %v876_v23 }
  0x40   : > { %570 = vmatpush.bf16.msra.mxu1 %v884_v24 }
  0x41   : > { %584 = vmatpush.bf16.msra.mxu2 %v892_v25 }
  0x43   : > { %557 = vmatpush.bf16.msra.mxu0 %v875_v26 }
  0x44   : > { %571 = vmatpush.bf16.msra.mxu1 %v883_v27 }
  0x45   : > { %585 = vmatpush.bf16.msra.mxu2 %v891_v32 }
  0x46   : > { %558 = vmatmul.bf16.vlgmr.msra.gmra.mxu0 %v761_v35 }
  0x47   : > { %572 = vmatmul.bf16.vlgmr.msra.gmra.mxu1 %v765_v36 }
  0x48   : > { %586 = vmatmul.bf16.vlgmr.msra.gmra.mxu2 %v769_v37 }
  0xc3   : > { %v559_v38 = vpop.f32.mrf.mxu0 }
  0xc4   : > { %v573_v39 = vpop.f32.mrf.mxu1 }
  0xc5   : > { %v574_v40 = vadd.f32 %v573_v39, %v559_v38 }
  0xcb   : > { %v587_v42 = vpop.f32.mrf.mxu2  ;;  %v561_v45 = vpop.f32.mrf.mxu0 }
  0xcc   : > { %v588_v43 = vadd.f32 %v587_v42, %v574_v40  ;;  %v575_v46 = vpop.f32.mrf.mxu1 }
  0xcd   : > { %v576_v47 = vadd.f32 %v575_v46, %v561_v45 }
  0xce   : > { %v592_v44 = vadd.f32 %v588_v43, %v336_v41 }
  0xd0   : > { %594 = vst [vmem:[%s1151_s4] sm:$0xff] %v592_v44 }
  0xd3   : > { %v589_v49 = vpop.f32.mrf.mxu2 }
  0xd4   : > { %v590_v50 = vadd.f32 %v589_v49, %v576_v47  ;;  %599 = sbr.rel (%p866_p11) target bundleno = 231 (0xe7), region = 70 }
  0xd6   : > { %v593_v51 = vadd.f32 %v590_v50, %v337_v48 }
  0xd8   : > { %595 = vst [vmem:[%s1151_s4 + $0x8] sm:$0xff] %v593_v51 }
  0xd9   : > { %v600_v52 = vld [vmem:[%s1151_s4] sm:$0xff] }
  0xda   : > { %v942_v53 = vld [vmem:[%s1149_s2] ss:$0 sm:$0xff] }
  0xdb   : > { %v943_v54 = vld [vmem:[%s1150_s3] ss:$0 sm:$0xff]  ;;  %v606_v56 = vmul.f32 %v942_v53, %v600_v52 }
  0xdd   : > { %v612_v58 = vadd.f32 %v943_v54, %v606_v56 }
  0xdf   : > { %v601_v55 = vld [vmem:[%s1151_s4 + $0x8] sm:$0xff]  ;;  %v614_v60 = vmax.f32 %v612_v58, 0.0 }
  0xe0   : > { %v607_v57 = vmul.f32 %v942_v53, %v601_v55 }
  0xe1   : > { %616 = vst [vmem:[%s1151_s4] sm:$0xff] %v614_v60 }
  0xe2   : > { %v613_v59 = vadd.f32 %v943_v54, %v607_v57 }
  0xe4   : > { %v615_v61 = vmax.f32 %v613_v59, 0.0 }
  0xe6   : > { %617 = vst [vmem:[%s1151_s4 + $0x8] sm:$0xff] %v615_v61 }
  0xe7 PF: > { %s14_s19 = sadd.s32 1, %s982_s19   ;;  %s1152_s15 = smov %s970_s16 }
  0xe8   : > { %p11_p12 = scmp.ge.s32.totalorder %s14_s19, 5   ;;  %s1153_s16 = smov %s1045_s23 }
  0xe9   : > { %s1154_s17 = smov %s978_s18  ;;  %s1155_s18 = smov %s1157_s20 }
  0xea   :  { %13 = sbr.rel (!%p11_p12) target bundleno = 3 (0x3), region = 120 }

// kernel: resnet18_16s_forward.35
= control target key start
LH: loop header
LB: loop body
LE: loop exit
PB: predicated region body
PF: predicated region fallthrough
CT: control target
= control target key end

     0   :  { %s1325_s15 = smov 0   ;;  %s1327_s16 = smov 0   ;;  %s1572_s0 = inlined_call_operand.vmem [shape: bf16[16,1152], index: 0, kind: input, shape index: {}]   ;;  %s1573_s1 = inlined_call_operand.vmem [shape: bf16[1152,256], index: 1, kind: input, shape index: {}]   ;;  %s1574_s2 = inlined_call_operand.vmem [shape: f32[1,256], index: 2, kind: input, shape index: {}]   ;;  %s1575_s3 = inlined_call_operand.vmem [shape: f32[1,256], index: 3, kind: input, shape index: {}]   ;;  %s1576_s4 = inlined_call_operand.vmem [shape: f32[16,256], index: 4, kind: output, shape index: {}]  }
   0x1   :  { %s1329_s17 = smov 0   ;;  %s1331_s18 = smov 0  }
   0x2   :  { %s1333_s19 = smov 0  }
   0x3 LB: > { %s26_s20 = sadd.s32 1, %s1293_s18  ;;  %p49_p1 = scmp.ne.s32.totalorder %s1285_s16, %s1281_s15  ;;  %s1297_s19 = sphi %s1333_s19, %s14_s19   ;;  %s1293_s18 = sphi %s1331_s18, %s1580_s18   ;;  %s1289_s17 = sphi %s1329_s17, %s1579_s17   ;;  %s1285_s16 = sphi %s1327_s16, %s1578_s16   ;;  %s1281_s15 = sphi %s1325_s15, %s1577_s15  }
   0x4   : > { %p27_p0 = scmp.ge.s32.totalorder %s26_s20, 3  ;;  %p50_p2 = scmp.eq.s32.totalorder %s1297_s19, 0 }
   0x5   : > { %s42_s22 = sadd.s32 1, %s1285_s16  ;;  %p944_p5 = scmp.ge.s32.totalorder %s1297_s19, 3 }
   0x6   : > { %s1582_s20 = smov (%p27_p0, %s26_s20), 0  ;;  %p51_p3 = por %p50_p2, %p49_p1 }
   0x7   : > { %s38_s21 = ssub.s32 %s1293_s18, %s1582_s20  ;;  %199 = sbr.rel (%p944_p5) target bundleno = 21 (0x15), region = 24 }
   0x8   : > { %p40_p4 = scmp.eq.s32.totalorder %s38_s21, 0 }
   0xa   : > { %s1360_s23 = scalar_select %p40_p4, %s1285_s16, %s42_s22  }
   0xc   : > { %202 = sbr.rel (!%p51_p3) target bundleno = 21 (0x15), region = 28  ;;  %s204_s24 = sand.u32 (%p51_p3), 1, %s1285_s16  }
   0xd   : > { %s1163_s25 = smul.u32 (%p51_p3), 12, %s1293_s18 }
   0xe   : > { %s1216_s26 = smul.u32 (%p51_p3), 24, %s204_s24 }
   0xf   : > { %s212_s29 = scalar_lea.vmem (%p51_p3), %s1572_s0, %s1163_s25 }
  0x10   : > { %v227_v0 = vld [vmem:[%s212_s29] sm:$0xff] (%p51_p3)  ;;  %v946_v2 = vld [vmem:[%s212_s29 + $0x8] sm:$0xf] (%p51_p3)  ;;  %s206_s30 = scalar_lea.vmem (%p51_p3), [#allocation2], %s1216_s26  ;;  %v948_v3 = vld [vmem:[%s212_s29 + $0x2c] sm:$0xf] (%p51_p3) }
  0x11   : > { %v229_v1 = vld [vmem:[%s212_s29 + $0x24] sm:$0xff]  ;;  %228 = vst [vmem:[%s206_s30] sm:$0xff] %v227_v0 }
  0x12   : > { %230 = vst [vmem:[%s206_s30 + $0xc] sm:$0xff] %v229_v1 }
  0x13   : > { %947 = vst [vmem:[%s206_s30 + $0x8] sm:$0xf] %v946_v2 }
  0x14   : > { %949 = vst [vmem:[%s206_s30 + $0x14] sm:$0xf] %v948_v3 }
  0x15 PF: > { %p950_p6 = scmp.ge.s32.totalorder %s1297_s19, 1  ;;  %p262_p7 = scmp.lt.s32.totalorder %s1297_s19, 4 }
  0x17   : > { %p263_p8 = pnand %p950_p6, %p262_p7 }
  0x18   : > { %s269_s5 = sand.u32 (!%p263_p8), 1, %s1281_s15   ;;  %s319_s6 = smul.u32 (!%p263_p8), 48, %s1289_s17 }
  0x19   : > { %266 = sbr.rel (%p263_p8) target bundleno = 261 (0x105), region = 58  ;;  %p953_p10 = scmp.ne.s32.totalorder (!%p263_p8), %s1289_s17, 0 }
  0x1a   : > { %s1217_s7 = smul.u32 (!%p263_p8), 24, %s269_s5  ;;  %p321_p9 = scmp.lt.s32.totalorder (!%p263_p8), %s319_s6, 143 }
  0x1c   : > { %s1377_s12 = scalar_lea.vmem (!%p263_p8), [#allocation2], %s1217_s7 }
  0x1e   : > { %s1584_s6 = smov (!%p321_p9, %s319_s6), 143  ;;  %356 = sbr.rel (%p953_p10) target bundleno = 40 (0x28), region = 66 }
  0x1f   : > { %s1164_s8 = sshll.u32 %s1584_s6, 3 }
  0x20   : > { %s1375_s11 = scalar_lea.vmem %s1573_s1, %s1164_s8 }
  0x23   : > { %v1299_v4 = vmov 0.0  }
  0x24   : > { %357 = vst [vmem:[%s1576_s4] sm:$0xff] %v1299_v4 }
  0x25   : > { %358 = vst [vmem:[%s1576_s4 + $0x8] sm:$0xff] %v1299_v4 }
  0x26   : > { %359 = vst [vmem:[%s1576_s4 + $0x10] sm:$0xff] %v1299_v4 }
  0x27   : > { %360 = vst [vmem:[%s1576_s4 + $0x18] sm:$0xff] %v1299_v4 }
  0x28 PF: > { %v1024_v5 = vld [vmem:[%s1375_s11 + $0x70] sm:$0xf]  ;;  %v1183_v6 = vld [vmem:[%s1375_s11 + $0x74] sm:$0xf0]  ;;  %v1016_v14 = vld [vmem:[%s1375_s11 + $0x60] sm:$0xf] }
  0x29   : > { %v1088_v7 = vld [vmem:[%s1375_s11 + $0xf0] sm:$0xf]  ;;  %v1025_v8 = vor.u32 %v1183_v6, %v1024_v5  ;;  %v1199_v9 = vld [vmem:[%s1375_s11 + $0xf4] sm:$0xf0]  ;;  %v1181_v15 = vld [vmem:[%s1375_s11 + $0x64] sm:$0xf0] }
  0x2a   : > { %v1152_v10 = vld [vmem:[%s1375_s11 + $0x170] sm:$0xf]  ;;  %v1215_v11 = vld [vmem:[%s1375_s11 + $0x174] sm:$0xf0]  ;;  %v1089_v12 = vor.u32 %v1199_v9, %v1088_v7  ;;  %v1080_v16 = vld [vmem:[%s1375_s11 + $0xe0] sm:$0xf]  ;;  %v1017_v17 = vor.u32 %v1181_v15, %v1016_v14 }
  0x2b   : > { %v1153_v13 = vor.u32 %v1215_v11, %v1152_v10  ;;  %673 = vmatpush.bf16.msra.mxu0 %v1025_v8  ;;  %v1197_v18 = vld [vmem:[%s1375_s11 + $0xe4] sm:$0xf0]  ;;  %v1144_v19 = vld [vmem:[%s1375_s11 + $0x160] sm:$0xf]  ;;  %v1008_v23 = vld [vmem:[%s1375_s11 + $0x50] sm:$0xf] }
  0x2c   : > { %v1213_v20 = vld [vmem:[%s1375_s11 + $0x164] sm:$0xf0]  ;;  %687 = vmatpush.bf16.msra.mxu1 %v1089_v12  ;;  %v1081_v21 = vor.u32 %v1197_v18, %v1080_v16  ;;  %v1179_v24 = vld [vmem:[%s1375_s11 + $0x54] sm:$0xf0]  ;;  %v1072_v25 = vld [vmem:[%s1375_s11 + $0xd0] sm:$0xf] }
  0x2d   : > { %701 = vmatpush.bf16.msra.mxu2 %v1153_v13  ;;  %v1145_v22 = vor.u32 %v1213_v20, %v1144_v19  ;;  %v1195_v26 = vld [vmem:[%s1375_s11 + $0xd4] sm:$0xf0]  ;;  %v1136_v27 = vld [vmem:[%s1375_s11 + $0x150] sm:$0xf]  ;;  %v1009_v29 = vor.u32 %v1179_v24, %v1008_v23  ;;  %v1000_v30 = vld [vmem:[%s1375_s11 + $0x40] sm:$0xf] }
  0x2e   : > { %v1211_v28 = vld [vmem:[%s1375_s11 + $0x154] sm:$0xf0]  ;;  %v1177_v31 = vld [vmem:[%s1375_s11 + $0x44] sm:$0xf0]  ;;  %v1073_v32 = vor.u32 %v1195_v26, %v1072_v25  ;;  %v1064_v34 = vld [vmem:[%s1375_s11 + $0xc0] sm:$0xf] }
  0x2f   : > { %674 = vmatpush.bf16.msra.mxu0 %v1017_v17  ;;  %v1137_v33 = vor.u32 %v1211_v28, %v1136_v27  ;;  %v1182_v35 = vld [vmem:[%s1375_s11 + $0x74] sm:$0xf]  ;;  %v1026_v36 = vld [vmem:[%s1375_s11 + $0x78] sm:$0xf0]  ;;  %v1193_v37 = vld [vmem:[%s1375_s11 + $0xc4] sm:$0xf0]  ;;  %v1001_v42 = vor.u32 %v1177_v31, %v1000_v30 }
  0x30   : > { %688 = vmatpush.bf16.msra.mxu1 %v1081_v21  ;;  %v1128_v38 = vld [vmem:[%s1375_s11 + $0x140] sm:$0xf]  ;;  %v1209_v39 = vld [vmem:[%s1375_s11 + $0x144] sm:$0xf0]  ;;  %v1029_v40 = vor.u32 %v1182_v35, %v1026_v36  ;;  %v1180_v41 = vld [vmem:[%s1375_s11 + $0x64] sm:$0xf]  ;;  %v1065_v46 = vor.u32 %v1193_v37, %v1064_v34 }
  0x31   : > { %702 = vmatpush.bf16.msra.mxu2 %v1145_v22  ;;  %v992_v43 = vld [vmem:[%s1375_s11 + $0x30] sm:$0xf]  ;;  %v1175_v44 = vld [vmem:[%s1375_s11 + $0x34] sm:$0xf0]  ;;  %v1018_v45 = vld [vmem:[%s1375_s11 + $0x68] sm:$0xf0]  ;;  %v1129_v47 = vor.u32 %v1209_v39, %v1128_v38 }
  0x32   : > { %715 = vmatpush.bf16.msra.mxu3 %v1029_v40  ;;  %v1056_v48 = vld [vmem:[%s1375_s11 + $0xb0] sm:$0xf]  ;;  %v1191_v49 = vld [vmem:[%s1375_s11 + $0xb4] sm:$0xf0]  ;;  %v1021_v51 = vor.u32 %v1180_v41, %v1018_v45  ;;  %v1178_v53 = vld [vmem:[%s1375_s11 + $0x54] sm:$0xf]  ;;  %v993_v55 = vor.u32 %v1175_v44, %v992_v43 }
  0x33   : > { %675 = vmatpush.bf16.msra.mxu0 %v1009_v29  ;;  %v1120_v50 = vld [vmem:[%s1375_s11 + $0x130] sm:$0xf]  ;;  %v1207_v52 = vld [vmem:[%s1375_s11 + $0x134] sm:$0xf0]  ;;  %v1010_v54 = vld [vmem:[%s1375_s11 + $0x58] sm:$0xf0]  ;;  %v1057_v59 = vor.u32 %v1191_v49, %v1056_v48 }
  0x34   : > { %689 = vmatpush.bf16.msra.mxu1 %v1073_v32  ;;  %v984_v56 = vld [vmem:[%s1375_s11 + $0x20] sm:$0xf]  ;;  %v1173_v57 = vld [vmem:[%s1375_s11 + $0x24] sm:$0xf0]  ;;  %v1013_v58 = vor.u32 %v1178_v53, %v1010_v54  ;;  %v1121_v60 = vor.u32 %v1207_v52, %v1120_v50  ;;  %v1176_v62 = vld [vmem:[%s1375_s11 + $0x44] sm:$0xf] }
  0x35   : > { %703 = vmatpush.bf16.msra.mxu2 %v1137_v33  ;;  %v1048_v61 = vld [vmem:[%s1375_s11 + $0xa0] sm:$0xf]  ;;  %v1002_v63 = vld [vmem:[%s1375_s11 + $0x48] sm:$0xf0]  ;;  %v1189_v0 = vld [vmem:[%s1375_s11 + $0xa4] sm:$0xf0]  ;;  %v985_v3 = vor.u32 %v1173_v57, %v984_v56 }
  0x36   : > { %716 = vmatpush.bf16.msra.mxu3 %v1021_v51  ;;  %v1112_v1 = vld [vmem:[%s1375_s11 + $0x120] sm:$0xf]  ;;  %v1205_v2 = vld [vmem:[%s1375_s11 + $0x124] sm:$0xf0]  ;;  %v976_v4 = vld [vmem:[%s1375_s11 + $0x10] sm:$0xf]  ;;  %v1005_v6 = vor.u32 %v1176_v62, %v1002_v63  ;;  %v1049_v7 = vor.u32 %v1189_v0, %v1048_v61 }
  0x37   : > { %676 = vmatpush.bf16.msra.mxu0 %v1001_v42  ;;  %v1171_v5 = vld [vmem:[%s1375_s11 + $0x14] sm:$0xf0]  ;;  %v1113_v8 = vor.u32 %v1205_v2, %v1112_v1  ;;  %v1040_v9 = vld [vmem:[%s1375_s11 + $0x90] sm:$0xf]  ;;  %v1174_v10 = vld [vmem:[%s1375_s11 + $0x34] sm:$0xf] }
  0x38   : > { %690 = vmatpush.bf16.msra.mxu1 %v1065_v46  ;;  %v994_v11 = vld [vmem:[%s1375_s11 + $0x38] sm:$0xf0]  ;;  %v1187_v12 = vld [vmem:[%s1375_s11 + $0x94] sm:$0xf0]  ;;  %v1104_v13 = vld [vmem:[%s1375_s11 + $0x110] sm:$0xf]  ;;  %v977_v15 = vor.u32 %v1171_v5, %v976_v4 }
  0x39   : > { %704 = vmatpush.bf16.msra.mxu2 %v1129_v47  ;;  %v1203_v14 = vld [vmem:[%s1375_s11 + $0x114] sm:$0xf0]  ;;  %v968_v16 = vld [vmem:[%s1375_s11] sm:$0xf]  ;;  %v1169_v17 = vld [vmem:[%s1375_s11 + $0x4] sm:$0xf0]  ;;  %v997_v19 = vor.u32 %v1174_v10, %v994_v11  ;;  %v1041_v20 = vor.u32 %v1187_v12, %v1040_v9 }
  0x3a   : > { %717 = vmatpush.bf16.msra.mxu3 %v1013_v58  ;;  %v1032_v18 = vld [vmem:[%s1375_s11 + $0x80] sm:$0xf]  ;;  %v1105_v21 = vor.u32 %v1203_v14, %v1104_v13  ;;  %v1185_v22 = vld [vmem:[%s1375_s11 + $0x84] sm:$0xf0]  ;;  %v1172_v23 = vld [vmem:[%s1375_s11 + $0x24] sm:$0xf]  ;;  %v969_v31 = vor.u32 %v1169_v17, %v968_v16 }
  0x3b   : > { %677 = vmatpush.bf16.msra.mxu0 %v993_v55  ;;  %v986_v24 = vld [vmem:[%s1375_s11 + $0x28] sm:$0xf0]  ;;  %v1096_v25 = vld [vmem:[%s1375_s11 + $0x100] sm:$0xf]  ;;  %v1201_v26 = vld [vmem:[%s1375_s11 + $0x104] sm:$0xf0]  ;;  %v1033_v36 = vor.u32 %v1185_v22, %v1032_v18 }
  0x3c   : > { %691 = vmatpush.bf16.msra.mxu1 %v1057_v59  ;;  %v1198_v27 = vld [vmem:[%s1375_s11 + $0xf4] sm:$0xf]  ;;  %v1090_v28 = vld [vmem:[%s1375_s11 + $0xf8] sm:$0xf0]  ;;  %v964_v32 = vld [vmem:[%s1377_s12 + $0x8] sm:$0xf]  ;;  %v989_v33 = vor.u32 %v1172_v23, %v986_v24  ;;  %v1097_v37 = vor.u32 %v1201_v26, %v1096_v25 }
  0x3d   : > { %705 = vmatpush.bf16.msra.mxu2 %v1121_v60  ;;  %v1214_v29 = vld [vmem:[%s1375_s11 + $0x174] sm:$0xf]  ;;  %v1154_v30 = vld [vmem:[%s1375_s11 + $0x178] sm:$0xf0]  ;;  %v956_v34 = vld [vmem:[%s1377_s12] sm:$0xf]  ;;  %v1093_v41 = vor.u32 %v1198_v27, %v1090_v28 }
  0x3e   : > { %718 = vmatpush.bf16.msra.mxu3 %v1005_v6  ;;  %v1166_v35 = vld [vmem:[%s1377_s12 + $0x8] sm:$0xf0]  ;;  %v1167_v38 = vld [vmem:[%s1377_s12 + $0x10] sm:$0xf0]  ;;  %v1165_v39 = vld [vmem:[%s1377_s12 + $0x4] sm:$0xf]  ;;  %v1157_v42 = vor.u32 %v1214_v29, %v1154_v30 }
  0x3f   : > { %678 = vmatpush.bf16.msra.mxu0 %v985_v3  ;;  %v958_v40 = vld [vmem:[%s1377_s12 + $0xc] sm:$0xf0]  ;;  %v1196_v43 = vld [vmem:[%s1375_s11 + $0xe4] sm:$0xf]  ;;  %v1170_v44 = vld [vmem:[%s1375_s11 + $0x14] sm:$0xf]  ;;  %v957_v49 = vor.u32 %v1166_v35, %v956_v34  ;;  %v1468_v50 = vor.u32 %v1167_v38, %v964_v32 }
  0x40   : > { %692 = vmatpush.bf16.msra.mxu1 %v1049_v7  ;;  %v978_v45 = vld [vmem:[%s1375_s11 + $0x18] sm:$0xf0]  ;;  %v1082_v46 = vld [vmem:[%s1375_s11 + $0xe8] sm:$0xf0]  ;;  %v1212_v47 = vld [vmem:[%s1375_s11 + $0x164] sm:$0xf]  ;;  %v1470_v51 = vor.u32 %v1165_v39, %v958_v40 }
  0x41   : > { %706 = vmatpush.bf16.msra.mxu2 %v1113_v8  ;;  %v1146_v48 = vld [vmem:[%s1375_s11 + $0x168] sm:$0xf0]  ;;  %v981_v52 = vor.u32 %v1170_v44, %v978_v45  ;;  %v1085_v53 = vor.u32 %v1196_v43, %v1082_v46  ;;  %v1194_v55 = vld [vmem:[%s1375_s11 + $0xd4] sm:$0xf]  ;;  %v1168_v56 = vld [vmem:[%s1375_s11 + $0x4] sm:$0xf] }
  0x42   : > { %719 = vmatpush.bf16.msra.mxu3 %v997_v19  ;;  %v1149_v54 = vor.u32 %v1212_v47, %v1146_v48  ;;  %v970_v57 = vld [vmem:[%s1375_s11 + $0x8] sm:$0xf0]  ;;  %v1074_v58 = vld [vmem:[%s1375_s11 + $0xd8] sm:$0xf0]  ;;  %v1210_v59 = vld [vmem:[%s1375_s11 + $0x154] sm:$0xf] }
  0x43   : > { %679 = vmatpush.bf16.msra.mxu0 %v977_v15  ;;  %v1138_v60 = vld [vmem:[%s1375_s11 + $0x158] sm:$0xf0]  ;;  %v973_v61 = vor.u32 %v1168_v56, %v970_v57  ;;  %v1077_v62 = vor.u32 %v1194_v55, %v1074_v58  ;;  %v1192_v0 = vld [vmem:[%s1375_s11 + $0xc4] sm:$0xf]  ;;  %v1066_v1 = vld [vmem:[%s1375_s11 + $0xc8] sm:$0xf0] }
  0x44   : > { %693 = vmatpush.bf16.msra.mxu1 %v1041_v20  ;;  %v1141_v63 = vor.u32 %v1210_v59, %v1138_v60  ;;  %v1208_v2 = vld [vmem:[%s1375_s11 + $0x144] sm:$0xf]  ;;  %v1130_v3 = vld [vmem:[%s1375_s11 + $0x148] sm:$0xf0]  ;;  %v1069_v4 = vor.u32 %v1192_v0, %v1066_v1  ;;  %v1190_v6 = vld [vmem:[%s1375_s11 + $0xb4] sm:$0xf] }
  0x45   : > { %707 = vmatpush.bf16.msra.mxu2 %v1105_v21  ;;  %v1133_v5 = vor.u32 %v1208_v2, %v1130_v3  ;;  %v1058_v7 = vld [vmem:[%s1375_s11 + $0xb8] sm:$0xf0]  ;;  %v1206_v8 = vld [vmem:[%s1375_s11 + $0x134] sm:$0xf]  ;;  %v1188_v12 = vld [vmem:[%s1375_s11 + $0xa4] sm:$0xf] }
  0x46   : > { %720 = vmatpush.bf16.msra.mxu3 %v989_v33  ;;  %v1122_v9 = vld [vmem:[%s1375_s11 + $0x138] sm:$0xf0]  ;;  %v1061_v10 = vor.u32 %v1190_v6, %v1058_v7  ;;  %v1050_v13 = vld [vmem:[%s1375_s11 + $0xa8] sm:$0xf0]  ;;  %v1204_v14 = vld [vmem:[%s1375_s11 + $0x124] sm:$0xf] }
  0x47   : > { %680 = vmatpush.bf16.msra.mxu0 %v969_v31  ;;  %v1125_v11 = vor.u32 %v1206_v8, %v1122_v9  ;;  %v1114_v15 = vld [vmem:[%s1375_s11 + $0x128] sm:$0xf0]  ;;  %v1053_v16 = vor.u32 %v1188_v12, %v1050_v13  ;;  %v1186_v18 = vld [vmem:[%s1375_s11 + $0x94] sm:$0xf]  ;;  %v1042_v19 = vld [vmem:[%s1375_s11 + $0x98] sm:$0xf0] }
  0x48   : > { %694 = vmatpush.bf16.msra.mxu1 %v1033_v36  ;;  %v1117_v17 = vor.u32 %v1204_v14, %v1114_v15  ;;  %v1202_v20 = vld [vmem:[%s1375_s11 + $0x114] sm:$0xf]  ;;  %v1106_v21 = vld [vmem:[%s1375_s11 + $0x118] sm:$0xf0]  ;;  %v1045_v22 = vor.u32 %v1186_v18, %v1042_v19  ;;  %v1184_v24 = vld [vmem:[%s1375_s11 + $0x84] sm:$0xf] }
  0x49   : > { %708 = vmatpush.bf16.msra.mxu2 %v1097_v37  ;;  %v1109_v23 = vor.u32 %v1202_v20, %v1106_v21  ;;  %v1034_v25 = vld [vmem:[%s1375_s11 + $0x88] sm:$0xf0]  ;;  %v1200_v26 = vld [vmem:[%s1375_s11 + $0x104] sm:$0xf]  ;;  %v363_v40 = vld [vmem:[%s1576_s4 + $0x10] sm:$0xff]  ;;  %p1158_p11 = scmp.ne.s32.totalorder %s1289_s17, 2 }
  0x4a   : > { %681 = vmatmul.bf16.vlgmr.msra.gmra.mxu0 %v957_v49  ;;  %721 = vmatpush.bf16.msra.mxu3 %v981_v52  ;;  %v1098_v27 = vld [vmem:[%s1375_s11 + $0x108] sm:$0xf0]  ;;  %v1037_v28 = vor.u32 %v1184_v24, %v1034_v25  ;;  %v361_v33 = vld [vmem:[%s1576_s4] sm:$0xff] }
  0x4b   : > { %729 = vmatpush.bf16.msrb.mxu0 %v1093_v41  ;;  %695 = vmatmul.bf16.vlgmr.msra.gmra.mxu1 %v1470_v51  ;;  %v1101_v29 = vor.u32 %v1200_v26, %v1098_v27  ;;  %v362_v48 = vld [vmem:[%s1576_s4 + $0x8] sm:$0xff] }
  0x4c   : > { %743 = vmatpush.bf16.msrb.mxu1 %v1157_v42  ;;  %709 = vmatmul.bf16.vlgmr.msra.gmra.mxu2 %v1468_v50 }
  0x4e   : > { %722 = vmatpush.bf16.msra.mxu3 %v973_v61 }
  0x4f   : > { %730 = vmatpush.bf16.msrb.mxu0 %v1085_v53 }
  0x50   : > { %744 = vmatpush.bf16.msrb.mxu1 %v1149_v54  ;;  %v364_v54 = vld [vmem:[%s1576_s4 + $0x18] sm:$0xff] }
  0x51   : > { %723 = vmatmul.bf16.vlgmr.msra.gmra.mxu3 %v957_v49 }
  0x53   : > { %731 = vmatpush.bf16.msrb.mxu0 %v1077_v62 }
  0x54   : > { %745 = vmatpush.bf16.msrb.mxu1 %v1141_v63 }
  0x57   : > { %732 = vmatpush.bf16.msrb.mxu0 %v1069_v4 }
  0x58   : > { %746 = vmatpush.bf16.msrb.mxu1 %v1133_v5 }
  0x5b   : > { %733 = vmatpush.bf16.msrb.mxu0 %v1061_v10 }
  0x5c   : > { %747 = vmatpush.bf16.msrb.mxu1 %v1125_v11 }
  0x5f   : > { %734 = vmatpush.bf16.msrb.mxu0 %v1053_v16 }
  0x60   : > { %748 = vmatpush.bf16.msrb.mxu1 %v1117_v17 }
  0x63   : > { %735 = vmatpush.bf16.msrb.mxu0 %v1045_v22 }
  0x64   : > { %749 = vmatpush.bf16.msrb.mxu1 %v1109_v23 }
  0x67   : > { %736 = vmatpush.bf16.msrb.mxu0 %v1037_v28 }
  0x68   : > { %750 = vmatpush.bf16.msrb.mxu1 %v1101_v29 }
  0x6a   : > { %737 = vmatmul.bf16.vlgmr.msrb.gmra.mxu0 %v1470_v51 }
  0x6b   : > { %751 = vmatmul.bf16.vlgmr.msrb.gmra.mxu1 %v1468_v50 }
  0xc7   : > { %v682_v30 = vpop.f32.mrf.mxu0 }
  0xc8   : > { %v696_v31 = vpop.f32.mrf.mxu1 }
  0xc9   : > { %v697_v32 = vadd.f32 %v696_v31, %v682_v30 }
  0xcf   : > { %v710_v34 = vpop.f32.mrf.mxu2  ;;  %v684_v36 = vpop.f32.mrf.mxu0 }
  0xd0   : > { %v711_v35 = vadd.f32 %v710_v34, %v697_v32  ;;  %v698_v37 = vpop.f32.mrf.mxu1 }
  0xd1   : > { %v699_v39 = vadd.f32 %v698_v37, %v684_v36 }
  0xd2   : > { %v757_v38 = vadd.f32 %v711_v35, %v361_v33 }
  0xd4   : > { %761 = vst [vmem:[%s1576_s4] sm:$0xff] %v757_v38  ;;  %v724_v44 = vpop.f32.mrf.mxu3 }
  0xd7   : > { %v712_v41 = vpop.f32.mrf.mxu2 }
  0xd8   : > { %v713_v42 = vadd.f32 %v712_v41, %v699_v39 }
  0xda   : > { %v759_v43 = vadd.f32 %v713_v42, %v363_v40 }
  0xdc   : > { %763 = vst [vmem:[%s1576_s4 + $0x10] sm:$0xff] %v759_v43  ;;  %v726_v51 = vpop.f32.mrf.mxu3 }
  0xe7   : > { %v738_v45 = vpop.f32.mrf.mxu0 }
  0xe8   : > { %v752_v46 = vpop.f32.mrf.mxu1  ;;  %v739_v47 = vadd.f32 %v738_v45, %v724_v44 }
  0xea   : > { %v753_v49 = vadd.f32 %v752_v46, %v739_v47 }
  0xec   : > { %v758_v50 = vadd.f32 %v753_v49, %v362_v48 }
  0xee   : > { %762 = vst [vmem:[%s1576_s4 + $0x8] sm:$0xff] %v758_v50 }
  0xef   : > { %v740_v52 = vpop.f32.mrf.mxu0 }
  0xf0   : > { %v741_v53 = vadd.f32 %v740_v52, %v726_v51  ;;  %v754_v55 = vpop.f32.mrf.mxu1 }
  0xf2   : > { %v755_v56 = vadd.f32 %v754_v55, %v741_v53  ;;  %768 = sbr.rel (%p1158_p11) target bundleno = 261 (0x105), region = 70 }
  0xf4   : > { %v760_v57 = vadd.f32 %v755_v56, %v364_v54 }
  0xf6   : > { %764 = vst [vmem:[%s1576_s4 + $0x18] sm:$0xff] %v760_v57 }
  0xf7   : > { %v769_v58 = vld [vmem:[%s1576_s4] sm:$0xff]  ;;  %v770_v63 = vld [vmem:[%s1576_s4 + $0x8] sm:$0xff]  ;;  %v771_v2 = vld [vmem:[%s1576_s4 + $0x10] sm:$0xff] }
  0xf8   : > { %v773_v59 = vld [vmem:[%s1574_s2] sm:$0x3] }
  0xf9   : > { %v783_v60 = vld [vmem:[%s1575_s3] sm:$0x3]  ;;  %v775_v61 = vperm.slane %v773_v59, 0  ;;  %v776_v0 = vperm.slane %v773_v59, 1 }
  0xfa   : > { %v785_v62 = vperm.slane %v783_v60, 0  ;;  %v786_v1 = vperm.slane %v783_v60, 1 }
  0xfb   : > { %v779_v4 = vmul.f32 %v775_v61, %v769_v58  ;;  %v780_v5 = vmul.f32 %v776_v0, %v770_v63  ;;  %v781_v6 = vmul.f32 %v775_v61, %v771_v2 }
  0xfd   : > { %v772_v3 = vld [vmem:[%s1576_s4 + $0x18] sm:$0xff]  ;;  %v789_v8 = vadd.f32 %v785_v62, %v779_v4  ;;  %v790_v9 = vadd.f32 %v786_v1, %v780_v5  ;;  %v791_v10 = vadd.f32 %v785_v62, %v781_v6 }
  0xfe   : > { %v782_v7 = vmul.f32 %v776_v0, %v772_v3 }
  0xff   : > { %v793_v12 = vmax.f32 %v789_v8, 0.0  ;;  %v794_v13 = vmax.f32 %v790_v9, 0.0  ;;  %v795_v14 = vmax.f32 %v791_v10, 0.0 }
 0x100   : > { %v792_v11 = vadd.f32 %v786_v1, %v782_v7 }
 0x101   : > { %797 = vst [vmem:[%s1576_s4] sm:$0xff] %v793_v12 }
 0x102   : > { %v796_v15 = vmax.f32 %v792_v11, 0.0  ;;  %798 = vst [vmem:[%s1576_s4 + $0x8] sm:$0xff] %v794_v13 }
 0x103   : > { %799 = vst [vmem:[%s1576_s4 + $0x10] sm:$0xff] %v795_v14 }
 0x104   : > { %800 = vst [vmem:[%s1576_s4 + $0x18] sm:$0xff] %v796_v15 }
 0x105 PF: > { %s14_s19 = sadd.s32 1, %s1297_s19   ;;  %s1577_s15 = smov %s1285_s16 }
 0x106   : > { %p11_p12 = scmp.ge.s32.totalorder %s14_s19, 5   ;;  %s1578_s16 = smov %s1360_s23 }
 0x107   : > { %s1579_s17 = smov %s1293_s18  ;;  %s1580_s18 = smov %s1582_s20 }
 0x108   :  { %13 = sbr.rel (!%p11_p12) target bundleno = 3 (0x3), region = 120 }

// kernel: resnet18_16s_forward.36
= control target key start
LH: loop header
LB: loop body
LE: loop exit
PB: predicated region body
PF: predicated region fallthrough
CT: control target
= control target key end

     0   :  { %s432_s1 = inlined_call_operand.vmem [shape: bf16[128,256], index: 1, kind: input, shape index: {}]   ;;  %s433_s0 = inlined_call_operand.vmem [shape: bf16[16,128], index: 0, kind: input, shape index: {}]   ;;  %s434_s2 = inlined_call_operand.vmem [shape: f32[1,256], index: 2, kind: input, shape index: {}]   ;;  %s435_s3 = inlined_call_operand.vmem [shape: f32[1,256], index: 3, kind: input, shape index: {}]   ;;  %s436_s4 = inlined_call_operand.vmem [shape: f32[16,256], index: 4, kind: output, shape index: {}]  }
   0x1   :  { %v266_v0 = vld [vmem:[%s432_s1 + $0x70] sm:$0xf]  ;;  %v288_v1 = vld [vmem:[%s432_s1 + $0x74] sm:$0xf0]  ;;  %v287_v2 = vld [vmem:[%s432_s1 + $0x74] sm:$0xf] }
   0x2   :  { %v267_v3 = vor.u32 %v288_v1, %v266_v0  ;;  %v268_v4 = vld [vmem:[%s432_s1 + $0x78] sm:$0xf0]  ;;  %v258_v5 = vld [vmem:[%s432_s1 + $0x60] sm:$0xf]  ;;  %v286_v6 = vld [vmem:[%s432_s1 + $0x64] sm:$0xf0] }
   0x3   :  { %v271_v7 = vor.u32 %v287_v2, %v268_v4  ;;  %v285_v8 = vld [vmem:[%s432_s1 + $0x64] sm:$0xf]  ;;  %v260_v9 = vld [vmem:[%s432_s1 + $0x68] sm:$0xf0]  ;;  %v259_v10 = vor.u32 %v286_v6, %v258_v5  ;;  %v250_v12 = vld [vmem:[%s432_s1 + $0x50] sm:$0xf] }
   0x4   :  { %133 = vmatpush.bf16.msra.mxu0 %v267_v3  ;;  %v263_v11 = vor.u32 %v285_v8, %v260_v9  ;;  %v284_v13 = vld [vmem:[%s432_s1 + $0x54] sm:$0xf0]  ;;  %v283_v14 = vld [vmem:[%s432_s1 + $0x54] sm:$0xf]  ;;  %v252_v15 = vld [vmem:[%s432_s1 + $0x58] sm:$0xf0] }
   0x5   :  { %147 = vmatpush.bf16.msra.mxu1 %v271_v7  ;;  %v251_v16 = vor.u32 %v284_v13, %v250_v12  ;;  %v255_v17 = vor.u32 %v283_v14, %v252_v15  ;;  %v242_v18 = vld [vmem:[%s432_s1 + $0x40] sm:$0xf]  ;;  %v282_v19 = vld [vmem:[%s432_s1 + $0x44] sm:$0xf0]  ;;  %v281_v20 = vld [vmem:[%s432_s1 + $0x44] sm:$0xf] }
   0x6   :  { %v244_v21 = vld [vmem:[%s432_s1 + $0x48] sm:$0xf0]  ;;  %v243_v22 = vor.u32 %v282_v19, %v242_v18  ;;  %v234_v24 = vld [vmem:[%s432_s1 + $0x30] sm:$0xf]  ;;  %v280_v25 = vld [vmem:[%s432_s1 + $0x34] sm:$0xf0] }
   0x7   :  { %v247_v23 = vor.u32 %v281_v20, %v244_v21  ;;  %v279_v26 = vld [vmem:[%s432_s1 + $0x34] sm:$0xf]  ;;  %v236_v27 = vld [vmem:[%s432_s1 + $0x38] sm:$0xf0]  ;;  %v235_v28 = vor.u32 %v280_v25, %v234_v24  ;;  %v226_v30 = vld [vmem:[%s432_s1 + $0x20] sm:$0xf] }
   0x8   :  { %134 = vmatpush.bf16.msra.mxu0 %v259_v10  ;;  %v239_v29 = vor.u32 %v279_v26, %v236_v27  ;;  %v278_v31 = vld [vmem:[%s432_s1 + $0x24] sm:$0xf0]  ;;  %v277_v32 = vld [vmem:[%s432_s1 + $0x24] sm:$0xf]  ;;  %v228_v33 = vld [vmem:[%s432_s1 + $0x28] sm:$0xf0] }
   0x9   :  { %148 = vmatpush.bf16.msra.mxu1 %v263_v11  ;;  %v227_v34 = vor.u32 %v278_v31, %v226_v30  ;;  %v231_v35 = vor.u32 %v277_v32, %v228_v33  ;;  %v218_v36 = vld [vmem:[%s432_s1 + $0x10] sm:$0xf]  ;;  %v276_v37 = vld [vmem:[%s432_s1 + $0x14] sm:$0xf0]  ;;  %v275_v38 = vld [vmem:[%s432_s1 + $0x14] sm:$0xf] }
   0xa   :  { %v220_v39 = vld [vmem:[%s432_s1 + $0x18] sm:$0xf0]  ;;  %v219_v40 = vor.u32 %v276_v37, %v218_v36  ;;  %v210_v42 = vld [vmem:[%s432_s1] sm:$0xf]  ;;  %v274_v43 = vld [vmem:[%s432_s1 + $0x4] sm:$0xf0] }
   0xb   :  { %v223_v41 = vor.u32 %v275_v38, %v220_v39  ;;  %v273_v44 = vld [vmem:[%s432_s1 + $0x4] sm:$0xf]  ;;  %v212_v45 = vld [vmem:[%s432_s1 + $0x8] sm:$0xf0]  ;;  %v211_v46 = vor.u32 %v274_v43, %v210_v42  ;;  %v176_v49 = vld [vmem:[%s434_s2] sm:$0x3] }
   0xc   :  { %135 = vmatpush.bf16.msra.mxu0 %v251_v16  ;;  %v215_v47 = vor.u32 %v273_v44, %v212_v45  ;;  %v272_v48 = vld [vmem:[%s433_s0] sm:$0xff]  ;;  %v178_v51 = vperm.slane %v176_v49, 0  ;;  %v179_v53 = vperm.slane %v176_v49, 1 }
   0xd   :  { %149 = vmatpush.bf16.msra.mxu1 %v255_v17  ;;  %v186_v50 = vld [vmem:[%s435_s3] sm:$0x3] }
   0xe   :  { %v188_v54 = vperm.slane %v186_v50, 0  ;;  %v189_v56 = vperm.slane %v186_v50, 1 }
  0x10   :  { %136 = vmatpush.bf16.msra.mxu0 %v243_v22 }
  0x11   :  { %150 = vmatpush.bf16.msra.mxu1 %v247_v23 }
  0x14   :  { %137 = vmatpush.bf16.msra.mxu0 %v235_v28 }
  0x15   :  { %151 = vmatpush.bf16.msra.mxu1 %v239_v29 }
  0x18   :  { %138 = vmatpush.bf16.msra.mxu0 %v227_v34 }
  0x19   :  { %152 = vmatpush.bf16.msra.mxu1 %v231_v35 }
  0x1c   :  { %139 = vmatpush.bf16.msra.mxu0 %v219_v40 }
  0x1d   :  { %153 = vmatpush.bf16.msra.mxu1 %v223_v41 }
  0x20   :  { %140 = vmatpush.bf16.msra.mxu0 %v211_v46 }
  0x21   :  { %154 = vmatpush.bf16.msra.mxu1 %v215_v47 }
  0x23   :  { %141 = vmatmul.bf16.vlgmr.msra.gmra.mxu0 %v272_v48 }
  0x24   :  { %155 = vmatmul.bf16.vlgmr.msra.gmra.mxu1 %v272_v48 }
  0xa0   :  { %v142_v52 = vpop.f32.mrf.mxu0 }
  0xa1   :  { %v156_v55 = vpop.f32.mrf.mxu1  ;;  %v182_v57 = vmul.f32 %v178_v51, %v142_v52 }
  0xa2   :  { %v183_v58 = vmul.f32 %v179_v53, %v156_v55 }
  0xa3   :  { %v192_v59 = vadd.f32 %v188_v54, %v182_v57 }
  0xa4   :  { %v193_v60 = vadd.f32 %v189_v56, %v183_v58 }
  0xa5   :  { %196 = vst [vmem:[%s436_s4] sm:$0xff] %v192_v59 }
  0xa6   :  { %197 = vst [vmem:[%s436_s4 + $0x8] sm:$0xff] %v193_v60 }
  0xa8   :  { %v144_v61 = vpop.f32.mrf.mxu0 }
  0xa9   :  { %v158_v62 = vpop.f32.mrf.mxu1  ;;  %v184_v63 = vmul.f32 %v178_v51, %v144_v61 }
  0xaa   :  { %v185_v0 = vmul.f32 %v179_v53, %v158_v62 }
  0xab   :  { %v194_v1 = vadd.f32 %v188_v54, %v184_v63 }
  0xac   :  { %v195_v2 = vadd.f32 %v189_v56, %v185_v0 }
  0xad   :  { %198 = vst [vmem:[%s436_s4 + $0x10] sm:$0xff] %v194_v1 }
  0xae   :  { %199 = vst [vmem:[%s436_s4 + $0x18] sm:$0xff] %v195_v2 }

// kernel: resnet18_16s_forward.37
= control target key start
LH: loop header
LB: loop body
LE: loop exit
PB: predicated region body
PF: predicated region fallthrough
CT: control target
= control target key end

     0   :  { %s1428_s18 = smov 0   ;;  %s1430_s19 = smov 0   ;;  %s1687_s0 = inlined_call_operand.vmem [shape: bf16[16,2304], index: 0, kind: input, shape index: {}]   ;;  %s1688_s1 = inlined_call_operand.vmem [shape: bf16[2304,256], index: 1, kind: input, shape index: {}]   ;;  %s1689_s2 = inlined_call_operand.vmem [shape: f32[1,256], index: 2, kind: input, shape index: {}]   ;;  %s1690_s3 = inlined_call_operand.vmem [shape: f32[1,256], index: 3, kind: input, shape index: {}]   ;;  %s1691_s4 = inlined_call_operand.vmem [shape: f32[16,256], index: 4, kind: input, shape index: {}]   ;;  %s1692_s5 = inlined_call_operand.vmem [shape: f32[16,256], index: 5, kind: output, shape index: {}]  }
   0x1   :  { %s1432_s20 = smov 0   ;;  %s1434_s21 = smov 0  }
   0x2   :  { %s1436_s22 = smov 0  }
   0x3 LB: > { %s27_s23 = sadd.s32 1, %s1391_s21  ;;  %p50_p1 = scmp.ne.s32.totalorder %s1383_s19, %s1379_s18  ;;  %s1395_s22 = sphi %s1436_s22, %s15_s22   ;;  %s1391_s21 = sphi %s1434_s21, %s1696_s21   ;;  %s1387_s20 = sphi %s1432_s20, %s1695_s20   ;;  %s1383_s19 = sphi %s1430_s19, %s1694_s19   ;;  %s1379_s18 = sphi %s1428_s18, %s1693_s18  }
   0x4   : > { %p28_p0 = scmp.ge.s32.totalorder %s27_s23, 6  ;;  %p51_p2 = scmp.eq.s32.totalorder %s1395_s22, 0 }
   0x5   : > { %s43_s25 = sadd.s32 1, %s1383_s19  ;;  %p1042_p5 = scmp.ge.s32.totalorder %s1395_s22, 6 }
   0x6   : > { %s1698_s23 = smov (%p28_p0, %s27_s23), 0  ;;  %p52_p3 = por %p51_p2, %p50_p1 }
   0x7   : > { %s39_s24 = ssub.s32 %s1391_s21, %s1698_s23  ;;  %243 = sbr.rel (%p1042_p5) target bundleno = 21 (0x15), region = 28 }
   0x8   : > { %p41_p4 = scmp.eq.s32.totalorder %s39_s24, 0 }
   0xa   : > { %s1463_s26 = scalar_select %p41_p4, %s1383_s19, %s43_s25  }
   0xc   : > { %246 = sbr.rel (!%p52_p3) target bundleno = 21 (0x15), region = 32  ;;  %s248_s27 = sand.u32 (%p52_p3), 1, %s1383_s19  }
   0xd   : > { %s1261_s28 = smul.u32 (%p52_p3), 12, %s1391_s21 }
   0xe   : > { %s1314_s29 = smul.u32 (%p52_p3), 24, %s248_s27 }
   0xf   : > { %s256_s7 = scalar_lea.vmem (%p52_p3), %s1687_s0, %s1261_s28 }
  0x10   : > { %v271_v0 = vld [vmem:[%s256_s7] sm:$0xff] (%p52_p3)  ;;  %v273_v1 = vld [vmem:[%s256_s7 + $0x48] sm:$0xff] (%p52_p3)  ;;  %s250_s8 = scalar_lea.vmem (%p52_p3), [#allocation2], %s1314_s29  ;;  %v1046_v3 = vld [vmem:[%s256_s7 + $0x50] sm:$0xf] (%p52_p3) }
  0x11   : > { %v1044_v2 = vld [vmem:[%s256_s7 + $0x8] sm:$0xf]  ;;  %272 = vst [vmem:[%s250_s8] sm:$0xff] %v271_v0 }
  0x12   : > { %274 = vst [vmem:[%s250_s8 + $0xc] sm:$0xff] %v273_v1 }
  0x13   : > { %1045 = vst [vmem:[%s250_s8 + $0x8] sm:$0xf] %v1044_v2 }
  0x14   : > { %1047 = vst [vmem:[%s250_s8 + $0x14] sm:$0xf] %v1046_v3 }
  0x15 PF: > { %p1048_p6 = scmp.ge.s32.totalorder %s1395_s22, 1  ;;  %p306_p7 = scmp.lt.s32.totalorder %s1395_s22, 7 }
  0x17   : > { %p307_p8 = pnand %p1048_p6, %p306_p7 }
  0x18   : > { %s313_s9 = sand.u32 (!%p307_p8), 1, %s1379_s18   ;;  %s375_s10 = smul.u32 (!%p307_p8), 48, %s1387_s20 }
  0x19   : > { %310 = sbr.rel (%p307_p8) target bundleno = 263 (0x107), region = 62  ;;  %p1051_p10 = scmp.ne.s32.totalorder (!%p307_p8), %s1387_s20, 0 }
  0x1a   : > { %s1315_s11 = smul.u32 (!%p307_p8), 24, %s313_s9  ;;  %p377_p9 = scmp.lt.s32.totalorder (!%p307_p8), %s375_s10, 287 }
  0x1c   : > { %s1480_s16 = scalar_lea.vmem (!%p307_p8), [#allocation2], %s1315_s11 }
  0x1e   : > { %s1700_s10 = smov (!%p377_p9, %s375_s10), 287  ;;  %424 = sbr.rel (%p1051_p10) target bundleno = 40 (0x28), region = 70 }
  0x1f   : > { %s1262_s12 = sshll.u32 %s1700_s10, 3 }
  0x20   : > { %s1478_s15 = scalar_lea.vmem %s1688_s1, %s1262_s12 }
  0x23   : > { %v1397_v4 = vmov 0.0  }
  0x24   : > { %425 = vst [vmem:[%s1692_s5] sm:$0xff] %v1397_v4 }
  0x25   : > { %426 = vst [vmem:[%s1692_s5 + $0x8] sm:$0xff] %v1397_v4 }
  0x26   : > { %427 = vst [vmem:[%s1692_s5 + $0x10] sm:$0xff] %v1397_v4 }
  0x27   : > { %428 = vst [vmem:[%s1692_s5 + $0x18] sm:$0xff] %v1397_v4 }
  0x28 PF: > { %v1122_v5 = vld [vmem:[%s1478_s15 + $0x70] sm:$0xf]  ;;  %v1281_v6 = vld [vmem:[%s1478_s15 + $0x74] sm:$0xf0]  ;;  %v1114_v14 = vld [vmem:[%s1478_s15 + $0x60] sm:$0xf] }
  0x29   : > { %v1186_v7 = vld [vmem:[%s1478_s15 + $0xf0] sm:$0xf]  ;;  %v1123_v8 = vor.u32 %v1281_v6, %v1122_v5  ;;  %v1297_v9 = vld [vmem:[%s1478_s15 + $0xf4] sm:$0xf0]  ;;  %v1279_v15 = vld [vmem:[%s1478_s15 + $0x64] sm:$0xf0] }
  0x2a   : > { %v1250_v10 = vld [vmem:[%s1478_s15 + $0x170] sm:$0xf]  ;;  %v1313_v11 = vld [vmem:[%s1478_s15 + $0x174] sm:$0xf0]  ;;  %v1187_v12 = vor.u32 %v1297_v9, %v1186_v7  ;;  %v1178_v16 = vld [vmem:[%s1478_s15 + $0xe0] sm:$0xf]  ;;  %v1115_v17 = vor.u32 %v1279_v15, %v1114_v14 }
  0x2b   : > { %v1251_v13 = vor.u32 %v1313_v11, %v1250_v10  ;;  %741 = vmatpush.bf16.msra.mxu0 %v1123_v8  ;;  %v1295_v18 = vld [vmem:[%s1478_s15 + $0xe4] sm:$0xf0]  ;;  %v1242_v19 = vld [vmem:[%s1478_s15 + $0x160] sm:$0xf]  ;;  %v1106_v23 = vld [vmem:[%s1478_s15 + $0x50] sm:$0xf] }
  0x2c   : > { %v1311_v20 = vld [vmem:[%s1478_s15 + $0x164] sm:$0xf0]  ;;  %755 = vmatpush.bf16.msra.mxu1 %v1187_v12  ;;  %v1179_v21 = vor.u32 %v1295_v18, %v1178_v16  ;;  %v1277_v24 = vld [vmem:[%s1478_s15 + $0x54] sm:$0xf0]  ;;  %v1170_v25 = vld [vmem:[%s1478_s15 + $0xd0] sm:$0xf] }
  0x2d   : > { %769 = vmatpush.bf16.msra.mxu2 %v1251_v13  ;;  %v1243_v22 = vor.u32 %v1311_v20, %v1242_v19  ;;  %v1293_v26 = vld [vmem:[%s1478_s15 + $0xd4] sm:$0xf0]  ;;  %v1234_v27 = vld [vmem:[%s1478_s15 + $0x150] sm:$0xf]  ;;  %v1107_v29 = vor.u32 %v1277_v24, %v1106_v23  ;;  %v1098_v30 = vld [vmem:[%s1478_s15 + $0x40] sm:$0xf] }
  0x2e   : > { %v1309_v28 = vld [vmem:[%s1478_s15 + $0x154] sm:$0xf0]  ;;  %v1275_v31 = vld [vmem:[%s1478_s15 + $0x44] sm:$0xf0]  ;;  %v1171_v32 = vor.u32 %v1293_v26, %v1170_v25  ;;  %v1162_v34 = vld [vmem:[%s1478_s15 + $0xc0] sm:$0xf] }
  0x2f   : > { %742 = vmatpush.bf16.msra.mxu0 %v1115_v17  ;;  %v1235_v33 = vor.u32 %v1309_v28, %v1234_v27  ;;  %v1280_v35 = vld [vmem:[%s1478_s15 + $0x74] sm:$0xf]  ;;  %v1124_v36 = vld [vmem:[%s1478_s15 + $0x78] sm:$0xf0]  ;;  %v1291_v37 = vld [vmem:[%s1478_s15 + $0xc4] sm:$0xf0]  ;;  %v1099_v42 = vor.u32 %v1275_v31, %v1098_v30 }
  0x30   : > { %756 = vmatpush.bf16.msra.mxu1 %v1179_v21  ;;  %v1226_v38 = vld [vmem:[%s1478_s15 + $0x140] sm:$0xf]  ;;  %v1307_v39 = vld [vmem:[%s1478_s15 + $0x144] sm:$0xf0]  ;;  %v1127_v40 = vor.u32 %v1280_v35, %v1124_v36  ;;  %v1278_v41 = vld [vmem:[%s1478_s15 + $0x64] sm:$0xf]  ;;  %v1163_v46 = vor.u32 %v1291_v37, %v1162_v34 }
  0x31   : > { %770 = vmatpush.bf16.msra.mxu2 %v1243_v22  ;;  %v1090_v43 = vld [vmem:[%s1478_s15 + $0x30] sm:$0xf]  ;;  %v1273_v44 = vld [vmem:[%s1478_s15 + $0x34] sm:$0xf0]  ;;  %v1116_v45 = vld [vmem:[%s1478_s15 + $0x68] sm:$0xf0]  ;;  %v1227_v47 = vor.u32 %v1307_v39, %v1226_v38 }
  0x32   : > { %783 = vmatpush.bf16.msra.mxu3 %v1127_v40  ;;  %v1154_v48 = vld [vmem:[%s1478_s15 + $0xb0] sm:$0xf]  ;;  %v1289_v49 = vld [vmem:[%s1478_s15 + $0xb4] sm:$0xf0]  ;;  %v1119_v51 = vor.u32 %v1278_v41, %v1116_v45  ;;  %v1276_v53 = vld [vmem:[%s1478_s15 + $0x54] sm:$0xf]  ;;  %v1091_v55 = vor.u32 %v1273_v44, %v1090_v43 }
  0x33   : > { %743 = vmatpush.bf16.msra.mxu0 %v1107_v29  ;;  %v1218_v50 = vld [vmem:[%s1478_s15 + $0x130] sm:$0xf]  ;;  %v1305_v52 = vld [vmem:[%s1478_s15 + $0x134] sm:$0xf0]  ;;  %v1108_v54 = vld [vmem:[%s1478_s15 + $0x58] sm:$0xf0]  ;;  %v1155_v59 = vor.u32 %v1289_v49, %v1154_v48 }
  0x34   : > { %757 = vmatpush.bf16.msra.mxu1 %v1171_v32  ;;  %v1082_v56 = vld [vmem:[%s1478_s15 + $0x20] sm:$0xf]  ;;  %v1271_v57 = vld [vmem:[%s1478_s15 + $0x24] sm:$0xf0]  ;;  %v1111_v58 = vor.u32 %v1276_v53, %v1108_v54  ;;  %v1219_v60 = vor.u32 %v1305_v52, %v1218_v50  ;;  %v1274_v62 = vld [vmem:[%s1478_s15 + $0x44] sm:$0xf] }
  0x35   : > { %771 = vmatpush.bf16.msra.mxu2 %v1235_v33  ;;  %v1146_v61 = vld [vmem:[%s1478_s15 + $0xa0] sm:$0xf]  ;;  %v1100_v63 = vld [vmem:[%s1478_s15 + $0x48] sm:$0xf0]  ;;  %v1287_v0 = vld [vmem:[%s1478_s15 + $0xa4] sm:$0xf0]  ;;  %v1083_v3 = vor.u32 %v1271_v57, %v1082_v56 }
  0x36   : > { %784 = vmatpush.bf16.msra.mxu3 %v1119_v51  ;;  %v1210_v1 = vld [vmem:[%s1478_s15 + $0x120] sm:$0xf]  ;;  %v1303_v2 = vld [vmem:[%s1478_s15 + $0x124] sm:$0xf0]  ;;  %v1074_v4 = vld [vmem:[%s1478_s15 + $0x10] sm:$0xf]  ;;  %v1103_v6 = vor.u32 %v1274_v62, %v1100_v63  ;;  %v1147_v7 = vor.u32 %v1287_v0, %v1146_v61 }
  0x37   : > { %744 = vmatpush.bf16.msra.mxu0 %v1099_v42  ;;  %v1269_v5 = vld [vmem:[%s1478_s15 + $0x14] sm:$0xf0]  ;;  %v1211_v8 = vor.u32 %v1303_v2, %v1210_v1  ;;  %v1138_v9 = vld [vmem:[%s1478_s15 + $0x90] sm:$0xf]  ;;  %v1272_v10 = vld [vmem:[%s1478_s15 + $0x34] sm:$0xf] }
  0x38   : > { %758 = vmatpush.bf16.msra.mxu1 %v1163_v46  ;;  %v1092_v11 = vld [vmem:[%s1478_s15 + $0x38] sm:$0xf0]  ;;  %v1285_v12 = vld [vmem:[%s1478_s15 + $0x94] sm:$0xf0]  ;;  %v1202_v13 = vld [vmem:[%s1478_s15 + $0x110] sm:$0xf]  ;;  %v1075_v15 = vor.u32 %v1269_v5, %v1074_v4 }
  0x39   : > { %772 = vmatpush.bf16.msra.mxu2 %v1227_v47  ;;  %v1301_v14 = vld [vmem:[%s1478_s15 + $0x114] sm:$0xf0]  ;;  %v1066_v16 = vld [vmem:[%s1478_s15] sm:$0xf]  ;;  %v1267_v17 = vld [vmem:[%s1478_s15 + $0x4] sm:$0xf0]  ;;  %v1095_v19 = vor.u32 %v1272_v10, %v1092_v11  ;;  %v1139_v20 = vor.u32 %v1285_v12, %v1138_v9 }
  0x3a   : > { %785 = vmatpush.bf16.msra.mxu3 %v1111_v58  ;;  %v1130_v18 = vld [vmem:[%s1478_s15 + $0x80] sm:$0xf]  ;;  %v1203_v21 = vor.u32 %v1301_v14, %v1202_v13  ;;  %v1283_v22 = vld [vmem:[%s1478_s15 + $0x84] sm:$0xf0]  ;;  %v1270_v23 = vld [vmem:[%s1478_s15 + $0x24] sm:$0xf]  ;;  %v1067_v31 = vor.u32 %v1267_v17, %v1066_v16 }
  0x3b   : > { %745 = vmatpush.bf16.msra.mxu0 %v1091_v55  ;;  %v1084_v24 = vld [vmem:[%s1478_s15 + $0x28] sm:$0xf0]  ;;  %v1194_v25 = vld [vmem:[%s1478_s15 + $0x100] sm:$0xf]  ;;  %v1299_v26 = vld [vmem:[%s1478_s15 + $0x104] sm:$0xf0]  ;;  %v1131_v36 = vor.u32 %v1283_v22, %v1130_v18 }
  0x3c   : > { %759 = vmatpush.bf16.msra.mxu1 %v1155_v59  ;;  %v1296_v27 = vld [vmem:[%s1478_s15 + $0xf4] sm:$0xf]  ;;  %v1188_v28 = vld [vmem:[%s1478_s15 + $0xf8] sm:$0xf0]  ;;  %v1062_v32 = vld [vmem:[%s1480_s16 + $0x8] sm:$0xf]  ;;  %v1087_v33 = vor.u32 %v1270_v23, %v1084_v24  ;;  %v1195_v37 = vor.u32 %v1299_v26, %v1194_v25 }
  0x3d   : > { %773 = vmatpush.bf16.msra.mxu2 %v1219_v60  ;;  %v1312_v29 = vld [vmem:[%s1478_s15 + $0x174] sm:$0xf]  ;;  %v1252_v30 = vld [vmem:[%s1478_s15 + $0x178] sm:$0xf0]  ;;  %v1054_v34 = vld [vmem:[%s1480_s16] sm:$0xf]  ;;  %v1191_v41 = vor.u32 %v1296_v27, %v1188_v28 }
  0x3e   : > { %786 = vmatpush.bf16.msra.mxu3 %v1103_v6  ;;  %v1264_v35 = vld [vmem:[%s1480_s16 + $0x8] sm:$0xf0]  ;;  %v1265_v38 = vld [vmem:[%s1480_s16 + $0x10] sm:$0xf0]  ;;  %v1263_v39 = vld [vmem:[%s1480_s16 + $0x4] sm:$0xf]  ;;  %v1255_v42 = vor.u32 %v1312_v29, %v1252_v30 }
  0x3f   : > { %746 = vmatpush.bf16.msra.mxu0 %v1083_v3  ;;  %v1056_v40 = vld [vmem:[%s1480_s16 + $0xc] sm:$0xf0]  ;;  %v1294_v43 = vld [vmem:[%s1478_s15 + $0xe4] sm:$0xf]  ;;  %v1268_v44 = vld [vmem:[%s1478_s15 + $0x14] sm:$0xf]  ;;  %v1055_v49 = vor.u32 %v1264_v35, %v1054_v34  ;;  %v1571_v50 = vor.u32 %v1265_v38, %v1062_v32 }
  0x40   : > { %760 = vmatpush.bf16.msra.mxu1 %v1147_v7  ;;  %v1076_v45 = vld [vmem:[%s1478_s15 + $0x18] sm:$0xf0]  ;;  %v1180_v46 = vld [vmem:[%s1478_s15 + $0xe8] sm:$0xf0]  ;;  %v1310_v47 = vld [vmem:[%s1478_s15 + $0x164] sm:$0xf]  ;;  %v1573_v51 = vor.u32 %v1263_v39, %v1056_v40 }
  0x41   : > { %774 = vmatpush.bf16.msra.mxu2 %v1211_v8  ;;  %v1244_v48 = vld [vmem:[%s1478_s15 + $0x168] sm:$0xf0]  ;;  %v1079_v52 = vor.u32 %v1268_v44, %v1076_v45  ;;  %v1183_v53 = vor.u32 %v1294_v43, %v1180_v46  ;;  %v1292_v55 = vld [vmem:[%s1478_s15 + $0xd4] sm:$0xf]  ;;  %v1266_v56 = vld [vmem:[%s1478_s15 + $0x4] sm:$0xf] }
  0x42   : > { %787 = vmatpush.bf16.msra.mxu3 %v1095_v19  ;;  %v1247_v54 = vor.u32 %v1310_v47, %v1244_v48  ;;  %v1068_v57 = vld [vmem:[%s1478_s15 + $0x8] sm:$0xf0]  ;;  %v1172_v58 = vld [vmem:[%s1478_s15 + $0xd8] sm:$0xf0]  ;;  %v1308_v59 = vld [vmem:[%s1478_s15 + $0x154] sm:$0xf] }
  0x43   : > { %747 = vmatpush.bf16.msra.mxu0 %v1075_v15  ;;  %v1236_v60 = vld [vmem:[%s1478_s15 + $0x158] sm:$0xf0]  ;;  %v1071_v61 = vor.u32 %v1266_v56, %v1068_v57  ;;  %v1175_v62 = vor.u32 %v1292_v55, %v1172_v58  ;;  %v1290_v0 = vld [vmem:[%s1478_s15 + $0xc4] sm:$0xf]  ;;  %v1164_v1 = vld [vmem:[%s1478_s15 + $0xc8] sm:$0xf0] }
  0x44   : > { %761 = vmatpush.bf16.msra.mxu1 %v1139_v20  ;;  %v1239_v63 = vor.u32 %v1308_v59, %v1236_v60  ;;  %v1306_v2 = vld [vmem:[%s1478_s15 + $0x144] sm:$0xf]  ;;  %v1228_v3 = vld [vmem:[%s1478_s15 + $0x148] sm:$0xf0]  ;;  %v1167_v4 = vor.u32 %v1290_v0, %v1164_v1  ;;  %v1288_v6 = vld [vmem:[%s1478_s15 + $0xb4] sm:$0xf] }
  0x45   : > { %775 = vmatpush.bf16.msra.mxu2 %v1203_v21  ;;  %v1231_v5 = vor.u32 %v1306_v2, %v1228_v3  ;;  %v1156_v7 = vld [vmem:[%s1478_s15 + $0xb8] sm:$0xf0]  ;;  %v1304_v8 = vld [vmem:[%s1478_s15 + $0x134] sm:$0xf]  ;;  %v1286_v12 = vld [vmem:[%s1478_s15 + $0xa4] sm:$0xf] }
  0x46   : > { %788 = vmatpush.bf16.msra.mxu3 %v1087_v33  ;;  %v1220_v9 = vld [vmem:[%s1478_s15 + $0x138] sm:$0xf0]  ;;  %v1159_v10 = vor.u32 %v1288_v6, %v1156_v7  ;;  %v1148_v13 = vld [vmem:[%s1478_s15 + $0xa8] sm:$0xf0]  ;;  %v1302_v14 = vld [vmem:[%s1478_s15 + $0x124] sm:$0xf] }
  0x47   : > { %748 = vmatpush.bf16.msra.mxu0 %v1067_v31  ;;  %v1223_v11 = vor.u32 %v1304_v8, %v1220_v9  ;;  %v1212_v15 = vld [vmem:[%s1478_s15 + $0x128] sm:$0xf0]  ;;  %v1151_v16 = vor.u32 %v1286_v12, %v1148_v13  ;;  %v1284_v18 = vld [vmem:[%s1478_s15 + $0x94] sm:$0xf]  ;;  %v1140_v19 = vld [vmem:[%s1478_s15 + $0x98] sm:$0xf0] }
  0x48   : > { %762 = vmatpush.bf16.msra.mxu1 %v1131_v36  ;;  %v1215_v17 = vor.u32 %v1302_v14, %v1212_v15  ;;  %v1300_v20 = vld [vmem:[%s1478_s15 + $0x114] sm:$0xf]  ;;  %v1204_v21 = vld [vmem:[%s1478_s15 + $0x118] sm:$0xf0]  ;;  %v1143_v22 = vor.u32 %v1284_v18, %v1140_v19  ;;  %v1282_v24 = vld [vmem:[%s1478_s15 + $0x84] sm:$0xf] }
  0x49   : > { %776 = vmatpush.bf16.msra.mxu2 %v1195_v37  ;;  %v1207_v23 = vor.u32 %v1300_v20, %v1204_v21  ;;  %v1132_v25 = vld [vmem:[%s1478_s15 + $0x88] sm:$0xf0]  ;;  %v1298_v26 = vld [vmem:[%s1478_s15 + $0x104] sm:$0xf]  ;;  %v431_v40 = vld [vmem:[%s1692_s5 + $0x10] sm:$0xff]  ;;  %p1256_p11 = scmp.ne.s32.totalorder %s1387_s20, 5 }
  0x4a   : > { %749 = vmatmul.bf16.vlgmr.msra.gmra.mxu0 %v1055_v49  ;;  %789 = vmatpush.bf16.msra.mxu3 %v1079_v52  ;;  %v1196_v27 = vld [vmem:[%s1478_s15 + $0x108] sm:$0xf0]  ;;  %v1135_v28 = vor.u32 %v1282_v24, %v1132_v25  ;;  %v429_v33 = vld [vmem:[%s1692_s5] sm:$0xff] }
  0x4b   : > { %797 = vmatpush.bf16.msrb.mxu0 %v1191_v41  ;;  %763 = vmatmul.bf16.vlgmr.msra.gmra.mxu1 %v1573_v51  ;;  %v1199_v29 = vor.u32 %v1298_v26, %v1196_v27  ;;  %v430_v48 = vld [vmem:[%s1692_s5 + $0x8] sm:$0xff] }
  0x4c   : > { %811 = vmatpush.bf16.msrb.mxu1 %v1255_v42  ;;  %777 = vmatmul.bf16.vlgmr.msra.gmra.mxu2 %v1571_v50 }
  0x4e   : > { %790 = vmatpush.bf16.msra.mxu3 %v1071_v61 }
  0x4f   : > { %798 = vmatpush.bf16.msrb.mxu0 %v1183_v53 }
  0x50   : > { %812 = vmatpush.bf16.msrb.mxu1 %v1247_v54  ;;  %v432_v54 = vld [vmem:[%s1692_s5 + $0x18] sm:$0xff] }
  0x51   : > { %791 = vmatmul.bf16.vlgmr.msra.gmra.mxu3 %v1055_v49 }
  0x53   : > { %799 = vmatpush.bf16.msrb.mxu0 %v1175_v62 }
  0x54   : > { %813 = vmatpush.bf16.msrb.mxu1 %v1239_v63 }
  0x57   : > { %800 = vmatpush.bf16.msrb.mxu0 %v1167_v4 }
  0x58   : > { %814 = vmatpush.bf16.msrb.mxu1 %v1231_v5 }
  0x5b   : > { %801 = vmatpush.bf16.msrb.mxu0 %v1159_v10 }
  0x5c   : > { %815 = vmatpush.bf16.msrb.mxu1 %v1223_v11 }
  0x5f   : > { %802 = vmatpush.bf16.msrb.mxu0 %v1151_v16 }
  0x60   : > { %816 = vmatpush.bf16.msrb.mxu1 %v1215_v17 }
  0x63   : > { %803 = vmatpush.bf16.msrb.mxu0 %v1143_v22 }
  0x64   : > { %817 = vmatpush.bf16.msrb.mxu1 %v1207_v23 }
  0x67   : > { %804 = vmatpush.bf16.msrb.mxu0 %v1135_v28 }
  0x68   : > { %818 = vmatpush.bf16.msrb.mxu1 %v1199_v29 }
  0x6a   : > { %805 = vmatmul.bf16.vlgmr.msrb.gmra.mxu0 %v1573_v51 }
  0x6b   : > { %819 = vmatmul.bf16.vlgmr.msrb.gmra.mxu1 %v1571_v50 }
  0xc7   : > { %v750_v30 = vpop.f32.mrf.mxu0 }
  0xc8   : > { %v764_v31 = vpop.f32.mrf.mxu1 }
  0xc9   : > { %v765_v32 = vadd.f32 %v764_v31, %v750_v30 }
  0xcf   : > { %v778_v34 = vpop.f32.mrf.mxu2  ;;  %v752_v36 = vpop.f32.mrf.mxu0 }
  0xd0   : > { %v779_v35 = vadd.f32 %v778_v34, %v765_v32  ;;  %v766_v37 = vpop.f32.mrf.mxu1 }
  0xd1   : > { %v767_v39 = vadd.f32 %v766_v37, %v752_v36 }
  0xd2   : > { %v825_v38 = vadd.f32 %v779_v35, %v429_v33 }
  0xd4   : > { %829 = vst [vmem:[%s1692_s5] sm:$0xff] %v825_v38  ;;  %v792_v44 = vpop.f32.mrf.mxu3 }
  0xd7   : > { %v780_v41 = vpop.f32.mrf.mxu2 }
  0xd8   : > { %v781_v42 = vadd.f32 %v780_v41, %v767_v39 }
  0xda   : > { %v827_v43 = vadd.f32 %v781_v42, %v431_v40 }
  0xdc   : > { %831 = vst [vmem:[%s1692_s5 + $0x10] sm:$0xff] %v827_v43  ;;  %v794_v51 = vpop.f32.mrf.mxu3 }
  0xe7   : > { %v806_v45 = vpop.f32.mrf.mxu0 }
  0xe8   : > { %v820_v46 = vpop.f32.mrf.mxu1  ;;  %v807_v47 = vadd.f32 %v806_v45, %v792_v44 }
  0xea   : > { %v821_v49 = vadd.f32 %v820_v46, %v807_v47 }
  0xec   : > { %v826_v50 = vadd.f32 %v821_v49, %v430_v48 }
  0xee   : > { %830 = vst [vmem:[%s1692_s5 + $0x8] sm:$0xff] %v826_v50 }
  0xef   : > { %v808_v52 = vpop.f32.mrf.mxu0 }
  0xf0   : > { %v809_v53 = vadd.f32 %v808_v52, %v794_v51  ;;  %v822_v55 = vpop.f32.mrf.mxu1 }
  0xf2   : > { %v823_v56 = vadd.f32 %v822_v55, %v809_v53  ;;  %836 = sbr.rel (%p1256_p11) target bundleno = 263 (0x107), region = 74 }
  0xf4   : > { %v828_v57 = vadd.f32 %v823_v56, %v432_v54 }
  0xf6   : > { %832 = vst [vmem:[%s1692_s5 + $0x18] sm:$0xff] %v828_v57 }
  0xf7   : > { %v837_v58 = vld [vmem:[%s1692_s5] sm:$0xff]  ;;  %v838_v63 = vld [vmem:[%s1692_s5 + $0x8] sm:$0xff]  ;;  %v839_v2 = vld [vmem:[%s1692_s5 + $0x10] sm:$0xff] }
  0xf8   : > { %v841_v59 = vld [vmem:[%s1689_s2] sm:$0x3]  ;;  %v862_v8 = vld [vmem:[%s1691_s4 + $0x8] sm:$0xff]  ;;  %v863_v9 = vld [vmem:[%s1691_s4 + $0x10] sm:$0xff] }
  0xf9   : > { %v851_v60 = vld [vmem:[%s1690_s3] sm:$0x3]  ;;  %v843_v61 = vperm.slane %v841_v59, 0  ;;  %v844_v0 = vperm.slane %v841_v59, 1  ;;  %v864_v14 = vld [vmem:[%s1691_s4 + $0x18] sm:$0xff] }
  0xfa   : > { %v853_v62 = vperm.slane %v851_v60, 0  ;;  %v854_v1 = vperm.slane %v851_v60, 1  ;;  %v861_v7 = vld [vmem:[%s1691_s4] sm:$0xff] }
  0xfb   : > { %v847_v3 = vmul.f32 %v843_v61, %v837_v58  ;;  %v848_v4 = vmul.f32 %v844_v0, %v838_v63  ;;  %v849_v5 = vmul.f32 %v843_v61, %v839_v2 }
  0xfd   : > { %v840_v6 = vld [vmem:[%s1692_s5 + $0x18] sm:$0xff]  ;;  %v857_v11 = vadd.f32 %v853_v62, %v847_v3  ;;  %v858_v12 = vadd.f32 %v854_v1, %v848_v4  ;;  %v859_v13 = vadd.f32 %v853_v62, %v849_v5 }
  0xfe   : > { %v850_v10 = vmul.f32 %v844_v0, %v840_v6 }
  0xff   : > { %v865_v16 = vadd.f32 %v861_v7, %v857_v11  ;;  %v866_v17 = vadd.f32 %v862_v8, %v858_v12  ;;  %v867_v18 = vadd.f32 %v863_v9, %v859_v13 }
 0x100   : > { %v860_v15 = vadd.f32 %v854_v1, %v850_v10 }
 0x101   : > { %v869_v20 = vmax.f32 %v865_v16, 0.0  ;;  %v870_v21 = vmax.f32 %v866_v17, 0.0  ;;  %v871_v22 = vmax.f32 %v867_v18, 0.0 }
 0x102   : > { %v868_v19 = vadd.f32 %v864_v14, %v860_v15 }
 0x103   : > { %873 = vst [vmem:[%s1692_s5] sm:$0xff] %v869_v20 }
 0x104   : > { %v872_v23 = vmax.f32 %v868_v19, 0.0  ;;  %874 = vst [vmem:[%s1692_s5 + $0x8] sm:$0xff] %v870_v21 }
 0x105   : > { %875 = vst [vmem:[%s1692_s5 + $0x10] sm:$0xff] %v871_v22 }
 0x106   : > { %876 = vst [vmem:[%s1692_s5 + $0x18] sm:$0xff] %v872_v23 }
 0x107 PF: > { %s15_s22 = sadd.s32 1, %s1395_s22   ;;  %s1693_s18 = smov %s1383_s19 }
 0x108   : > { %p12_p12 = scmp.ge.s32.totalorder %s15_s22, 8   ;;  %s1694_s19 = smov %s1463_s26 }
 0x109   : > { %s1695_s20 = smov %s1391_s21  ;;  %s1696_s21 = smov %s1698_s23 }
 0x10a   :  { %14 = sbr.rel (!%p12_p12) target bundleno = 3 (0x3), region = 127 }

// kernel: resnet18_16s_forward.38
= control target key start
LH: loop header
LB: loop body
LE: loop exit
PB: predicated region body
PF: predicated region fallthrough
CT: control target
= control target key end

     0   :  { %s1325_s15 = smov 0   ;;  %s1327_s16 = smov 0   ;;  %s1572_s0 = inlined_call_operand.vmem [shape: bf16[16,2304], index: 0, kind: input, shape index: {}]   ;;  %s1573_s1 = inlined_call_operand.vmem [shape: bf16[2304,256], index: 1, kind: input, shape index: {}]   ;;  %s1574_s2 = inlined_call_operand.vmem [shape: f32[1,256], index: 2, kind: input, shape index: {}]   ;;  %s1575_s3 = inlined_call_operand.vmem [shape: f32[1,256], index: 3, kind: input, shape index: {}]   ;;  %s1576_s4 = inlined_call_operand.vmem [shape: f32[16,256], index: 4, kind: output, shape index: {}]  }
   0x1   :  { %s1329_s17 = smov 0   ;;  %s1331_s18 = smov 0  }
   0x2   :  { %s1333_s19 = smov 0  }
   0x3 LB: > { %s26_s20 = sadd.s32 1, %s1293_s18  ;;  %p49_p1 = scmp.ne.s32.totalorder %s1285_s16, %s1281_s15  ;;  %s1297_s19 = sphi %s1333_s19, %s14_s19   ;;  %s1293_s18 = sphi %s1331_s18, %s1580_s18   ;;  %s1289_s17 = sphi %s1329_s17, %s1579_s17   ;;  %s1285_s16 = sphi %s1327_s16, %s1578_s16   ;;  %s1281_s15 = sphi %s1325_s15, %s1577_s15  }
   0x4   : > { %p27_p0 = scmp.ge.s32.totalorder %s26_s20, 6  ;;  %p50_p2 = scmp.eq.s32.totalorder %s1297_s19, 0 }
   0x5   : > { %s42_s22 = sadd.s32 1, %s1285_s16  ;;  %p944_p5 = scmp.ge.s32.totalorder %s1297_s19, 6 }
   0x6   : > { %s1582_s20 = smov (%p27_p0, %s26_s20), 0  ;;  %p51_p3 = por %p50_p2, %p49_p1 }
   0x7   : > { %s38_s21 = ssub.s32 %s1293_s18, %s1582_s20  ;;  %199 = sbr.rel (%p944_p5) target bundleno = 21 (0x15), region = 24 }
   0x8   : > { %p40_p4 = scmp.eq.s32.totalorder %s38_s21, 0 }
   0xa   : > { %s1360_s23 = scalar_select %p40_p4, %s1285_s16, %s42_s22  }
   0xc   : > { %202 = sbr.rel (!%p51_p3) target bundleno = 21 (0x15), region = 28  ;;  %s204_s24 = sand.u32 (%p51_p3), 1, %s1285_s16  }
   0xd   : > { %s1163_s25 = smul.u32 (%p51_p3), 12, %s1293_s18 }
   0xe   : > { %s1216_s26 = smul.u32 (%p51_p3), 24, %s204_s24 }
   0xf   : > { %s212_s29 = scalar_lea.vmem (%p51_p3), %s1572_s0, %s1163_s25 }
  0x10   : > { %v227_v0 = vld [vmem:[%s212_s29] sm:$0xff] (%p51_p3)  ;;  %v229_v1 = vld [vmem:[%s212_s29 + $0x48] sm:$0xff] (%p51_p3)  ;;  %s206_s30 = scalar_lea.vmem (%p51_p3), [#allocation2], %s1216_s26  ;;  %v948_v3 = vld [vmem:[%s212_s29 + $0x50] sm:$0xf] (%p51_p3) }
  0x11   : > { %v946_v2 = vld [vmem:[%s212_s29 + $0x8] sm:$0xf]  ;;  %228 = vst [vmem:[%s206_s30] sm:$0xff] %v227_v0 }
  0x12   : > { %230 = vst [vmem:[%s206_s30 + $0xc] sm:$0xff] %v229_v1 }
  0x13   : > { %947 = vst [vmem:[%s206_s30 + $0x8] sm:$0xf] %v946_v2 }
  0x14   : > { %949 = vst [vmem:[%s206_s30 + $0x14] sm:$0xf] %v948_v3 }
  0x15 PF: > { %p950_p6 = scmp.ge.s32.totalorder %s1297_s19, 1  ;;  %p262_p7 = scmp.lt.s32.totalorder %s1297_s19, 7 }
  0x17   : > { %p263_p8 = pnand %p950_p6, %p262_p7 }
  0x18   : > { %s269_s5 = sand.u32 (!%p263_p8), 1, %s1281_s15   ;;  %s319_s6 = smul.u32 (!%p263_p8), 48, %s1289_s17 }
  0x19   : > { %266 = sbr.rel (%p263_p8) target bundleno = 261 (0x105), region = 58  ;;  %p953_p10 = scmp.ne.s32.totalorder (!%p263_p8), %s1289_s17, 0 }
  0x1a   : > { %s1217_s7 = smul.u32 (!%p263_p8), 24, %s269_s5  ;;  %p321_p9 = scmp.lt.s32.totalorder (!%p263_p8), %s319_s6, 287 }
  0x1c   : > { %s1377_s12 = scalar_lea.vmem (!%p263_p8), [#allocation2], %s1217_s7 }
  0x1e   : > { %s1584_s6 = smov (!%p321_p9, %s319_s6), 287  ;;  %356 = sbr.rel (%p953_p10) target bundleno = 40 (0x28), region = 66 }
  0x1f   : > { %s1164_s8 = sshll.u32 %s1584_s6, 3 }
  0x20   : > { %s1375_s11 = scalar_lea.vmem %s1573_s1, %s1164_s8 }
  0x23   : > { %v1299_v4 = vmov 0.0  }
  0x24   : > { %357 = vst [vmem:[%s1576_s4] sm:$0xff] %v1299_v4 }
  0x25   : > { %358 = vst [vmem:[%s1576_s4 + $0x8] sm:$0xff] %v1299_v4 }
  0x26   : > { %359 = vst [vmem:[%s1576_s4 + $0x10] sm:$0xff] %v1299_v4 }
  0x27   : > { %360 = vst [vmem:[%s1576_s4 + $0x18] sm:$0xff] %v1299_v4 }
  0x28 PF: > { %v1024_v5 = vld [vmem:[%s1375_s11 + $0x70] sm:$0xf]  ;;  %v1183_v6 = vld [vmem:[%s1375_s11 + $0x74] sm:$0xf0]  ;;  %v1016_v14 = vld [vmem:[%s1375_s11 + $0x60] sm:$0xf] }
  0x29   : > { %v1088_v7 = vld [vmem:[%s1375_s11 + $0xf0] sm:$0xf]  ;;  %v1025_v8 = vor.u32 %v1183_v6, %v1024_v5  ;;  %v1199_v9 = vld [vmem:[%s1375_s11 + $0xf4] sm:$0xf0]  ;;  %v1181_v15 = vld [vmem:[%s1375_s11 + $0x64] sm:$0xf0] }
  0x2a   : > { %v1152_v10 = vld [vmem:[%s1375_s11 + $0x170] sm:$0xf]  ;;  %v1215_v11 = vld [vmem:[%s1375_s11 + $0x174] sm:$0xf0]  ;;  %v1089_v12 = vor.u32 %v1199_v9, %v1088_v7  ;;  %v1080_v16 = vld [vmem:[%s1375_s11 + $0xe0] sm:$0xf]  ;;  %v1017_v17 = vor.u32 %v1181_v15, %v1016_v14 }
  0x2b   : > { %v1153_v13 = vor.u32 %v1215_v11, %v1152_v10  ;;  %673 = vmatpush.bf16.msra.mxu0 %v1025_v8  ;;  %v1197_v18 = vld [vmem:[%s1375_s11 + $0xe4] sm:$0xf0]  ;;  %v1144_v19 = vld [vmem:[%s1375_s11 + $0x160] sm:$0xf]  ;;  %v1008_v23 = vld [vmem:[%s1375_s11 + $0x50] sm:$0xf] }
  0x2c   : > { %v1213_v20 = vld [vmem:[%s1375_s11 + $0x164] sm:$0xf0]  ;;  %687 = vmatpush.bf16.msra.mxu1 %v1089_v12  ;;  %v1081_v21 = vor.u32 %v1197_v18, %v1080_v16  ;;  %v1179_v24 = vld [vmem:[%s1375_s11 + $0x54] sm:$0xf0]  ;;  %v1072_v25 = vld [vmem:[%s1375_s11 + $0xd0] sm:$0xf] }
  0x2d   : > { %701 = vmatpush.bf16.msra.mxu2 %v1153_v13  ;;  %v1145_v22 = vor.u32 %v1213_v20, %v1144_v19  ;;  %v1195_v26 = vld [vmem:[%s1375_s11 + $0xd4] sm:$0xf0]  ;;  %v1136_v27 = vld [vmem:[%s1375_s11 + $0x150] sm:$0xf]  ;;  %v1009_v29 = vor.u32 %v1179_v24, %v1008_v23  ;;  %v1000_v30 = vld [vmem:[%s1375_s11 + $0x40] sm:$0xf] }
  0x2e   : > { %v1211_v28 = vld [vmem:[%s1375_s11 + $0x154] sm:$0xf0]  ;;  %v1177_v31 = vld [vmem:[%s1375_s11 + $0x44] sm:$0xf0]  ;;  %v1073_v32 = vor.u32 %v1195_v26, %v1072_v25  ;;  %v1064_v34 = vld [vmem:[%s1375_s11 + $0xc0] sm:$0xf] }
  0x2f   : > { %674 = vmatpush.bf16.msra.mxu0 %v1017_v17  ;;  %v1137_v33 = vor.u32 %v1211_v28, %v1136_v27  ;;  %v1182_v35 = vld [vmem:[%s1375_s11 + $0x74] sm:$0xf]  ;;  %v1026_v36 = vld [vmem:[%s1375_s11 + $0x78] sm:$0xf0]  ;;  %v1193_v37 = vld [vmem:[%s1375_s11 + $0xc4] sm:$0xf0]  ;;  %v1001_v42 = vor.u32 %v1177_v31, %v1000_v30 }
  0x30   : > { %688 = vmatpush.bf16.msra.mxu1 %v1081_v21  ;;  %v1128_v38 = vld [vmem:[%s1375_s11 + $0x140] sm:$0xf]  ;;  %v1209_v39 = vld [vmem:[%s1375_s11 + $0x144] sm:$0xf0]  ;;  %v1029_v40 = vor.u32 %v1182_v35, %v1026_v36  ;;  %v1180_v41 = vld [vmem:[%s1375_s11 + $0x64] sm:$0xf]  ;;  %v1065_v46 = vor.u32 %v1193_v37, %v1064_v34 }
  0x31   : > { %702 = vmatpush.bf16.msra.mxu2 %v1145_v22  ;;  %v992_v43 = vld [vmem:[%s1375_s11 + $0x30] sm:$0xf]  ;;  %v1175_v44 = vld [vmem:[%s1375_s11 + $0x34] sm:$0xf0]  ;;  %v1018_v45 = vld [vmem:[%s1375_s11 + $0x68] sm:$0xf0]  ;;  %v1129_v47 = vor.u32 %v1209_v39, %v1128_v38 }
  0x32   : > { %715 = vmatpush.bf16.msra.mxu3 %v1029_v40  ;;  %v1056_v48 = vld [vmem:[%s1375_s11 + $0xb0] sm:$0xf]  ;;  %v1191_v49 = vld [vmem:[%s1375_s11 + $0xb4] sm:$0xf0]  ;;  %v1021_v51 = vor.u32 %v1180_v41, %v1018_v45  ;;  %v1178_v53 = vld [vmem:[%s1375_s11 + $0x54] sm:$0xf]  ;;  %v993_v55 = vor.u32 %v1175_v44, %v992_v43 }
  0x33   : > { %675 = vmatpush.bf16.msra.mxu0 %v1009_v29  ;;  %v1120_v50 = vld [vmem:[%s1375_s11 + $0x130] sm:$0xf]  ;;  %v1207_v52 = vld [vmem:[%s1375_s11 + $0x134] sm:$0xf0]  ;;  %v1010_v54 = vld [vmem:[%s1375_s11 + $0x58] sm:$0xf0]  ;;  %v1057_v59 = vor.u32 %v1191_v49, %v1056_v48 }
  0x34   : > { %689 = vmatpush.bf16.msra.mxu1 %v1073_v32  ;;  %v984_v56 = vld [vmem:[%s1375_s11 + $0x20] sm:$0xf]  ;;  %v1173_v57 = vld [vmem:[%s1375_s11 + $0x24] sm:$0xf0]  ;;  %v1013_v58 = vor.u32 %v1178_v53, %v1010_v54  ;;  %v1121_v60 = vor.u32 %v1207_v52, %v1120_v50  ;;  %v1176_v62 = vld [vmem:[%s1375_s11 + $0x44] sm:$0xf] }
  0x35   : > { %703 = vmatpush.bf16.msra.mxu2 %v1137_v33  ;;  %v1048_v61 = vld [vmem:[%s1375_s11 + $0xa0] sm:$0xf]  ;;  %v1002_v63 = vld [vmem:[%s1375_s11 + $0x48] sm:$0xf0]  ;;  %v1189_v0 = vld [vmem:[%s1375_s11 + $0xa4] sm:$0xf0]  ;;  %v985_v3 = vor.u32 %v1173_v57, %v984_v56 }
  0x36   : > { %716 = vmatpush.bf16.msra.mxu3 %v1021_v51  ;;  %v1112_v1 = vld [vmem:[%s1375_s11 + $0x120] sm:$0xf]  ;;  %v1205_v2 = vld [vmem:[%s1375_s11 + $0x124] sm:$0xf0]  ;;  %v976_v4 = vld [vmem:[%s1375_s11 + $0x10] sm:$0xf]  ;;  %v1005_v6 = vor.u32 %v1176_v62, %v1002_v63  ;;  %v1049_v7 = vor.u32 %v1189_v0, %v1048_v61 }
  0x37   : > { %676 = vmatpush.bf16.msra.mxu0 %v1001_v42  ;;  %v1171_v5 = vld [vmem:[%s1375_s11 + $0x14] sm:$0xf0]  ;;  %v1113_v8 = vor.u32 %v1205_v2, %v1112_v1  ;;  %v1040_v9 = vld [vmem:[%s1375_s11 + $0x90] sm:$0xf]  ;;  %v1174_v10 = vld [vmem:[%s1375_s11 + $0x34] sm:$0xf] }
  0x38   : > { %690 = vmatpush.bf16.msra.mxu1 %v1065_v46  ;;  %v994_v11 = vld [vmem:[%s1375_s11 + $0x38] sm:$0xf0]  ;;  %v1187_v12 = vld [vmem:[%s1375_s11 + $0x94] sm:$0xf0]  ;;  %v1104_v13 = vld [vmem:[%s1375_s11 + $0x110] sm:$0xf]  ;;  %v977_v15 = vor.u32 %v1171_v5, %v976_v4 }
  0x39   : > { %704 = vmatpush.bf16.msra.mxu2 %v1129_v47  ;;  %v1203_v14 = vld [vmem:[%s1375_s11 + $0x114] sm:$0xf0]  ;;  %v968_v16 = vld [vmem:[%s1375_s11] sm:$0xf]  ;;  %v1169_v17 = vld [vmem:[%s1375_s11 + $0x4] sm:$0xf0]  ;;  %v997_v19 = vor.u32 %v1174_v10, %v994_v11  ;;  %v1041_v20 = vor.u32 %v1187_v12, %v1040_v9 }
  0x3a   : > { %717 = vmatpush.bf16.msra.mxu3 %v1013_v58  ;;  %v1032_v18 = vld [vmem:[%s1375_s11 + $0x80] sm:$0xf]  ;;  %v1105_v21 = vor.u32 %v1203_v14, %v1104_v13  ;;  %v1185_v22 = vld [vmem:[%s1375_s11 + $0x84] sm:$0xf0]  ;;  %v1172_v23 = vld [vmem:[%s1375_s11 + $0x24] sm:$0xf]  ;;  %v969_v31 = vor.u32 %v1169_v17, %v968_v16 }
  0x3b   : > { %677 = vmatpush.bf16.msra.mxu0 %v993_v55  ;;  %v986_v24 = vld [vmem:[%s1375_s11 + $0x28] sm:$0xf0]  ;;  %v1096_v25 = vld [vmem:[%s1375_s11 + $0x100] sm:$0xf]  ;;  %v1201_v26 = vld [vmem:[%s1375_s11 + $0x104] sm:$0xf0]  ;;  %v1033_v36 = vor.u32 %v1185_v22, %v1032_v18 }
  0x3c   : > { %691 = vmatpush.bf16.msra.mxu1 %v1057_v59  ;;  %v1198_v27 = vld [vmem:[%s1375_s11 + $0xf4] sm:$0xf]  ;;  %v1090_v28 = vld [vmem:[%s1375_s11 + $0xf8] sm:$0xf0]  ;;  %v964_v32 = vld [vmem:[%s1377_s12 + $0x8] sm:$0xf]  ;;  %v989_v33 = vor.u32 %v1172_v23, %v986_v24  ;;  %v1097_v37 = vor.u32 %v1201_v26, %v1096_v25 }
  0x3d   : > { %705 = vmatpush.bf16.msra.mxu2 %v1121_v60  ;;  %v1214_v29 = vld [vmem:[%s1375_s11 + $0x174] sm:$0xf]  ;;  %v1154_v30 = vld [vmem:[%s1375_s11 + $0x178] sm:$0xf0]  ;;  %v956_v34 = vld [vmem:[%s1377_s12] sm:$0xf]  ;;  %v1093_v41 = vor.u32 %v1198_v27, %v1090_v28 }
  0x3e   : > { %718 = vmatpush.bf16.msra.mxu3 %v1005_v6  ;;  %v1166_v35 = vld [vmem:[%s1377_s12 + $0x8] sm:$0xf0]  ;;  %v1167_v38 = vld [vmem:[%s1377_s12 + $0x10] sm:$0xf0]  ;;  %v1165_v39 = vld [vmem:[%s1377_s12 + $0x4] sm:$0xf]  ;;  %v1157_v42 = vor.u32 %v1214_v29, %v1154_v30 }
  0x3f   : > { %678 = vmatpush.bf16.msra.mxu0 %v985_v3  ;;  %v958_v40 = vld [vmem:[%s1377_s12 + $0xc] sm:$0xf0]  ;;  %v1196_v43 = vld [vmem:[%s1375_s11 + $0xe4] sm:$0xf]  ;;  %v1170_v44 = vld [vmem:[%s1375_s11 + $0x14] sm:$0xf]  ;;  %v957_v49 = vor.u32 %v1166_v35, %v956_v34  ;;  %v1468_v50 = vor.u32 %v1167_v38, %v964_v32 }
  0x40   : > { %692 = vmatpush.bf16.msra.mxu1 %v1049_v7  ;;  %v978_v45 = vld [vmem:[%s1375_s11 + $0x18] sm:$0xf0]  ;;  %v1082_v46 = vld [vmem:[%s1375_s11 + $0xe8] sm:$0xf0]  ;;  %v1212_v47 = vld [vmem:[%s1375_s11 + $0x164] sm:$0xf]  ;;  %v1470_v51 = vor.u32 %v1165_v39, %v958_v40 }
  0x41   : > { %706 = vmatpush.bf16.msra.mxu2 %v1113_v8  ;;  %v1146_v48 = vld [vmem:[%s1375_s11 + $0x168] sm:$0xf0]  ;;  %v981_v52 = vor.u32 %v1170_v44, %v978_v45  ;;  %v1085_v53 = vor.u32 %v1196_v43, %v1082_v46  ;;  %v1194_v55 = vld [vmem:[%s1375_s11 + $0xd4] sm:$0xf]  ;;  %v1168_v56 = vld [vmem:[%s1375_s11 + $0x4] sm:$0xf] }
  0x42   : > { %719 = vmatpush.bf16.msra.mxu3 %v997_v19  ;;  %v1149_v54 = vor.u32 %v1212_v47, %v1146_v48  ;;  %v970_v57 = vld [vmem:[%s1375_s11 + $0x8] sm:$0xf0]  ;;  %v1074_v58 = vld [vmem:[%s1375_s11 + $0xd8] sm:$0xf0]  ;;  %v1210_v59 = vld [vmem:[%s1375_s11 + $0x154] sm:$0xf] }
  0x43   : > { %679 = vmatpush.bf16.msra.mxu0 %v977_v15  ;;  %v1138_v60 = vld [vmem:[%s1375_s11 + $0x158] sm:$0xf0]  ;;  %v973_v61 = vor.u32 %v1168_v56, %v970_v57  ;;  %v1077_v62 = vor.u32 %v1194_v55, %v1074_v58  ;;  %v1192_v0 = vld [vmem:[%s1375_s11 + $0xc4] sm:$0xf]  ;;  %v1066_v1 = vld [vmem:[%s1375_s11 + $0xc8] sm:$0xf0] }
  0x44   : > { %693 = vmatpush.bf16.msra.mxu1 %v1041_v20  ;;  %v1141_v63 = vor.u32 %v1210_v59, %v1138_v60  ;;  %v1208_v2 = vld [vmem:[%s1375_s11 + $0x144] sm:$0xf]  ;;  %v1130_v3 = vld [vmem:[%s1375_s11 + $0x148] sm:$0xf0]  ;;  %v1069_v4 = vor.u32 %v1192_v0, %v1066_v1  ;;  %v1190_v6 = vld [vmem:[%s1375_s11 + $0xb4] sm:$0xf] }
  0x45   : > { %707 = vmatpush.bf16.msra.mxu2 %v1105_v21  ;;  %v1133_v5 = vor.u32 %v1208_v2, %v1130_v3  ;;  %v1058_v7 = vld [vmem:[%s1375_s11 + $0xb8] sm:$0xf0]  ;;  %v1206_v8 = vld [vmem:[%s1375_s11 + $0x134] sm:$0xf]  ;;  %v1188_v12 = vld [vmem:[%s1375_s11 + $0xa4] sm:$0xf] }
  0x46   : > { %720 = vmatpush.bf16.msra.mxu3 %v989_v33  ;;  %v1122_v9 = vld [vmem:[%s1375_s11 + $0x138] sm:$0xf0]  ;;  %v1061_v10 = vor.u32 %v1190_v6, %v1058_v7  ;;  %v1050_v13 = vld [vmem:[%s1375_s11 + $0xa8] sm:$0xf0]  ;;  %v1204_v14 = vld [vmem:[%s1375_s11 + $0x124] sm:$0xf] }
  0x47   : > { %680 = vmatpush.bf16.msra.mxu0 %v969_v31  ;;  %v1125_v11 = vor.u32 %v1206_v8, %v1122_v9  ;;  %v1114_v15 = vld [vmem:[%s1375_s11 + $0x128] sm:$0xf0]  ;;  %v1053_v16 = vor.u32 %v1188_v12, %v1050_v13  ;;  %v1186_v18 = vld [vmem:[%s1375_s11 + $0x94] sm:$0xf]  ;;  %v1042_v19 = vld [vmem:[%s1375_s11 + $0x98] sm:$0xf0] }
  0x48   : > { %694 = vmatpush.bf16.msra.mxu1 %v1033_v36  ;;  %v1117_v17 = vor.u32 %v1204_v14, %v1114_v15  ;;  %v1202_v20 = vld [vmem:[%s1375_s11 + $0x114] sm:$0xf]  ;;  %v1106_v21 = vld [vmem:[%s1375_s11 + $0x118] sm:$0xf0]  ;;  %v1045_v22 = vor.u32 %v1186_v18, %v1042_v19  ;;  %v1184_v24 = vld [vmem:[%s1375_s11 + $0x84] sm:$0xf] }
  0x49   : > { %708 = vmatpush.bf16.msra.mxu2 %v1097_v37  ;;  %v1109_v23 = vor.u32 %v1202_v20, %v1106_v21  ;;  %v1034_v25 = vld [vmem:[%s1375_s11 + $0x88] sm:$0xf0]  ;;  %v1200_v26 = vld [vmem:[%s1375_s11 + $0x104] sm:$0xf]  ;;  %v363_v40 = vld [vmem:[%s1576_s4 + $0x10] sm:$0xff]  ;;  %p1158_p11 = scmp.ne.s32.totalorder %s1289_s17, 5 }
  0x4a   : > { %681 = vmatmul.bf16.vlgmr.msra.gmra.mxu0 %v957_v49  ;;  %721 = vmatpush.bf16.msra.mxu3 %v981_v52  ;;  %v1098_v27 = vld [vmem:[%s1375_s11 + $0x108] sm:$0xf0]  ;;  %v1037_v28 = vor.u32 %v1184_v24, %v1034_v25  ;;  %v361_v33 = vld [vmem:[%s1576_s4] sm:$0xff] }
  0x4b   : > { %729 = vmatpush.bf16.msrb.mxu0 %v1093_v41  ;;  %695 = vmatmul.bf16.vlgmr.msra.gmra.mxu1 %v1470_v51  ;;  %v1101_v29 = vor.u32 %v1200_v26, %v1098_v27  ;;  %v362_v48 = vld [vmem:[%s1576_s4 + $0x8] sm:$0xff] }
  0x4c   : > { %743 = vmatpush.bf16.msrb.mxu1 %v1157_v42  ;;  %709 = vmatmul.bf16.vlgmr.msra.gmra.mxu2 %v1468_v50 }
  0x4e   : > { %722 = vmatpush.bf16.msra.mxu3 %v973_v61 }
  0x4f   : > { %730 = vmatpush.bf16.msrb.mxu0 %v1085_v53 }
  0x50   : > { %744 = vmatpush.bf16.msrb.mxu1 %v1149_v54  ;;  %v364_v54 = vld [vmem:[%s1576_s4 + $0x18] sm:$0xff] }
  0x51   : > { %723 = vmatmul.bf16.vlgmr.msra.gmra.mxu3 %v957_v49 }
  0x53   : > { %731 = vmatpush.bf16.msrb.mxu0 %v1077_v62 }
  0x54   : > { %745 = vmatpush.bf16.msrb.mxu1 %v1141_v63 }
  0x57   : > { %732 = vmatpush.bf16.msrb.mxu0 %v1069_v4 }
  0x58   : > { %746 = vmatpush.bf16.msrb.mxu1 %v1133_v5 }
  0x5b   : > { %733 = vmatpush.bf16.msrb.mxu0 %v1061_v10 }
  0x5c   : > { %747 = vmatpush.bf16.msrb.mxu1 %v1125_v11 }
  0x5f   : > { %734 = vmatpush.bf16.msrb.mxu0 %v1053_v16 }
  0x60   : > { %748 = vmatpush.bf16.msrb.mxu1 %v1117_v17 }
  0x63   : > { %735 = vmatpush.bf16.msrb.mxu0 %v1045_v22 }
  0x64   : > { %749 = vmatpush.bf16.msrb.mxu1 %v1109_v23 }
  0x67   : > { %736 = vmatpush.bf16.msrb.mxu0 %v1037_v28 }
  0x68   : > { %750 = vmatpush.bf16.msrb.mxu1 %v1101_v29 }
  0x6a   : > { %737 = vmatmul.bf16.vlgmr.msrb.gmra.mxu0 %v1470_v51 }
  0x6b   : > { %751 = vmatmul.bf16.vlgmr.msrb.gmra.mxu1 %v1468_v50 }
  0xc7   : > { %v682_v30 = vpop.f32.mrf.mxu0 }
  0xc8   : > { %v696_v31 = vpop.f32.mrf.mxu1 }
  0xc9   : > { %v697_v32 = vadd.f32 %v696_v31, %v682_v30 }
  0xcf   : > { %v710_v34 = vpop.f32.mrf.mxu2  ;;  %v684_v36 = vpop.f32.mrf.mxu0 }
  0xd0   : > { %v711_v35 = vadd.f32 %v710_v34, %v697_v32  ;;  %v698_v37 = vpop.f32.mrf.mxu1 }
  0xd1   : > { %v699_v39 = vadd.f32 %v698_v37, %v684_v36 }
  0xd2   : > { %v757_v38 = vadd.f32 %v711_v35, %v361_v33 }
  0xd4   : > { %761 = vst [vmem:[%s1576_s4] sm:$0xff] %v757_v38  ;;  %v724_v44 = vpop.f32.mrf.mxu3 }
  0xd7   : > { %v712_v41 = vpop.f32.mrf.mxu2 }
  0xd8   : > { %v713_v42 = vadd.f32 %v712_v41, %v699_v39 }
  0xda   : > { %v759_v43 = vadd.f32 %v713_v42, %v363_v40 }
  0xdc   : > { %763 = vst [vmem:[%s1576_s4 + $0x10] sm:$0xff] %v759_v43  ;;  %v726_v51 = vpop.f32.mrf.mxu3 }
  0xe7   : > { %v738_v45 = vpop.f32.mrf.mxu0 }
  0xe8   : > { %v752_v46 = vpop.f32.mrf.mxu1  ;;  %v739_v47 = vadd.f32 %v738_v45, %v724_v44 }
  0xea   : > { %v753_v49 = vadd.f32 %v752_v46, %v739_v47 }
  0xec   : > { %v758_v50 = vadd.f32 %v753_v49, %v362_v48 }
  0xee   : > { %762 = vst [vmem:[%s1576_s4 + $0x8] sm:$0xff] %v758_v50 }
  0xef   : > { %v740_v52 = vpop.f32.mrf.mxu0 }
  0xf0   : > { %v741_v53 = vadd.f32 %v740_v52, %v726_v51  ;;  %v754_v55 = vpop.f32.mrf.mxu1 }
  0xf2   : > { %v755_v56 = vadd.f32 %v754_v55, %v741_v53  ;;  %768 = sbr.rel (%p1158_p11) target bundleno = 261 (0x105), region = 70 }
  0xf4   : > { %v760_v57 = vadd.f32 %v755_v56, %v364_v54 }
  0xf6   : > { %764 = vst [vmem:[%s1576_s4 + $0x18] sm:$0xff] %v760_v57 }
  0xf7   : > { %v769_v58 = vld [vmem:[%s1576_s4] sm:$0xff]  ;;  %v770_v63 = vld [vmem:[%s1576_s4 + $0x8] sm:$0xff]  ;;  %v771_v2 = vld [vmem:[%s1576_s4 + $0x10] sm:$0xff] }
  0xf8   : > { %v773_v59 = vld [vmem:[%s1574_s2] sm:$0x3] }
  0xf9   : > { %v783_v60 = vld [vmem:[%s1575_s3] sm:$0x3]  ;;  %v775_v61 = vperm.slane %v773_v59, 0  ;;  %v776_v0 = vperm.slane %v773_v59, 1 }
  0xfa   : > { %v785_v62 = vperm.slane %v783_v60, 0  ;;  %v786_v1 = vperm.slane %v783_v60, 1 }
  0xfb   : > { %v779_v4 = vmul.f32 %v775_v61, %v769_v58  ;;  %v780_v5 = vmul.f32 %v776_v0, %v770_v63  ;;  %v781_v6 = vmul.f32 %v775_v61, %v771_v2 }
  0xfd   : > { %v772_v3 = vld [vmem:[%s1576_s4 + $0x18] sm:$0xff]  ;;  %v789_v8 = vadd.f32 %v785_v62, %v779_v4  ;;  %v790_v9 = vadd.f32 %v786_v1, %v780_v5  ;;  %v791_v10 = vadd.f32 %v785_v62, %v781_v6 }
  0xfe   : > { %v782_v7 = vmul.f32 %v776_v0, %v772_v3 }
  0xff   : > { %v793_v12 = vmax.f32 %v789_v8, 0.0  ;;  %v794_v13 = vmax.f32 %v790_v9, 0.0  ;;  %v795_v14 = vmax.f32 %v791_v10, 0.0 }
 0x100   : > { %v792_v11 = vadd.f32 %v786_v1, %v782_v7 }
 0x101   : > { %797 = vst [vmem:[%s1576_s4] sm:$0xff] %v793_v12 }
 0x102   : > { %v796_v15 = vmax.f32 %v792_v11, 0.0  ;;  %798 = vst [vmem:[%s1576_s4 + $0x8] sm:$0xff] %v794_v13 }
 0x103   : > { %799 = vst [vmem:[%s1576_s4 + $0x10] sm:$0xff] %v795_v14 }
 0x104   : > { %800 = vst [vmem:[%s1576_s4 + $0x18] sm:$0xff] %v796_v15 }
 0x105 PF: > { %s14_s19 = sadd.s32 1, %s1297_s19   ;;  %s1577_s15 = smov %s1285_s16 }
 0x106   : > { %p11_p12 = scmp.ge.s32.totalorder %s14_s19, 8   ;;  %s1578_s16 = smov %s1360_s23 }
 0x107   : > { %s1579_s17 = smov %s1293_s18  ;;  %s1580_s18 = smov %s1582_s20 }
 0x108   :  { %13 = sbr.rel (!%p11_p12) target bundleno = 3 (0x3), region = 120 }

// kernel: resnet18_16s_forward.40
= control target key start
LH: loop header
LB: loop body
LE: loop exit
PB: predicated region body
PF: predicated region fallthrough
CT: control target
= control target key end

     0   :  { %s2060_s0 = inlined_call_operand.vmem [shape: bf16[16,2304], index: 0, kind: input, shape index: {}]   ;;  %s2061_s1 = inlined_call_operand.vmem [shape: bf16[2304,512], index: 1, kind: input, shape index: {}]   ;;  %s2062_s2 = inlined_call_operand.vmem [shape: f32[1,512], index: 2, kind: input, shape index: {}]   ;;  %s2063_s3 = inlined_call_operand.vmem [shape: f32[1,512], index: 3, kind: input, shape index: {}]   ;;  %s2064_s4 = inlined_call_operand.vmem [shape: f32[16,512], index: 4, kind: output, shape index: {}]  }
   0x1   :  { %2067 = sst [smem:[#allocation7_spill]] %s2060_s0 }
   0x2   :  { %2068 = sst [smem:[#allocation8_spill]] %s2061_s1 }
   0x3   :  { %s1639_s15 = smov 0   ;;  %s1641_s16 = smov 0  }
   0x4   :  { %s1643_s17 = smov 0   ;;  %s1645_s18 = smov 0  }
   0x5   :  { %s1647_s19 = smov 0   ;;  %s1649_s20 = smov 0  }
   0x6   :  { %s1651_s21 = smov 0   ;;  %s1653_s22 = smov 0  }
   0x7   :  { %s1655_s23 = smov 0   ;;  %s1657_s24 = smov 0  }
   0x8   :  { %s1659_s25 = smov 0  }
   0x9 LB: > { %s1151_s26 = sadd.s32 4294967295, %s1611_s25   ;;  %s26_s27 = sadd.s32 1, %s1603_s23  ;;  %s1611_s25 = sphi %s1659_s25, %s14_s25   ;;  %s1607_s24 = sphi %s1657_s24, %s2087_s24   ;;  %s1603_s23 = sphi %s1655_s23, %s2086_s23   ;;  %s1599_s22 = sphi %s1653_s22, %s2085_s22   ;;  %s1595_s21 = sphi %s1651_s21, %s2084_s21   ;;  %s1591_s20 = sphi %s1649_s20, %s2083_s20   ;;  %s1587_s19 = sphi %s1647_s19, %s2082_s19   ;;  %s1583_s18 = sphi %s1645_s18, %s2081_s18   ;;  %s1579_s17 = sphi %s1643_s17, %s2080_s17   ;;  %s1575_s16 = sphi %s1641_s16, %s2079_s16   ;;  %s1571_s15 = sphi %s1639_s15, %s2078_s15  }
   0xa   : > { %p27_p0 = scmp.ge.s32.totalorder %s26_s27, 6  ;;  %s29_s28 = sadd.s32 1, %s1607_s24 }
   0xb   : > { %s42_s29 = sadd.s32 1, %s1591_s20  ;;  %p49_p1 = scmp.ne.s32.totalorder %s1591_s20, %s1587_s19 }
   0xc   : > { %s2089_s27 = smov (%p27_p0, %s26_s27), 0  ;;  %s2091_s28 = smov (!%p27_p0, %s29_s28), %s1607_s24 }
   0xd   : > { %2069 = sst [smem:[#allocation5_spill]] %s2089_s27  ;;  %s38_s30 = ssub.s32 %s1603_s23, %s2089_s27 }
   0xe   : > { %p50_p2 = scmp.eq.s32.totalorder %s1611_s25, 0  ;;  %p31_p3 = scmp.ge.s32.totalorder %s2091_s28, 2 }
   0xf   : > { %p40_p4 = scmp.eq.s32.totalorder %s38_s30, 0  ;;  %s70_s6 = sadd.s32 1, %s1583_s18 }
  0x10   : > { %p1706_p5 = por %p50_p2, %p49_p1  ;;  %s2093_s28 = smov (%p31_p3, %s2091_s28), 0 }
  0x11   : > { %2071 = sst [smem:[#allocation6_spill]] %s2093_s28  ;;  %s66_s8 = ssub.s32 %s1607_s24, %s2093_s28 }
  0x12   : > { %s1714_s7 = scalar_select %p40_p4, %s1591_s20, %s42_s29  }
  0x13   : > { %p77_p6 = scmp.ne.s32.totalorder %s1583_s18, %s1579_s17  ;;  %s67_s9 = sor.u32 %s66_s8, %s38_s30 }
  0x14   : > { %p148_p7 = scmp.eq.s32.totalorder %s66_s8, 0  ;;  %p68_p8 = scmp.eq.s32.totalorder %s67_s9, 0 }
  0x15   : > { %p1720_p9 = por %p77_p6, %p50_p2  ;;  %s150_s11 = sadd.s32 1, %s1575_s16 }
  0x16   : > { %p160_p10 = scmp.ne.s32.totalorder %s1575_s16, %s1571_s15  ;;  %p161_p11 = scmp.eq.s32.totalorder %s1151_s26, 11 }
  0x17   : > { %s1728_s12 = scalar_select %p68_p8, %s1583_s18, %s70_s6  }
  0x18   : > { %s1731_s13 = scalar_select %p148_p7, %s1575_s16, %s150_s11  }
  0x19   : > { %p1733_p12 = por %p161_p11, %p160_p10  ;;  %p1154_p13 = scmp.ge.s32.totalorder %s1611_s25, 12 }
  0x1b   : > { %183 = sbr.rel (%p1154_p13) target bundleno = 103 (0x67), region = 16 }
  0x20   : > { %186 = sbr.rel (!%p1706_p5) target bundleno = 45 (0x2d), region = 20  ;;  %s188_s29 = sand.u32 (%p1706_p5), 1, %s1591_s20  }
  0x21   : > { %s1378_s30 = smul.u32 (%p1706_p5), 12, %s1603_s23  ;;  %s2074_s0 = sld [smem:[#allocation7_spill]] (%p1706_p5) }
  0x22   : > { %s1432_s8 = smul.u32 (%p1706_p5), 24, %s188_s29 }
  0x24   : > { %s190_s26 = scalar_lea.vmem (%p1706_p5), [#allocation2], %s1432_s8 }
  0x27   : > { %s196_s11 = scalar_lea.vmem %s2074_s0, %s1378_s30 }
  0x28   : > { %v211_v0 = vld [vmem:[%s196_s11] sm:$0xff]  ;;  %v213_v1 = vld [vmem:[%s196_s11 + $0x48] sm:$0xff]  ;;  %v1158_v3 = vld [vmem:[%s196_s11 + $0x50] sm:$0xf] }
  0x29   : > { %v1156_v2 = vld [vmem:[%s196_s11 + $0x8] sm:$0xf]  ;;  %212 = vst [vmem:[%s190_s26] sm:$0xff] %v211_v0 }
  0x2a   : > { %214 = vst [vmem:[%s190_s26 + $0xc] sm:$0xff] %v213_v1 }
  0x2b   : > { %1157 = vst [vmem:[%s190_s26 + $0x8] sm:$0xf] %v1156_v2 }
  0x2c   : > { %1159 = vst [vmem:[%s190_s26 + $0x14] sm:$0xf] %v1158_v3 }
  0x2d PF: > { %232 = sbr.rel (!%p1720_p9) target bundleno = 103 (0x67), region = 46  ;;  %s234_s5 = sand.u32 (%p1720_p9), 1, %s1583_s18  }
  0x2e   : > { %s1433_s29 = smul.u32 (%p1720_p9), 384, %s234_s5  ;;  %s1160_s6 = sshll.u32 (%p1720_p9), %s1607_s24, 1 }
  0x2f   : > { %s1379_s30 = smul.u32 (%p1720_p9), 192, %s1603_s23  ;;  %s2075_s1 = sld [smem:[#allocation8_spill]] (%p1720_p9) }
  0x30   : > { %s1758_s10 = scalar_lea.vmem (%p1720_p9), [#allocation3], %s1433_s29 }
  0x31   : > { %s240_s9 = sadd.s32 (%p1720_p9), %s1379_s30, %s1160_s6 }
  0x32   : > { %s1162_s0 = sshll.u32 %s240_s9, 2 }
  0x35   : > { %s1753_s11 = scalar_lea.vmem %s2075_s1, %s1162_s0 }
  0x36   : > { %v365_v4 = vld [vmem:[%s1753_s11] sm:$0xff]  ;;  %v367_v5 = vld [vmem:[%s1753_s11 + $0x10] sm:$0xff] }
  0x37   : > { %v369_v6 = vld [vmem:[%s1753_s11 + $0x20] sm:$0xff]  ;;  %366 = vst [vmem:[%s1758_s10] sm:$0xff] %v365_v4  ;;  %v371_v7 = vld [vmem:[%s1753_s11 + $0x30] sm:$0xff] }
  0x38   : > { %368 = vst [vmem:[%s1758_s10 + $0x8] sm:$0xff] %v367_v5  ;;  %v373_v8 = vld [vmem:[%s1753_s11 + $0x40] sm:$0xff]  ;;  %v375_v9 = vld [vmem:[%s1753_s11 + $0x50] sm:$0xff] }
  0x39   : > { %370 = vst [vmem:[%s1758_s10 + $0x10] sm:$0xff] %v369_v6  ;;  %v377_v10 = vld [vmem:[%s1753_s11 + $0x60] sm:$0xff]  ;;  %v379_v11 = vld [vmem:[%s1753_s11 + $0x70] sm:$0xff] }
  0x3a   : > { %372 = vst [vmem:[%s1758_s10 + $0x18] sm:$0xff] %v371_v7  ;;  %v381_v12 = vld [vmem:[%s1753_s11 + $0x80] sm:$0xff]  ;;  %v383_v13 = vld [vmem:[%s1753_s11 + $0x90] sm:$0xff] }
  0x3b   : > { %374 = vst [vmem:[%s1758_s10 + $0x20] sm:$0xff] %v373_v8  ;;  %v385_v14 = vld [vmem:[%s1753_s11 + $0xa0] sm:$0xff]  ;;  %v387_v15 = vld [vmem:[%s1753_s11 + $0xb0] sm:$0xff] }
  0x3c   : > { %376 = vst [vmem:[%s1758_s10 + $0x28] sm:$0xff] %v375_v9  ;;  %v389_v16 = vld [vmem:[%s1753_s11 + $0xc0] sm:$0xff]  ;;  %v391_v17 = vld [vmem:[%s1753_s11 + $0xd0] sm:$0xff] }
  0x3d   : > { %378 = vst [vmem:[%s1758_s10 + $0x30] sm:$0xff] %v377_v10  ;;  %v393_v18 = vld [vmem:[%s1753_s11 + $0xe0] sm:$0xff]  ;;  %v395_v19 = vld [vmem:[%s1753_s11 + $0xf0] sm:$0xff] }
  0x3e   : > { %380 = vst [vmem:[%s1758_s10 + $0x38] sm:$0xff] %v379_v11  ;;  %v397_v20 = vld [vmem:[%s1753_s11 + $0x100] sm:$0xff]  ;;  %v399_v21 = vld [vmem:[%s1753_s11 + $0x110] sm:$0xff] }
  0x3f   : > { %382 = vst [vmem:[%s1758_s10 + $0x40] sm:$0xff] %v381_v12  ;;  %v401_v22 = vld [vmem:[%s1753_s11 + $0x120] sm:$0xff]  ;;  %v403_v23 = vld [vmem:[%s1753_s11 + $0x130] sm:$0xff] }
  0x40   : > { %384 = vst [vmem:[%s1758_s10 + $0x48] sm:$0xff] %v383_v13  ;;  %v405_v24 = vld [vmem:[%s1753_s11 + $0x140] sm:$0xff]  ;;  %v407_v25 = vld [vmem:[%s1753_s11 + $0x150] sm:$0xff] }
  0x41   : > { %386 = vst [vmem:[%s1758_s10 + $0x50] sm:$0xff] %v385_v14  ;;  %v409_v26 = vld [vmem:[%s1753_s11 + $0x160] sm:$0xff]  ;;  %v411_v27 = vld [vmem:[%s1753_s11 + $0x170] sm:$0xff] }
  0x42   : > { %388 = vst [vmem:[%s1758_s10 + $0x58] sm:$0xff] %v387_v15  ;;  %v413_v28 = vld [vmem:[%s1753_s11 + $0x180] sm:$0xff]  ;;  %v415_v29 = vld [vmem:[%s1753_s11 + $0x190] sm:$0xff] }
  0x43   : > { %390 = vst [vmem:[%s1758_s10 + $0x60] sm:$0xff] %v389_v16  ;;  %v417_v30 = vld [vmem:[%s1753_s11 + $0x1a0] sm:$0xff]  ;;  %v419_v31 = vld [vmem:[%s1753_s11 + $0x1b0] sm:$0xff] }
  0x44   : > { %392 = vst [vmem:[%s1758_s10 + $0x68] sm:$0xff] %v391_v17  ;;  %v421_v32 = vld [vmem:[%s1753_s11 + $0x1c0] sm:$0xff]  ;;  %v423_v33 = vld [vmem:[%s1753_s11 + $0x1d0] sm:$0xff] }
  0x45   : > { %394 = vst [vmem:[%s1758_s10 + $0x70] sm:$0xff] %v393_v18  ;;  %v425_v34 = vld [vmem:[%s1753_s11 + $0x1e0] sm:$0xff]  ;;  %v427_v35 = vld [vmem:[%s1753_s11 + $0x1f0] sm:$0xff] }
  0x46   : > { %396 = vst [vmem:[%s1758_s10 + $0x78] sm:$0xff] %v395_v19  ;;  %v429_v36 = vld [vmem:[%s1753_s11 + $0x200] sm:$0xff]  ;;  %v431_v37 = vld [vmem:[%s1753_s11 + $0x210] sm:$0xff] }
  0x47   : > { %398 = vst [vmem:[%s1758_s10 + $0x80] sm:$0xff] %v397_v20  ;;  %v433_v38 = vld [vmem:[%s1753_s11 + $0x220] sm:$0xff]  ;;  %v435_v39 = vld [vmem:[%s1753_s11 + $0x230] sm:$0xff] }
  0x48   : > { %400 = vst [vmem:[%s1758_s10 + $0x88] sm:$0xff] %v399_v21  ;;  %v437_v40 = vld [vmem:[%s1753_s11 + $0x240] sm:$0xff]  ;;  %v439_v41 = vld [vmem:[%s1753_s11 + $0x250] sm:$0xff] }
  0x49   : > { %402 = vst [vmem:[%s1758_s10 + $0x90] sm:$0xff] %v401_v22  ;;  %v441_v42 = vld [vmem:[%s1753_s11 + $0x260] sm:$0xff]  ;;  %v443_v43 = vld [vmem:[%s1753_s11 + $0x270] sm:$0xff] }
  0x4a   : > { %404 = vst [vmem:[%s1758_s10 + $0x98] sm:$0xff] %v403_v23  ;;  %v445_v44 = vld [vmem:[%s1753_s11 + $0x280] sm:$0xff]  ;;  %v447_v45 = vld [vmem:[%s1753_s11 + $0x290] sm:$0xff] }
  0x4b   : > { %406 = vst [vmem:[%s1758_s10 + $0xa0] sm:$0xff] %v405_v24  ;;  %v449_v46 = vld [vmem:[%s1753_s11 + $0x2a0] sm:$0xff]  ;;  %v451_v47 = vld [vmem:[%s1753_s11 + $0x2b0] sm:$0xff] }
  0x4c   : > { %408 = vst [vmem:[%s1758_s10 + $0xa8] sm:$0xff] %v407_v25  ;;  %v453_v48 = vld [vmem:[%s1753_s11 + $0x2c0] sm:$0xff]  ;;  %v455_v49 = vld [vmem:[%s1753_s11 + $0x2d0] sm:$0xff] }
  0x4d   : > { %410 = vst [vmem:[%s1758_s10 + $0xb0] sm:$0xff] %v409_v26  ;;  %v457_v50 = vld [vmem:[%s1753_s11 + $0x2e0] sm:$0xff]  ;;  %v459_v51 = vld [vmem:[%s1753_s11 + $0x2f0] sm:$0xff] }
  0x4e   : > { %412 = vst [vmem:[%s1758_s10 + $0xb8] sm:$0xff] %v411_v27 }
  0x4f   : > { %414 = vst [vmem:[%s1758_s10 + $0xc0] sm:$0xff] %v413_v28 }
  0x50   : > { %416 = vst [vmem:[%s1758_s10 + $0xc8] sm:$0xff] %v415_v29 }
  0x51   : > { %418 = vst [vmem:[%s1758_s10 + $0xd0] sm:$0xff] %v417_v30 }
  0x52   : > { %420 = vst [vmem:[%s1758_s10 + $0xd8] sm:$0xff] %v419_v31 }
  0x53   : > { %422 = vst [vmem:[%s1758_s10 + $0xe0] sm:$0xff] %v421_v32 }
  0x54   : > { %424 = vst [vmem:[%s1758_s10 + $0xe8] sm:$0xff] %v423_v33 }
  0x55   : > { %426 = vst [vmem:[%s1758_s10 + $0xf0] sm:$0xff] %v425_v34 }
  0x56   : > { %428 = vst [vmem:[%s1758_s10 + $0xf8] sm:$0xff] %v427_v35 }
  0x57   : > { %430 = vst [vmem:[%s1758_s10 + $0x100] sm:$0xff] %v429_v36 }
  0x58   : > { %432 = vst [vmem:[%s1758_s10 + $0x108] sm:$0xff] %v431_v37 }
  0x59   : > { %434 = vst [vmem:[%s1758_s10 + $0x110] sm:$0xff] %v433_v38 }
  0x5a   : > { %436 = vst [vmem:[%s1758_s10 + $0x118] sm:$0xff] %v435_v39 }
  0x5b   : > { %438 = vst [vmem:[%s1758_s10 + $0x120] sm:$0xff] %v437_v40 }
  0x5c   : > { %440 = vst [vmem:[%s1758_s10 + $0x128] sm:$0xff] %v439_v41 }
  0x5d   : > { %442 = vst [vmem:[%s1758_s10 + $0x130] sm:$0xff] %v441_v42 }
  0x5e   : > { %444 = vst [vmem:[%s1758_s10 + $0x138] sm:$0xff] %v443_v43 }
  0x5f   : > { %446 = vst [vmem:[%s1758_s10 + $0x140] sm:$0xff] %v445_v44 }
  0x60   : > { %448 = vst [vmem:[%s1758_s10 + $0x148] sm:$0xff] %v447_v45 }
  0x61   : > { %450 = vst [vmem:[%s1758_s10 + $0x150] sm:$0xff] %v449_v46 }
  0x62   : > { %452 = vst [vmem:[%s1758_s10 + $0x158] sm:$0xff] %v451_v47 }
  0x63   : > { %454 = vst [vmem:[%s1758_s10 + $0x160] sm:$0xff] %v453_v48 }
  0x64   : > { %456 = vst [vmem:[%s1758_s10 + $0x168] sm:$0xff] %v455_v49 }
  0x65   : > { %458 = vst [vmem:[%s1758_s10 + $0x170] sm:$0xff] %v457_v50 }
  0x66   : > { %460 = vst [vmem:[%s1758_s10 + $0x178] sm:$0xff] %v459_v51 }
  0x67 PF: > { %p1163_p0 = scmp.ge.s32.totalorder %s1611_s25, 1  ;;  %p481_p1 = scmp.lt.s32.totalorder %s1611_s25, 13 }
  0x69   : > { %p482_p2 = pnand %p1163_p0, %p481_p1 }
  0x6a   : > { %s488_s0 = sand.u32 (!%p482_p2), 1, %s1587_s19   ;;  %s495_s28 = sand.u32 (!%p482_p2), 1, %s1579_s17  }
  0x6b   : > { %485 = sbr.rel (%p482_p2) target bundleno = 353 (0x161), region = 92  ;;  %s528_s5 = sand.u32 (!%p482_p2), 1, %s1571_s15  }
  0x6c   : > { %s1434_s26 = smul.u32 (!%p482_p2), 24, %s488_s0  ;;  %s1164_s6 = sshll.u32 (!%p482_p2), %s528_s5, 5 }
  0x6d   : > { %s1435_s29 = smul.u32 (!%p482_p2), 384, %s495_s28  ;;  %s1165_s30 = sshll.u32 (!%p482_p2), %s1599_s22, 1 }
  0x6e   : > { %p536_p3 = scmp.lt.s32.totalorder (!%p482_p2), %s1165_s30, 3  ;;  %s1869_s19 = scalar_lea.vmem (!%p482_p2), [#allocation2], %s1434_s26 }
  0x6f   : > { %s1871_s17 = scalar_lea.vmem (!%p482_p2), [#allocation3], %s1435_s29  ;;  %s1873_s15 = scalar_lea.vmem (!%p482_p2), [#allocation4], %s1164_s6 }
  0x70   : > { %s2095_s30 = smov (!%p536_p3, %s1165_s30), 3  ;;  %p1167_p4 = scmp.ne.s32.totalorder %s1595_s21, 0 }
  0x71   : > { %s538_s11 = scalar_lea.vmem %s2062_s2, %s2095_s30  ;;  %s543_s27 = scalar_lea.vmem %s2063_s3, %s2095_s30 }
  0x72   : > { %550 = sbr.rel (%p1167_p4) target bundleno = 124 (0x7c), region = 104 }
  0x77   : > { %v1613_v52 = vmov 0.0  }
  0x78   : > { %551 = vst [vmem:[%s1873_s15] sm:$0xff] %v1613_v52 }
  0x79   : > { %552 = vst [vmem:[%s1873_s15 + $0x8] sm:$0xff] %v1613_v52 }
  0x7a   : > { %553 = vst [vmem:[%s1873_s15 + $0x10] sm:$0xff] %v1613_v52 }
  0x7b   : > { %554 = vst [vmem:[%s1873_s15 + $0x18] sm:$0xff] %v1613_v52 }
  0x7c PF: > { %v1238_v53 = vld [vmem:[%s1871_s17 + $0x70] sm:$0xf]  ;;  %v1398_v54 = vld [vmem:[%s1871_s17 + $0x74] sm:$0xf0]  ;;  %v1230_v62 = vld [vmem:[%s1871_s17 + $0x60] sm:$0xf] }
  0x7d   : > { %v1302_v55 = vld [vmem:[%s1871_s17 + $0xf0] sm:$0xf]  ;;  %v1239_v56 = vor.u32 %v1398_v54, %v1238_v53  ;;  %v1414_v57 = vld [vmem:[%s1871_s17 + $0xf4] sm:$0xf0]  ;;  %v1396_v63 = vld [vmem:[%s1871_s17 + $0x64] sm:$0xf0] }
  0x7e   : > { %v1366_v58 = vld [vmem:[%s1871_s17 + $0x170] sm:$0xf]  ;;  %v1430_v59 = vld [vmem:[%s1871_s17 + $0x174] sm:$0xf0]  ;;  %v1303_v60 = vor.u32 %v1414_v57, %v1302_v55  ;;  %v1294_v0 = vld [vmem:[%s1871_s17 + $0xe0] sm:$0xf]  ;;  %v1231_v1 = vor.u32 %v1396_v63, %v1230_v62 }
  0x7f   : > { %v1367_v61 = vor.u32 %v1430_v59, %v1366_v58  ;;  %867 = vmatpush.bf16.msra.mxu0 %v1239_v56  ;;  %v1412_v2 = vld [vmem:[%s1871_s17 + $0xe4] sm:$0xf0]  ;;  %v1358_v3 = vld [vmem:[%s1871_s17 + $0x160] sm:$0xf]  ;;  %v1222_v7 = vld [vmem:[%s1871_s17 + $0x50] sm:$0xf] }
  0x80   : > { %v1428_v4 = vld [vmem:[%s1871_s17 + $0x164] sm:$0xf0]  ;;  %881 = vmatpush.bf16.msra.mxu1 %v1303_v60  ;;  %v1295_v5 = vor.u32 %v1412_v2, %v1294_v0  ;;  %v1394_v8 = vld [vmem:[%s1871_s17 + $0x54] sm:$0xf0]  ;;  %v1286_v9 = vld [vmem:[%s1871_s17 + $0xd0] sm:$0xf] }
  0x81   : > { %895 = vmatpush.bf16.msra.mxu2 %v1367_v61  ;;  %v1359_v6 = vor.u32 %v1428_v4, %v1358_v3  ;;  %v1410_v10 = vld [vmem:[%s1871_s17 + $0xd4] sm:$0xf0]  ;;  %v1350_v11 = vld [vmem:[%s1871_s17 + $0x150] sm:$0xf]  ;;  %v1223_v13 = vor.u32 %v1394_v8, %v1222_v7  ;;  %v1214_v14 = vld [vmem:[%s1871_s17 + $0x40] sm:$0xf] }
  0x82   : > { %v1426_v12 = vld [vmem:[%s1871_s17 + $0x154] sm:$0xf0]  ;;  %v1392_v15 = vld [vmem:[%s1871_s17 + $0x44] sm:$0xf0]  ;;  %v1287_v16 = vor.u32 %v1410_v10, %v1286_v9  ;;  %v1278_v18 = vld [vmem:[%s1871_s17 + $0xc0] sm:$0xf] }
  0x83   : > { %868 = vmatpush.bf16.msra.mxu0 %v1231_v1  ;;  %v1351_v17 = vor.u32 %v1426_v12, %v1350_v11  ;;  %v1397_v19 = vld [vmem:[%s1871_s17 + $0x74] sm:$0xf]  ;;  %v1240_v20 = vld [vmem:[%s1871_s17 + $0x78] sm:$0xf0]  ;;  %v1408_v21 = vld [vmem:[%s1871_s17 + $0xc4] sm:$0xf0]  ;;  %v1215_v26 = vor.u32 %v1392_v15, %v1214_v14 }
  0x84   : > { %882 = vmatpush.bf16.msra.mxu1 %v1295_v5  ;;  %v1342_v22 = vld [vmem:[%s1871_s17 + $0x140] sm:$0xf]  ;;  %v1424_v23 = vld [vmem:[%s1871_s17 + $0x144] sm:$0xf0]  ;;  %v1243_v24 = vor.u32 %v1397_v19, %v1240_v20  ;;  %v1395_v25 = vld [vmem:[%s1871_s17 + $0x64] sm:$0xf]  ;;  %v1279_v30 = vor.u32 %v1408_v21, %v1278_v18 }
  0x85   : > { %896 = vmatpush.bf16.msra.mxu2 %v1359_v6  ;;  %v1206_v27 = vld [vmem:[%s1871_s17 + $0x30] sm:$0xf]  ;;  %v1390_v28 = vld [vmem:[%s1871_s17 + $0x34] sm:$0xf0]  ;;  %v1232_v29 = vld [vmem:[%s1871_s17 + $0x68] sm:$0xf0]  ;;  %v1343_v31 = vor.u32 %v1424_v23, %v1342_v22 }
  0x86   : > { %909 = vmatpush.bf16.msra.mxu3 %v1243_v24  ;;  %v1270_v32 = vld [vmem:[%s1871_s17 + $0xb0] sm:$0xf]  ;;  %v1406_v33 = vld [vmem:[%s1871_s17 + $0xb4] sm:$0xf0]  ;;  %v1235_v35 = vor.u32 %v1395_v25, %v1232_v29  ;;  %v1393_v37 = vld [vmem:[%s1871_s17 + $0x54] sm:$0xf]  ;;  %v1207_v39 = vor.u32 %v1390_v28, %v1206_v27 }
  0x87   : > { %869 = vmatpush.bf16.msra.mxu0 %v1223_v13  ;;  %v1334_v34 = vld [vmem:[%s1871_s17 + $0x130] sm:$0xf]  ;;  %v1422_v36 = vld [vmem:[%s1871_s17 + $0x134] sm:$0xf0]  ;;  %v1224_v38 = vld [vmem:[%s1871_s17 + $0x58] sm:$0xf0]  ;;  %v1271_v43 = vor.u32 %v1406_v33, %v1270_v32 }
  0x88   : > { %883 = vmatpush.bf16.msra.mxu1 %v1287_v16  ;;  %v1198_v40 = vld [vmem:[%s1871_s17 + $0x20] sm:$0xf]  ;;  %v1388_v41 = vld [vmem:[%s1871_s17 + $0x24] sm:$0xf0]  ;;  %v1227_v42 = vor.u32 %v1393_v37, %v1224_v38  ;;  %v1335_v44 = vor.u32 %v1422_v36, %v1334_v34  ;;  %v1391_v46 = vld [vmem:[%s1871_s17 + $0x44] sm:$0xf] }
  0x89   : > { %897 = vmatpush.bf16.msra.mxu2 %v1351_v17  ;;  %v1262_v45 = vld [vmem:[%s1871_s17 + $0xa0] sm:$0xf]  ;;  %v1216_v47 = vld [vmem:[%s1871_s17 + $0x48] sm:$0xf0]  ;;  %v1404_v48 = vld [vmem:[%s1871_s17 + $0xa4] sm:$0xf0]  ;;  %v1199_v51 = vor.u32 %v1388_v41, %v1198_v40 }
  0x8a   : > { %910 = vmatpush.bf16.msra.mxu3 %v1235_v35  ;;  %v1326_v49 = vld [vmem:[%s1871_s17 + $0x120] sm:$0xf]  ;;  %v1420_v50 = vld [vmem:[%s1871_s17 + $0x124] sm:$0xf0]  ;;  %v1190_v52 = vld [vmem:[%s1871_s17 + $0x10] sm:$0xf]  ;;  %v1219_v54 = vor.u32 %v1391_v46, %v1216_v47  ;;  %v1263_v55 = vor.u32 %v1404_v48, %v1262_v45 }
  0x8b   : > { %870 = vmatpush.bf16.msra.mxu0 %v1215_v26  ;;  %v1386_v53 = vld [vmem:[%s1871_s17 + $0x14] sm:$0xf0]  ;;  %v1327_v56 = vor.u32 %v1420_v50, %v1326_v49  ;;  %v1254_v57 = vld [vmem:[%s1871_s17 + $0x90] sm:$0xf]  ;;  %v1389_v58 = vld [vmem:[%s1871_s17 + $0x34] sm:$0xf] }
  0x8c   : > { %884 = vmatpush.bf16.msra.mxu1 %v1279_v30  ;;  %v1208_v59 = vld [vmem:[%s1871_s17 + $0x38] sm:$0xf0]  ;;  %v1402_v60 = vld [vmem:[%s1871_s17 + $0x94] sm:$0xf0]  ;;  %v1318_v61 = vld [vmem:[%s1871_s17 + $0x110] sm:$0xf]  ;;  %v1191_v63 = vor.u32 %v1386_v53, %v1190_v52 }
  0x8d   : > { %898 = vmatpush.bf16.msra.mxu2 %v1343_v31  ;;  %v1418_v62 = vld [vmem:[%s1871_s17 + $0x114] sm:$0xf0]  ;;  %v1182_v0 = vld [vmem:[%s1871_s17] sm:$0xf]  ;;  %v1384_v1 = vld [vmem:[%s1871_s17 + $0x4] sm:$0xf0]  ;;  %v1211_v3 = vor.u32 %v1389_v58, %v1208_v59  ;;  %v1255_v4 = vor.u32 %v1402_v60, %v1254_v57 }
  0x8e   : > { %911 = vmatpush.bf16.msra.mxu3 %v1227_v42  ;;  %v1246_v2 = vld [vmem:[%s1871_s17 + $0x80] sm:$0xf]  ;;  %v1319_v5 = vor.u32 %v1418_v62, %v1318_v61  ;;  %v1400_v6 = vld [vmem:[%s1871_s17 + $0x84] sm:$0xf0]  ;;  %v1387_v7 = vld [vmem:[%s1871_s17 + $0x24] sm:$0xf]  ;;  %v1183_v15 = vor.u32 %v1384_v1, %v1182_v0 }
  0x8f   : > { %871 = vmatpush.bf16.msra.mxu0 %v1207_v39  ;;  %v1200_v8 = vld [vmem:[%s1871_s17 + $0x28] sm:$0xf0]  ;;  %v1310_v9 = vld [vmem:[%s1871_s17 + $0x100] sm:$0xf]  ;;  %v1416_v10 = vld [vmem:[%s1871_s17 + $0x104] sm:$0xf0]  ;;  %v1247_v20 = vor.u32 %v1400_v6, %v1246_v2 }
  0x90   : > { %885 = vmatpush.bf16.msra.mxu1 %v1271_v43  ;;  %v1413_v11 = vld [vmem:[%s1871_s17 + $0xf4] sm:$0xf]  ;;  %v1304_v12 = vld [vmem:[%s1871_s17 + $0xf8] sm:$0xf0]  ;;  %v1178_v16 = vld [vmem:[%s1869_s19 + $0x8] sm:$0xf]  ;;  %v1203_v17 = vor.u32 %v1387_v7, %v1200_v8  ;;  %v1311_v21 = vor.u32 %v1416_v10, %v1310_v9 }
  0x91   : > { %899 = vmatpush.bf16.msra.mxu2 %v1335_v44  ;;  %v1429_v13 = vld [vmem:[%s1871_s17 + $0x174] sm:$0xf]  ;;  %v1368_v14 = vld [vmem:[%s1871_s17 + $0x178] sm:$0xf0]  ;;  %v1170_v18 = vld [vmem:[%s1869_s19] sm:$0xf]  ;;  %v1307_v25 = vor.u32 %v1413_v11, %v1304_v12 }
  0x92   : > { %912 = vmatpush.bf16.msra.mxu3 %v1219_v54  ;;  %v1381_v19 = vld [vmem:[%s1869_s19 + $0x8] sm:$0xf0]  ;;  %v1382_v22 = vld [vmem:[%s1869_s19 + $0x10] sm:$0xf0]  ;;  %v1380_v23 = vld [vmem:[%s1869_s19 + $0x4] sm:$0xf]  ;;  %v1371_v26 = vor.u32 %v1429_v13, %v1368_v14 }
  0x93   : > { %872 = vmatpush.bf16.msra.mxu0 %v1199_v51  ;;  %v1172_v24 = vld [vmem:[%s1869_s19 + $0xc] sm:$0xf0]  ;;  %v1411_v27 = vld [vmem:[%s1871_s17 + $0xe4] sm:$0xf]  ;;  %v1385_v28 = vld [vmem:[%s1871_s17 + $0x14] sm:$0xf]  ;;  %v1171_v33 = vor.u32 %v1381_v19, %v1170_v18  ;;  %v1956_v34 = vor.u32 %v1382_v22, %v1178_v16 }
  0x94   : > { %886 = vmatpush.bf16.msra.mxu1 %v1263_v55  ;;  %v1192_v29 = vld [vmem:[%s1871_s17 + $0x18] sm:$0xf0]  ;;  %v1296_v30 = vld [vmem:[%s1871_s17 + $0xe8] sm:$0xf0]  ;;  %v1427_v31 = vld [vmem:[%s1871_s17 + $0x164] sm:$0xf]  ;;  %v1958_v35 = vor.u32 %v1380_v23, %v1172_v24 }
  0x95   : > { %900 = vmatpush.bf16.msra.mxu2 %v1327_v56  ;;  %v1360_v32 = vld [vmem:[%s1871_s17 + $0x168] sm:$0xf0]  ;;  %v1195_v36 = vor.u32 %v1385_v28, %v1192_v29  ;;  %v1299_v37 = vor.u32 %v1411_v27, %v1296_v30  ;;  %v1409_v39 = vld [vmem:[%s1871_s17 + $0xd4] sm:$0xf]  ;;  %v1383_v40 = vld [vmem:[%s1871_s17 + $0x4] sm:$0xf] }
  0x96   : > { %913 = vmatpush.bf16.msra.mxu3 %v1211_v3  ;;  %v1363_v38 = vor.u32 %v1427_v31, %v1360_v32  ;;  %v1184_v41 = vld [vmem:[%s1871_s17 + $0x8] sm:$0xf0]  ;;  %v1288_v42 = vld [vmem:[%s1871_s17 + $0xd8] sm:$0xf0]  ;;  %v1425_v43 = vld [vmem:[%s1871_s17 + $0x154] sm:$0xf] }
  0x97   : > { %873 = vmatpush.bf16.msra.mxu0 %v1191_v63  ;;  %v1352_v44 = vld [vmem:[%s1871_s17 + $0x158] sm:$0xf0]  ;;  %v1187_v45 = vor.u32 %v1383_v40, %v1184_v41  ;;  %v1291_v46 = vor.u32 %v1409_v39, %v1288_v42  ;;  %v1407_v48 = vld [vmem:[%s1871_s17 + $0xc4] sm:$0xf]  ;;  %v1280_v49 = vld [vmem:[%s1871_s17 + $0xc8] sm:$0xf0] }
  0x98   : > { %887 = vmatpush.bf16.msra.mxu1 %v1255_v4  ;;  %v1355_v47 = vor.u32 %v1425_v43, %v1352_v44  ;;  %v1423_v50 = vld [vmem:[%s1871_s17 + $0x144] sm:$0xf]  ;;  %v1344_v51 = vld [vmem:[%s1871_s17 + $0x148] sm:$0xf0]  ;;  %v1283_v52 = vor.u32 %v1407_v48, %v1280_v49  ;;  %v1405_v54 = vld [vmem:[%s1871_s17 + $0xb4] sm:$0xf] }
  0x99   : > { %901 = vmatpush.bf16.msra.mxu2 %v1319_v5  ;;  %v1347_v53 = vor.u32 %v1423_v50, %v1344_v51  ;;  %v1272_v55 = vld [vmem:[%s1871_s17 + $0xb8] sm:$0xf0]  ;;  %v1421_v56 = vld [vmem:[%s1871_s17 + $0x134] sm:$0xf]  ;;  %v1403_v60 = vld [vmem:[%s1871_s17 + $0xa4] sm:$0xf] }
  0x9a   : > { %914 = vmatpush.bf16.msra.mxu3 %v1203_v17  ;;  %v1336_v57 = vld [vmem:[%s1871_s17 + $0x138] sm:$0xf0]  ;;  %v1275_v58 = vor.u32 %v1405_v54, %v1272_v55  ;;  %v1264_v61 = vld [vmem:[%s1871_s17 + $0xa8] sm:$0xf0]  ;;  %v1419_v62 = vld [vmem:[%s1871_s17 + $0x124] sm:$0xf] }
  0x9b   : > { %874 = vmatpush.bf16.msra.mxu0 %v1183_v15  ;;  %v1339_v59 = vor.u32 %v1421_v56, %v1336_v57  ;;  %v1328_v63 = vld [vmem:[%s1871_s17 + $0x128] sm:$0xf0]  ;;  %v1267_v0 = vor.u32 %v1403_v60, %v1264_v61  ;;  %v1401_v2 = vld [vmem:[%s1871_s17 + $0x94] sm:$0xf]  ;;  %v1256_v3 = vld [vmem:[%s1871_s17 + $0x98] sm:$0xf0] }
  0x9c   : > { %888 = vmatpush.bf16.msra.mxu1 %v1247_v20  ;;  %v1331_v1 = vor.u32 %v1419_v62, %v1328_v63  ;;  %v1417_v4 = vld [vmem:[%s1871_s17 + $0x114] sm:$0xf]  ;;  %v1320_v5 = vld [vmem:[%s1871_s17 + $0x118] sm:$0xf0]  ;;  %v1259_v6 = vor.u32 %v1401_v2, %v1256_v3  ;;  %v1399_v8 = vld [vmem:[%s1871_s17 + $0x84] sm:$0xf] }
  0x9d   : > { %902 = vmatpush.bf16.msra.mxu2 %v1311_v21  ;;  %v1323_v7 = vor.u32 %v1417_v4, %v1320_v5  ;;  %v1248_v9 = vld [vmem:[%s1871_s17 + $0x88] sm:$0xf0]  ;;  %v1415_v10 = vld [vmem:[%s1871_s17 + $0x104] sm:$0xf]  ;;  %v557_v24 = vld [vmem:[%s1873_s15 + $0x10] sm:$0xff]  ;;  %p1372_p5 = scmp.ne.s32.totalorder %s1595_s21, 5 }
  0x9e   : > { %875 = vmatmul.bf16.vlgmr.msra.gmra.mxu0 %v1171_v33  ;;  %915 = vmatpush.bf16.msra.mxu3 %v1195_v36  ;;  %v1312_v11 = vld [vmem:[%s1871_s17 + $0x108] sm:$0xf0]  ;;  %v1251_v12 = vor.u32 %v1399_v8, %v1248_v9  ;;  %v555_v17 = vld [vmem:[%s1873_s15] sm:$0xff] }
  0x9f   : > { %923 = vmatpush.bf16.msrb.mxu0 %v1307_v25  ;;  %889 = vmatmul.bf16.vlgmr.msra.gmra.mxu1 %v1958_v35  ;;  %v1315_v13 = vor.u32 %v1415_v10, %v1312_v11  ;;  %v556_v32 = vld [vmem:[%s1873_s15 + $0x8] sm:$0xff] }
  0xa0   : > { %937 = vmatpush.bf16.msrb.mxu1 %v1371_v26  ;;  %903 = vmatmul.bf16.vlgmr.msra.gmra.mxu2 %v1956_v34 }
  0xa2   : > { %916 = vmatpush.bf16.msra.mxu3 %v1187_v45 }
  0xa3   : > { %924 = vmatpush.bf16.msrb.mxu0 %v1299_v37 }
  0xa4   : > { %938 = vmatpush.bf16.msrb.mxu1 %v1363_v38  ;;  %v558_v38 = vld [vmem:[%s1873_s15 + $0x18] sm:$0xff] }
  0xa5   : > { %917 = vmatmul.bf16.vlgmr.msra.gmra.mxu3 %v1171_v33 }
  0xa7   : > { %925 = vmatpush.bf16.msrb.mxu0 %v1291_v46 }
  0xa8   : > { %939 = vmatpush.bf16.msrb.mxu1 %v1355_v47 }
  0xab   : > { %926 = vmatpush.bf16.msrb.mxu0 %v1283_v52 }
  0xac   : > { %940 = vmatpush.bf16.msrb.mxu1 %v1347_v53 }
  0xaf   : > { %927 = vmatpush.bf16.msrb.mxu0 %v1275_v58 }
  0xb0   : > { %941 = vmatpush.bf16.msrb.mxu1 %v1339_v59 }
  0xb3   : > { %928 = vmatpush.bf16.msrb.mxu0 %v1267_v0 }
  0xb4   : > { %942 = vmatpush.bf16.msrb.mxu1 %v1331_v1 }
  0xb7   : > { %929 = vmatpush.bf16.msrb.mxu0 %v1259_v6 }
  0xb8   : > { %943 = vmatpush.bf16.msrb.mxu1 %v1323_v7 }
  0xbb   : > { %930 = vmatpush.bf16.msrb.mxu0 %v1251_v12 }
  0xbc   : > { %944 = vmatpush.bf16.msrb.mxu1 %v1315_v13 }
  0xbe   : > { %931 = vmatmul.bf16.vlgmr.msrb.gmra.mxu0 %v1958_v35 }
  0xbf   : > { %945 = vmatmul.bf16.vlgmr.msrb.gmra.mxu1 %v1956_v34 }
 0x11b   : > { %v876_v14 = vpop.f32.mrf.mxu0 }
 0x11c   : > { %v890_v15 = vpop.f32.mrf.mxu1 }
 0x11d   : > { %v891_v16 = vadd.f32 %v890_v15, %v876_v14 }
 0x123   : > { %v904_v18 = vpop.f32.mrf.mxu2  ;;  %v878_v20 = vpop.f32.mrf.mxu0 }
 0x124   : > { %v905_v19 = vadd.f32 %v904_v18, %v891_v16  ;;  %v892_v21 = vpop.f32.mrf.mxu1 }
 0x125   : > { %v893_v23 = vadd.f32 %v892_v21, %v878_v20 }
 0x126   : > { %v951_v22 = vadd.f32 %v905_v19, %v555_v17 }
 0x128   : > { %955 = vst [vmem:[%s1873_s15] sm:$0xff] %v951_v22  ;;  %v918_v28 = vpop.f32.mrf.mxu3 }
 0x12b   : > { %v906_v25 = vpop.f32.mrf.mxu2 }
 0x12c   : > { %v907_v26 = vadd.f32 %v906_v25, %v893_v23 }
 0x12e   : > { %v953_v27 = vadd.f32 %v907_v26, %v557_v24 }
 0x130   : > { %957 = vst [vmem:[%s1873_s15 + $0x10] sm:$0xff] %v953_v27  ;;  %v920_v35 = vpop.f32.mrf.mxu3 }
 0x13b   : > { %v932_v29 = vpop.f32.mrf.mxu0 }
 0x13c   : > { %v946_v30 = vpop.f32.mrf.mxu1  ;;  %v933_v31 = vadd.f32 %v932_v29, %v918_v28 }
 0x13e   : > { %v947_v33 = vadd.f32 %v946_v30, %v933_v31 }
 0x140   : > { %v952_v34 = vadd.f32 %v947_v33, %v556_v32 }
 0x142   : > { %956 = vst [vmem:[%s1873_s15 + $0x8] sm:$0xff] %v952_v34 }
 0x143   : > { %v934_v36 = vpop.f32.mrf.mxu0 }
 0x144   : > { %v935_v37 = vadd.f32 %v934_v36, %v920_v35  ;;  %v948_v39 = vpop.f32.mrf.mxu1 }
 0x146   : > { %v949_v40 = vadd.f32 %v948_v39, %v935_v37  ;;  %962 = sbr.rel (%p1372_p5) target bundleno = 345 (0x159), region = 108 }
 0x148   : > { %v954_v41 = vadd.f32 %v949_v40, %v558_v38 }
 0x14a   : > { %958 = vst [vmem:[%s1873_s15 + $0x18] sm:$0xff] %v954_v41 }
 0x14b   : > { %v963_v42 = vld [vmem:[%s1873_s15] sm:$0xff]  ;;  %v967_v43 = vld [vmem:[%s538_s11] sm:$0x3]  ;;  %v964_v47 = vld [vmem:[%s1873_s15 + $0x8] sm:$0xff] }
 0x14c   : > { %v977_v44 = vld [vmem:[%s543_s27] sm:$0x3]  ;;  %v969_v45 = vperm.slane %v967_v43, 0  ;;  %v970_v48 = vperm.slane %v967_v43, 1 }
 0x14d   : > { %v979_v46 = vperm.slane %v977_v44, 0  ;;  %v980_v49 = vperm.slane %v977_v44, 1  ;;  %v965_v50 = vld [vmem:[%s1873_s15 + $0x10] sm:$0xff] }
 0x14e   : > { %v973_v52 = vmul.f32 %v969_v45, %v963_v42  ;;  %v974_v53 = vmul.f32 %v970_v48, %v964_v47  ;;  %v975_v54 = vmul.f32 %v969_v45, %v965_v50 }
 0x150   : > { %v983_v56 = vadd.f32 %v979_v46, %v973_v52  ;;  %v984_v57 = vadd.f32 %v980_v49, %v974_v53  ;;  %v985_v58 = vadd.f32 %v979_v46, %v975_v54 }
 0x151   : > { %v966_v51 = vld [vmem:[%s1873_s15 + $0x18] sm:$0xff] }
 0x152   : > { %v976_v55 = vmul.f32 %v970_v48, %v966_v51  ;;  %v987_v60 = vmax.f32 %v983_v56, 0.0  ;;  %v988_v61 = vmax.f32 %v984_v57, 0.0  ;;  %v989_v62 = vmax.f32 %v985_v58, 0.0 }
 0x154   : > { %v986_v59 = vadd.f32 %v980_v49, %v976_v55  ;;  %991 = vst [vmem:[%s1873_s15] sm:$0xff] %v987_v60 }
 0x155   : > { %992 = vst [vmem:[%s1873_s15 + $0x8] sm:$0xff] %v988_v61 }
 0x156   : > { %v990_v63 = vmax.f32 %v986_v59, 0.0  ;;  %993 = vst [vmem:[%s1873_s15 + $0x10] sm:$0xff] %v989_v62 }
 0x158   : > { %994 = vst [vmem:[%s1873_s15 + $0x18] sm:$0xff] %v990_v63 }
 0x159 PF: > { %1001 = sbr.rel (!%p1733_p12) target bundleno = 353 (0x161), region = 112  ;;  %s1431_s21 = sshll.u32 (%p1733_p12), %s1599_s22, 4 }
 0x15a   : > { %s1007_s29 = scalar_lea.vmem (%p1733_p12), %s2064_s4, %s1431_s21 }
 0x15b   : > { %v1020_v0 = vld [vmem:[%s1873_s15] sm:$0xff] (%p1733_p12) }
 0x15c   : > { %v1022_v1 = vld [vmem:[%s1873_s15 + $0x8] sm:$0xff] (%p1733_p12)  ;;  %1021 = vst [vmem:[%s1007_s29] sm:$0xff] (%p1733_p12), %v1020_v0 }
 0x15d   : > { %v1024_v2 = vld [vmem:[%s1873_s15 + $0x10] sm:$0xff] (%p1733_p12)  ;;  %1023 = vst [vmem:[%s1007_s29 + $0x8] sm:$0xff] (%p1733_p12), %v1022_v1 }
 0x15e   : > { %1025 = vst [vmem:[%s1007_s29 + $0x20] sm:$0xff] %v1024_v2 }
 0x15f   : > { %v1026_v3 = vld [vmem:[%s1873_s15 + $0x18] sm:$0xff] }
 0x160   : > { %1027 = vst [vmem:[%s1007_s29 + $0x28] sm:$0xff] %v1026_v3 }
 0x161 PF: > { %s14_s25 = sadd.s32 1, %s1611_s25   ;;  %s2076_s14 = sld [smem:[#allocation5_spill]] }
 0x162   : > { %p11_p6 = scmp.ge.s32.totalorder %s14_s25, 14   ;;  %s2077_s6 = sld [smem:[#allocation6_spill]] }
 0x163   : > { %s2078_s15 = smov %s1575_s16  ;;  %s2079_s16 = smov %s1731_s13 }
 0x164   : > { %s2080_s17 = smov %s1583_s18  ;;  %s2081_s18 = smov %s1728_s12 }
 0x165   : > { %s2082_s19 = smov %s1591_s20  ;;  %s2083_s20 = smov %s1714_s7 }
 0x166   : > { %s2084_s21 = smov %s1603_s23  ;;  %s2085_s22 = smov %s1607_s24 }
 0x167   : > { %s2086_s23 = smov %s2076_s14  ;;  %13 = sbr.rel (!%p11_p6) target bundleno = 9 (0x9), region = 186 }
 0x168   : > { %s2087_s24 = smov %s2077_s6 }

// kernel: resnet18_16s_forward.41
= control target key start
LH: loop header
LB: loop body
LE: loop exit
PB: predicated region body
PF: predicated region fallthrough
CT: control target
= control target key end

     0   :  { %s1217_s15 = smov 0   ;;  %s1219_s16 = smov 0   ;;  %s1446_s0 = inlined_call_operand.vmem [shape: bf16[16,256], index: 0, kind: input, shape index: {}]   ;;  %s1447_s1 = inlined_call_operand.vmem [shape: bf16[256,512], index: 1, kind: input, shape index: {}]   ;;  %s1448_s2 = inlined_call_operand.vmem [shape: f32[1,512], index: 2, kind: input, shape index: {}]   ;;  %s1449_s3 = inlined_call_operand.vmem [shape: f32[1,512], index: 3, kind: input, shape index: {}]   ;;  %s1450_s4 = inlined_call_operand.vmem [shape: f32[16,512], index: 4, kind: output, shape index: {}]  }
   0x1   :  { %s1221_s17 = smov 0   ;;  %s1223_s18 = smov 0  }
   0x2   :  { %s1225_s19 = smov 0  }
   0x3 LB: > { %s29_s20 = sadd.s32 1, %s1186_s18  ;;  %s921_s21 = sadd.s32 4294967295, %s1190_s19   ;;  %s1190_s19 = sphi %s1225_s19, %s14_s19   ;;  %s1186_s18 = sphi %s1223_s18, %s1455_s18   ;;  %s1182_s17 = sphi %s1221_s17, %s1454_s17   ;;  %s1178_s16 = sphi %s1219_s16, %s1453_s16   ;;  %s1174_s15 = sphi %s1217_s15, %s1452_s15  }
   0x4   : > { %p31_p0 = scmp.ge.s32.totalorder %s29_s20, 2  ;;  %p77_p1 = scmp.ne.s32.totalorder %s1178_s16, %s1174_s15 }
   0x5   : > { %p78_p2 = scmp.eq.s32.totalorder %s1190_s19, 0  ;;  %p161_p4 = scmp.eq.s32.totalorder %s921_s21, 1 }
   0x6   : > { %s1457_s20 = smov (%p31_p0, %s29_s20), 0  ;;  %s70_s23 = sadd.s32 1, %s1178_s16 }
   0x7   : > { %p79_p3 = por %p78_p2, %p77_p1  ;;  %s66_s22 = ssub.s32 %s1186_s18, %s1457_s20 }
   0x8   : > { %p68_p5 = scmp.eq.s32.totalorder %s66_s22, 0  ;;  %p1252_p6 = por %p161_p4, %p77_p1 }
   0x9   : > { %p925_p7 = scmp.ge.s32.totalorder %s1190_s19, 2 }
   0xa   : > { %s1257_s25 = scalar_select %p68_p5, %s1178_s16, %s70_s23  }
   0xb   : > { %198 = sbr.rel (%p925_p7) target bundleno = 52 (0x34), region = 20 }
  0x10   : > { %201 = sbr.rel (!%p79_p3) target bundleno = 52 (0x34), region = 24  ;;  %s203_s26 = sand.u32 (%p79_p3), 1, %s1178_s16  }
  0x11   : > { %s1075_s27 = sshll.u32 (%p79_p3), %s1186_s18, 3  ;;  %s926_s28 = sshll.u32 (%p79_p3), %s203_s26, 8 }
  0x12   : > { %s1265_s5 = scalar_lea.vmem (%p79_p3), %s1447_s1, %s1075_s27  ;;  %s1270_s6 = scalar_lea.vmem (%p79_p3), [#allocation2], %s926_s28 }
  0x13   : > { %v302_v0 = vld [vmem:[%s1265_s5] sm:$0xff] (%p79_p3)  ;;  %v304_v1 = vld [vmem:[%s1265_s5 + $0x10] sm:$0xff] (%p79_p3) }
  0x14   : > { %v306_v2 = vld [vmem:[%s1265_s5 + $0x20] sm:$0xff] (%p79_p3)  ;;  %303 = vst [vmem:[%s1270_s6] sm:$0xff] (%p79_p3), %v302_v0  ;;  %v308_v3 = vld [vmem:[%s1265_s5 + $0x30] sm:$0xff] (%p79_p3) }
  0x15   : > { %305 = vst [vmem:[%s1270_s6 + $0x8] sm:$0xff] %v304_v1  ;;  %v310_v4 = vld [vmem:[%s1265_s5 + $0x40] sm:$0xff]  ;;  %v312_v5 = vld [vmem:[%s1265_s5 + $0x50] sm:$0xff] }
  0x16   : > { %307 = vst [vmem:[%s1270_s6 + $0x10] sm:$0xff] %v306_v2  ;;  %v314_v6 = vld [vmem:[%s1265_s5 + $0x60] sm:$0xff]  ;;  %v316_v7 = vld [vmem:[%s1265_s5 + $0x70] sm:$0xff] }
  0x17   : > { %309 = vst [vmem:[%s1270_s6 + $0x18] sm:$0xff] %v308_v3  ;;  %v318_v8 = vld [vmem:[%s1265_s5 + $0x80] sm:$0xff]  ;;  %v320_v9 = vld [vmem:[%s1265_s5 + $0x90] sm:$0xff] }
  0x18   : > { %311 = vst [vmem:[%s1270_s6 + $0x20] sm:$0xff] %v310_v4  ;;  %v322_v10 = vld [vmem:[%s1265_s5 + $0xa0] sm:$0xff]  ;;  %v324_v11 = vld [vmem:[%s1265_s5 + $0xb0] sm:$0xff] }
  0x19   : > { %313 = vst [vmem:[%s1270_s6 + $0x28] sm:$0xff] %v312_v5  ;;  %v326_v12 = vld [vmem:[%s1265_s5 + $0xc0] sm:$0xff]  ;;  %v328_v13 = vld [vmem:[%s1265_s5 + $0xd0] sm:$0xff] }
  0x1a   : > { %315 = vst [vmem:[%s1270_s6 + $0x30] sm:$0xff] %v314_v6  ;;  %v330_v14 = vld [vmem:[%s1265_s5 + $0xe0] sm:$0xff]  ;;  %v332_v15 = vld [vmem:[%s1265_s5 + $0xf0] sm:$0xff] }
  0x1b   : > { %317 = vst [vmem:[%s1270_s6 + $0x38] sm:$0xff] %v316_v7  ;;  %v334_v16 = vld [vmem:[%s1265_s5 + $0x100] sm:$0xff]  ;;  %v336_v17 = vld [vmem:[%s1265_s5 + $0x110] sm:$0xff] }
  0x1c   : > { %319 = vst [vmem:[%s1270_s6 + $0x40] sm:$0xff] %v318_v8  ;;  %v338_v18 = vld [vmem:[%s1265_s5 + $0x120] sm:$0xff]  ;;  %v340_v19 = vld [vmem:[%s1265_s5 + $0x130] sm:$0xff] }
  0x1d   : > { %321 = vst [vmem:[%s1270_s6 + $0x48] sm:$0xff] %v320_v9  ;;  %v342_v20 = vld [vmem:[%s1265_s5 + $0x140] sm:$0xff]  ;;  %v344_v21 = vld [vmem:[%s1265_s5 + $0x150] sm:$0xff] }
  0x1e   : > { %323 = vst [vmem:[%s1270_s6 + $0x50] sm:$0xff] %v322_v10  ;;  %v346_v22 = vld [vmem:[%s1265_s5 + $0x160] sm:$0xff]  ;;  %v348_v23 = vld [vmem:[%s1265_s5 + $0x170] sm:$0xff] }
  0x1f   : > { %325 = vst [vmem:[%s1270_s6 + $0x58] sm:$0xff] %v324_v11  ;;  %v350_v24 = vld [vmem:[%s1265_s5 + $0x180] sm:$0xff]  ;;  %v352_v25 = vld [vmem:[%s1265_s5 + $0x190] sm:$0xff] }
  0x20   : > { %327 = vst [vmem:[%s1270_s6 + $0x60] sm:$0xff] %v326_v12  ;;  %v354_v26 = vld [vmem:[%s1265_s5 + $0x1a0] sm:$0xff]  ;;  %v356_v27 = vld [vmem:[%s1265_s5 + $0x1b0] sm:$0xff] }
  0x21   : > { %329 = vst [vmem:[%s1270_s6 + $0x68] sm:$0xff] %v328_v13  ;;  %v358_v28 = vld [vmem:[%s1265_s5 + $0x1c0] sm:$0xff]  ;;  %v360_v29 = vld [vmem:[%s1265_s5 + $0x1d0] sm:$0xff] }
  0x22   : > { %331 = vst [vmem:[%s1270_s6 + $0x70] sm:$0xff] %v330_v14  ;;  %v362_v30 = vld [vmem:[%s1265_s5 + $0x1e0] sm:$0xff]  ;;  %v364_v31 = vld [vmem:[%s1265_s5 + $0x1f0] sm:$0xff] }
  0x23   : > { %333 = vst [vmem:[%s1270_s6 + $0x78] sm:$0xff] %v332_v15 }
  0x24   : > { %335 = vst [vmem:[%s1270_s6 + $0x80] sm:$0xff] %v334_v16 }
  0x25   : > { %337 = vst [vmem:[%s1270_s6 + $0x88] sm:$0xff] %v336_v17 }
  0x26   : > { %339 = vst [vmem:[%s1270_s6 + $0x90] sm:$0xff] %v338_v18 }
  0x27   : > { %341 = vst [vmem:[%s1270_s6 + $0x98] sm:$0xff] %v340_v19 }
  0x28   : > { %343 = vst [vmem:[%s1270_s6 + $0xa0] sm:$0xff] %v342_v20 }
  0x29   : > { %345 = vst [vmem:[%s1270_s6 + $0xa8] sm:$0xff] %v344_v21 }
  0x2a   : > { %347 = vst [vmem:[%s1270_s6 + $0xb0] sm:$0xff] %v346_v22 }
  0x2b   : > { %349 = vst [vmem:[%s1270_s6 + $0xb8] sm:$0xff] %v348_v23 }
  0x2c   : > { %351 = vst [vmem:[%s1270_s6 + $0xc0] sm:$0xff] %v350_v24 }
  0x2d   : > { %353 = vst [vmem:[%s1270_s6 + $0xc8] sm:$0xff] %v352_v25 }
  0x2e   : > { %355 = vst [vmem:[%s1270_s6 + $0xd0] sm:$0xff] %v354_v26 }
  0x2f   : > { %357 = vst [vmem:[%s1270_s6 + $0xd8] sm:$0xff] %v356_v27 }
  0x30   : > { %359 = vst [vmem:[%s1270_s6 + $0xe0] sm:$0xff] %v358_v28 }
  0x31   : > { %361 = vst [vmem:[%s1270_s6 + $0xe8] sm:$0xff] %v360_v29 }
  0x32   : > { %363 = vst [vmem:[%s1270_s6 + $0xf0] sm:$0xff] %v362_v30 }
  0x33   : > { %365 = vst [vmem:[%s1270_s6 + $0xf8] sm:$0xff] %v364_v31 }
  0x34 PF: > { %p929_p8 = scmp.ge.s32.totalorder %s1190_s19, 1  ;;  %p386_p9 = scmp.lt.s32.totalorder %s1190_s19, 3 }
  0x36   : > { %p387_p10 = pnand %p929_p8, %p386_p9 }
  0x37   : > { %s393_s7 = sand.u32 (!%p387_p10), 1, %s1174_s15   ;;  %s932_s26 = sshll.u32 (!%p387_p10), %s1182_s17, 1 }
  0x38   : > { %390 = sbr.rel (%p387_p10) target bundleno = 252 (0xfc), region = 70  ;;  %s930_s8 = sshll.u32 (!%p387_p10), %s393_s7, 8 }
  0x39   : > { %s1338_s9 = scalar_lea.vmem (!%p387_p10), [#allocation2], %s930_s8  ;;  %p450_p11 = scmp.lt.s32.totalorder (!%p387_p10), %s932_s26, 3 }
  0x3a   : > { %s931_s8 = sshll.u32 (!%p387_p10), %s393_s7, 5 }
  0x3d   : > { %v1000_v32 = vld [vmem:[%s1338_s9 + $0x70] sm:$0xf]  ;;  %v1093_v33 = vld [vmem:[%s1338_s9 + $0x74] sm:$0xf0]  ;;  %v1092_v37 = vld [vmem:[%s1338_s9 + $0x74] sm:$0xf] }
  0x3e   : > { %v1064_v34 = vld [vmem:[%s1338_s9 + $0xf0] sm:$0xf]  ;;  %v1001_v35 = vor.u32 %v1093_v33, %v1000_v32  ;;  %v1109_v36 = vld [vmem:[%s1338_s9 + $0xf4] sm:$0xf0]  ;;  %v1002_v38 = vld [vmem:[%s1338_s9 + $0x78] sm:$0xf0] }
  0x3f   : > { %v1065_v39 = vor.u32 %v1109_v36, %v1064_v34  ;;  %v1005_v40 = vor.u32 %v1092_v37, %v1002_v38  ;;  %v1108_v41 = vld [vmem:[%s1338_s9 + $0xf4] sm:$0xf]  ;;  %v1066_v42 = vld [vmem:[%s1338_s9 + $0xf8] sm:$0xf0]  ;;  %v992_v43 = vld [vmem:[%s1338_s9 + $0x60] sm:$0xf] }
  0x40   : > { %677 = vmatpush.bf16.msra.mxu0 %v1001_v35  ;;  %v1069_v44 = vor.u32 %v1108_v41, %v1066_v42  ;;  %v1091_v45 = vld [vmem:[%s1338_s9 + $0x64] sm:$0xf0]  ;;  %v1056_v46 = vld [vmem:[%s1338_s9 + $0xe0] sm:$0xf]  ;;  %v1090_v50 = vld [vmem:[%s1338_s9 + $0x64] sm:$0xf] }
  0x41   : > { %v1107_v47 = vld [vmem:[%s1338_s9 + $0xe4] sm:$0xf0]  ;;  %691 = vmatpush.bf16.msra.mxu1 %v1065_v39  ;;  %705 = vmatpush.bf16.msra.mxu2 %v1005_v40  ;;  %v993_v48 = vor.u32 %v1091_v45, %v992_v43  ;;  %v994_v51 = vld [vmem:[%s1338_s9 + $0x68] sm:$0xf0]  ;;  %v1106_v52 = vld [vmem:[%s1338_s9 + $0xe4] sm:$0xf] }
  0x42   : > { %v1057_v49 = vor.u32 %v1107_v47, %v1056_v46  ;;  %719 = vmatpush.bf16.msra.mxu3 %v1069_v44  ;;  %v997_v53 = vor.u32 %v1090_v50, %v994_v51  ;;  %v1058_v54 = vld [vmem:[%s1338_s9 + $0xe8] sm:$0xf0]  ;;  %v984_v55 = vld [vmem:[%s1338_s9 + $0x50] sm:$0xf]  ;;  %v1089_v56 = vld [vmem:[%s1338_s9 + $0x54] sm:$0xf0] }
  0x43   : > { %v1061_v57 = vor.u32 %v1106_v52, %v1058_v54  ;;  %v1048_v58 = vld [vmem:[%s1338_s9 + $0xd0] sm:$0xf]  ;;  %v1105_v59 = vld [vmem:[%s1338_s9 + $0xd4] sm:$0xf0]  ;;  %v1088_v60 = vld [vmem:[%s1338_s9 + $0x54] sm:$0xf]  ;;  %v985_v61 = vor.u32 %v1089_v56, %v984_v55 }
  0x44   : > { %678 = vmatpush.bf16.msra.mxu0 %v993_v48  ;;  %v986_v62 = vld [vmem:[%s1338_s9 + $0x58] sm:$0xf0]  ;;  %v1104_v63 = vld [vmem:[%s1338_s9 + $0xd4] sm:$0xf]  ;;  %v1049_v1 = vor.u32 %v1105_v59, %v1048_v58  ;;  %v976_v3 = vld [vmem:[%s1338_s9 + $0x40] sm:$0xf] }
  0x45   : > { %v1050_v0 = vld [vmem:[%s1338_s9 + $0xd8] sm:$0xf0]  ;;  %692 = vmatpush.bf16.msra.mxu1 %v1057_v49  ;;  %706 = vmatpush.bf16.msra.mxu2 %v997_v53  ;;  %v989_v2 = vor.u32 %v1088_v60, %v986_v62  ;;  %v1087_v4 = vld [vmem:[%s1338_s9 + $0x44] sm:$0xf0]  ;;  %v1040_v5 = vld [vmem:[%s1338_s9 + $0xc0] sm:$0xf] }
  0x46   : > { %720 = vmatpush.bf16.msra.mxu3 %v1061_v57  ;;  %v1053_v6 = vor.u32 %v1104_v63, %v1050_v0  ;;  %v1103_v7 = vld [vmem:[%s1338_s9 + $0xc4] sm:$0xf0]  ;;  %v1086_v8 = vld [vmem:[%s1338_s9 + $0x44] sm:$0xf]  ;;  %v978_v9 = vld [vmem:[%s1338_s9 + $0x48] sm:$0xf0]  ;;  %v977_v12 = vor.u32 %v1087_v4, %v976_v3 }
  0x47   : > { %v1102_v10 = vld [vmem:[%s1338_s9 + $0xc4] sm:$0xf]  ;;  %v1042_v11 = vld [vmem:[%s1338_s9 + $0xc8] sm:$0xf0]  ;;  %v1041_v13 = vor.u32 %v1103_v7, %v1040_v5  ;;  %v981_v14 = vor.u32 %v1086_v8, %v978_v9  ;;  %v968_v15 = vld [vmem:[%s1338_s9 + $0x30] sm:$0xf] }
  0x48   : > { %679 = vmatpush.bf16.msra.mxu0 %v985_v61  ;;  %v1085_v16 = vld [vmem:[%s1338_s9 + $0x34] sm:$0xf0]  ;;  %v1032_v17 = vld [vmem:[%s1338_s9 + $0xb0] sm:$0xf]  ;;  %v1045_v18 = vor.u32 %v1102_v10, %v1042_v11  ;;  %v1084_v20 = vld [vmem:[%s1338_s9 + $0x34] sm:$0xf] }
  0x49   : > { %693 = vmatpush.bf16.msra.mxu1 %v1049_v1  ;;  %707 = vmatpush.bf16.msra.mxu2 %v989_v2  ;;  %v1101_v19 = vld [vmem:[%s1338_s9 + $0xb4] sm:$0xf0]  ;;  %v970_v21 = vld [vmem:[%s1338_s9 + $0x38] sm:$0xf0]  ;;  %v1100_v22 = vld [vmem:[%s1338_s9 + $0xb4] sm:$0xf]  ;;  %v969_v24 = vor.u32 %v1085_v16, %v968_v15 }
  0x4a   : > { %721 = vmatpush.bf16.msra.mxu3 %v1053_v6  ;;  %v1034_v23 = vld [vmem:[%s1338_s9 + $0xb8] sm:$0xf0]  ;;  %v1033_v25 = vor.u32 %v1101_v19, %v1032_v17  ;;  %v973_v26 = vor.u32 %v1084_v20, %v970_v21  ;;  %v960_v27 = vld [vmem:[%s1338_s9 + $0x20] sm:$0xf]  ;;  %v1083_v28 = vld [vmem:[%s1338_s9 + $0x24] sm:$0xf0] }
  0x4b   : > { %v1024_v29 = vld [vmem:[%s1338_s9 + $0xa0] sm:$0xf]  ;;  %v1037_v30 = vor.u32 %v1100_v22, %v1034_v23  ;;  %v1099_v31 = vld [vmem:[%s1338_s9 + $0xa4] sm:$0xf0]  ;;  %v1082_v32 = vld [vmem:[%s1338_s9 + $0x24] sm:$0xf]  ;;  %v961_v36 = vor.u32 %v1083_v28, %v960_v27 }
  0x4c   : > { %680 = vmatpush.bf16.msra.mxu0 %v977_v12  ;;  %v962_v33 = vld [vmem:[%s1338_s9 + $0x28] sm:$0xf0]  ;;  %v1098_v34 = vld [vmem:[%s1338_s9 + $0xa4] sm:$0xf]  ;;  %v1025_v37 = vor.u32 %v1099_v31, %v1024_v29  ;;  %v952_v39 = vld [vmem:[%s1338_s9 + $0x10] sm:$0xf] }
  0x4d   : > { %694 = vmatpush.bf16.msra.mxu1 %v1041_v13  ;;  %708 = vmatpush.bf16.msra.mxu2 %v981_v14  ;;  %v1026_v35 = vld [vmem:[%s1338_s9 + $0xa8] sm:$0xf0]  ;;  %v965_v38 = vor.u32 %v1082_v32, %v962_v33  ;;  %v1081_v40 = vld [vmem:[%s1338_s9 + $0x14] sm:$0xf0]  ;;  %v1016_v41 = vld [vmem:[%s1338_s9 + $0x90] sm:$0xf] }
  0x4e   : > { %722 = vmatpush.bf16.msra.mxu3 %v1045_v18  ;;  %v1029_v42 = vor.u32 %v1098_v34, %v1026_v35  ;;  %v1097_v43 = vld [vmem:[%s1338_s9 + $0x94] sm:$0xf0]  ;;  %v1080_v44 = vld [vmem:[%s1338_s9 + $0x14] sm:$0xf]  ;;  %v954_v45 = vld [vmem:[%s1338_s9 + $0x18] sm:$0xf0]  ;;  %v953_v48 = vor.u32 %v1081_v40, %v952_v39 }
  0x4f   : > { %v1096_v46 = vld [vmem:[%s1338_s9 + $0x94] sm:$0xf]  ;;  %v1018_v47 = vld [vmem:[%s1338_s9 + $0x98] sm:$0xf0]  ;;  %v1017_v49 = vor.u32 %v1097_v43, %v1016_v41  ;;  %v957_v50 = vor.u32 %v1080_v44, %v954_v45  ;;  %v944_v51 = vld [vmem:[%s1338_s9] sm:$0xf] }
  0x50   : > { %681 = vmatpush.bf16.msra.mxu0 %v969_v24  ;;  %v1079_v52 = vld [vmem:[%s1338_s9 + $0x4] sm:$0xf0]  ;;  %v1008_v53 = vld [vmem:[%s1338_s9 + $0x80] sm:$0xf]  ;;  %v1021_v54 = vor.u32 %v1096_v46, %v1018_v47  ;;  %v1078_v56 = vld [vmem:[%s1338_s9 + $0x4] sm:$0xf] }
  0x51   : > { %695 = vmatpush.bf16.msra.mxu1 %v1033_v25  ;;  %709 = vmatpush.bf16.msra.mxu2 %v973_v26  ;;  %v1095_v55 = vld [vmem:[%s1338_s9 + $0x84] sm:$0xf0]  ;;  %v946_v57 = vld [vmem:[%s1338_s9 + $0x8] sm:$0xf0]  ;;  %v1094_v58 = vld [vmem:[%s1338_s9 + $0x84] sm:$0xf]  ;;  %v945_v60 = vor.u32 %v1079_v52, %v944_v51 }
  0x52   : > { %723 = vmatpush.bf16.msra.mxu3 %v1037_v30  ;;  %v1010_v59 = vld [vmem:[%s1338_s9 + $0x88] sm:$0xf0]  ;;  %v936_v61 = vld [vmem:[%s1446_s0] sm:$0xf]  ;;  %v1077_v62 = vld [vmem:[%s1446_s0 + $0x4] sm:$0xf0]  ;;  %v1009_v63 = vor.u32 %v1095_v55, %v1008_v53  ;;  %v949_v0 = vor.u32 %v1078_v56, %v946_v57 }
  0x53   : > { %v1076_v1 = vld [vmem:[%s1446_s0 + $0x4] sm:$0xf]  ;;  %v938_v2 = vld [vmem:[%s1446_s0 + $0x8] sm:$0xf0]  ;;  %v1013_v3 = vor.u32 %v1094_v58, %v1010_v59  ;;  %v937_v4 = vor.u32 %v1077_v62, %v936_v61  ;;  %s1459_s26 = smov (!%p450_p11, %s932_s26), 3  ;;  %s434_s9 = scalar_lea.vmem [#allocation3], %s931_s8 }
  0x54   : > { %682 = vmatpush.bf16.msra.mxu0 %v961_v36  ;;  %v941_v5 = vor.u32 %v1076_v1, %v938_v2  ;;  %s452_s29 = scalar_lea.vmem %s1448_s2, %s1459_s26  ;;  %s457_s6 = scalar_lea.vmem %s1449_s3, %s1459_s26 }
  0x55   : > { %696 = vmatpush.bf16.msra.mxu1 %v1025_v37  ;;  %710 = vmatpush.bf16.msra.mxu2 %v965_v38  ;;  %v748_v6 = vld [vmem:[%s452_s29] sm:$0x3]  ;;  %s1110_s15 = sshll.u32 (%p1252_p6), %s1182_s17, 4 }
  0x56   : > { %724 = vmatpush.bf16.msra.mxu3 %v1029_v42  ;;  %v758_v9 = vld [vmem:[%s457_s6] sm:$0x3]  ;;  %v750_v11 = vperm.slane %v748_v6, 0  ;;  %v751_v19 = vperm.slane %v748_v6, 1  ;;  %s784_s11 = scalar_lea.vmem (%p1252_p6), %s1450_s4, %s1110_s15 }
  0x57   : > { %v760_v12 = vperm.slane %v758_v9, 0  ;;  %v761_v22 = vperm.slane %v758_v9, 1 }
  0x58   : > { %683 = vmatpush.bf16.msra.mxu0 %v953_v48 }
  0x59   : > { %697 = vmatpush.bf16.msra.mxu1 %v1017_v49  ;;  %711 = vmatpush.bf16.msra.mxu2 %v957_v50 }
  0x5a   : > { %725 = vmatpush.bf16.msra.mxu3 %v1021_v54 }
  0x5c   : > { %684 = vmatpush.bf16.msra.mxu0 %v945_v60 }
  0x5d   : > { %698 = vmatpush.bf16.msra.mxu1 %v1009_v63  ;;  %712 = vmatpush.bf16.msra.mxu2 %v949_v0 }
  0x5e   : > { %726 = vmatpush.bf16.msra.mxu3 %v1013_v3 }
  0x5f   : > { %685 = vmatmul.bf16.vlgmr.msra.gmra.mxu0 %v937_v4 }
  0x60   : > { %699 = vmatmul.bf16.vlgmr.msra.gmra.mxu1 %v941_v5  ;;  %713 = vmatmul.bf16.vlgmr.msra.gmra.mxu2 %v937_v4 }
  0x61   : > { %727 = vmatmul.bf16.vlgmr.msra.gmra.mxu3 %v941_v5 }
  0xdc   : > { %v686_v7 = vpop.f32.mrf.mxu0 }
  0xdd   : > { %v700_v8 = vpop.f32.mrf.mxu1 }
  0xde   : > { %v701_v10 = vadd.f32 %v700_v8, %v686_v7 }
  0xe0   : > { %v754_v13 = vmul.f32 %v750_v11, %v701_v10 }
  0xe2   : > { %v764_v15 = vadd.f32 %v760_v12, %v754_v13 }
  0xe3   : > { %v714_v14 = vpop.f32.mrf.mxu2 }
  0xe4   : > { %v728_v16 = vpop.f32.mrf.mxu3  ;;  %v688_v17 = vpop.f32.mrf.mxu0  ;;  %768 = vst [vmem:[%s434_s9] sm:$0xff] %v764_v15 }
  0xe5   : > { %v729_v18 = vadd.f32 %v728_v16, %v714_v14  ;;  %v702_v20 = vpop.f32.mrf.mxu1 }
  0xe6   : > { %v703_v21 = vadd.f32 %v702_v20, %v688_v17 }
  0xe7   : > { %v755_v23 = vmul.f32 %v751_v19, %v729_v18 }
  0xe8   : > { %v756_v24 = vmul.f32 %v750_v11, %v703_v21 }
  0xe9   : > { %v765_v25 = vadd.f32 %v761_v22, %v755_v23 }
  0xea   : > { %v766_v27 = vadd.f32 %v760_v12, %v756_v24 }
  0xeb   : > { %v716_v26 = vpop.f32.mrf.mxu2  ;;  %769 = vst [vmem:[%s434_s9 + $0x8] sm:$0xff] %v765_v25  ;;  %v797_v32 = vld [vmem:[%s434_s9] sm:$0xff] (%p1252_p6) }
  0xec   : > { %v730_v28 = vpop.f32.mrf.mxu3  ;;  %770 = vst [vmem:[%s434_s9 + $0x10] sm:$0xff] %v766_v27 }
  0xed   : > { %v731_v29 = vadd.f32 %v730_v28, %v716_v26  ;;  %798 = vst [vmem:[%s784_s11] sm:$0xff] (%p1252_p6), %v797_v32 }
  0xef   : > { %v757_v30 = vmul.f32 %v751_v19, %v731_v29  ;;  %778 = sbr.rel (!%p1252_p6) target bundleno = 252 (0xfc), region = 86 }
  0xf1   : > { %v767_v31 = vadd.f32 %v761_v22, %v757_v30 }
  0xf2   : > { %v799_v33 = vld [vmem:[%s434_s9 + $0x8] sm:$0xff] (%p1252_p6) }
  0xf3   : > { %771 = vst [vmem:[%s434_s9 + $0x18] sm:$0xff] %v767_v31  ;;  %v801_v34 = vld [vmem:[%s434_s9 + $0x10] sm:$0xff] (%p1252_p6) }
  0xf4   : > { %800 = vst [vmem:[%s784_s11 + $0x8] sm:$0xff] %v799_v33 }
  0xf5   : > { %802 = vst [vmem:[%s784_s11 + $0x20] sm:$0xff] %v801_v34 }
  0xfa   : > { %v803_v35 = vld [vmem:[%s434_s9 + $0x18] sm:$0xff] }
  0xfb   : > { %804 = vst [vmem:[%s784_s11 + $0x28] sm:$0xff] %v803_v35 }
  0xfc PF: > { %s14_s19 = sadd.s32 1, %s1190_s19   ;;  %s1452_s15 = smov %s1178_s16 }
  0xfd   : > { %p11_p12 = scmp.ge.s32.totalorder %s14_s19, 4   ;;  %s1453_s16 = smov %s1257_s25 }
  0xfe   : > { %s1454_s17 = smov %s1186_s18  ;;  %s1455_s18 = smov %s1457_s20 }
  0xff   :  { %13 = sbr.rel (!%p11_p12) target bundleno = 3 (0x3), region = 149 }

// kernel: resnet18_16s_forward.42
= control target key start
LH: loop header
LB: loop body
LE: loop exit
PB: predicated region body
PF: predicated region fallthrough
CT: control target
= control target key end

     0   :  { %s2537_s0 = inlined_call_operand.vmem [shape: bf16[16,4608], index: 0, kind: input, shape index: {}]   ;;  %s2538_s1 = inlined_call_operand.vmem [shape: bf16[4608,512], index: 1, kind: input, shape index: {}]   ;;  %s2539_s2 = inlined_call_operand.vmem [shape: f32[1,512], index: 2, kind: input, shape index: {}]   ;;  %s2540_s3 = inlined_call_operand.vmem [shape: f32[1,512], index: 3, kind: input, shape index: {}]   ;;  %s2541_s4 = inlined_call_operand.vmem [shape: f32[16,512], index: 4, kind: input, shape index: {}]   ;;  %s2542_s5 = inlined_call_operand.vmem [shape: f32[16,512], index: 5, kind: output, shape index: {}]  }
   0x1   :  { %2545 = sst [smem:[#allocation9_spill]] %s2537_s0 }
   0x2   :  { %2546 = sst [smem:[#allocation10_spill]] %s2538_s1 }
   0x3   :  { %s2019_s18 = smov 0   ;;  %s2021_s19 = smov 0  }
   0x4   :  { %s2023_s20 = smov 0   ;;  %s2025_s21 = smov 0  }
   0x5   :  { %s2027_s22 = smov 0   ;;  %s2029_s23 = smov 0  }
   0x6   :  { %s2031_s24 = smov 0   ;;  %s2033_s25 = smov 0  }
   0x7   :  { %s2035_s26 = smov 0   ;;  %s2037_s27 = smov 0  }
   0x8   :  { %s2039_s28 = smov 0  }
   0x9 LB: > { %s1438_s29 = sadd.s32 4294967295, %s1986_s28   ;;  %s27_s30 = sadd.s32 1, %s1978_s26  ;;  %s1986_s28 = sphi %s2039_s28, %s15_s28   ;;  %s1982_s27 = sphi %s2037_s27, %s2568_s27   ;;  %s1978_s26 = sphi %s2035_s26, %s2567_s26   ;;  %s1974_s25 = sphi %s2033_s25, %s2566_s25   ;;  %s1970_s24 = sphi %s2031_s24, %s2565_s24   ;;  %s1966_s23 = sphi %s2029_s23, %s2564_s23   ;;  %s1962_s22 = sphi %s2027_s22, %s2563_s22   ;;  %s1958_s21 = sphi %s2025_s21, %s2562_s21   ;;  %s1954_s20 = sphi %s2023_s20, %s2561_s20   ;;  %s1950_s19 = sphi %s2021_s19, %s2560_s19   ;;  %s1946_s18 = sphi %s2019_s18, %s2559_s18  }
   0xa   : > { %p28_p0 = scmp.ge.s32.totalorder %s27_s30, 9  ;;  %s30_s6 = sadd.s32 1, %s1982_s27 }
   0xb   : > { %s43_s7 = sadd.s32 1, %s1966_s23  ;;  %p50_p1 = scmp.ne.s32.totalorder %s1966_s23, %s1962_s22 }
   0xc   : > { %s2570_s30 = smov (%p28_p0, %s27_s30), 0  ;;  %s2572_s6 = smov (!%p28_p0, %s30_s6), %s1982_s27 }
   0xd   : > { %2547 = sst [smem:[#allocation6_spill]] %s2570_s30  ;;  %s39_s8 = ssub.s32 %s1978_s26, %s2570_s30 }
   0xe   : > { %p51_p2 = scmp.eq.s32.totalorder %s1986_s28, 0  ;;  %p32_p3 = scmp.ge.s32.totalorder %s2572_s6, 2 }
   0xf   : > { %p41_p4 = scmp.eq.s32.totalorder %s39_s8, 0  ;;  %s71_s10 = sadd.s32 1, %s1958_s21 }
  0x10   : > { %p2088_p5 = por %p51_p2, %p50_p1  ;;  %s2574_s6 = smov (%p32_p3, %s2572_s6), 0 }
  0x11   : > { %2549 = sst [smem:[#allocation7_spill]] %s2574_s6  ;;  %s67_s12 = ssub.s32 %s1982_s27, %s2574_s6 }
  0x12   : > { %s2096_s11 = scalar_select %p41_p4, %s1966_s23, %s43_s7  }
  0x13   : > { %p78_p6 = scmp.ne.s32.totalorder %s1958_s21, %s1954_s20  ;;  %s68_s13 = sor.u32 %s67_s12, %s39_s8 }
  0x14   : > { %2550 = sst [smem:[#allocation8_spill]] %s2096_s11  ;;  %p149_p7 = scmp.eq.s32.totalorder %s67_s12, 0 }
  0x15   : > { %p69_p8 = scmp.eq.s32.totalorder %s68_s13, 0  ;;  %p2104_p9 = por %p78_p6, %p51_p2 }
  0x16   : > { %s151_s15 = sadd.s32 1, %s1950_s19  ;;  %p158_p10 = scmp.ne.s32.totalorder %s1950_s19, %s1946_s18 }
  0x17   : > { %s2112_s16 = scalar_select %p69_p8, %s1958_s21, %s71_s10  }
  0x18   : > { %s2115_s17 = scalar_select %p149_p7, %s1950_s19, %s151_s15  }
  0x19   : > { %p2119_p11 = por %p158_p10, %p51_p2  ;;  %p190_p12 = scmp.eq.s32.totalorder %s1438_s29, 17 }
  0x1a   : > { %p1441_p0 = scmp.ge.s32.totalorder %s1986_s28, 18 }
  0x1b   : > { %p2123_p13 = por %p190_p12, %p158_p10 }
  0x1c   : > { %212 = sbr.rel (%p1441_p0) target bundleno = 129 (0x81), region = 16 }
  0x21   : > { %215 = sbr.rel (!%p2088_p5) target bundleno = 47 (0x2f), region = 20  ;;  %s217_s10 = sand.u32 (%p2088_p5), 1, %s1966_s23  }
  0x22   : > { %s1739_s12 = sshll.u32 (%p2088_p5), %s1978_s26, 4  ;;  %s1442_s13 = sshll.u32 (%p2088_p5), %s217_s10, 5 }
  0x23   : > { %s2554_s0 = sld [smem:[#allocation9_spill]] (%p2088_p5)  ;;  %s219_s29 = scalar_lea.vmem (%p2088_p5), [#allocation2], %s1442_s13 }
  0x29   : > { %s225_s30 = scalar_lea.vmem %s2554_s0, %s1739_s12 }
  0x2a   : > { %v238_v0 = vld [vmem:[%s225_s30] sm:$0xff]  ;;  %v240_v1 = vld [vmem:[%s225_s30 + $0x8] sm:$0xff]  ;;  %v242_v2 = vld [vmem:[%s225_s30 + $0x90] sm:$0xff] }
  0x2b   : > { %239 = vst [vmem:[%s219_s29] sm:$0xff] %v238_v0  ;;  %v244_v3 = vld [vmem:[%s225_s30 + $0x98] sm:$0xff] }
  0x2c   : > { %241 = vst [vmem:[%s219_s29 + $0x8] sm:$0xff] %v240_v1 }
  0x2d   : > { %243 = vst [vmem:[%s219_s29 + $0x10] sm:$0xff] %v242_v2 }
  0x2e   : > { %245 = vst [vmem:[%s219_s29 + $0x18] sm:$0xff] %v244_v3 }
  0x2f PF: > { %251 = sbr.rel (!%p2104_p9) target bundleno = 121 (0x79), region = 43  ;;  %s253_s9 = sand.u32 (%p2104_p9), 1, %s1958_s21  }
  0x30   : > { %s1447_s10 = sshll.u32 (%p2104_p9), %s1982_s27, 1  ;;  %s1445_s6 = sshll.u32 (%p2104_p9), %s253_s9, 9 }
  0x31   : > { %s1740_s12 = sshll.u32 (%p2104_p9), %s1978_s26, 8  ;;  %s2555_s1 = sld [smem:[#allocation10_spill]] (%p2104_p9) }
  0x32   : > { %s259_s15 = sadd.s32 (%p2104_p9), %s1740_s12, %s1447_s10  ;;  %s2148_s14 = scalar_lea.vmem (%p2104_p9), [#allocation3], %s1445_s6 }
  0x33   : > { %s1449_s0 = sshll.u32 (%p2104_p9), %s259_s15, 2 }
  0x37   : > { %s2143_s30 = scalar_lea.vmem %s2555_s1, %s1449_s0 }
  0x38   : > { %v416_v4 = vld [vmem:[%s2143_s30] sm:$0xff]  ;;  %v418_v5 = vld [vmem:[%s2143_s30 + $0x10] sm:$0xff] }
  0x39   : > { %v420_v6 = vld [vmem:[%s2143_s30 + $0x20] sm:$0xff]  ;;  %417 = vst [vmem:[%s2148_s14] sm:$0xff] %v416_v4  ;;  %v422_v7 = vld [vmem:[%s2143_s30 + $0x30] sm:$0xff] }
  0x3a   : > { %419 = vst [vmem:[%s2148_s14 + $0x8] sm:$0xff] %v418_v5  ;;  %v424_v8 = vld [vmem:[%s2143_s30 + $0x40] sm:$0xff]  ;;  %v426_v9 = vld [vmem:[%s2143_s30 + $0x50] sm:$0xff] }
  0x3b   : > { %421 = vst [vmem:[%s2148_s14 + $0x10] sm:$0xff] %v420_v6  ;;  %v428_v10 = vld [vmem:[%s2143_s30 + $0x60] sm:$0xff]  ;;  %v430_v11 = vld [vmem:[%s2143_s30 + $0x70] sm:$0xff] }
  0x3c   : > { %423 = vst [vmem:[%s2148_s14 + $0x18] sm:$0xff] %v422_v7  ;;  %v432_v12 = vld [vmem:[%s2143_s30 + $0x80] sm:$0xff]  ;;  %v434_v13 = vld [vmem:[%s2143_s30 + $0x90] sm:$0xff] }
  0x3d   : > { %425 = vst [vmem:[%s2148_s14 + $0x20] sm:$0xff] %v424_v8  ;;  %v436_v14 = vld [vmem:[%s2143_s30 + $0xa0] sm:$0xff]  ;;  %v438_v15 = vld [vmem:[%s2143_s30 + $0xb0] sm:$0xff] }
  0x3e   : > { %427 = vst [vmem:[%s2148_s14 + $0x28] sm:$0xff] %v426_v9  ;;  %v440_v16 = vld [vmem:[%s2143_s30 + $0xc0] sm:$0xff]  ;;  %v442_v17 = vld [vmem:[%s2143_s30 + $0xd0] sm:$0xff] }
  0x3f   : > { %429 = vst [vmem:[%s2148_s14 + $0x30] sm:$0xff] %v428_v10  ;;  %v444_v18 = vld [vmem:[%s2143_s30 + $0xe0] sm:$0xff]  ;;  %v446_v19 = vld [vmem:[%s2143_s30 + $0xf0] sm:$0xff] }
  0x40   : > { %431 = vst [vmem:[%s2148_s14 + $0x38] sm:$0xff] %v430_v11  ;;  %v448_v20 = vld [vmem:[%s2143_s30 + $0x100] sm:$0xff]  ;;  %v450_v21 = vld [vmem:[%s2143_s30 + $0x110] sm:$0xff] }
  0x41   : > { %433 = vst [vmem:[%s2148_s14 + $0x40] sm:$0xff] %v432_v12  ;;  %v452_v22 = vld [vmem:[%s2143_s30 + $0x120] sm:$0xff]  ;;  %v454_v23 = vld [vmem:[%s2143_s30 + $0x130] sm:$0xff] }
  0x42   : > { %435 = vst [vmem:[%s2148_s14 + $0x48] sm:$0xff] %v434_v13  ;;  %v456_v24 = vld [vmem:[%s2143_s30 + $0x140] sm:$0xff]  ;;  %v458_v25 = vld [vmem:[%s2143_s30 + $0x150] sm:$0xff] }
  0x43   : > { %437 = vst [vmem:[%s2148_s14 + $0x50] sm:$0xff] %v436_v14  ;;  %v460_v26 = vld [vmem:[%s2143_s30 + $0x160] sm:$0xff]  ;;  %v462_v27 = vld [vmem:[%s2143_s30 + $0x170] sm:$0xff] }
  0x44   : > { %439 = vst [vmem:[%s2148_s14 + $0x58] sm:$0xff] %v438_v15  ;;  %v464_v28 = vld [vmem:[%s2143_s30 + $0x180] sm:$0xff]  ;;  %v466_v29 = vld [vmem:[%s2143_s30 + $0x190] sm:$0xff] }
  0x45   : > { %441 = vst [vmem:[%s2148_s14 + $0x60] sm:$0xff] %v440_v16  ;;  %v468_v30 = vld [vmem:[%s2143_s30 + $0x1a0] sm:$0xff]  ;;  %v470_v31 = vld [vmem:[%s2143_s30 + $0x1b0] sm:$0xff] }
  0x46   : > { %443 = vst [vmem:[%s2148_s14 + $0x68] sm:$0xff] %v442_v17  ;;  %v472_v32 = vld [vmem:[%s2143_s30 + $0x1c0] sm:$0xff]  ;;  %v474_v33 = vld [vmem:[%s2143_s30 + $0x1d0] sm:$0xff] }
  0x47   : > { %445 = vst [vmem:[%s2148_s14 + $0x70] sm:$0xff] %v444_v18  ;;  %v476_v34 = vld [vmem:[%s2143_s30 + $0x1e0] sm:$0xff]  ;;  %v478_v35 = vld [vmem:[%s2143_s30 + $0x1f0] sm:$0xff] }
  0x48   : > { %447 = vst [vmem:[%s2148_s14 + $0x78] sm:$0xff] %v446_v19  ;;  %v480_v36 = vld [vmem:[%s2143_s30 + $0x200] sm:$0xff]  ;;  %v482_v37 = vld [vmem:[%s2143_s30 + $0x210] sm:$0xff] }
  0x49   : > { %449 = vst [vmem:[%s2148_s14 + $0x80] sm:$0xff] %v448_v20  ;;  %v484_v38 = vld [vmem:[%s2143_s30 + $0x220] sm:$0xff]  ;;  %v486_v39 = vld [vmem:[%s2143_s30 + $0x230] sm:$0xff] }
  0x4a   : > { %451 = vst [vmem:[%s2148_s14 + $0x88] sm:$0xff] %v450_v21  ;;  %v488_v40 = vld [vmem:[%s2143_s30 + $0x240] sm:$0xff]  ;;  %v490_v41 = vld [vmem:[%s2143_s30 + $0x250] sm:$0xff] }
  0x4b   : > { %453 = vst [vmem:[%s2148_s14 + $0x90] sm:$0xff] %v452_v22  ;;  %v492_v42 = vld [vmem:[%s2143_s30 + $0x260] sm:$0xff]  ;;  %v494_v43 = vld [vmem:[%s2143_s30 + $0x270] sm:$0xff] }
  0x4c   : > { %455 = vst [vmem:[%s2148_s14 + $0x98] sm:$0xff] %v454_v23  ;;  %v496_v44 = vld [vmem:[%s2143_s30 + $0x280] sm:$0xff]  ;;  %v498_v45 = vld [vmem:[%s2143_s30 + $0x290] sm:$0xff] }
  0x4d   : > { %457 = vst [vmem:[%s2148_s14 + $0xa0] sm:$0xff] %v456_v24  ;;  %v500_v46 = vld [vmem:[%s2143_s30 + $0x2a0] sm:$0xff]  ;;  %v502_v47 = vld [vmem:[%s2143_s30 + $0x2b0] sm:$0xff] }
  0x4e   : > { %459 = vst [vmem:[%s2148_s14 + $0xa8] sm:$0xff] %v458_v25  ;;  %v504_v48 = vld [vmem:[%s2143_s30 + $0x2c0] sm:$0xff]  ;;  %v506_v49 = vld [vmem:[%s2143_s30 + $0x2d0] sm:$0xff] }
  0x4f   : > { %461 = vst [vmem:[%s2148_s14 + $0xb0] sm:$0xff] %v460_v26  ;;  %v508_v50 = vld [vmem:[%s2143_s30 + $0x2e0] sm:$0xff]  ;;  %v510_v51 = vld [vmem:[%s2143_s30 + $0x2f0] sm:$0xff] }
  0x50   : > { %463 = vst [vmem:[%s2148_s14 + $0xb8] sm:$0xff] %v462_v27  ;;  %v512_v52 = vld [vmem:[%s2143_s30 + $0x300] sm:$0xff]  ;;  %v514_v53 = vld [vmem:[%s2143_s30 + $0x310] sm:$0xff] }
  0x51   : > { %465 = vst [vmem:[%s2148_s14 + $0xc0] sm:$0xff] %v464_v28  ;;  %v516_v54 = vld [vmem:[%s2143_s30 + $0x320] sm:$0xff]  ;;  %v518_v55 = vld [vmem:[%s2143_s30 + $0x330] sm:$0xff] }
  0x52   : > { %467 = vst [vmem:[%s2148_s14 + $0xc8] sm:$0xff] %v466_v29  ;;  %v520_v56 = vld [vmem:[%s2143_s30 + $0x340] sm:$0xff]  ;;  %v522_v57 = vld [vmem:[%s2143_s30 + $0x350] sm:$0xff] }
  0x53   : > { %469 = vst [vmem:[%s2148_s14 + $0xd0] sm:$0xff] %v468_v30  ;;  %v524_v58 = vld [vmem:[%s2143_s30 + $0x360] sm:$0xff]  ;;  %v526_v59 = vld [vmem:[%s2143_s30 + $0x370] sm:$0xff] }
  0x54   : > { %471 = vst [vmem:[%s2148_s14 + $0xd8] sm:$0xff] %v470_v31  ;;  %v528_v60 = vld [vmem:[%s2143_s30 + $0x380] sm:$0xff]  ;;  %v530_v61 = vld [vmem:[%s2143_s30 + $0x390] sm:$0xff] }
  0x55   : > { %473 = vst [vmem:[%s2148_s14 + $0xe0] sm:$0xff] %v472_v32  ;;  %v532_v62 = vld [vmem:[%s2143_s30 + $0x3a0] sm:$0xff]  ;;  %v534_v63 = vld [vmem:[%s2143_s30 + $0x3b0] sm:$0xff] }
  0x56   : > { %475 = vst [vmem:[%s2148_s14 + $0xe8] sm:$0xff] %v474_v33  ;;  %v536_v0 = vld [vmem:[%s2143_s30 + $0x3c0] sm:$0xff]  ;;  %v538_v1 = vld [vmem:[%s2143_s30 + $0x3d0] sm:$0xff] }
  0x57   : > { %477 = vst [vmem:[%s2148_s14 + $0xf0] sm:$0xff] %v476_v34  ;;  %v540_v2 = vld [vmem:[%s2143_s30 + $0x3e0] sm:$0xff]  ;;  %v542_v3 = vld [vmem:[%s2143_s30 + $0x3f0] sm:$0xff] }
  0x58   : > { %479 = vst [vmem:[%s2148_s14 + $0xf8] sm:$0xff] %v478_v35 }
  0x59   : > { %481 = vst [vmem:[%s2148_s14 + $0x100] sm:$0xff] %v480_v36 }
  0x5a   : > { %483 = vst [vmem:[%s2148_s14 + $0x108] sm:$0xff] %v482_v37 }
  0x5b   : > { %485 = vst [vmem:[%s2148_s14 + $0x110] sm:$0xff] %v484_v38 }
  0x5c   : > { %487 = vst [vmem:[%s2148_s14 + $0x118] sm:$0xff] %v486_v39 }
  0x5d   : > { %489 = vst [vmem:[%s2148_s14 + $0x120] sm:$0xff] %v488_v40 }
  0x5e   : > { %491 = vst [vmem:[%s2148_s14 + $0x128] sm:$0xff] %v490_v41 }
  0x5f   : > { %493 = vst [vmem:[%s2148_s14 + $0x130] sm:$0xff] %v492_v42 }
  0x60   : > { %495 = vst [vmem:[%s2148_s14 + $0x138] sm:$0xff] %v494_v43 }
  0x61   : > { %497 = vst [vmem:[%s2148_s14 + $0x140] sm:$0xff] %v496_v44 }
  0x62   : > { %499 = vst [vmem:[%s2148_s14 + $0x148] sm:$0xff] %v498_v45 }
  0x63   : > { %501 = vst [vmem:[%s2148_s14 + $0x150] sm:$0xff] %v500_v46 }
  0x64   : > { %503 = vst [vmem:[%s2148_s14 + $0x158] sm:$0xff] %v502_v47 }
  0x65   : > { %505 = vst [vmem:[%s2148_s14 + $0x160] sm:$0xff] %v504_v48 }
  0x66   : > { %507 = vst [vmem:[%s2148_s14 + $0x168] sm:$0xff] %v506_v49 }
  0x67   : > { %509 = vst [vmem:[%s2148_s14 + $0x170] sm:$0xff] %v508_v50 }
  0x68   : > { %511 = vst [vmem:[%s2148_s14 + $0x178] sm:$0xff] %v510_v51 }
  0x69   : > { %513 = vst [vmem:[%s2148_s14 + $0x180] sm:$0xff] %v512_v52 }
  0x6a   : > { %515 = vst [vmem:[%s2148_s14 + $0x188] sm:$0xff] %v514_v53 }
  0x6b   : > { %517 = vst [vmem:[%s2148_s14 + $0x190] sm:$0xff] %v516_v54 }
  0x6c   : > { %519 = vst [vmem:[%s2148_s14 + $0x198] sm:$0xff] %v518_v55 }
  0x6d   : > { %521 = vst [vmem:[%s2148_s14 + $0x1a0] sm:$0xff] %v520_v56 }
  0x6e   : > { %523 = vst [vmem:[%s2148_s14 + $0x1a8] sm:$0xff] %v522_v57 }
  0x6f   : > { %525 = vst [vmem:[%s2148_s14 + $0x1b0] sm:$0xff] %v524_v58 }
  0x70   : > { %527 = vst [vmem:[%s2148_s14 + $0x1b8] sm:$0xff] %v526_v59 }
  0x71   : > { %529 = vst [vmem:[%s2148_s14 + $0x1c0] sm:$0xff] %v528_v60 }
  0x72   : > { %531 = vst [vmem:[%s2148_s14 + $0x1c8] sm:$0xff] %v530_v61 }
  0x73   : > { %533 = vst [vmem:[%s2148_s14 + $0x1d0] sm:$0xff] %v532_v62 }
  0x74   : > { %535 = vst [vmem:[%s2148_s14 + $0x1d8] sm:$0xff] %v534_v63 }
  0x75   : > { %537 = vst [vmem:[%s2148_s14 + $0x1e0] sm:$0xff] %v536_v0 }
  0x76   : > { %539 = vst [vmem:[%s2148_s14 + $0x1e8] sm:$0xff] %v538_v1 }
  0x77   : > { %541 = vst [vmem:[%s2148_s14 + $0x1f0] sm:$0xff] %v540_v2 }
  0x78   : > { %543 = vst [vmem:[%s2148_s14 + $0x1f8] sm:$0xff] %v542_v3 }
  0x79 PF: > { %565 = sbr.rel (!%p2119_p11) target bundleno = 129 (0x81), region = 89  ;;  %s567_s0 = sand.u32 (%p2119_p11), 1, %s1950_s19  }
  0x7a   : > { %s1741_s11 = sshll.u32 (%p2119_p11), %s1982_s27, 4  ;;  %s1450_s29 = sshll.u32 (%p2119_p11), %s567_s0, 5 }
  0x7b   : > { %s575_s6 = scalar_lea.vmem (%p2119_p11), %s2541_s4, %s1741_s11  ;;  %s569_s12 = scalar_lea.vmem (%p2119_p11), [#allocation4], %s1450_s29 }
  0x7c   : > { %v588_v4 = vld [vmem:[%s575_s6] sm:$0xff] (%p2119_p11)  ;;  %v590_v5 = vld [vmem:[%s575_s6 + $0x8] sm:$0xff] (%p2119_p11) }
  0x7d   : > { %v592_v6 = vld [vmem:[%s575_s6 + $0x20] sm:$0xff] (%p2119_p11)  ;;  %589 = vst [vmem:[%s569_s12] sm:$0xff] (%p2119_p11), %v588_v4  ;;  %v594_v7 = vld [vmem:[%s575_s6 + $0x28] sm:$0xff] (%p2119_p11) }
  0x7e   : > { %591 = vst [vmem:[%s569_s12 + $0x8] sm:$0xff] %v590_v5 }
  0x7f   : > { %593 = vst [vmem:[%s569_s12 + $0x10] sm:$0xff] %v592_v6 }
  0x80   : > { %595 = vst [vmem:[%s569_s12 + $0x18] sm:$0xff] %v594_v7 }
  0x81 PF: > { %p1453_p1 = scmp.ge.s32.totalorder %s1986_s28, 1  ;;  %p600_p2 = scmp.lt.s32.totalorder %s1986_s28, 19 }
  0x83   : > { %p601_p3 = pnand %p1453_p1, %p600_p2 }
  0x84   : > { %s607_s7 = sand.u32 (!%p601_p3), 1, %s1962_s22   ;;  %s614_s15 = sand.u32 (!%p601_p3), 1, %s1954_s20  }
  0x85   : > { %604 = sbr.rel (%p601_p3) target bundleno = 391 (0x187), region = 112  ;;  %s1454_s13 = sshll.u32 (!%p601_p3), %s607_s7, 5 }
  0x86   : > { %s1455_s30 = sshll.u32 (!%p601_p3), %s614_s15, 9  ;;  %s621_s14 = sand.u32 (!%p601_p3), 1, %s1946_s18  }
  0x87   : > { %s1458_s0 = sshll.u32 (!%p601_p3), %s1974_s25, 1  ;;  %s1456_s11 = sshll.u32 (!%p601_p3), %s621_s14, 5 }
  0x88   : > { %p668_p4 = scmp.lt.s32.totalorder (!%p601_p3), %s1458_s0, 3  ;;  %s2298_s22 = scalar_lea.vmem (!%p601_p3), [#allocation2], %s1454_s13 }
  0x89   : > { %s2300_s20 = scalar_lea.vmem (!%p601_p3), [#allocation3], %s1455_s30  ;;  %s2302_s18 = scalar_lea.vmem (!%p601_p3), [#allocation4], %s1456_s11 }
  0x8a   : > { %s2576_s0 = smov (!%p668_p4, %s1458_s0), 3  ;;  %s2304_s7 = scalar_lea.vmem [#allocation5], %s1456_s11 }
  0x8b   : > { %s670_s10 = scalar_lea.vmem %s2539_s2, %s2576_s0  ;;  %s675_s1 = scalar_lea.vmem %s2540_s3, %s2576_s0 }
  0x8c   : > { %p1460_p5 = scmp.ne.s32.totalorder %s1970_s24, 0 }
  0x8e   : > { %684 = sbr.rel (%p1460_p5) target bundleno = 152 (0x98), region = 128 }
  0x93   : > { %v1988_v8 = vmov 0.0  }
  0x94   : > { %685 = vst [vmem:[%s2304_s7] sm:$0xff] %v1988_v8 }
  0x95   : > { %686 = vst [vmem:[%s2304_s7 + $0x8] sm:$0xff] %v1988_v8 }
  0x96   : > { %687 = vst [vmem:[%s2304_s7 + $0x10] sm:$0xff] %v1988_v8 }
  0x97   : > { %688 = vst [vmem:[%s2304_s7 + $0x18] sm:$0xff] %v1988_v8 }
  0x98 PF: > { %v1535_v9 = vld [vmem:[%s2300_s20 + $0x70] sm:$0xf]  ;;  %v1761_v10 = vld [vmem:[%s2300_s20 + $0x74] sm:$0xf0]  ;;  %v1527_v20 = vld [vmem:[%s2300_s20 + $0x60] sm:$0xf] }
  0x99   : > { %v1599_v11 = vld [vmem:[%s2300_s20 + $0xf0] sm:$0xf]  ;;  %v1536_v12 = vor.u32 %v1761_v10, %v1535_v9  ;;  %v1777_v13 = vld [vmem:[%s2300_s20 + $0xf4] sm:$0xf0]  ;;  %v1759_v22 = vld [vmem:[%s2300_s20 + $0x64] sm:$0xf0] }
  0x9a   : > { %v1663_v14 = vld [vmem:[%s2300_s20 + $0x170] sm:$0xf]  ;;  %v1793_v15 = vld [vmem:[%s2300_s20 + $0x174] sm:$0xf0]  ;;  %v1600_v16 = vor.u32 %v1777_v13, %v1599_v11  ;;  %v1591_v23 = vld [vmem:[%s2300_s20 + $0xe0] sm:$0xf]  ;;  %v1528_v25 = vor.u32 %v1759_v22, %v1527_v20 }
  0x9b   : > { %v1664_v17 = vor.u32 %v1793_v15, %v1663_v14  ;;  %v1727_v18 = vld [vmem:[%s2300_s20 + $0x1f0] sm:$0xf]  ;;  %v1809_v19 = vld [vmem:[%s2300_s20 + $0x1f4] sm:$0xf0]  ;;  %1101 = vmatpush.bf16.msra.mxu0 %v1536_v12  ;;  %v1775_v24 = vld [vmem:[%s2300_s20 + $0xe4] sm:$0xf0] }
  0x9c   : > { %v1728_v21 = vor.u32 %v1809_v19, %v1727_v18  ;;  %1115 = vmatpush.bf16.msra.mxu1 %v1600_v16  ;;  %v1592_v26 = vor.u32 %v1775_v24, %v1591_v23  ;;  %v1655_v27 = vld [vmem:[%s2300_s20 + $0x160] sm:$0xf]  ;;  %v1791_v28 = vld [vmem:[%s2300_s20 + $0x164] sm:$0xf0]  ;;  %v1519_v32 = vld [vmem:[%s2300_s20 + $0x50] sm:$0xf] }
  0x9d   : > { %1129 = vmatpush.bf16.msra.mxu2 %v1664_v17  ;;  %v1719_v29 = vld [vmem:[%s2300_s20 + $0x1e0] sm:$0xf]  ;;  %v1656_v30 = vor.u32 %v1791_v28, %v1655_v27  ;;  %v1807_v31 = vld [vmem:[%s2300_s20 + $0x1e4] sm:$0xf0]  ;;  %v1757_v33 = vld [vmem:[%s2300_s20 + $0x54] sm:$0xf0] }
  0x9e   : > { %1143 = vmatpush.bf16.msra.mxu3 %v1728_v21  ;;  %v1720_v34 = vor.u32 %v1807_v31, %v1719_v29  ;;  %v1583_v35 = vld [vmem:[%s2300_s20 + $0xd0] sm:$0xf]  ;;  %v1773_v36 = vld [vmem:[%s2300_s20 + $0xd4] sm:$0xf0]  ;;  %v1520_v38 = vor.u32 %v1757_v33, %v1519_v32  ;;  %v1511_v44 = vld [vmem:[%s2300_s20 + $0x40] sm:$0xf] }
  0x9f   : > { %v1647_v37 = vld [vmem:[%s2300_s20 + $0x150] sm:$0xf]  ;;  %1102 = vmatpush.bf16.msra.mxu0 %v1528_v25  ;;  %v1789_v39 = vld [vmem:[%s2300_s20 + $0x154] sm:$0xf0]  ;;  %v1584_v42 = vor.u32 %v1773_v36, %v1583_v35  ;;  %v1755_v45 = vld [vmem:[%s2300_s20 + $0x44] sm:$0xf0] }
  0xa0   : > { %v1711_v40 = vld [vmem:[%s2300_s20 + $0x1d0] sm:$0xf]  ;;  %v1805_v41 = vld [vmem:[%s2300_s20 + $0x1d4] sm:$0xf0]  ;;  %1116 = vmatpush.bf16.msra.mxu1 %v1592_v26  ;;  %v1648_v43 = vor.u32 %v1789_v39, %v1647_v37  ;;  %v1575_v46 = vld [vmem:[%s2300_s20 + $0xc0] sm:$0xf]  ;;  %v1512_v53 = vor.u32 %v1755_v45, %v1511_v44 }
  0xa1   : > { %1130 = vmatpush.bf16.msra.mxu2 %v1656_v30  ;;  %v1712_v47 = vor.u32 %v1805_v41, %v1711_v40  ;;  %v1771_v48 = vld [vmem:[%s2300_s20 + $0xc4] sm:$0xf0]  ;;  %v1639_v49 = vld [vmem:[%s2300_s20 + $0x140] sm:$0xf]  ;;  %v1503_v56 = vld [vmem:[%s2300_s20 + $0x30] sm:$0xf] }
  0xa2   : > { %1144 = vmatpush.bf16.msra.mxu3 %v1720_v34  ;;  %v1787_v50 = vld [vmem:[%s2300_s20 + $0x144] sm:$0xf0]  ;;  %v1703_v51 = vld [vmem:[%s2300_s20 + $0x1c0] sm:$0xf]  ;;  %v1576_v54 = vor.u32 %v1771_v48, %v1575_v46  ;;  %v1753_v57 = vld [vmem:[%s2300_s20 + $0x34] sm:$0xf0] }
  0xa3   : > { %v1803_v52 = vld [vmem:[%s2300_s20 + $0x1c4] sm:$0xf0]  ;;  %1103 = vmatpush.bf16.msra.mxu0 %v1520_v38  ;;  %v1640_v55 = vor.u32 %v1787_v50, %v1639_v49  ;;  %v1567_v58 = vld [vmem:[%s2300_s20 + $0xb0] sm:$0xf]  ;;  %v1769_v60 = vld [vmem:[%s2300_s20 + $0xb4] sm:$0xf0]  ;;  %v1504_v1 = vor.u32 %v1753_v57, %v1503_v56 }
  0xa4   : > { %1117 = vmatpush.bf16.msra.mxu1 %v1584_v42  ;;  %v1704_v59 = vor.u32 %v1803_v52, %v1703_v51  ;;  %v1631_v61 = vld [vmem:[%s2300_s20 + $0x130] sm:$0xf]  ;;  %v1785_v62 = vld [vmem:[%s2300_s20 + $0x134] sm:$0xf0]  ;;  %v1568_v2 = vor.u32 %v1769_v60, %v1567_v58  ;;  %v1495_v4 = vld [vmem:[%s2300_s20 + $0x20] sm:$0xf] }
  0xa5   : > { %1131 = vmatpush.bf16.msra.mxu2 %v1648_v43  ;;  %v1695_v63 = vld [vmem:[%s2300_s20 + $0x1b0] sm:$0xf]  ;;  %v1801_v0 = vld [vmem:[%s2300_s20 + $0x1b4] sm:$0xf0]  ;;  %v1632_v3 = vor.u32 %v1785_v62, %v1631_v61  ;;  %v1751_v5 = vld [vmem:[%s2300_s20 + $0x24] sm:$0xf0] }
  0xa6   : > { %1145 = vmatpush.bf16.msra.mxu3 %v1712_v47  ;;  %v1559_v6 = vld [vmem:[%s2300_s20 + $0xa0] sm:$0xf]  ;;  %v1696_v7 = vor.u32 %v1801_v0, %v1695_v63  ;;  %v1767_v8 = vld [vmem:[%s2300_s20 + $0xa4] sm:$0xf0]  ;;  %v1496_v13 = vor.u32 %v1751_v5, %v1495_v4  ;;  %v1487_v16 = vld [vmem:[%s2300_s20 + $0x10] sm:$0xf] }
  0xa7   : > { %1104 = vmatpush.bf16.msra.mxu0 %v1512_v53  ;;  %v1623_v9 = vld [vmem:[%s2300_s20 + $0x120] sm:$0xf]  ;;  %v1783_v10 = vld [vmem:[%s2300_s20 + $0x124] sm:$0xf0]  ;;  %v1560_v14 = vor.u32 %v1767_v8, %v1559_v6  ;;  %v1749_v17 = vld [vmem:[%s2300_s20 + $0x14] sm:$0xf0] }
  0xa8   : > { %1118 = vmatpush.bf16.msra.mxu1 %v1576_v54  ;;  %v1687_v11 = vld [vmem:[%s2300_s20 + $0x1a0] sm:$0xf]  ;;  %v1799_v12 = vld [vmem:[%s2300_s20 + $0x1a4] sm:$0xf0]  ;;  %v1624_v15 = vor.u32 %v1783_v10, %v1623_v9  ;;  %v1551_v18 = vld [vmem:[%s2300_s20 + $0x90] sm:$0xf]  ;;  %v1488_v26 = vor.u32 %v1749_v17, %v1487_v16 }
  0xa9   : > { %1132 = vmatpush.bf16.msra.mxu2 %v1640_v55  ;;  %v1688_v19 = vor.u32 %v1799_v12, %v1687_v11  ;;  %v1765_v20 = vld [vmem:[%s2300_s20 + $0x94] sm:$0xf0]  ;;  %v1615_v21 = vld [vmem:[%s2300_s20 + $0x110] sm:$0xf]  ;;  %v1479_v25 = vld [vmem:[%s2300_s20] sm:$0xf] }
  0xaa   : > { %1146 = vmatpush.bf16.msra.mxu3 %v1704_v59  ;;  %v1781_v22 = vld [vmem:[%s2300_s20 + $0x114] sm:$0xf0]  ;;  %v1679_v23 = vld [vmem:[%s2300_s20 + $0x190] sm:$0xf]  ;;  %v1747_v27 = vld [vmem:[%s2300_s20 + $0x4] sm:$0xf0]  ;;  %v1552_v30 = vor.u32 %v1765_v20, %v1551_v18 }
  0xab   : > { %1105 = vmatpush.bf16.msra.mxu0 %v1504_v1  ;;  %v1797_v24 = vld [vmem:[%s2300_s20 + $0x194] sm:$0xf0]  ;;  %v1543_v28 = vld [vmem:[%s2300_s20 + $0x80] sm:$0xf]  ;;  %v1763_v29 = vld [vmem:[%s2300_s20 + $0x84] sm:$0xf0]  ;;  %v1616_v31 = vor.u32 %v1781_v22, %v1615_v21  ;;  %v1480_v42 = vor.u32 %v1747_v27, %v1479_v25 }
  0xac   : > { %1119 = vmatpush.bf16.msra.mxu1 %v1568_v2  ;;  %v1607_v32 = vld [vmem:[%s2300_s20 + $0x100] sm:$0xf]  ;;  %v1779_v33 = vld [vmem:[%s2300_s20 + $0x104] sm:$0xf0]  ;;  %v1680_v35 = vor.u32 %v1797_v24, %v1679_v23  ;;  %v1760_v37 = vld [vmem:[%s2300_s20 + $0x74] sm:$0xf]  ;;  %v1544_v46 = vor.u32 %v1763_v29, %v1543_v28 }
  0xad   : > { %1133 = vmatpush.bf16.msra.mxu2 %v1632_v3  ;;  %v1671_v34 = vld [vmem:[%s2300_s20 + $0x180] sm:$0xf]  ;;  %v1795_v36 = vld [vmem:[%s2300_s20 + $0x184] sm:$0xf0]  ;;  %v1537_v38 = vld [vmem:[%s2300_s20 + $0x78] sm:$0xf0]  ;;  %v1608_v47 = vor.u32 %v1779_v33, %v1607_v32 }
  0xae   : > { %1147 = vmatpush.bf16.msra.mxu3 %v1696_v7  ;;  %v1776_v39 = vld [vmem:[%s2300_s20 + $0xf4] sm:$0xf]  ;;  %v1601_v40 = vld [vmem:[%s2300_s20 + $0xf8] sm:$0xf0]  ;;  %v1758_v48 = vld [vmem:[%s2300_s20 + $0x64] sm:$0xf]  ;;  %v1672_v52 = vor.u32 %v1795_v36, %v1671_v34  ;;  %v1540_v53 = vor.u32 %v1760_v37, %v1537_v38 }
  0xaf   : > { %1106 = vmatpush.bf16.msra.mxu0 %v1496_v13  ;;  %v1792_v41 = vld [vmem:[%s2300_s20 + $0x174] sm:$0xf]  ;;  %v1665_v43 = vld [vmem:[%s2300_s20 + $0x178] sm:$0xf0]  ;;  %v1529_v49 = vld [vmem:[%s2300_s20 + $0x68] sm:$0xf0]  ;;  %v1604_v58 = vor.u32 %v1776_v39, %v1601_v40 }
  0xb0   : > { %1120 = vmatpush.bf16.msra.mxu1 %v1560_v14  ;;  %v1808_v44 = vld [vmem:[%s2300_s20 + $0x1f4] sm:$0xf]  ;;  %v1729_v45 = vld [vmem:[%s2300_s20 + $0x1f8] sm:$0xf0]  ;;  %v1471_v50 = vld [vmem:[%s2298_s22 + $0x8] sm:$0xf]  ;;  %v1668_v59 = vor.u32 %v1792_v41, %v1665_v43  ;;  %v1532_v8 = vor.u32 %v1758_v48, %v1529_v49 }
  0xb1   : > { %1134 = vmatpush.bf16.msra.mxu2 %v1624_v15  ;;  %v1745_v51 = vld [vmem:[%s2298_s22 + $0x14] sm:$0xf0]  ;;  %v1774_v54 = vld [vmem:[%s2300_s20 + $0xe4] sm:$0xf]  ;;  %v1593_v55 = vld [vmem:[%s2300_s20 + $0xe8] sm:$0xf0]  ;;  %v1732_v63 = vor.u32 %v1808_v44, %v1729_v45 }
  0xb2   : > { %1148 = vmatpush.bf16.msra.mxu3 %v1688_v19  ;;  %v1790_v56 = vld [vmem:[%s2300_s20 + $0x164] sm:$0xf]  ;;  %v1657_v57 = vld [vmem:[%s2300_s20 + $0x168] sm:$0xf0]  ;;  %v1473_v61 = vld [vmem:[%s2298_s22 + $0x18] sm:$0xf0]  ;;  %v2394_v0 = vor.u32 %v1745_v51, %v1471_v50  ;;  %v1596_v10 = vor.u32 %v1774_v54, %v1593_v55 }
  0xb3   : > { %1107 = vmatpush.bf16.msra.mxu0 %v1488_v26  ;;  %v1743_v60 = vld [vmem:[%s2298_s22 + $0xc] sm:$0xf]  ;;  %v1463_v62 = vld [vmem:[%s2298_s22] sm:$0xf]  ;;  %v1744_v1 = vld [vmem:[%s2298_s22 + $0xc] sm:$0xf0]  ;;  %v1660_v11 = vor.u32 %v1790_v56, %v1657_v57 }
  0xb4   : > { %1121 = vmatpush.bf16.msra.mxu1 %v1552_v30  ;;  %v1742_v2 = vld [vmem:[%s2298_s22 + $0x4] sm:$0xf]  ;;  %v1465_v3 = vld [vmem:[%s2298_s22 + $0x10] sm:$0xf0]  ;;  %v1721_v5 = vld [vmem:[%s2300_s20 + $0x1e8] sm:$0xf0]  ;;  %v2401_v6 = vor.u32 %v1743_v60, %v1473_v61  ;;  %v2403_v7 = vor.u32 %v1744_v1, %v1463_v62 }
  0xb5   : > { %1135 = vmatpush.bf16.msra.mxu2 %v1616_v31  ;;  %v1806_v4 = vld [vmem:[%s2300_s20 + $0x1e4] sm:$0xf]  ;;  %v2405_v9 = vor.u32 %v1742_v2, %v1465_v3  ;;  %v1756_v12 = vld [vmem:[%s2300_s20 + $0x54] sm:$0xf]  ;;  %v1521_v13 = vld [vmem:[%s2300_s20 + $0x58] sm:$0xf0] }
  0xb6   : > { %1149 = vmatpush.bf16.msra.mxu3 %v1680_v35  ;;  %v1772_v14 = vld [vmem:[%s2300_s20 + $0xd4] sm:$0xf]  ;;  %v1724_v15 = vor.u32 %v1806_v4, %v1721_v5  ;;  %v1585_v16 = vld [vmem:[%s2300_s20 + $0xd8] sm:$0xf0]  ;;  %v1524_v21 = vor.u32 %v1756_v12, %v1521_v13  ;;  %v1754_v24 = vld [vmem:[%s2300_s20 + $0x44] sm:$0xf] }
  0xb7   : > { %1108 = vmatpush.bf16.msra.mxu0 %v1480_v42  ;;  %v1788_v17 = vld [vmem:[%s2300_s20 + $0x154] sm:$0xf]  ;;  %v1649_v18 = vld [vmem:[%s2300_s20 + $0x158] sm:$0xf0]  ;;  %v1588_v22 = vor.u32 %v1772_v14, %v1585_v16  ;;  %v1513_v25 = vld [vmem:[%s2300_s20 + $0x48] sm:$0xf0] }
  0xb8   : > { %1122 = vmatpush.bf16.msra.mxu1 %v1544_v46  ;;  %v1804_v19 = vld [vmem:[%s2300_s20 + $0x1d4] sm:$0xf]  ;;  %v1713_v20 = vld [vmem:[%s2300_s20 + $0x1d8] sm:$0xf0]  ;;  %v1652_v23 = vor.u32 %v1788_v17, %v1649_v18  ;;  %v1770_v26 = vld [vmem:[%s2300_s20 + $0xc4] sm:$0xf]  ;;  %v1516_v33 = vor.u32 %v1754_v24, %v1513_v25 }
  0xb9   : > { %1136 = vmatpush.bf16.msra.mxu2 %v1608_v47  ;;  %v1716_v27 = vor.u32 %v1804_v19, %v1713_v20  ;;  %v1577_v28 = vld [vmem:[%s2300_s20 + $0xc8] sm:$0xf0]  ;;  %v1786_v29 = vld [vmem:[%s2300_s20 + $0x144] sm:$0xf]  ;;  %v1752_v36 = vld [vmem:[%s2300_s20 + $0x34] sm:$0xf] }
  0xba   : > { %1150 = vmatpush.bf16.msra.mxu3 %v1672_v52  ;;  %1109 = vmatmul.bf16.vlgmr.msra.gmra.mxu0 %v2403_v7  ;;  %v1641_v30 = vld [vmem:[%s2300_s20 + $0x148] sm:$0xf0]  ;;  %v1802_v31 = vld [vmem:[%s2300_s20 + $0x1c4] sm:$0xf]  ;;  %v1580_v34 = vor.u32 %v1770_v26, %v1577_v28  ;;  %v1505_v37 = vld [vmem:[%s2300_s20 + $0x38] sm:$0xf0] }
  0xbb   : > { %1157 = vmatpush.bf16.msrb.mxu0 %v1540_v53  ;;  %1123 = vmatmul.bf16.vlgmr.msra.gmra.mxu1 %v2405_v9  ;;  %v1705_v32 = vld [vmem:[%s2300_s20 + $0x1c8] sm:$0xf0]  ;;  %v1644_v35 = vor.u32 %v1786_v29, %v1641_v30  ;;  %v1768_v38 = vld [vmem:[%s2300_s20 + $0xb4] sm:$0xf]  ;;  %v1569_v40 = vld [vmem:[%s2300_s20 + $0xb8] sm:$0xf0]  ;;  %v1508_v45 = vor.u32 %v1752_v36, %v1505_v37 }
  0xbc   : > { %1171 = vmatpush.bf16.msrb.mxu1 %v1604_v58  ;;  %1137 = vmatmul.bf16.vlgmr.msra.gmra.mxu2 %v2394_v0  ;;  %v1708_v39 = vor.u32 %v1802_v31, %v1705_v32  ;;  %v1784_v41 = vld [vmem:[%s2300_s20 + $0x134] sm:$0xf]  ;;  %v1633_v42 = vld [vmem:[%s2300_s20 + $0x138] sm:$0xf0]  ;;  %v1572_v46 = vor.u32 %v1768_v38, %v1569_v40  ;;  %v1750_v48 = vld [vmem:[%s2300_s20 + $0x24] sm:$0xf] }
  0xbd   : > { %1185 = vmatpush.bf16.msrb.mxu2 %v1668_v59  ;;  %1151 = vmatmul.bf16.vlgmr.msra.gmra.mxu3 %v2401_v6  ;;  %v1800_v43 = vld [vmem:[%s2300_s20 + $0x1b4] sm:$0xf]  ;;  %v1697_v44 = vld [vmem:[%s2300_s20 + $0x1b8] sm:$0xf0]  ;;  %v1636_v47 = vor.u32 %v1784_v41, %v1633_v42  ;;  %v1497_v49 = vld [vmem:[%s2300_s20 + $0x28] sm:$0xf0] }
  0xbe   : > { %1199 = vmatpush.bf16.msrb.mxu3 %v1732_v63  ;;  %v1766_v50 = vld [vmem:[%s2300_s20 + $0xa4] sm:$0xf]  ;;  %v1700_v51 = vor.u32 %v1800_v43, %v1697_v44  ;;  %v1561_v52 = vld [vmem:[%s2300_s20 + $0xa8] sm:$0xf0]  ;;  %v1500_v57 = vor.u32 %v1750_v48, %v1497_v49  ;;  %v1748_v60 = vld [vmem:[%s2300_s20 + $0x14] sm:$0xf] }
  0xbf   : > { %1158 = vmatpush.bf16.msrb.mxu0 %v1532_v8  ;;  %v1782_v53 = vld [vmem:[%s2300_s20 + $0x124] sm:$0xf]  ;;  %v1625_v54 = vld [vmem:[%s2300_s20 + $0x128] sm:$0xf0]  ;;  %v1564_v58 = vor.u32 %v1766_v50, %v1561_v52  ;;  %v1489_v61 = vld [vmem:[%s2300_s20 + $0x18] sm:$0xf0] }
  0xc0   : > { %1172 = vmatpush.bf16.msrb.mxu1 %v1596_v10  ;;  %v1798_v55 = vld [vmem:[%s2300_s20 + $0x1a4] sm:$0xf]  ;;  %v1689_v56 = vld [vmem:[%s2300_s20 + $0x1a8] sm:$0xf0]  ;;  %v1628_v59 = vor.u32 %v1782_v53, %v1625_v54  ;;  %v1764_v62 = vld [vmem:[%s2300_s20 + $0x94] sm:$0xf]  ;;  %v1492_v8 = vor.u32 %v1748_v60, %v1489_v61 }
  0xc1   : > { %1186 = vmatpush.bf16.msrb.mxu2 %v1660_v11  ;;  %v1692_v63 = vor.u32 %v1798_v55, %v1689_v56  ;;  %v1553_v1 = vld [vmem:[%s2300_s20 + $0x98] sm:$0xf0]  ;;  %v1780_v2 = vld [vmem:[%s2300_s20 + $0x114] sm:$0xf]  ;;  %v1746_v12 = vld [vmem:[%s2300_s20 + $0x4] sm:$0xf] }
  0xc2   : > { %1200 = vmatpush.bf16.msrb.mxu3 %v1724_v15  ;;  %v1617_v3 = vld [vmem:[%s2300_s20 + $0x118] sm:$0xf0]  ;;  %v1796_v4 = vld [vmem:[%s2300_s20 + $0x194] sm:$0xf]  ;;  %v1556_v10 = vor.u32 %v1764_v62, %v1553_v1  ;;  %v1481_v13 = vld [vmem:[%s2300_s20 + $0x8] sm:$0xf0] }
  0xc3   : > { %1159 = vmatpush.bf16.msrb.mxu0 %v1524_v21  ;;  %v1681_v5 = vld [vmem:[%s2300_s20 + $0x198] sm:$0xf0]  ;;  %v1620_v11 = vor.u32 %v1780_v2, %v1617_v3  ;;  %v1762_v14 = vld [vmem:[%s2300_s20 + $0x84] sm:$0xf]  ;;  %v1545_v16 = vld [vmem:[%s2300_s20 + $0x88] sm:$0xf0]  ;;  %v1484_v21 = vor.u32 %v1746_v12, %v1481_v13 }
  0xc4   : > { %1173 = vmatpush.bf16.msrb.mxu1 %v1588_v22  ;;  %v1684_v15 = vor.u32 %v1796_v4, %v1681_v5  ;;  %v1778_v17 = vld [vmem:[%s2300_s20 + $0x104] sm:$0xf]  ;;  %v1609_v18 = vld [vmem:[%s2300_s20 + $0x108] sm:$0xf0]  ;;  %v1548_v22 = vor.u32 %v1762_v14, %v1545_v16  ;;  %v692_v53 = vld [vmem:[%s2304_s7 + $0x18] sm:$0xff]  ;;  %p1733_p6 = scmp.ne.s32.totalorder %s1970_s24, 8 }
  0xc5   : > { %1187 = vmatpush.bf16.msrb.mxu2 %v1652_v23  ;;  %v1794_v19 = vld [vmem:[%s2300_s20 + $0x184] sm:$0xf]  ;;  %v1673_v20 = vld [vmem:[%s2300_s20 + $0x188] sm:$0xf0]  ;;  %v1612_v23 = vor.u32 %v1778_v17, %v1609_v18 }
  0xc6   : > { %1201 = vmatpush.bf16.msrb.mxu3 %v1716_v27  ;;  %v1676_v24 = vor.u32 %v1794_v19, %v1673_v20  ;;  %v689_v31 = vld [vmem:[%s2304_s7] sm:$0xff] }
  0xc7   : > { %1160 = vmatpush.bf16.msrb.mxu0 %v1516_v33 }
  0xc8   : > { %1174 = vmatpush.bf16.msrb.mxu1 %v1580_v34 }
  0xc9   : > { %1188 = vmatpush.bf16.msrb.mxu2 %v1644_v35 }
  0xca   : > { %1202 = vmatpush.bf16.msrb.mxu3 %v1708_v39 }
  0xcb   : > { %1161 = vmatpush.bf16.msrb.mxu0 %v1508_v45  ;;  %v690_v45 = vld [vmem:[%s2304_s7 + $0x8] sm:$0xff] }
  0xcc   : > { %1175 = vmatpush.bf16.msrb.mxu1 %v1572_v46 }
  0xcd   : > { %1189 = vmatpush.bf16.msrb.mxu2 %v1636_v47 }
  0xce   : > { %1203 = vmatpush.bf16.msrb.mxu3 %v1700_v51 }
  0xcf   : > { %1162 = vmatpush.bf16.msrb.mxu0 %v1500_v57 }
  0xd0   : > { %1176 = vmatpush.bf16.msrb.mxu1 %v1564_v58 }
  0xd1   : > { %1190 = vmatpush.bf16.msrb.mxu2 %v1628_v59 }
  0xd2   : > { %1204 = vmatpush.bf16.msrb.mxu3 %v1692_v63 }
  0xd3   : > { %1163 = vmatpush.bf16.msrb.mxu0 %v1492_v8 }
  0xd4   : > { %1177 = vmatpush.bf16.msrb.mxu1 %v1556_v10 }
  0xd5   : > { %1191 = vmatpush.bf16.msrb.mxu2 %v1620_v11 }
  0xd6   : > { %1205 = vmatpush.bf16.msrb.mxu3 %v1684_v15 }
  0xd7   : > { %1164 = vmatpush.bf16.msrb.mxu0 %v1484_v21 }
  0xd8   : > { %1178 = vmatpush.bf16.msrb.mxu1 %v1548_v22 }
  0xd9   : > { %1192 = vmatpush.bf16.msrb.mxu2 %v1612_v23 }
  0xda   : > { %1206 = vmatpush.bf16.msrb.mxu3 %v1676_v24  ;;  %1165 = vmatmul.bf16.vlgmr.msrb.gmra.mxu0 %v2403_v7 }
  0xdb   : > { %1179 = vmatmul.bf16.vlgmr.msrb.gmra.mxu1 %v2405_v9 }
  0xdc   : > { %1193 = vmatmul.bf16.vlgmr.msrb.gmra.mxu2 %v2394_v0 }
  0xdd   : > { %1207 = vmatmul.bf16.vlgmr.msrb.gmra.mxu3 %v2401_v6  ;;  %v691_v6 = vld [vmem:[%s2304_s7 + $0x10] sm:$0xff] }
 0x137   : > { %v1110_v25 = vpop.f32.mrf.mxu0 }
 0x138   : > { %v1124_v26 = vpop.f32.mrf.mxu1 }
 0x139   : > { %v1125_v27 = vadd.f32 %v1124_v26, %v1110_v25 }
 0x13f   : > { %v1138_v28 = vpop.f32.mrf.mxu2  ;;  %v1112_v33 = vpop.f32.mrf.mxu0 }
 0x140   : > { %v1139_v29 = vadd.f32 %v1138_v28, %v1125_v27  ;;  %v1152_v30 = vpop.f32.mrf.mxu3  ;;  %v1126_v34 = vpop.f32.mrf.mxu1 }
 0x141   : > { %v1127_v35 = vadd.f32 %v1126_v34, %v1112_v33 }
 0x142   : > { %v1153_v32 = vadd.f32 %v1152_v30, %v1139_v29 }
 0x144   : > { %v1213_v7 = vadd.f32 %v1153_v32, %v689_v31 }
 0x146   : > { %1217 = vst [vmem:[%s2304_s7] sm:$0xff] %v1213_v7 }
 0x147   : > { %v1140_v9 = vpop.f32.mrf.mxu2 }
 0x148   : > { %v1141_v0 = vadd.f32 %v1140_v9, %v1127_v35  ;;  %v1154_v36 = vpop.f32.mrf.mxu3 }
 0x14a   : > { %v1155_v37 = vadd.f32 %v1154_v36, %v1141_v0 }
 0x14c   : > { %v1215_v38 = vadd.f32 %v1155_v37, %v691_v6 }
 0x14e   : > { %1219 = vst [vmem:[%s2304_s7 + $0x10] sm:$0xff] %v1215_v38 }
 0x157   : > { %v1166_v39 = vpop.f32.mrf.mxu0 }
 0x158   : > { %v1180_v40 = vpop.f32.mrf.mxu1 }
 0x159   : > { %v1181_v41 = vadd.f32 %v1180_v40, %v1166_v39 }
 0x15f   : > { %v1194_v42 = vpop.f32.mrf.mxu2  ;;  %v1168_v47 = vpop.f32.mrf.mxu0 }
 0x160   : > { %v1195_v43 = vadd.f32 %v1194_v42, %v1181_v41  ;;  %v1208_v44 = vpop.f32.mrf.mxu3  ;;  %v1182_v48 = vpop.f32.mrf.mxu1 }
 0x161   : > { %v1183_v50 = vadd.f32 %v1182_v48, %v1168_v47 }
 0x162   : > { %v1209_v46 = vadd.f32 %v1208_v44, %v1195_v43 }
 0x164   : > { %v1214_v49 = vadd.f32 %v1209_v46, %v690_v45 }
 0x166   : > { %1218 = vst [vmem:[%s2304_s7 + $0x8] sm:$0xff] %v1214_v49 }
 0x167   : > { %v1196_v51 = vpop.f32.mrf.mxu2 }
 0x168   : > { %v1197_v52 = vadd.f32 %v1196_v51, %v1183_v50  ;;  %v1210_v54 = vpop.f32.mrf.mxu3 }
 0x16a   : > { %v1211_v55 = vadd.f32 %v1210_v54, %v1197_v52  ;;  %1224 = sbr.rel (%p1733_p6) target bundleno = 383 (0x17f), region = 132 }
 0x16c   : > { %v1216_v56 = vadd.f32 %v1211_v55, %v692_v53 }
 0x16e   : > { %1220 = vst [vmem:[%s2304_s7 + $0x18] sm:$0xff] %v1216_v56 }
 0x16f   : > { %v1225_v57 = vld [vmem:[%s2304_s7] sm:$0xff]  ;;  %v1226_v62 = vld [vmem:[%s2304_s7 + $0x8] sm:$0xff]  ;;  %v1227_v2 = vld [vmem:[%s2304_s7 + $0x10] sm:$0xff] }
 0x170   : > { %v1229_v58 = vld [vmem:[%s670_s10] sm:$0x3]  ;;  %v1250_v11 = vld [vmem:[%s2302_s18 + $0x8] sm:$0xff]  ;;  %v1251_v12 = vld [vmem:[%s2302_s18 + $0x10] sm:$0xff] }
 0x171   : > { %v1239_v59 = vld [vmem:[%s675_s1] sm:$0x3]  ;;  %v1231_v60 = vperm.slane %v1229_v58, 0  ;;  %v1232_v63 = vperm.slane %v1229_v58, 1  ;;  %v1252_v17 = vld [vmem:[%s2302_s18 + $0x18] sm:$0xff] }
 0x172   : > { %v1241_v61 = vperm.slane %v1239_v59, 0  ;;  %v1242_v1 = vperm.slane %v1239_v59, 1  ;;  %v1249_v10 = vld [vmem:[%s2302_s18] sm:$0xff] }
 0x173   : > { %v1235_v3 = vmul.f32 %v1231_v60, %v1225_v57  ;;  %v1236_v4 = vmul.f32 %v1232_v63, %v1226_v62  ;;  %v1237_v5 = vmul.f32 %v1231_v60, %v1227_v2 }
 0x175   : > { %v1228_v8 = vld [vmem:[%s2304_s7 + $0x18] sm:$0xff]  ;;  %v1245_v14 = vadd.f32 %v1241_v61, %v1235_v3  ;;  %v1246_v15 = vadd.f32 %v1242_v1, %v1236_v4  ;;  %v1247_v16 = vadd.f32 %v1241_v61, %v1237_v5 }
 0x176   : > { %v1238_v13 = vmul.f32 %v1232_v63, %v1228_v8 }
 0x177   : > { %v1253_v19 = vadd.f32 %v1249_v10, %v1245_v14  ;;  %v1254_v20 = vadd.f32 %v1250_v11, %v1246_v15  ;;  %v1255_v21 = vadd.f32 %v1251_v12, %v1247_v16 }
 0x178   : > { %v1248_v18 = vadd.f32 %v1242_v1, %v1238_v13 }
 0x179   : > { %v1257_v23 = vmax.f32 %v1253_v19, 0.0  ;;  %v1258_v24 = vmax.f32 %v1254_v20, 0.0  ;;  %v1259_v25 = vmax.f32 %v1255_v21, 0.0 }
 0x17a   : > { %v1256_v22 = vadd.f32 %v1252_v17, %v1248_v18 }
 0x17b   : > { %1261 = vst [vmem:[%s2304_s7] sm:$0xff] %v1257_v23 }
 0x17c   : > { %v1260_v26 = vmax.f32 %v1256_v22, 0.0  ;;  %1262 = vst [vmem:[%s2304_s7 + $0x8] sm:$0xff] %v1258_v24 }
 0x17d   : > { %1263 = vst [vmem:[%s2304_s7 + $0x10] sm:$0xff] %v1259_v25 }
 0x17e   : > { %1264 = vst [vmem:[%s2304_s7 + $0x18] sm:$0xff] %v1260_v26 }
 0x17f PF: > { %1271 = sbr.rel (!%p2123_p13) target bundleno = 391 (0x187), region = 136  ;;  %s1810_s1 = sshll.u32 (%p2123_p13), %s1974_s25, 4 }
 0x180   : > { %s1277_s11 = scalar_lea.vmem (%p2123_p13), %s2542_s5, %s1810_s1 }
 0x182   : > { %v1290_v27 = vld [vmem:[%s2304_s7] sm:$0xff] (%p2123_p13) }
 0x183   : > { %v1292_v28 = vld [vmem:[%s2304_s7 + $0x8] sm:$0xff] (%p2123_p13)  ;;  %1291 = vst [vmem:[%s1277_s11] sm:$0xff] (%p2123_p13), %v1290_v27 }
 0x184   : > { %v1294_v29 = vld [vmem:[%s2304_s7 + $0x10] sm:$0xff]  ;;  %1293 = vst [vmem:[%s1277_s11 + $0x8] sm:$0xff] %v1292_v28 }
 0x185   : > { %v1296_v30 = vld [vmem:[%s2304_s7 + $0x18] sm:$0xff]  ;;  %1295 = vst [vmem:[%s1277_s11 + $0x20] sm:$0xff] %v1294_v29 }
 0x186   : > { %1297 = vst [vmem:[%s1277_s11 + $0x28] sm:$0xff] %v1296_v30 }
 0x187 PF: > { %s15_s28 = sadd.s32 1, %s1986_s28   ;;  %s2556_s25 = sld [smem:[#allocation8_spill]] }
 0x188   : > { %p12_p7 = scmp.ge.s32.totalorder %s15_s28, 20   ;;  %s2557_s8 = sld [smem:[#allocation6_spill]] }
 0x189   : > { %s2558_s29 = sld [smem:[#allocation7_spill]]  ;;  %s2559_s18 = smov %s1950_s19 }
 0x18a   : > { %s2560_s19 = smov %s2115_s17  ;;  %s2561_s20 = smov %s1958_s21 }
 0x18b   : > { %s2562_s21 = smov %s2112_s16  ;;  %s2563_s22 = smov %s1966_s23 }
 0x18c   : > { %s2565_s24 = smov %s1978_s26  ;;  %14 = sbr.rel (!%p12_p7) target bundleno = 9 (0x9), region = 212 }
 0x18d   : > { %s2564_s23 = smov %s2556_s25  ;;  %s2566_s25 = smov %s1982_s27 }
 0x18e   : > { %s2567_s26 = smov %s2557_s8 }
 0x18f   : > { %s2568_s27 = smov %s2558_s29 }

// kernel: resnet18_16s_forward.43
= control target key start
LH: loop header
LB: loop body
LE: loop exit
PB: predicated region body
PF: predicated region fallthrough
CT: control target
= control target key end

     0   :  { %s2395_s0 = inlined_call_operand.vmem [shape: bf16[16,4608], index: 0, kind: input, shape index: {}]   ;;  %s2396_s1 = inlined_call_operand.vmem [shape: bf16[4608,512], index: 1, kind: input, shape index: {}]   ;;  %s2397_s2 = inlined_call_operand.vmem [shape: f32[1,512], index: 2, kind: input, shape index: {}]   ;;  %s2398_s3 = inlined_call_operand.vmem [shape: f32[1,512], index: 3, kind: input, shape index: {}]   ;;  %s2399_s4 = inlined_call_operand.vmem [shape: f32[16,512], index: 4, kind: output, shape index: {}]  }
   0x1   :  { %2402 = sst [smem:[#allocation7_spill]] %s2395_s0 }
   0x2   :  { %2403 = sst [smem:[#allocation8_spill]] %s2396_s1 }
   0x3   :  { %s1900_s15 = smov 0   ;;  %s1902_s16 = smov 0  }
   0x4   :  { %s1904_s17 = smov 0   ;;  %s1906_s18 = smov 0  }
   0x5   :  { %s1908_s19 = smov 0   ;;  %s1910_s20 = smov 0  }
   0x6   :  { %s1912_s21 = smov 0   ;;  %s1914_s22 = smov 0  }
   0x7   :  { %s1916_s23 = smov 0   ;;  %s1918_s24 = smov 0  }
   0x8   :  { %s1920_s25 = smov 0  }
   0x9 LB: > { %s1329_s26 = sadd.s32 4294967295, %s1872_s25   ;;  %s26_s27 = sadd.s32 1, %s1864_s23  ;;  %s1872_s25 = sphi %s1920_s25, %s14_s25   ;;  %s1868_s24 = sphi %s1918_s24, %s2422_s24   ;;  %s1864_s23 = sphi %s1916_s23, %s2421_s23   ;;  %s1860_s22 = sphi %s1914_s22, %s2420_s22   ;;  %s1856_s21 = sphi %s1912_s21, %s2419_s21   ;;  %s1852_s20 = sphi %s1910_s20, %s2418_s20   ;;  %s1848_s19 = sphi %s1908_s19, %s2417_s19   ;;  %s1844_s18 = sphi %s1906_s18, %s2416_s18   ;;  %s1840_s17 = sphi %s1904_s17, %s2415_s17   ;;  %s1836_s16 = sphi %s1902_s16, %s2414_s16   ;;  %s1832_s15 = sphi %s1900_s15, %s2413_s15  }
   0xa   : > { %p27_p0 = scmp.ge.s32.totalorder %s26_s27, 9  ;;  %s29_s28 = sadd.s32 1, %s1868_s24 }
   0xb   : > { %s42_s29 = sadd.s32 1, %s1852_s20  ;;  %p49_p1 = scmp.ne.s32.totalorder %s1852_s20, %s1848_s19 }
   0xc   : > { %s2424_s27 = smov (%p27_p0, %s26_s27), 0  ;;  %s2426_s28 = smov (!%p27_p0, %s29_s28), %s1868_s24 }
   0xd   : > { %2404 = sst [smem:[#allocation5_spill]] %s2424_s27  ;;  %s38_s30 = ssub.s32 %s1864_s23, %s2424_s27 }
   0xe   : > { %p50_p2 = scmp.eq.s32.totalorder %s1872_s25, 0  ;;  %p31_p3 = scmp.ge.s32.totalorder %s2426_s28, 2 }
   0xf   : > { %p40_p4 = scmp.eq.s32.totalorder %s38_s30, 0  ;;  %s70_s6 = sadd.s32 1, %s1844_s18 }
  0x10   : > { %p1967_p5 = por %p50_p2, %p49_p1  ;;  %s2428_s28 = smov (%p31_p3, %s2426_s28), 0 }
  0x11   : > { %2406 = sst [smem:[#allocation6_spill]] %s2428_s28  ;;  %s66_s8 = ssub.s32 %s1868_s24, %s2428_s28 }
  0x12   : > { %s1975_s7 = scalar_select %p40_p4, %s1852_s20, %s42_s29  }
  0x13   : > { %p77_p6 = scmp.ne.s32.totalorder %s1844_s18, %s1840_s17  ;;  %s67_s9 = sor.u32 %s66_s8, %s38_s30 }
  0x14   : > { %p148_p7 = scmp.eq.s32.totalorder %s66_s8, 0  ;;  %p68_p8 = scmp.eq.s32.totalorder %s67_s9, 0 }
  0x15   : > { %p1981_p9 = por %p77_p6, %p50_p2  ;;  %s150_s11 = sadd.s32 1, %s1836_s16 }
  0x16   : > { %p160_p10 = scmp.ne.s32.totalorder %s1836_s16, %s1832_s15  ;;  %p161_p11 = scmp.eq.s32.totalorder %s1329_s26, 17 }
  0x17   : > { %s1989_s12 = scalar_select %p68_p8, %s1844_s18, %s70_s6  }
  0x18   : > { %s1992_s13 = scalar_select %p148_p7, %s1836_s16, %s150_s11  }
  0x19   : > { %p1994_p12 = por %p161_p11, %p160_p10  ;;  %p1332_p13 = scmp.ge.s32.totalorder %s1872_s25, 18 }
  0x1b   : > { %183 = sbr.rel (%p1332_p13) target bundleno = 120 (0x78), region = 16 }
  0x20   : > { %186 = sbr.rel (!%p1967_p5) target bundleno = 46 (0x2e), region = 20  ;;  %s188_s29 = sand.u32 (%p1967_p5), 1, %s1852_s20  }
  0x21   : > { %s1626_s30 = sshll.u32 (%p1967_p5), %s1864_s23, 4  ;;  %s1333_s8 = sshll.u32 (%p1967_p5), %s188_s29, 5 }
  0x22   : > { %s2409_s0 = sld [smem:[#allocation7_spill]] (%p1967_p5)  ;;  %s190_s26 = scalar_lea.vmem (%p1967_p5), [#allocation2], %s1333_s8 }
  0x28   : > { %s196_s11 = scalar_lea.vmem %s2409_s0, %s1626_s30 }
  0x29   : > { %v209_v0 = vld [vmem:[%s196_s11] sm:$0xff]  ;;  %v211_v1 = vld [vmem:[%s196_s11 + $0x8] sm:$0xff]  ;;  %v213_v2 = vld [vmem:[%s196_s11 + $0x90] sm:$0xff] }
  0x2a   : > { %210 = vst [vmem:[%s190_s26] sm:$0xff] %v209_v0  ;;  %v215_v3 = vld [vmem:[%s196_s11 + $0x98] sm:$0xff] }
  0x2b   : > { %212 = vst [vmem:[%s190_s26 + $0x8] sm:$0xff] %v211_v1 }
  0x2c   : > { %214 = vst [vmem:[%s190_s26 + $0x10] sm:$0xff] %v213_v2 }
  0x2d   : > { %216 = vst [vmem:[%s190_s26 + $0x18] sm:$0xff] %v215_v3 }
  0x2e PF: > { %222 = sbr.rel (!%p1981_p9) target bundleno = 120 (0x78), region = 43  ;;  %s224_s5 = sand.u32 (%p1981_p9), 1, %s1844_s18  }
  0x2f   : > { %s1338_s29 = sshll.u32 (%p1981_p9), %s1868_s24, 1  ;;  %s1336_s6 = sshll.u32 (%p1981_p9), %s224_s5, 9 }
  0x30   : > { %s1627_s30 = sshll.u32 (%p1981_p9), %s1864_s23, 8  ;;  %s2410_s1 = sld [smem:[#allocation8_spill]] (%p1981_p9) }
  0x31   : > { %s230_s9 = sadd.s32 (%p1981_p9), %s1627_s30, %s1338_s29  ;;  %s2019_s10 = scalar_lea.vmem (%p1981_p9), [#allocation3], %s1336_s6 }
  0x32   : > { %s1340_s0 = sshll.u32 (%p1981_p9), %s230_s9, 2 }
  0x36   : > { %s2014_s11 = scalar_lea.vmem %s2410_s1, %s1340_s0 }
  0x37   : > { %v387_v4 = vld [vmem:[%s2014_s11] sm:$0xff]  ;;  %v389_v5 = vld [vmem:[%s2014_s11 + $0x10] sm:$0xff] }
  0x38   : > { %v391_v6 = vld [vmem:[%s2014_s11 + $0x20] sm:$0xff]  ;;  %388 = vst [vmem:[%s2019_s10] sm:$0xff] %v387_v4  ;;  %v393_v7 = vld [vmem:[%s2014_s11 + $0x30] sm:$0xff] }
  0x39   : > { %390 = vst [vmem:[%s2019_s10 + $0x8] sm:$0xff] %v389_v5  ;;  %v395_v8 = vld [vmem:[%s2014_s11 + $0x40] sm:$0xff]  ;;  %v397_v9 = vld [vmem:[%s2014_s11 + $0x50] sm:$0xff] }
  0x3a   : > { %392 = vst [vmem:[%s2019_s10 + $0x10] sm:$0xff] %v391_v6  ;;  %v399_v10 = vld [vmem:[%s2014_s11 + $0x60] sm:$0xff]  ;;  %v401_v11 = vld [vmem:[%s2014_s11 + $0x70] sm:$0xff] }
  0x3b   : > { %394 = vst [vmem:[%s2019_s10 + $0x18] sm:$0xff] %v393_v7  ;;  %v403_v12 = vld [vmem:[%s2014_s11 + $0x80] sm:$0xff]  ;;  %v405_v13 = vld [vmem:[%s2014_s11 + $0x90] sm:$0xff] }
  0x3c   : > { %396 = vst [vmem:[%s2019_s10 + $0x20] sm:$0xff] %v395_v8  ;;  %v407_v14 = vld [vmem:[%s2014_s11 + $0xa0] sm:$0xff]  ;;  %v409_v15 = vld [vmem:[%s2014_s11 + $0xb0] sm:$0xff] }
  0x3d   : > { %398 = vst [vmem:[%s2019_s10 + $0x28] sm:$0xff] %v397_v9  ;;  %v411_v16 = vld [vmem:[%s2014_s11 + $0xc0] sm:$0xff]  ;;  %v413_v17 = vld [vmem:[%s2014_s11 + $0xd0] sm:$0xff] }
  0x3e   : > { %400 = vst [vmem:[%s2019_s10 + $0x30] sm:$0xff] %v399_v10  ;;  %v415_v18 = vld [vmem:[%s2014_s11 + $0xe0] sm:$0xff]  ;;  %v417_v19 = vld [vmem:[%s2014_s11 + $0xf0] sm:$0xff] }
  0x3f   : > { %402 = vst [vmem:[%s2019_s10 + $0x38] sm:$0xff] %v401_v11  ;;  %v419_v20 = vld [vmem:[%s2014_s11 + $0x100] sm:$0xff]  ;;  %v421_v21 = vld [vmem:[%s2014_s11 + $0x110] sm:$0xff] }
  0x40   : > { %404 = vst [vmem:[%s2019_s10 + $0x40] sm:$0xff] %v403_v12  ;;  %v423_v22 = vld [vmem:[%s2014_s11 + $0x120] sm:$0xff]  ;;  %v425_v23 = vld [vmem:[%s2014_s11 + $0x130] sm:$0xff] }
  0x41   : > { %406 = vst [vmem:[%s2019_s10 + $0x48] sm:$0xff] %v405_v13  ;;  %v427_v24 = vld [vmem:[%s2014_s11 + $0x140] sm:$0xff]  ;;  %v429_v25 = vld [vmem:[%s2014_s11 + $0x150] sm:$0xff] }
  0x42   : > { %408 = vst [vmem:[%s2019_s10 + $0x50] sm:$0xff] %v407_v14  ;;  %v431_v26 = vld [vmem:[%s2014_s11 + $0x160] sm:$0xff]  ;;  %v433_v27 = vld [vmem:[%s2014_s11 + $0x170] sm:$0xff] }
  0x43   : > { %410 = vst [vmem:[%s2019_s10 + $0x58] sm:$0xff] %v409_v15  ;;  %v435_v28 = vld [vmem:[%s2014_s11 + $0x180] sm:$0xff]  ;;  %v437_v29 = vld [vmem:[%s2014_s11 + $0x190] sm:$0xff] }
  0x44   : > { %412 = vst [vmem:[%s2019_s10 + $0x60] sm:$0xff] %v411_v16  ;;  %v439_v30 = vld [vmem:[%s2014_s11 + $0x1a0] sm:$0xff]  ;;  %v441_v31 = vld [vmem:[%s2014_s11 + $0x1b0] sm:$0xff] }
  0x45   : > { %414 = vst [vmem:[%s2019_s10 + $0x68] sm:$0xff] %v413_v17  ;;  %v443_v32 = vld [vmem:[%s2014_s11 + $0x1c0] sm:$0xff]  ;;  %v445_v33 = vld [vmem:[%s2014_s11 + $0x1d0] sm:$0xff] }
  0x46   : > { %416 = vst [vmem:[%s2019_s10 + $0x70] sm:$0xff] %v415_v18  ;;  %v447_v34 = vld [vmem:[%s2014_s11 + $0x1e0] sm:$0xff]  ;;  %v449_v35 = vld [vmem:[%s2014_s11 + $0x1f0] sm:$0xff] }
  0x47   : > { %418 = vst [vmem:[%s2019_s10 + $0x78] sm:$0xff] %v417_v19  ;;  %v451_v36 = vld [vmem:[%s2014_s11 + $0x200] sm:$0xff]  ;;  %v453_v37 = vld [vmem:[%s2014_s11 + $0x210] sm:$0xff] }
  0x48   : > { %420 = vst [vmem:[%s2019_s10 + $0x80] sm:$0xff] %v419_v20  ;;  %v455_v38 = vld [vmem:[%s2014_s11 + $0x220] sm:$0xff]  ;;  %v457_v39 = vld [vmem:[%s2014_s11 + $0x230] sm:$0xff] }
  0x49   : > { %422 = vst [vmem:[%s2019_s10 + $0x88] sm:$0xff] %v421_v21  ;;  %v459_v40 = vld [vmem:[%s2014_s11 + $0x240] sm:$0xff]  ;;  %v461_v41 = vld [vmem:[%s2014_s11 + $0x250] sm:$0xff] }
  0x4a   : > { %424 = vst [vmem:[%s2019_s10 + $0x90] sm:$0xff] %v423_v22  ;;  %v463_v42 = vld [vmem:[%s2014_s11 + $0x260] sm:$0xff]  ;;  %v465_v43 = vld [vmem:[%s2014_s11 + $0x270] sm:$0xff] }
  0x4b   : > { %426 = vst [vmem:[%s2019_s10 + $0x98] sm:$0xff] %v425_v23  ;;  %v467_v44 = vld [vmem:[%s2014_s11 + $0x280] sm:$0xff]  ;;  %v469_v45 = vld [vmem:[%s2014_s11 + $0x290] sm:$0xff] }
  0x4c   : > { %428 = vst [vmem:[%s2019_s10 + $0xa0] sm:$0xff] %v427_v24  ;;  %v471_v46 = vld [vmem:[%s2014_s11 + $0x2a0] sm:$0xff]  ;;  %v473_v47 = vld [vmem:[%s2014_s11 + $0x2b0] sm:$0xff] }
  0x4d   : > { %430 = vst [vmem:[%s2019_s10 + $0xa8] sm:$0xff] %v429_v25  ;;  %v475_v48 = vld [vmem:[%s2014_s11 + $0x2c0] sm:$0xff]  ;;  %v477_v49 = vld [vmem:[%s2014_s11 + $0x2d0] sm:$0xff] }
  0x4e   : > { %432 = vst [vmem:[%s2019_s10 + $0xb0] sm:$0xff] %v431_v26  ;;  %v479_v50 = vld [vmem:[%s2014_s11 + $0x2e0] sm:$0xff]  ;;  %v481_v51 = vld [vmem:[%s2014_s11 + $0x2f0] sm:$0xff] }
  0x4f   : > { %434 = vst [vmem:[%s2019_s10 + $0xb8] sm:$0xff] %v433_v27  ;;  %v483_v52 = vld [vmem:[%s2014_s11 + $0x300] sm:$0xff]  ;;  %v485_v53 = vld [vmem:[%s2014_s11 + $0x310] sm:$0xff] }
  0x50   : > { %436 = vst [vmem:[%s2019_s10 + $0xc0] sm:$0xff] %v435_v28  ;;  %v487_v54 = vld [vmem:[%s2014_s11 + $0x320] sm:$0xff]  ;;  %v489_v55 = vld [vmem:[%s2014_s11 + $0x330] sm:$0xff] }
  0x51   : > { %438 = vst [vmem:[%s2019_s10 + $0xc8] sm:$0xff] %v437_v29  ;;  %v491_v56 = vld [vmem:[%s2014_s11 + $0x340] sm:$0xff]  ;;  %v493_v57 = vld [vmem:[%s2014_s11 + $0x350] sm:$0xff] }
  0x52   : > { %440 = vst [vmem:[%s2019_s10 + $0xd0] sm:$0xff] %v439_v30  ;;  %v495_v58 = vld [vmem:[%s2014_s11 + $0x360] sm:$0xff]  ;;  %v497_v59 = vld [vmem:[%s2014_s11 + $0x370] sm:$0xff] }
  0x53   : > { %442 = vst [vmem:[%s2019_s10 + $0xd8] sm:$0xff] %v441_v31  ;;  %v499_v60 = vld [vmem:[%s2014_s11 + $0x380] sm:$0xff]  ;;  %v501_v61 = vld [vmem:[%s2014_s11 + $0x390] sm:$0xff] }
  0x54   : > { %444 = vst [vmem:[%s2019_s10 + $0xe0] sm:$0xff] %v443_v32  ;;  %v503_v62 = vld [vmem:[%s2014_s11 + $0x3a0] sm:$0xff]  ;;  %v505_v63 = vld [vmem:[%s2014_s11 + $0x3b0] sm:$0xff] }
  0x55   : > { %446 = vst [vmem:[%s2019_s10 + $0xe8] sm:$0xff] %v445_v33  ;;  %v507_v0 = vld [vmem:[%s2014_s11 + $0x3c0] sm:$0xff]  ;;  %v509_v1 = vld [vmem:[%s2014_s11 + $0x3d0] sm:$0xff] }
  0x56   : > { %448 = vst [vmem:[%s2019_s10 + $0xf0] sm:$0xff] %v447_v34  ;;  %v511_v2 = vld [vmem:[%s2014_s11 + $0x3e0] sm:$0xff]  ;;  %v513_v3 = vld [vmem:[%s2014_s11 + $0x3f0] sm:$0xff] }
  0x57   : > { %450 = vst [vmem:[%s2019_s10 + $0xf8] sm:$0xff] %v449_v35 }
  0x58   : > { %452 = vst [vmem:[%s2019_s10 + $0x100] sm:$0xff] %v451_v36 }
  0x59   : > { %454 = vst [vmem:[%s2019_s10 + $0x108] sm:$0xff] %v453_v37 }
  0x5a   : > { %456 = vst [vmem:[%s2019_s10 + $0x110] sm:$0xff] %v455_v38 }
  0x5b   : > { %458 = vst [vmem:[%s2019_s10 + $0x118] sm:$0xff] %v457_v39 }
  0x5c   : > { %460 = vst [vmem:[%s2019_s10 + $0x120] sm:$0xff] %v459_v40 }
  0x5d   : > { %462 = vst [vmem:[%s2019_s10 + $0x128] sm:$0xff] %v461_v41 }
  0x5e   : > { %464 = vst [vmem:[%s2019_s10 + $0x130] sm:$0xff] %v463_v42 }
  0x5f   : > { %466 = vst [vmem:[%s2019_s10 + $0x138] sm:$0xff] %v465_v43 }
  0x60   : > { %468 = vst [vmem:[%s2019_s10 + $0x140] sm:$0xff] %v467_v44 }
  0x61   : > { %470 = vst [vmem:[%s2019_s10 + $0x148] sm:$0xff] %v469_v45 }
  0x62   : > { %472 = vst [vmem:[%s2019_s10 + $0x150] sm:$0xff] %v471_v46 }
  0x63   : > { %474 = vst [vmem:[%s2019_s10 + $0x158] sm:$0xff] %v473_v47 }
  0x64   : > { %476 = vst [vmem:[%s2019_s10 + $0x160] sm:$0xff] %v475_v48 }
  0x65   : > { %478 = vst [vmem:[%s2019_s10 + $0x168] sm:$0xff] %v477_v49 }
  0x66   : > { %480 = vst [vmem:[%s2019_s10 + $0x170] sm:$0xff] %v479_v50 }
  0x67   : > { %482 = vst [vmem:[%s2019_s10 + $0x178] sm:$0xff] %v481_v51 }
  0x68   : > { %484 = vst [vmem:[%s2019_s10 + $0x180] sm:$0xff] %v483_v52 }
  0x69   : > { %486 = vst [vmem:[%s2019_s10 + $0x188] sm:$0xff] %v485_v53 }
  0x6a   : > { %488 = vst [vmem:[%s2019_s10 + $0x190] sm:$0xff] %v487_v54 }
  0x6b   : > { %490 = vst [vmem:[%s2019_s10 + $0x198] sm:$0xff] %v489_v55 }
  0x6c   : > { %492 = vst [vmem:[%s2019_s10 + $0x1a0] sm:$0xff] %v491_v56 }
  0x6d   : > { %494 = vst [vmem:[%s2019_s10 + $0x1a8] sm:$0xff] %v493_v57 }
  0x6e   : > { %496 = vst [vmem:[%s2019_s10 + $0x1b0] sm:$0xff] %v495_v58 }
  0x6f   : > { %498 = vst [vmem:[%s2019_s10 + $0x1b8] sm:$0xff] %v497_v59 }
  0x70   : > { %500 = vst [vmem:[%s2019_s10 + $0x1c0] sm:$0xff] %v499_v60 }
  0x71   : > { %502 = vst [vmem:[%s2019_s10 + $0x1c8] sm:$0xff] %v501_v61 }
  0x72   : > { %504 = vst [vmem:[%s2019_s10 + $0x1d0] sm:$0xff] %v503_v62 }
  0x73   : > { %506 = vst [vmem:[%s2019_s10 + $0x1d8] sm:$0xff] %v505_v63 }
  0x74   : > { %508 = vst [vmem:[%s2019_s10 + $0x1e0] sm:$0xff] %v507_v0 }
  0x75   : > { %510 = vst [vmem:[%s2019_s10 + $0x1e8] sm:$0xff] %v509_v1 }
  0x76   : > { %512 = vst [vmem:[%s2019_s10 + $0x1f0] sm:$0xff] %v511_v2 }
  0x77   : > { %514 = vst [vmem:[%s2019_s10 + $0x1f8] sm:$0xff] %v513_v3 }
  0x78 PF: > { %p1341_p0 = scmp.ge.s32.totalorder %s1872_s25, 1  ;;  %p535_p1 = scmp.lt.s32.totalorder %s1872_s25, 19 }
  0x7a   : > { %p536_p2 = pnand %p1341_p0, %p535_p1 }
  0x7b   : > { %s542_s0 = sand.u32 (!%p536_p2), 1, %s1848_s19   ;;  %s549_s28 = sand.u32 (!%p536_p2), 1, %s1840_s17  }
  0x7c   : > { %539 = sbr.rel (%p536_p2) target bundleno = 378 (0x17a), region = 89  ;;  %s1342_s26 = sshll.u32 (!%p536_p2), %s542_s0, 5 }
  0x7d   : > { %s1343_s5 = sshll.u32 (!%p536_p2), %s549_s28, 9  ;;  %s582_s29 = sand.u32 (!%p536_p2), 1, %s1832_s15  }
  0x7e   : > { %s1345_s6 = sshll.u32 (!%p536_p2), %s1860_s22, 1  ;;  %s1344_s30 = sshll.u32 (!%p536_p2), %s582_s29, 5 }
  0x7f   : > { %p590_p3 = scmp.lt.s32.totalorder (!%p536_p2), %s1345_s6, 3  ;;  %s2162_s19 = scalar_lea.vmem (!%p536_p2), [#allocation2], %s1342_s26 }
  0x80   : > { %s2164_s17 = scalar_lea.vmem (!%p536_p2), [#allocation3], %s1343_s5  ;;  %s2166_s15 = scalar_lea.vmem (!%p536_p2), [#allocation4], %s1344_s30 }
  0x81   : > { %s2430_s6 = smov (!%p590_p3, %s1345_s6), 3  ;;  %p1347_p4 = scmp.ne.s32.totalorder %s1856_s21, 0 }
  0x82   : > { %s592_s11 = scalar_lea.vmem %s2397_s2, %s2430_s6  ;;  %s597_s27 = scalar_lea.vmem %s2398_s3, %s2430_s6 }
  0x83   : > { %604 = sbr.rel (%p1347_p4) target bundleno = 141 (0x8d), region = 101 }
  0x88   : > { %v1874_v4 = vmov 0.0  }
  0x89   : > { %605 = vst [vmem:[%s2166_s15] sm:$0xff] %v1874_v4 }
  0x8a   : > { %606 = vst [vmem:[%s2166_s15 + $0x8] sm:$0xff] %v1874_v4 }
  0x8b   : > { %607 = vst [vmem:[%s2166_s15 + $0x10] sm:$0xff] %v1874_v4 }
  0x8c   : > { %608 = vst [vmem:[%s2166_s15 + $0x18] sm:$0xff] %v1874_v4 }
  0x8d PF: > { %v1422_v5 = vld [vmem:[%s2164_s17 + $0x70] sm:$0xf]  ;;  %v1647_v6 = vld [vmem:[%s2164_s17 + $0x74] sm:$0xf0]  ;;  %v1414_v16 = vld [vmem:[%s2164_s17 + $0x60] sm:$0xf] }
  0x8e   : > { %v1486_v7 = vld [vmem:[%s2164_s17 + $0xf0] sm:$0xf]  ;;  %v1423_v8 = vor.u32 %v1647_v6, %v1422_v5  ;;  %v1663_v9 = vld [vmem:[%s2164_s17 + $0xf4] sm:$0xf0]  ;;  %v1645_v18 = vld [vmem:[%s2164_s17 + $0x64] sm:$0xf0] }
  0x8f   : > { %v1550_v10 = vld [vmem:[%s2164_s17 + $0x170] sm:$0xf]  ;;  %v1679_v11 = vld [vmem:[%s2164_s17 + $0x174] sm:$0xf0]  ;;  %v1487_v12 = vor.u32 %v1663_v9, %v1486_v7  ;;  %v1478_v19 = vld [vmem:[%s2164_s17 + $0xe0] sm:$0xf]  ;;  %v1415_v21 = vor.u32 %v1645_v18, %v1414_v16 }
  0x90   : > { %v1551_v13 = vor.u32 %v1679_v11, %v1550_v10  ;;  %v1614_v14 = vld [vmem:[%s2164_s17 + $0x1f0] sm:$0xf]  ;;  %v1695_v15 = vld [vmem:[%s2164_s17 + $0x1f4] sm:$0xf0]  ;;  %1021 = vmatpush.bf16.msra.mxu0 %v1423_v8  ;;  %v1661_v20 = vld [vmem:[%s2164_s17 + $0xe4] sm:$0xf0] }
  0x91   : > { %v1615_v17 = vor.u32 %v1695_v15, %v1614_v14  ;;  %1035 = vmatpush.bf16.msra.mxu1 %v1487_v12  ;;  %v1479_v22 = vor.u32 %v1661_v20, %v1478_v19  ;;  %v1542_v23 = vld [vmem:[%s2164_s17 + $0x160] sm:$0xf]  ;;  %v1677_v24 = vld [vmem:[%s2164_s17 + $0x164] sm:$0xf0]  ;;  %v1406_v28 = vld [vmem:[%s2164_s17 + $0x50] sm:$0xf] }
  0x92   : > { %1049 = vmatpush.bf16.msra.mxu2 %v1551_v13  ;;  %v1606_v25 = vld [vmem:[%s2164_s17 + $0x1e0] sm:$0xf]  ;;  %v1543_v26 = vor.u32 %v1677_v24, %v1542_v23  ;;  %v1693_v27 = vld [vmem:[%s2164_s17 + $0x1e4] sm:$0xf0]  ;;  %v1643_v29 = vld [vmem:[%s2164_s17 + $0x54] sm:$0xf0] }
  0x93   : > { %1063 = vmatpush.bf16.msra.mxu3 %v1615_v17  ;;  %v1607_v30 = vor.u32 %v1693_v27, %v1606_v25  ;;  %v1470_v31 = vld [vmem:[%s2164_s17 + $0xd0] sm:$0xf]  ;;  %v1659_v32 = vld [vmem:[%s2164_s17 + $0xd4] sm:$0xf0]  ;;  %v1407_v34 = vor.u32 %v1643_v29, %v1406_v28  ;;  %v1398_v40 = vld [vmem:[%s2164_s17 + $0x40] sm:$0xf] }
  0x94   : > { %v1534_v33 = vld [vmem:[%s2164_s17 + $0x150] sm:$0xf]  ;;  %1022 = vmatpush.bf16.msra.mxu0 %v1415_v21  ;;  %v1675_v35 = vld [vmem:[%s2164_s17 + $0x154] sm:$0xf0]  ;;  %v1471_v38 = vor.u32 %v1659_v32, %v1470_v31  ;;  %v1641_v41 = vld [vmem:[%s2164_s17 + $0x44] sm:$0xf0] }
  0x95   : > { %v1598_v36 = vld [vmem:[%s2164_s17 + $0x1d0] sm:$0xf]  ;;  %v1691_v37 = vld [vmem:[%s2164_s17 + $0x1d4] sm:$0xf0]  ;;  %1036 = vmatpush.bf16.msra.mxu1 %v1479_v22  ;;  %v1535_v39 = vor.u32 %v1675_v35, %v1534_v33  ;;  %v1462_v42 = vld [vmem:[%s2164_s17 + $0xc0] sm:$0xf]  ;;  %v1399_v49 = vor.u32 %v1641_v41, %v1398_v40 }
  0x96   : > { %1050 = vmatpush.bf16.msra.mxu2 %v1543_v26  ;;  %v1599_v43 = vor.u32 %v1691_v37, %v1598_v36  ;;  %v1657_v44 = vld [vmem:[%s2164_s17 + $0xc4] sm:$0xf0]  ;;  %v1526_v45 = vld [vmem:[%s2164_s17 + $0x140] sm:$0xf]  ;;  %v1390_v52 = vld [vmem:[%s2164_s17 + $0x30] sm:$0xf] }
  0x97   : > { %1064 = vmatpush.bf16.msra.mxu3 %v1607_v30  ;;  %v1673_v46 = vld [vmem:[%s2164_s17 + $0x144] sm:$0xf0]  ;;  %v1590_v47 = vld [vmem:[%s2164_s17 + $0x1c0] sm:$0xf]  ;;  %v1463_v50 = vor.u32 %v1657_v44, %v1462_v42  ;;  %v1639_v53 = vld [vmem:[%s2164_s17 + $0x34] sm:$0xf0] }
  0x98   : > { %v1689_v48 = vld [vmem:[%s2164_s17 + $0x1c4] sm:$0xf0]  ;;  %1023 = vmatpush.bf16.msra.mxu0 %v1407_v34  ;;  %v1527_v51 = vor.u32 %v1673_v46, %v1526_v45  ;;  %v1454_v54 = vld [vmem:[%s2164_s17 + $0xb0] sm:$0xf]  ;;  %v1655_v56 = vld [vmem:[%s2164_s17 + $0xb4] sm:$0xf0]  ;;  %v1391_v61 = vor.u32 %v1639_v53, %v1390_v52 }
  0x99   : > { %1037 = vmatpush.bf16.msra.mxu1 %v1471_v38  ;;  %v1591_v55 = vor.u32 %v1689_v48, %v1590_v47  ;;  %v1518_v57 = vld [vmem:[%s2164_s17 + $0x130] sm:$0xf]  ;;  %v1671_v58 = vld [vmem:[%s2164_s17 + $0x134] sm:$0xf0]  ;;  %v1455_v62 = vor.u32 %v1655_v56, %v1454_v54  ;;  %v1382_v0 = vld [vmem:[%s2164_s17 + $0x20] sm:$0xf] }
  0x9a   : > { %1051 = vmatpush.bf16.msra.mxu2 %v1535_v39  ;;  %v1582_v59 = vld [vmem:[%s2164_s17 + $0x1b0] sm:$0xf]  ;;  %v1687_v60 = vld [vmem:[%s2164_s17 + $0x1b4] sm:$0xf0]  ;;  %v1519_v63 = vor.u32 %v1671_v58, %v1518_v57  ;;  %v1637_v1 = vld [vmem:[%s2164_s17 + $0x24] sm:$0xf0] }
  0x9b   : > { %1065 = vmatpush.bf16.msra.mxu3 %v1599_v43  ;;  %v1446_v2 = vld [vmem:[%s2164_s17 + $0xa0] sm:$0xf]  ;;  %v1583_v3 = vor.u32 %v1687_v60, %v1582_v59  ;;  %v1653_v4 = vld [vmem:[%s2164_s17 + $0xa4] sm:$0xf0]  ;;  %v1383_v9 = vor.u32 %v1637_v1, %v1382_v0  ;;  %v1374_v12 = vld [vmem:[%s2164_s17 + $0x10] sm:$0xf] }
  0x9c   : > { %1024 = vmatpush.bf16.msra.mxu0 %v1399_v49  ;;  %v1510_v5 = vld [vmem:[%s2164_s17 + $0x120] sm:$0xf]  ;;  %v1669_v6 = vld [vmem:[%s2164_s17 + $0x124] sm:$0xf0]  ;;  %v1447_v10 = vor.u32 %v1653_v4, %v1446_v2  ;;  %v1635_v13 = vld [vmem:[%s2164_s17 + $0x14] sm:$0xf0] }
  0x9d   : > { %1038 = vmatpush.bf16.msra.mxu1 %v1463_v50  ;;  %v1574_v7 = vld [vmem:[%s2164_s17 + $0x1a0] sm:$0xf]  ;;  %v1685_v8 = vld [vmem:[%s2164_s17 + $0x1a4] sm:$0xf0]  ;;  %v1511_v11 = vor.u32 %v1669_v6, %v1510_v5  ;;  %v1438_v14 = vld [vmem:[%s2164_s17 + $0x90] sm:$0xf]  ;;  %v1375_v22 = vor.u32 %v1635_v13, %v1374_v12 }
  0x9e   : > { %1052 = vmatpush.bf16.msra.mxu2 %v1527_v51  ;;  %v1575_v15 = vor.u32 %v1685_v8, %v1574_v7  ;;  %v1651_v16 = vld [vmem:[%s2164_s17 + $0x94] sm:$0xf0]  ;;  %v1502_v17 = vld [vmem:[%s2164_s17 + $0x110] sm:$0xf]  ;;  %v1366_v21 = vld [vmem:[%s2164_s17] sm:$0xf] }
  0x9f   : > { %1066 = vmatpush.bf16.msra.mxu3 %v1591_v55  ;;  %v1667_v18 = vld [vmem:[%s2164_s17 + $0x114] sm:$0xf0]  ;;  %v1566_v19 = vld [vmem:[%s2164_s17 + $0x190] sm:$0xf]  ;;  %v1633_v23 = vld [vmem:[%s2164_s17 + $0x4] sm:$0xf0]  ;;  %v1439_v26 = vor.u32 %v1651_v16, %v1438_v14 }
  0xa0   : > { %1025 = vmatpush.bf16.msra.mxu0 %v1391_v61  ;;  %v1683_v20 = vld [vmem:[%s2164_s17 + $0x194] sm:$0xf0]  ;;  %v1430_v24 = vld [vmem:[%s2164_s17 + $0x80] sm:$0xf]  ;;  %v1649_v25 = vld [vmem:[%s2164_s17 + $0x84] sm:$0xf0]  ;;  %v1503_v27 = vor.u32 %v1667_v18, %v1502_v17  ;;  %v1367_v38 = vor.u32 %v1633_v23, %v1366_v21 }
  0xa1   : > { %1039 = vmatpush.bf16.msra.mxu1 %v1455_v62  ;;  %v1494_v28 = vld [vmem:[%s2164_s17 + $0x100] sm:$0xf]  ;;  %v1665_v29 = vld [vmem:[%s2164_s17 + $0x104] sm:$0xf0]  ;;  %v1567_v31 = vor.u32 %v1683_v20, %v1566_v19  ;;  %v1646_v33 = vld [vmem:[%s2164_s17 + $0x74] sm:$0xf]  ;;  %v1431_v42 = vor.u32 %v1649_v25, %v1430_v24 }
  0xa2   : > { %1053 = vmatpush.bf16.msra.mxu2 %v1519_v63  ;;  %v1558_v30 = vld [vmem:[%s2164_s17 + $0x180] sm:$0xf]  ;;  %v1681_v32 = vld [vmem:[%s2164_s17 + $0x184] sm:$0xf0]  ;;  %v1424_v34 = vld [vmem:[%s2164_s17 + $0x78] sm:$0xf0]  ;;  %v1495_v43 = vor.u32 %v1665_v29, %v1494_v28 }
  0xa3   : > { %1067 = vmatpush.bf16.msra.mxu3 %v1583_v3  ;;  %v1662_v35 = vld [vmem:[%s2164_s17 + $0xf4] sm:$0xf]  ;;  %v1488_v36 = vld [vmem:[%s2164_s17 + $0xf8] sm:$0xf0]  ;;  %v1644_v44 = vld [vmem:[%s2164_s17 + $0x64] sm:$0xf]  ;;  %v1559_v48 = vor.u32 %v1681_v32, %v1558_v30  ;;  %v1427_v49 = vor.u32 %v1646_v33, %v1424_v34 }
  0xa4   : > { %1026 = vmatpush.bf16.msra.mxu0 %v1383_v9  ;;  %v1678_v37 = vld [vmem:[%s2164_s17 + $0x174] sm:$0xf]  ;;  %v1552_v39 = vld [vmem:[%s2164_s17 + $0x178] sm:$0xf0]  ;;  %v1416_v45 = vld [vmem:[%s2164_s17 + $0x68] sm:$0xf0]  ;;  %v1491_v54 = vor.u32 %v1662_v35, %v1488_v36 }
  0xa5   : > { %1040 = vmatpush.bf16.msra.mxu1 %v1447_v10  ;;  %v1694_v40 = vld [vmem:[%s2164_s17 + $0x1f4] sm:$0xf]  ;;  %v1616_v41 = vld [vmem:[%s2164_s17 + $0x1f8] sm:$0xf0]  ;;  %v1358_v46 = vld [vmem:[%s2162_s19 + $0x8] sm:$0xf]  ;;  %v1555_v55 = vor.u32 %v1678_v37, %v1552_v39  ;;  %v1419_v4 = vor.u32 %v1644_v44, %v1416_v45 }
  0xa6   : > { %1054 = vmatpush.bf16.msra.mxu2 %v1511_v11  ;;  %v1631_v47 = vld [vmem:[%s2162_s19 + $0x14] sm:$0xf0]  ;;  %v1660_v50 = vld [vmem:[%s2164_s17 + $0xe4] sm:$0xf]  ;;  %v1480_v51 = vld [vmem:[%s2164_s17 + $0xe8] sm:$0xf0]  ;;  %v1619_v59 = vor.u32 %v1694_v40, %v1616_v41 }
  0xa7   : > { %1068 = vmatpush.bf16.msra.mxu3 %v1575_v15  ;;  %v1676_v52 = vld [vmem:[%s2164_s17 + $0x164] sm:$0xf]  ;;  %v1544_v53 = vld [vmem:[%s2164_s17 + $0x168] sm:$0xf0]  ;;  %v1360_v57 = vld [vmem:[%s2162_s19 + $0x18] sm:$0xf0]  ;;  %v2256_v60 = vor.u32 %v1631_v47, %v1358_v46  ;;  %v1483_v6 = vor.u32 %v1660_v50, %v1480_v51 }
  0xa8   : > { %1027 = vmatpush.bf16.msra.mxu0 %v1375_v22  ;;  %v1629_v56 = vld [vmem:[%s2162_s19 + $0xc] sm:$0xf]  ;;  %v1350_v58 = vld [vmem:[%s2162_s19] sm:$0xf]  ;;  %v1630_v61 = vld [vmem:[%s2162_s19 + $0xc] sm:$0xf0]  ;;  %v1547_v7 = vor.u32 %v1676_v52, %v1544_v53 }
  0xa9   : > { %1041 = vmatpush.bf16.msra.mxu1 %v1439_v26  ;;  %v1628_v62 = vld [vmem:[%s2162_s19 + $0x4] sm:$0xf]  ;;  %v1352_v63 = vld [vmem:[%s2162_s19 + $0x10] sm:$0xf0]  ;;  %v1608_v1 = vld [vmem:[%s2164_s17 + $0x1e8] sm:$0xf0]  ;;  %v2263_v2 = vor.u32 %v1629_v56, %v1360_v57  ;;  %v2265_v3 = vor.u32 %v1630_v61, %v1350_v58 }
  0xaa   : > { %1055 = vmatpush.bf16.msra.mxu2 %v1503_v27  ;;  %v1692_v0 = vld [vmem:[%s2164_s17 + $0x1e4] sm:$0xf]  ;;  %v2267_v5 = vor.u32 %v1628_v62, %v1352_v63  ;;  %v1642_v8 = vld [vmem:[%s2164_s17 + $0x54] sm:$0xf]  ;;  %v1408_v9 = vld [vmem:[%s2164_s17 + $0x58] sm:$0xf0] }
  0xab   : > { %1069 = vmatpush.bf16.msra.mxu3 %v1567_v31  ;;  %v1658_v10 = vld [vmem:[%s2164_s17 + $0xd4] sm:$0xf]  ;;  %v1611_v11 = vor.u32 %v1692_v0, %v1608_v1  ;;  %v1472_v12 = vld [vmem:[%s2164_s17 + $0xd8] sm:$0xf0]  ;;  %v1411_v17 = vor.u32 %v1642_v8, %v1408_v9  ;;  %v1640_v20 = vld [vmem:[%s2164_s17 + $0x44] sm:$0xf] }
  0xac   : > { %1028 = vmatpush.bf16.msra.mxu0 %v1367_v38  ;;  %v1674_v13 = vld [vmem:[%s2164_s17 + $0x154] sm:$0xf]  ;;  %v1536_v14 = vld [vmem:[%s2164_s17 + $0x158] sm:$0xf0]  ;;  %v1475_v18 = vor.u32 %v1658_v10, %v1472_v12  ;;  %v1400_v21 = vld [vmem:[%s2164_s17 + $0x48] sm:$0xf0] }
  0xad   : > { %1042 = vmatpush.bf16.msra.mxu1 %v1431_v42  ;;  %v1690_v15 = vld [vmem:[%s2164_s17 + $0x1d4] sm:$0xf]  ;;  %v1600_v16 = vld [vmem:[%s2164_s17 + $0x1d8] sm:$0xf0]  ;;  %v1539_v19 = vor.u32 %v1674_v13, %v1536_v14  ;;  %v1656_v22 = vld [vmem:[%s2164_s17 + $0xc4] sm:$0xf]  ;;  %v1403_v29 = vor.u32 %v1640_v20, %v1400_v21 }
  0xae   : > { %1056 = vmatpush.bf16.msra.mxu2 %v1495_v43  ;;  %v1603_v23 = vor.u32 %v1690_v15, %v1600_v16  ;;  %v1464_v24 = vld [vmem:[%s2164_s17 + $0xc8] sm:$0xf0]  ;;  %v1672_v25 = vld [vmem:[%s2164_s17 + $0x144] sm:$0xf]  ;;  %v1638_v32 = vld [vmem:[%s2164_s17 + $0x34] sm:$0xf] }
  0xaf   : > { %1070 = vmatpush.bf16.msra.mxu3 %v1559_v48  ;;  %1029 = vmatmul.bf16.vlgmr.msra.gmra.mxu0 %v2265_v3  ;;  %v1528_v26 = vld [vmem:[%s2164_s17 + $0x148] sm:$0xf0]  ;;  %v1688_v27 = vld [vmem:[%s2164_s17 + $0x1c4] sm:$0xf]  ;;  %v1467_v30 = vor.u32 %v1656_v22, %v1464_v24  ;;  %v1392_v33 = vld [vmem:[%s2164_s17 + $0x38] sm:$0xf0] }
  0xb0   : > { %1077 = vmatpush.bf16.msrb.mxu0 %v1427_v49  ;;  %1043 = vmatmul.bf16.vlgmr.msra.gmra.mxu1 %v2267_v5  ;;  %v1592_v28 = vld [vmem:[%s2164_s17 + $0x1c8] sm:$0xf0]  ;;  %v1531_v31 = vor.u32 %v1672_v25, %v1528_v26  ;;  %v1654_v34 = vld [vmem:[%s2164_s17 + $0xb4] sm:$0xf]  ;;  %v1456_v36 = vld [vmem:[%s2164_s17 + $0xb8] sm:$0xf0]  ;;  %v1395_v41 = vor.u32 %v1638_v32, %v1392_v33 }
  0xb1   : > { %1091 = vmatpush.bf16.msrb.mxu1 %v1491_v54  ;;  %1057 = vmatmul.bf16.vlgmr.msra.gmra.mxu2 %v2256_v60  ;;  %v1595_v35 = vor.u32 %v1688_v27, %v1592_v28  ;;  %v1670_v37 = vld [vmem:[%s2164_s17 + $0x134] sm:$0xf]  ;;  %v1520_v38 = vld [vmem:[%s2164_s17 + $0x138] sm:$0xf0]  ;;  %v1459_v42 = vor.u32 %v1654_v34, %v1456_v36  ;;  %v1636_v44 = vld [vmem:[%s2164_s17 + $0x24] sm:$0xf] }
  0xb2   : > { %1105 = vmatpush.bf16.msrb.mxu2 %v1555_v55  ;;  %1071 = vmatmul.bf16.vlgmr.msra.gmra.mxu3 %v2263_v2  ;;  %v1686_v39 = vld [vmem:[%s2164_s17 + $0x1b4] sm:$0xf]  ;;  %v1584_v40 = vld [vmem:[%s2164_s17 + $0x1b8] sm:$0xf0]  ;;  %v1523_v43 = vor.u32 %v1670_v37, %v1520_v38  ;;  %v1384_v45 = vld [vmem:[%s2164_s17 + $0x28] sm:$0xf0] }
  0xb3   : > { %1119 = vmatpush.bf16.msrb.mxu3 %v1619_v59  ;;  %v1652_v46 = vld [vmem:[%s2164_s17 + $0xa4] sm:$0xf]  ;;  %v1587_v47 = vor.u32 %v1686_v39, %v1584_v40  ;;  %v1448_v48 = vld [vmem:[%s2164_s17 + $0xa8] sm:$0xf0]  ;;  %v1387_v53 = vor.u32 %v1636_v44, %v1384_v45  ;;  %v1634_v56 = vld [vmem:[%s2164_s17 + $0x14] sm:$0xf] }
  0xb4   : > { %1078 = vmatpush.bf16.msrb.mxu0 %v1419_v4  ;;  %v1668_v49 = vld [vmem:[%s2164_s17 + $0x124] sm:$0xf]  ;;  %v1512_v50 = vld [vmem:[%s2164_s17 + $0x128] sm:$0xf0]  ;;  %v1451_v54 = vor.u32 %v1652_v46, %v1448_v48  ;;  %v1376_v57 = vld [vmem:[%s2164_s17 + $0x18] sm:$0xf0] }
  0xb5   : > { %1092 = vmatpush.bf16.msrb.mxu1 %v1483_v6  ;;  %v1684_v51 = vld [vmem:[%s2164_s17 + $0x1a4] sm:$0xf]  ;;  %v1576_v52 = vld [vmem:[%s2164_s17 + $0x1a8] sm:$0xf0]  ;;  %v1515_v55 = vor.u32 %v1668_v49, %v1512_v50  ;;  %v1650_v58 = vld [vmem:[%s2164_s17 + $0x94] sm:$0xf]  ;;  %v1379_v4 = vor.u32 %v1634_v56, %v1376_v57 }
  0xb6   : > { %1106 = vmatpush.bf16.msrb.mxu2 %v1547_v7  ;;  %v1579_v59 = vor.u32 %v1684_v51, %v1576_v52  ;;  %v1440_v61 = vld [vmem:[%s2164_s17 + $0x98] sm:$0xf0]  ;;  %v1666_v62 = vld [vmem:[%s2164_s17 + $0x114] sm:$0xf]  ;;  %v1632_v8 = vld [vmem:[%s2164_s17 + $0x4] sm:$0xf] }
  0xb7   : > { %1120 = vmatpush.bf16.msrb.mxu3 %v1611_v11  ;;  %v1504_v63 = vld [vmem:[%s2164_s17 + $0x118] sm:$0xf0]  ;;  %v1682_v0 = vld [vmem:[%s2164_s17 + $0x194] sm:$0xf]  ;;  %v1443_v6 = vor.u32 %v1650_v58, %v1440_v61  ;;  %v1368_v9 = vld [vmem:[%s2164_s17 + $0x8] sm:$0xf0] }
  0xb8   : > { %1079 = vmatpush.bf16.msrb.mxu0 %v1411_v17  ;;  %v1568_v1 = vld [vmem:[%s2164_s17 + $0x198] sm:$0xf0]  ;;  %v1507_v7 = vor.u32 %v1666_v62, %v1504_v63  ;;  %v1648_v10 = vld [vmem:[%s2164_s17 + $0x84] sm:$0xf]  ;;  %v1432_v12 = vld [vmem:[%s2164_s17 + $0x88] sm:$0xf0]  ;;  %v1371_v17 = vor.u32 %v1632_v8, %v1368_v9 }
  0xb9   : > { %1093 = vmatpush.bf16.msrb.mxu1 %v1475_v18  ;;  %v1571_v11 = vor.u32 %v1682_v0, %v1568_v1  ;;  %v1664_v13 = vld [vmem:[%s2164_s17 + $0x104] sm:$0xf]  ;;  %v1496_v14 = vld [vmem:[%s2164_s17 + $0x108] sm:$0xf0]  ;;  %v1435_v18 = vor.u32 %v1648_v10, %v1432_v12  ;;  %v612_v49 = vld [vmem:[%s2166_s15 + $0x18] sm:$0xff]  ;;  %p1620_p5 = scmp.ne.s32.totalorder %s1856_s21, 8 }
  0xba   : > { %1107 = vmatpush.bf16.msrb.mxu2 %v1539_v19  ;;  %v1680_v15 = vld [vmem:[%s2164_s17 + $0x184] sm:$0xf]  ;;  %v1560_v16 = vld [vmem:[%s2164_s17 + $0x188] sm:$0xf0]  ;;  %v1499_v19 = vor.u32 %v1664_v13, %v1496_v14 }
  0xbb   : > { %1121 = vmatpush.bf16.msrb.mxu3 %v1603_v23  ;;  %v1563_v20 = vor.u32 %v1680_v15, %v1560_v16  ;;  %v609_v27 = vld [vmem:[%s2166_s15] sm:$0xff] }
  0xbc   : > { %1080 = vmatpush.bf16.msrb.mxu0 %v1403_v29 }
  0xbd   : > { %1094 = vmatpush.bf16.msrb.mxu1 %v1467_v30 }
  0xbe   : > { %1108 = vmatpush.bf16.msrb.mxu2 %v1531_v31 }
  0xbf   : > { %1122 = vmatpush.bf16.msrb.mxu3 %v1595_v35 }
  0xc0   : > { %1081 = vmatpush.bf16.msrb.mxu0 %v1395_v41  ;;  %v610_v41 = vld [vmem:[%s2166_s15 + $0x8] sm:$0xff] }
  0xc1   : > { %1095 = vmatpush.bf16.msrb.mxu1 %v1459_v42 }
  0xc2   : > { %1109 = vmatpush.bf16.msrb.mxu2 %v1523_v43 }
  0xc3   : > { %1123 = vmatpush.bf16.msrb.mxu3 %v1587_v47 }
  0xc4   : > { %1082 = vmatpush.bf16.msrb.mxu0 %v1387_v53 }
  0xc5   : > { %1096 = vmatpush.bf16.msrb.mxu1 %v1451_v54 }
  0xc6   : > { %1110 = vmatpush.bf16.msrb.mxu2 %v1515_v55 }
  0xc7   : > { %1124 = vmatpush.bf16.msrb.mxu3 %v1579_v59 }
  0xc8   : > { %1083 = vmatpush.bf16.msrb.mxu0 %v1379_v4 }
  0xc9   : > { %1097 = vmatpush.bf16.msrb.mxu1 %v1443_v6 }
  0xca   : > { %1111 = vmatpush.bf16.msrb.mxu2 %v1507_v7 }
  0xcb   : > { %1125 = vmatpush.bf16.msrb.mxu3 %v1571_v11 }
  0xcc   : > { %1084 = vmatpush.bf16.msrb.mxu0 %v1371_v17 }
  0xcd   : > { %1098 = vmatpush.bf16.msrb.mxu1 %v1435_v18 }
  0xce   : > { %1112 = vmatpush.bf16.msrb.mxu2 %v1499_v19 }
  0xcf   : > { %1126 = vmatpush.bf16.msrb.mxu3 %v1563_v20  ;;  %1085 = vmatmul.bf16.vlgmr.msrb.gmra.mxu0 %v2265_v3 }
  0xd0   : > { %1099 = vmatmul.bf16.vlgmr.msrb.gmra.mxu1 %v2267_v5 }
  0xd1   : > { %1113 = vmatmul.bf16.vlgmr.msrb.gmra.mxu2 %v2256_v60 }
  0xd2   : > { %1127 = vmatmul.bf16.vlgmr.msrb.gmra.mxu3 %v2263_v2  ;;  %v611_v2 = vld [vmem:[%s2166_s15 + $0x10] sm:$0xff] }
 0x12c   : > { %v1030_v21 = vpop.f32.mrf.mxu0 }
 0x12d   : > { %v1044_v22 = vpop.f32.mrf.mxu1 }
 0x12e   : > { %v1045_v23 = vadd.f32 %v1044_v22, %v1030_v21 }
 0x134   : > { %v1058_v24 = vpop.f32.mrf.mxu2  ;;  %v1032_v29 = vpop.f32.mrf.mxu0 }
 0x135   : > { %v1059_v25 = vadd.f32 %v1058_v24, %v1045_v23  ;;  %v1072_v26 = vpop.f32.mrf.mxu3  ;;  %v1046_v30 = vpop.f32.mrf.mxu1 }
 0x136   : > { %v1047_v31 = vadd.f32 %v1046_v30, %v1032_v29 }
 0x137   : > { %v1073_v28 = vadd.f32 %v1072_v26, %v1059_v25 }
 0x139   : > { %v1133_v3 = vadd.f32 %v1073_v28, %v609_v27 }
 0x13b   : > { %1137 = vst [vmem:[%s2166_s15] sm:$0xff] %v1133_v3 }
 0x13c   : > { %v1060_v5 = vpop.f32.mrf.mxu2 }
 0x13d   : > { %v1061_v60 = vadd.f32 %v1060_v5, %v1047_v31  ;;  %v1074_v32 = vpop.f32.mrf.mxu3 }
 0x13f   : > { %v1075_v33 = vadd.f32 %v1074_v32, %v1061_v60 }
 0x141   : > { %v1135_v34 = vadd.f32 %v1075_v33, %v611_v2 }
 0x143   : > { %1139 = vst [vmem:[%s2166_s15 + $0x10] sm:$0xff] %v1135_v34 }
 0x14c   : > { %v1086_v35 = vpop.f32.mrf.mxu0 }
 0x14d   : > { %v1100_v36 = vpop.f32.mrf.mxu1 }
 0x14e   : > { %v1101_v37 = vadd.f32 %v1100_v36, %v1086_v35 }
 0x154   : > { %v1114_v38 = vpop.f32.mrf.mxu2  ;;  %v1088_v43 = vpop.f32.mrf.mxu0 }
 0x155   : > { %v1115_v39 = vadd.f32 %v1114_v38, %v1101_v37  ;;  %v1128_v40 = vpop.f32.mrf.mxu3  ;;  %v1102_v44 = vpop.f32.mrf.mxu1 }
 0x156   : > { %v1103_v46 = vadd.f32 %v1102_v44, %v1088_v43 }
 0x157   : > { %v1129_v42 = vadd.f32 %v1128_v40, %v1115_v39 }
 0x159   : > { %v1134_v45 = vadd.f32 %v1129_v42, %v610_v41 }
 0x15b   : > { %1138 = vst [vmem:[%s2166_s15 + $0x8] sm:$0xff] %v1134_v45 }
 0x15c   : > { %v1116_v47 = vpop.f32.mrf.mxu2 }
 0x15d   : > { %v1117_v48 = vadd.f32 %v1116_v47, %v1103_v46  ;;  %v1130_v50 = vpop.f32.mrf.mxu3 }
 0x15f   : > { %v1131_v51 = vadd.f32 %v1130_v50, %v1117_v48  ;;  %1144 = sbr.rel (%p1620_p5) target bundleno = 370 (0x172), region = 105 }
 0x161   : > { %v1136_v52 = vadd.f32 %v1131_v51, %v612_v49 }
 0x163   : > { %1140 = vst [vmem:[%s2166_s15 + $0x18] sm:$0xff] %v1136_v52 }
 0x164   : > { %v1145_v53 = vld [vmem:[%s2166_s15] sm:$0xff]  ;;  %v1146_v58 = vld [vmem:[%s2166_s15 + $0x8] sm:$0xff]  ;;  %v1147_v62 = vld [vmem:[%s2166_s15 + $0x10] sm:$0xff] }
 0x165   : > { %v1149_v54 = vld [vmem:[%s592_s11] sm:$0x3] }
 0x166   : > { %v1159_v55 = vld [vmem:[%s597_s27] sm:$0x3]  ;;  %v1151_v56 = vperm.slane %v1149_v54, 0  ;;  %v1152_v59 = vperm.slane %v1149_v54, 1 }
 0x167   : > { %v1161_v57 = vperm.slane %v1159_v55, 0  ;;  %v1162_v61 = vperm.slane %v1159_v55, 1 }
 0x168   : > { %v1155_v0 = vmul.f32 %v1151_v56, %v1145_v53  ;;  %v1156_v1 = vmul.f32 %v1152_v59, %v1146_v58  ;;  %v1157_v4 = vmul.f32 %v1151_v56, %v1147_v62 }
 0x16a   : > { %v1148_v63 = vld [vmem:[%s2166_s15 + $0x18] sm:$0xff]  ;;  %v1165_v7 = vadd.f32 %v1161_v57, %v1155_v0  ;;  %v1166_v8 = vadd.f32 %v1162_v61, %v1156_v1  ;;  %v1167_v9 = vadd.f32 %v1161_v57, %v1157_v4 }
 0x16b   : > { %v1158_v6 = vmul.f32 %v1152_v59, %v1148_v63 }
 0x16c   : > { %v1169_v11 = vmax.f32 %v1165_v7, 0.0  ;;  %v1170_v12 = vmax.f32 %v1166_v8, 0.0  ;;  %v1171_v13 = vmax.f32 %v1167_v9, 0.0 }
 0x16d   : > { %v1168_v10 = vadd.f32 %v1162_v61, %v1158_v6 }
 0x16e   : > { %1173 = vst [vmem:[%s2166_s15] sm:$0xff] %v1169_v11 }
 0x16f   : > { %v1172_v14 = vmax.f32 %v1168_v10, 0.0  ;;  %1174 = vst [vmem:[%s2166_s15 + $0x8] sm:$0xff] %v1170_v12 }
 0x170   : > { %1175 = vst [vmem:[%s2166_s15 + $0x10] sm:$0xff] %v1171_v13 }
 0x171   : > { %1176 = vst [vmem:[%s2166_s15 + $0x18] sm:$0xff] %v1172_v14 }
 0x172 PF: > { %1183 = sbr.rel (!%p1994_p12) target bundleno = 378 (0x17a), region = 109  ;;  %s1696_s21 = sshll.u32 (%p1994_p12), %s1860_s22, 4 }
 0x173   : > { %s1189_s29 = scalar_lea.vmem (%p1994_p12), %s2399_s4, %s1696_s21 }
 0x175   : > { %v1202_v15 = vld [vmem:[%s2166_s15] sm:$0xff] (%p1994_p12) }
 0x176   : > { %v1204_v16 = vld [vmem:[%s2166_s15 + $0x8] sm:$0xff] (%p1994_p12)  ;;  %1203 = vst [vmem:[%s1189_s29] sm:$0xff] (%p1994_p12), %v1202_v15 }
 0x177   : > { %v1206_v17 = vld [vmem:[%s2166_s15 + $0x10] sm:$0xff]  ;;  %1205 = vst [vmem:[%s1189_s29 + $0x8] sm:$0xff] %v1204_v16 }
 0x178   : > { %v1208_v18 = vld [vmem:[%s2166_s15 + $0x18] sm:$0xff]  ;;  %1207 = vst [vmem:[%s1189_s29 + $0x20] sm:$0xff] %v1206_v17 }
 0x179   : > { %1209 = vst [vmem:[%s1189_s29 + $0x28] sm:$0xff] %v1208_v18 }
 0x17a PF: > { %s14_s25 = sadd.s32 1, %s1872_s25   ;;  %s2411_s14 = sld [smem:[#allocation5_spill]] }
 0x17b   : > { %p11_p6 = scmp.ge.s32.totalorder %s14_s25, 20   ;;  %s2412_s6 = sld [smem:[#allocation6_spill]] }
 0x17c   : > { %s2413_s15 = smov %s1836_s16  ;;  %s2414_s16 = smov %s1992_s13 }
 0x17d   : > { %s2415_s17 = smov %s1844_s18  ;;  %s2416_s18 = smov %s1989_s12 }
 0x17e   : > { %s2417_s19 = smov %s1852_s20  ;;  %s2418_s20 = smov %s1975_s7 }
 0x17f   : > { %s2419_s21 = smov %s1864_s23  ;;  %s2420_s22 = smov %s1868_s24 }
 0x180   : > { %s2421_s23 = smov %s2411_s14  ;;  %13 = sbr.rel (!%p11_p6) target bundleno = 9 (0x9), region = 177 }
 0x181   : > { %s2422_s24 = smov %s2412_s6 }

// kernel: resnet18_16s_forward.45
= control target key start
LH: loop header
LB: loop body
LE: loop exit
PB: predicated region body
PF: predicated region fallthrough
CT: control target
= control target key end

     0   :  { %s728_s1 = inlined_call_operand.vmem [shape: bf16[512,128], index: 1, kind: input, shape index: {}]   ;;  %s729_s0 = inlined_call_operand.vmem [shape: bf16[16,512], index: 0, kind: input, shape index: {}]   ;;  %s730_s2 = inlined_call_operand.vmem [shape: f32[1,128], index: 2, kind: input, shape index: {}]   ;;  %s731_s3 = inlined_call_operand.vmem [shape: f32[1,128], index: 3, kind: input, shape index: {}]   ;;  %s732_s4 = inlined_call_operand.vmem [shape: f32[16,128], index: 4, kind: output, shape index: {}]  }
   0x1   :  { %v543_v0 = vld [vmem:[%s728_s1 + $0x38] sm:$0xff]  ;;  %v542_v4 = vld [vmem:[%s728_s1 + $0x30] sm:$0xff]  ;;  %v541_v8 = vld [vmem:[%s728_s1 + $0x28] sm:$0xff] }
   0x2   :  { %v551_v1 = vld [vmem:[%s728_s1 + $0x78] sm:$0xff]  ;;  %305 = vmatpush.bf16.msra.mxu0 %v543_v0  ;;  %v550_v5 = vld [vmem:[%s728_s1 + $0x70] sm:$0xff]  ;;  %v549_v9 = vld [vmem:[%s728_s1 + $0x68] sm:$0xff] }
   0x3   :  { %v559_v2 = vld [vmem:[%s728_s1 + $0xb8] sm:$0xff]  ;;  %319 = vmatpush.bf16.msra.mxu1 %v551_v1  ;;  %v558_v6 = vld [vmem:[%s728_s1 + $0xb0] sm:$0xff]  ;;  %v557_v10 = vld [vmem:[%s728_s1 + $0xa8] sm:$0xff] }
   0x4   :  { %v567_v3 = vld [vmem:[%s728_s1 + $0xf8] sm:$0xff]  ;;  %333 = vmatpush.bf16.msra.mxu2 %v559_v2  ;;  %v566_v7 = vld [vmem:[%s728_s1 + $0xf0] sm:$0xff]  ;;  %v565_v11 = vld [vmem:[%s728_s1 + $0xe8] sm:$0xff] }
   0x5   :  { %347 = vmatpush.bf16.msra.mxu3 %v567_v3  ;;  %v540_v12 = vld [vmem:[%s728_s1 + $0x20] sm:$0xff]  ;;  %v539_v16 = vld [vmem:[%s728_s1 + $0x18] sm:$0xff]  ;;  %v538_v20 = vld [vmem:[%s728_s1 + $0x10] sm:$0xff] }
   0x6   :  { %306 = vmatpush.bf16.msra.mxu0 %v542_v4  ;;  %v548_v13 = vld [vmem:[%s728_s1 + $0x60] sm:$0xff]  ;;  %v547_v17 = vld [vmem:[%s728_s1 + $0x58] sm:$0xff]  ;;  %v546_v21 = vld [vmem:[%s728_s1 + $0x50] sm:$0xff] }
   0x7   :  { %320 = vmatpush.bf16.msra.mxu1 %v550_v5  ;;  %v556_v14 = vld [vmem:[%s728_s1 + $0xa0] sm:$0xff]  ;;  %v555_v18 = vld [vmem:[%s728_s1 + $0x98] sm:$0xff]  ;;  %v554_v22 = vld [vmem:[%s728_s1 + $0x90] sm:$0xff] }
   0x8   :  { %334 = vmatpush.bf16.msra.mxu2 %v558_v6  ;;  %v564_v15 = vld [vmem:[%s728_s1 + $0xe0] sm:$0xff]  ;;  %v563_v19 = vld [vmem:[%s728_s1 + $0xd8] sm:$0xff]  ;;  %v562_v23 = vld [vmem:[%s728_s1 + $0xd0] sm:$0xff] }
   0x9   :  { %348 = vmatpush.bf16.msra.mxu3 %v566_v7  ;;  %v537_v24 = vld [vmem:[%s728_s1 + $0x8] sm:$0xff]  ;;  %v536_v28 = vld [vmem:[%s728_s1] sm:$0xff]  ;;  %v534_v33 = vld [vmem:[%s729_s0 + $0xc] sm:$0xf0] }
   0xa   :  { %307 = vmatpush.bf16.msra.mxu0 %v541_v8  ;;  %v545_v25 = vld [vmem:[%s728_s1 + $0x48] sm:$0xff]  ;;  %v544_v29 = vld [vmem:[%s728_s1 + $0x40] sm:$0xff]  ;;  %v392_v35 = vld [vmem:[%s729_s0 + $0x10] sm:$0xf0] }
   0xb   :  { %321 = vmatpush.bf16.msra.mxu1 %v549_v9  ;;  %v553_v26 = vld [vmem:[%s728_s1 + $0x88] sm:$0xff]  ;;  %v552_v30 = vld [vmem:[%s728_s1 + $0x80] sm:$0xff]  ;;  %v535_v37 = vld [vmem:[%s729_s0 + $0x14] sm:$0xf0] }
   0xc   :  { %335 = vmatpush.bf16.msra.mxu2 %v557_v10  ;;  %v561_v27 = vld [vmem:[%s728_s1 + $0xc8] sm:$0xff]  ;;  %v560_v31 = vld [vmem:[%s728_s1 + $0xc0] sm:$0xff]  ;;  %v400_v39 = vld [vmem:[%s729_s0 + $0x18] sm:$0xf0] }
   0xd   :  { %349 = vmatpush.bf16.msra.mxu3 %v565_v11  ;;  %v390_v32 = vld [vmem:[%s729_s0] sm:$0xf]  ;;  %v532_v34 = vld [vmem:[%s729_s0 + $0x4] sm:$0xf]  ;;  %v398_v36 = vld [vmem:[%s729_s0 + $0x8] sm:$0xf] }
   0xe   :  { %308 = vmatpush.bf16.msra.mxu0 %v540_v12  ;;  %v533_v38 = vld [vmem:[%s729_s0 + $0xc] sm:$0xf]  ;;  %v391_v40 = vor.u32 %v534_v33, %v390_v32  ;;  %v395_v41 = vor.u32 %v532_v34, %v392_v35  ;;  %v399_v42 = vor.u32 %v535_v37, %v398_v36  ;;  %v569_v51 = vld [vmem:[%s730_s2] ss:$0 sm:$0xff] }
   0xf   :  { %322 = vmatpush.bf16.msra.mxu1 %v548_v13  ;;  %v403_v43 = vor.u32 %v533_v38, %v400_v39  ;;  %v570_v54 = vld [vmem:[%s731_s3] ss:$0 sm:$0xff] }
  0x10   :  { %336 = vmatpush.bf16.msra.mxu2 %v556_v14 }
  0x11   :  { %350 = vmatpush.bf16.msra.mxu3 %v564_v15 }
  0x12   :  { %309 = vmatpush.bf16.msra.mxu0 %v539_v16 }
  0x13   :  { %323 = vmatpush.bf16.msra.mxu1 %v547_v17 }
  0x14   :  { %337 = vmatpush.bf16.msra.mxu2 %v555_v18 }
  0x15   :  { %351 = vmatpush.bf16.msra.mxu3 %v563_v19 }
  0x16   :  { %310 = vmatpush.bf16.msra.mxu0 %v538_v20 }
  0x17   :  { %324 = vmatpush.bf16.msra.mxu1 %v546_v21 }
  0x18   :  { %338 = vmatpush.bf16.msra.mxu2 %v554_v22 }
  0x19   :  { %352 = vmatpush.bf16.msra.mxu3 %v562_v23 }
  0x1a   :  { %311 = vmatpush.bf16.msra.mxu0 %v537_v24 }
  0x1b   :  { %325 = vmatpush.bf16.msra.mxu1 %v545_v25 }
  0x1c   :  { %339 = vmatpush.bf16.msra.mxu2 %v553_v26 }
  0x1d   :  { %353 = vmatpush.bf16.msra.mxu3 %v561_v27 }
  0x1e   :  { %312 = vmatpush.bf16.msra.mxu0 %v536_v28 }
  0x1f   :  { %326 = vmatpush.bf16.msra.mxu1 %v544_v29 }
  0x20   :  { %340 = vmatpush.bf16.msra.mxu2 %v552_v30 }
  0x21   :  { %354 = vmatpush.bf16.msra.mxu3 %v560_v31  ;;  %313 = vmatmul.bf16.vlgmr.msra.gmra.mxu0 %v391_v40 }
  0x22   :  { %327 = vmatmul.bf16.vlgmr.msra.gmra.mxu1 %v395_v41 }
  0x23   :  { %341 = vmatmul.bf16.vlgmr.msra.gmra.mxu2 %v399_v42 }
  0x24   :  { %355 = vmatmul.bf16.vlgmr.msra.gmra.mxu3 %v403_v43 }
  0x9e   :  { %v314_v44 = vpop.f32.mrf.mxu0 }
  0x9f   :  { %v328_v45 = vpop.f32.mrf.mxu1 }
  0xa0   :  { %v329_v46 = vadd.f32 %v328_v45, %v314_v44 }
  0xa6   :  { %v342_v47 = vpop.f32.mrf.mxu2  ;;  %v316_v52 = vpop.f32.mrf.mxu0 }
  0xa7   :  { %v356_v48 = vpop.f32.mrf.mxu3  ;;  %v343_v49 = vadd.f32 %v342_v47, %v329_v46  ;;  %v330_v53 = vpop.f32.mrf.mxu1 }
  0xa8   :  { %v331_v56 = vadd.f32 %v330_v53, %v316_v52 }
  0xa9   :  { %v357_v50 = vadd.f32 %v356_v48, %v343_v49 }
  0xab   :  { %v374_v55 = vmul.f32 %v569_v51, %v357_v50 }
  0xad   :  { %v380_v58 = vadd.f32 %v570_v54, %v374_v55 }
  0xae   :  { %v344_v57 = vpop.f32.mrf.mxu2 }
  0xaf   :  { %v345_v59 = vadd.f32 %v344_v57, %v331_v56  ;;  %v358_v60 = vpop.f32.mrf.mxu3  ;;  %382 = vst [vmem:[%s732_s4] sm:$0xff] %v380_v58 }
  0xb1   :  { %v359_v61 = vadd.f32 %v358_v60, %v345_v59 }
  0xb3   :  { %v375_v62 = vmul.f32 %v569_v51, %v359_v61 }
  0xb5   :  { %v381_v63 = vadd.f32 %v570_v54, %v375_v62 }
  0xb7   :  { %383 = vst [vmem:[%s732_s4 + $0x8] sm:$0xff] %v381_v63 }

// kernel: resnet18_16s_forward.46
= control target key start
LH: loop header
LB: loop body
LE: loop exit
PB: predicated region body
PF: predicated region fallthrough
CT: control target
= control target key end

     0   :  { %s301_s1 = inlined_call_operand.vmem [shape: bf16[128,128], index: 1, kind: input, shape index: {}]   ;;  %s302_s2 = inlined_call_operand.vmem [shape: f32[1,128], index: 2, kind: input, shape index: {}]   ;;  %s303_s3 = inlined_call_operand.vmem [shape: f32[1,128], index: 3, kind: input, shape index: {}]   ;;  %s304_s0 = inlined_call_operand.vmem [shape: bf16[32,128], index: 0, kind: input, shape index: {}]   ;;  %s305_s4 = inlined_call_operand.vmem [shape: f32[32,128], index: 4, kind: output, shape index: {}]  }
   0x1   :  { %v216_v0 = vld [vmem:[%s301_s1 + $0x38] sm:$0xff]  ;;  %v215_v1 = vld [vmem:[%s301_s1 + $0x30] sm:$0xff]  ;;  %v214_v2 = vld [vmem:[%s301_s1 + $0x28] sm:$0xff] }
   0x2   :  { %109 = vmatpush.bf16.msra.mxu0 %v216_v0  ;;  %217 = vmatpush.bf16.msra.mxu1 %v216_v0  ;;  %v213_v3 = vld [vmem:[%s301_s1 + $0x20] sm:$0xff]  ;;  %v212_v4 = vld [vmem:[%s301_s1 + $0x18] sm:$0xff]  ;;  %v211_v5 = vld [vmem:[%s301_s1 + $0x10] sm:$0xff] }
   0x3   :  { %v210_v6 = vld [vmem:[%s301_s1 + $0x8] sm:$0xff]  ;;  %v209_v7 = vld [vmem:[%s301_s1] sm:$0xff] }
   0x4   :  { %v207_v8 = vld [vmem:[%s304_s0] sm:$0xff]  ;;  %v208_v9 = vld [vmem:[%s304_s0 + $0x8] sm:$0xff] }
   0x5   :  { %v226_v10 = vld [vmem:[%s302_s2] ss:$0 sm:$0xff] }
   0x6   :  { %110 = vmatpush.bf16.msra.mxu0 %v215_v1  ;;  %218 = vmatpush.bf16.msra.mxu1 %v215_v1  ;;  %v227_v13 = vld [vmem:[%s303_s3] ss:$0 sm:$0xff] }
   0xa   :  { %111 = vmatpush.bf16.msra.mxu0 %v214_v2  ;;  %219 = vmatpush.bf16.msra.mxu1 %v214_v2 }
   0xe   :  { %112 = vmatpush.bf16.msra.mxu0 %v213_v3  ;;  %220 = vmatpush.bf16.msra.mxu1 %v213_v3 }
  0x12   :  { %113 = vmatpush.bf16.msra.mxu0 %v212_v4  ;;  %221 = vmatpush.bf16.msra.mxu1 %v212_v4 }
  0x16   :  { %114 = vmatpush.bf16.msra.mxu0 %v211_v5  ;;  %222 = vmatpush.bf16.msra.mxu1 %v211_v5 }
  0x1a   :  { %115 = vmatpush.bf16.msra.mxu0 %v210_v6  ;;  %223 = vmatpush.bf16.msra.mxu1 %v210_v6 }
  0x1e   :  { %116 = vmatpush.bf16.msra.mxu0 %v209_v7  ;;  %224 = vmatpush.bf16.msra.mxu1 %v209_v7 }
  0x21   :  { %117 = vmatmul.bf16.vlgmr.msra.gmra.mxu0 %v207_v8  ;;  %122 = vmatmul.bf16.vlgmr.msra.gmra.mxu1 %v208_v9 }
  0x9e   :  { %v118_v11 = vpop.f32.mrf.mxu0  ;;  %v123_v12 = vpop.f32.mrf.mxu1 }
  0x9f   :  { %v147_v14 = vmul.f32 %v226_v10, %v118_v11  ;;  %v149_v15 = vmul.f32 %v226_v10, %v123_v12 }
  0xa1   :  { %v155_v16 = vadd.f32 %v227_v13, %v147_v14  ;;  %v157_v17 = vadd.f32 %v227_v13, %v149_v15 }
  0xa3   :  { %159 = vst [vmem:[%s305_s4] sm:$0xff] %v155_v16 }
  0xa4   :  { %161 = vst [vmem:[%s305_s4 + $0x10] sm:$0xff] %v157_v17 }
  0xa6   :  { %v120_v18 = vpop.f32.mrf.mxu0  ;;  %v125_v19 = vpop.f32.mrf.mxu1 }
  0xa7   :  { %v148_v20 = vmul.f32 %v226_v10, %v120_v18  ;;  %v150_v21 = vmul.f32 %v226_v10, %v125_v19 }
  0xa9   :  { %v156_v22 = vadd.f32 %v227_v13, %v148_v20  ;;  %v158_v23 = vadd.f32 %v227_v13, %v150_v21 }
  0xab   :  { %160 = vst [vmem:[%s305_s4 + $0x8] sm:$0xff] %v156_v22 }
  0xac   :  { %162 = vst [vmem:[%s305_s4 + $0x18] sm:$0xff] %v158_v23 }

// kernel: resnet18_16s_forward.47
= control target key start
LH: loop header
LB: loop body
LE: loop exit
PB: predicated region body
PF: predicated region fallthrough
CT: control target
= control target key end

     0   :  { %s1209_s15 = smov 0   ;;  %s1211_s16 = smov 0   ;;  %s1399_s0 = inlined_call_operand.vmem [shape: bf16[512,128], index: 0, kind: input, shape index: {}]   ;;  %s1400_s1 = inlined_call_operand.vmem [shape: bf16[128,128], index: 1, kind: input, shape index: {}]   ;;  %s1401_s2 = inlined_call_operand.vmem [shape: f32[1,128], index: 2, kind: input, shape index: {}]   ;;  %s1402_s3 = inlined_call_operand.vmem [shape: f32[1,128], index: 3, kind: input, shape index: {}]   ;;  %s1403_s4 = inlined_call_operand.vmem [shape: f32[512,128], index: 4, kind: output, shape index: {}]  }
   0x1   :  { %s1213_s17 = smov 0  }
   0x2 LB: > { %s33_s18 = sadd.s32 1, %s1178_s16  ;;  %p982_p0 = scmp.ge.s32.totalorder %s1182_s17, 1  ;;  %s1182_s17 = sphi %s1213_s17, %s14_s17   ;;  %s1178_s16 = sphi %s1211_s16, %s1405_s16   ;;  %s1174_s15 = sphi %s1209_s15, %s1404_s15  }
   0x3   : > { %p35_p1 = scmp.ge.s32.totalorder %s33_s18, 2  ;;  %p221_p2 = scmp.lt.s32.totalorder %s1182_s17, 3 }
   0x5   : > { %s1407_s18 = smov (%p35_p1, %s33_s18), 0  ;;  %p222_p3 = pnand %p982_p0, %p221_p2 }
   0x6   : > { %s983_s27 = sshll.u32 (!%p222_p3), %s1174_s15, 5 }
   0x7   : > { %225 = sbr.rel (%p222_p3) target bundleno = 239 (0xef), region = 36  ;;  %p268_p4 = scmp.lt.s32.totalorder (!%p222_p3), %s983_s27, 63 }
   0xc   : > { %v1108_v0 = vld [vmem:[%s1400_s1 + $0x38] sm:$0xff]  ;;  %v1107_v1 = vld [vmem:[%s1400_s1 + $0x30] sm:$0xff]  ;;  %v1106_v2 = vld [vmem:[%s1400_s1 + $0x28] sm:$0xff]  ;;  %s1409_s27 = smov (!%p268_p4, %s983_s27), 63 }
   0xd   : > { %560 = vmatpush.bf16.msra.mxu0 %v1108_v0  ;;  %1109 = vmatpush.bf16.msra.mxu1 %v1108_v0  ;;  %v1105_v3 = vld [vmem:[%s1400_s1 + $0x20] sm:$0xff]  ;;  %v1104_v4 = vld [vmem:[%s1400_s1 + $0x18] sm:$0xff]  ;;  %v1103_v5 = vld [vmem:[%s1400_s1 + $0x10] sm:$0xff]  ;;  %s984_s8 = sshll.u32 %s1409_s27, 2  ;;  %s986_s19 = sshll.u32 %s1409_s27, 3 }
   0xe   : > { %1110 = vmatpush.bf16.msra.mxu2 %v1108_v0  ;;  %1111 = vmatpush.bf16.msra.mxu3 %v1108_v0  ;;  %v1102_v6 = vld [vmem:[%s1400_s1 + $0x8] sm:$0xff]  ;;  %v1101_v7 = vld [vmem:[%s1400_s1] sm:$0xff]  ;;  %s1260_s13 = scalar_lea.vmem %s1399_s0, %s984_s8  ;;  %s1294_s24 = scalar_lea.vmem %s1403_s4, %s986_s19 }
   0xf   : > { %v1085_v8 = vld [vmem:[%s1260_s13] sm:$0xff]  ;;  %v1086_v12 = vld [vmem:[%s1260_s13 + $0x8] sm:$0xff]  ;;  %v1087_v16 = vld [vmem:[%s1260_s13 + $0x10] sm:$0xff] }
  0x10   : > { %v1089_v9 = vld [vmem:[%s1260_s13 + $0x20] sm:$0xff]  ;;  %v1090_v13 = vld [vmem:[%s1260_s13 + $0x28] sm:$0xff]  ;;  %v1091_v17 = vld [vmem:[%s1260_s13 + $0x30] sm:$0xff] }
  0x11   : > { %561 = vmatpush.bf16.msra.mxu0 %v1107_v1  ;;  %1112 = vmatpush.bf16.msra.mxu1 %v1107_v1  ;;  %v1093_v10 = vld [vmem:[%s1260_s13 + $0x40] sm:$0xff]  ;;  %v1094_v14 = vld [vmem:[%s1260_s13 + $0x48] sm:$0xff]  ;;  %v1095_v18 = vld [vmem:[%s1260_s13 + $0x50] sm:$0xff] }
  0x12   : > { %1113 = vmatpush.bf16.msra.mxu2 %v1107_v1  ;;  %1114 = vmatpush.bf16.msra.mxu3 %v1107_v1  ;;  %v1097_v11 = vld [vmem:[%s1260_s13 + $0x60] sm:$0xff]  ;;  %v1098_v15 = vld [vmem:[%s1260_s13 + $0x68] sm:$0xff]  ;;  %v1099_v19 = vld [vmem:[%s1260_s13 + $0x70] sm:$0xff] }
  0x13   : > { %v1088_v20 = vld [vmem:[%s1260_s13 + $0x18] sm:$0xff]  ;;  %v1281_v24 = vld [vmem:[%s1401_s2] ss:$0 sm:$0xff] }
  0x14   : > { %v1092_v21 = vld [vmem:[%s1260_s13 + $0x38] sm:$0xff]  ;;  %v1287_v27 = vld [vmem:[%s1402_s3] ss:$0 sm:$0xff] }
  0x15   : > { %562 = vmatpush.bf16.msra.mxu0 %v1106_v2  ;;  %1115 = vmatpush.bf16.msra.mxu1 %v1106_v2  ;;  %v1096_v22 = vld [vmem:[%s1260_s13 + $0x58] sm:$0xff] }
  0x16   : > { %1116 = vmatpush.bf16.msra.mxu2 %v1106_v2  ;;  %1117 = vmatpush.bf16.msra.mxu3 %v1106_v2  ;;  %v1100_v23 = vld [vmem:[%s1260_s13 + $0x78] sm:$0xff] }
  0x19   : > { %563 = vmatpush.bf16.msra.mxu0 %v1105_v3  ;;  %1118 = vmatpush.bf16.msra.mxu1 %v1105_v3 }
  0x1a   : > { %1119 = vmatpush.bf16.msra.mxu2 %v1105_v3  ;;  %1120 = vmatpush.bf16.msra.mxu3 %v1105_v3 }
  0x1d   : > { %564 = vmatpush.bf16.msra.mxu0 %v1104_v4  ;;  %1121 = vmatpush.bf16.msra.mxu1 %v1104_v4 }
  0x1e   : > { %1122 = vmatpush.bf16.msra.mxu2 %v1104_v4  ;;  %1123 = vmatpush.bf16.msra.mxu3 %v1104_v4 }
  0x21   : > { %565 = vmatpush.bf16.msra.mxu0 %v1103_v5  ;;  %1124 = vmatpush.bf16.msra.mxu1 %v1103_v5 }
  0x22   : > { %1125 = vmatpush.bf16.msra.mxu2 %v1103_v5  ;;  %1126 = vmatpush.bf16.msra.mxu3 %v1103_v5 }
  0x25   : > { %566 = vmatpush.bf16.msra.mxu0 %v1102_v6  ;;  %1127 = vmatpush.bf16.msra.mxu1 %v1102_v6 }
  0x26   : > { %1128 = vmatpush.bf16.msra.mxu2 %v1102_v6  ;;  %1129 = vmatpush.bf16.msra.mxu3 %v1102_v6 }
  0x29   : > { %567 = vmatpush.bf16.msra.mxu0 %v1101_v7  ;;  %1130 = vmatpush.bf16.msra.mxu1 %v1101_v7 }
  0x2a   : > { %1131 = vmatpush.bf16.msra.mxu2 %v1101_v7  ;;  %1132 = vmatpush.bf16.msra.mxu3 %v1101_v7 }
  0x2c   : > { %568 = vmatmul.bf16.vlgmr.msra.gmra.mxu0 %v1085_v8  ;;  %588 = vmatmul.bf16.vlgmr.msra.gmra.mxu1 %v1089_v9 }
  0x2d   : > { %608 = vmatmul.bf16.vlgmr.msra.gmra.mxu2 %v1093_v10  ;;  %628 = vmatmul.bf16.vlgmr.msra.gmra.mxu3 %v1097_v11 }
  0x3c   : > { %573 = vmatmul.bf16.gmra.mxu0 %v1086_v12  ;;  %593 = vmatmul.bf16.gmra.mxu1 %v1090_v13 }
  0x3d   : > { %613 = vmatmul.bf16.gmra.mxu2 %v1094_v14  ;;  %633 = vmatmul.bf16.gmra.mxu3 %v1098_v15 }
  0x4c   : > { %578 = vmatmul.bf16.gmra.mxu0 %v1087_v16  ;;  %598 = vmatmul.bf16.gmra.mxu1 %v1091_v17 }
  0x4d   : > { %618 = vmatmul.bf16.gmra.mxu2 %v1095_v18  ;;  %638 = vmatmul.bf16.gmra.mxu3 %v1099_v19 }
  0x5c   : > { %583 = vmatmul.bf16.gmra.mxu0 %v1088_v20  ;;  %603 = vmatmul.bf16.gmra.mxu1 %v1092_v21 }
  0x5d   : > { %623 = vmatmul.bf16.gmra.mxu2 %v1096_v22  ;;  %643 = vmatmul.bf16.gmra.mxu3 %v1100_v23 }
  0xa9   : > { %v569_v25 = vpop.f32.mrf.mxu0  ;;  %v589_v26 = vpop.f32.mrf.mxu1 }
  0xaa   : > { %v752_v28 = vmul.f32 %v1281_v24, %v569_v25  ;;  %v760_v29 = vmul.f32 %v1281_v24, %v589_v26 }
  0xac   : > { %v788_v30 = vadd.f32 %v1287_v27, %v752_v28  ;;  %v796_v31 = vadd.f32 %v1287_v27, %v760_v29 }
  0xae   : > { %820 = vst [vmem:[%s1294_s24] sm:$0xff] %v788_v30 }
  0xaf   : > { %828 = vst [vmem:[%s1294_s24 + $0x40] sm:$0xff] %v796_v31 }
  0xb0   : > { %v609_v32 = vpop.f32.mrf.mxu2  ;;  %v629_v33 = vpop.f32.mrf.mxu3 }
  0xb1   : > { %v571_v34 = vpop.f32.mrf.mxu0  ;;  %v591_v35 = vpop.f32.mrf.mxu1  ;;  %v768_v36 = vmul.f32 %v1281_v24, %v609_v32  ;;  %v776_v37 = vmul.f32 %v1281_v24, %v629_v33 }
  0xb2   : > { %v753_v38 = vmul.f32 %v1281_v24, %v571_v34  ;;  %v761_v39 = vmul.f32 %v1281_v24, %v591_v35 }
  0xb3   : > { %v804_v40 = vadd.f32 %v1287_v27, %v768_v36  ;;  %v812_v41 = vadd.f32 %v1287_v27, %v776_v37 }
  0xb4   : > { %v789_v42 = vadd.f32 %v1287_v27, %v753_v38  ;;  %v797_v43 = vadd.f32 %v1287_v27, %v761_v39 }
  0xb5   : > { %836 = vst [vmem:[%s1294_s24 + $0x80] sm:$0xff] %v804_v40 }
  0xb6   : > { %844 = vst [vmem:[%s1294_s24 + $0xc0] sm:$0xff] %v812_v41 }
  0xb7   : > { %821 = vst [vmem:[%s1294_s24 + $0x8] sm:$0xff] %v789_v42 }
  0xb8   : > { %v611_v44 = vpop.f32.mrf.mxu2  ;;  %v631_v45 = vpop.f32.mrf.mxu3  ;;  %829 = vst [vmem:[%s1294_s24 + $0x48] sm:$0xff] %v797_v43 }
  0xb9   : > { %v574_v46 = vpop.f32.mrf.mxu0  ;;  %v594_v47 = vpop.f32.mrf.mxu1  ;;  %v769_v48 = vmul.f32 %v1281_v24, %v611_v44  ;;  %v777_v49 = vmul.f32 %v1281_v24, %v631_v45 }
  0xba   : > { %v754_v50 = vmul.f32 %v1281_v24, %v574_v46  ;;  %v762_v51 = vmul.f32 %v1281_v24, %v594_v47 }
  0xbb   : > { %v805_v52 = vadd.f32 %v1287_v27, %v769_v48  ;;  %v813_v53 = vadd.f32 %v1287_v27, %v777_v49 }
  0xbc   : > { %v790_v54 = vadd.f32 %v1287_v27, %v754_v50  ;;  %v798_v55 = vadd.f32 %v1287_v27, %v762_v51 }
  0xbd   : > { %837 = vst [vmem:[%s1294_s24 + $0x88] sm:$0xff] %v805_v52 }
  0xbe   : > { %845 = vst [vmem:[%s1294_s24 + $0xc8] sm:$0xff] %v813_v53 }
  0xbf   : > { %822 = vst [vmem:[%s1294_s24 + $0x10] sm:$0xff] %v790_v54 }
  0xc0   : > { %v614_v56 = vpop.f32.mrf.mxu2  ;;  %v634_v57 = vpop.f32.mrf.mxu3  ;;  %830 = vst [vmem:[%s1294_s24 + $0x50] sm:$0xff] %v798_v55 }
  0xc1   : > { %v576_v58 = vpop.f32.mrf.mxu0  ;;  %v596_v59 = vpop.f32.mrf.mxu1  ;;  %v770_v60 = vmul.f32 %v1281_v24, %v614_v56  ;;  %v778_v61 = vmul.f32 %v1281_v24, %v634_v57 }
  0xc2   : > { %v755_v62 = vmul.f32 %v1281_v24, %v576_v58  ;;  %v763_v63 = vmul.f32 %v1281_v24, %v596_v59 }
  0xc3   : > { %v806_v0 = vadd.f32 %v1287_v27, %v770_v60  ;;  %v814_v1 = vadd.f32 %v1287_v27, %v778_v61 }
  0xc4   : > { %v791_v2 = vadd.f32 %v1287_v27, %v755_v62  ;;  %v799_v3 = vadd.f32 %v1287_v27, %v763_v63 }
  0xc5   : > { %838 = vst [vmem:[%s1294_s24 + $0x90] sm:$0xff] %v806_v0 }
  0xc6   : > { %846 = vst [vmem:[%s1294_s24 + $0xd0] sm:$0xff] %v814_v1 }
  0xc7   : > { %823 = vst [vmem:[%s1294_s24 + $0x18] sm:$0xff] %v791_v2 }
  0xc8   : > { %v616_v4 = vpop.f32.mrf.mxu2  ;;  %v636_v5 = vpop.f32.mrf.mxu3  ;;  %831 = vst [vmem:[%s1294_s24 + $0x58] sm:$0xff] %v799_v3 }
  0xc9   : > { %v579_v6 = vpop.f32.mrf.mxu0  ;;  %v599_v7 = vpop.f32.mrf.mxu1  ;;  %v771_v8 = vmul.f32 %v1281_v24, %v616_v4  ;;  %v779_v9 = vmul.f32 %v1281_v24, %v636_v5 }
  0xca   : > { %v756_v10 = vmul.f32 %v1281_v24, %v579_v6  ;;  %v764_v11 = vmul.f32 %v1281_v24, %v599_v7 }
  0xcb   : > { %v807_v12 = vadd.f32 %v1287_v27, %v771_v8  ;;  %v815_v13 = vadd.f32 %v1287_v27, %v779_v9 }
  0xcc   : > { %v792_v14 = vadd.f32 %v1287_v27, %v756_v10  ;;  %v800_v15 = vadd.f32 %v1287_v27, %v764_v11 }
  0xcd   : > { %839 = vst [vmem:[%s1294_s24 + $0x98] sm:$0xff] %v807_v12 }
  0xce   : > { %847 = vst [vmem:[%s1294_s24 + $0xd8] sm:$0xff] %v815_v13 }
  0xcf   : > { %824 = vst [vmem:[%s1294_s24 + $0x20] sm:$0xff] %v792_v14 }
  0xd0   : > { %v619_v16 = vpop.f32.mrf.mxu2  ;;  %v639_v17 = vpop.f32.mrf.mxu3  ;;  %832 = vst [vmem:[%s1294_s24 + $0x60] sm:$0xff] %v800_v15 }
  0xd1   : > { %v581_v18 = vpop.f32.mrf.mxu0  ;;  %v601_v19 = vpop.f32.mrf.mxu1  ;;  %v772_v20 = vmul.f32 %v1281_v24, %v619_v16  ;;  %v780_v21 = vmul.f32 %v1281_v24, %v639_v17 }
  0xd2   : > { %v757_v22 = vmul.f32 %v1281_v24, %v581_v18  ;;  %v765_v23 = vmul.f32 %v1281_v24, %v601_v19 }
  0xd3   : > { %v808_v25 = vadd.f32 %v1287_v27, %v772_v20  ;;  %v816_v26 = vadd.f32 %v1287_v27, %v780_v21 }
  0xd4   : > { %v793_v28 = vadd.f32 %v1287_v27, %v757_v22  ;;  %v801_v29 = vadd.f32 %v1287_v27, %v765_v23 }
  0xd5   : > { %840 = vst [vmem:[%s1294_s24 + $0xa0] sm:$0xff] %v808_v25 }
  0xd6   : > { %848 = vst [vmem:[%s1294_s24 + $0xe0] sm:$0xff] %v816_v26 }
  0xd7   : > { %825 = vst [vmem:[%s1294_s24 + $0x28] sm:$0xff] %v793_v28 }
  0xd8   : > { %v621_v30 = vpop.f32.mrf.mxu2  ;;  %v641_v31 = vpop.f32.mrf.mxu3  ;;  %833 = vst [vmem:[%s1294_s24 + $0x68] sm:$0xff] %v801_v29 }
  0xd9   : > { %v584_v32 = vpop.f32.mrf.mxu0  ;;  %v604_v33 = vpop.f32.mrf.mxu1  ;;  %v773_v34 = vmul.f32 %v1281_v24, %v621_v30  ;;  %v781_v35 = vmul.f32 %v1281_v24, %v641_v31 }
  0xda   : > { %v758_v36 = vmul.f32 %v1281_v24, %v584_v32  ;;  %v766_v37 = vmul.f32 %v1281_v24, %v604_v33 }
  0xdb   : > { %v809_v38 = vadd.f32 %v1287_v27, %v773_v34  ;;  %v817_v39 = vadd.f32 %v1287_v27, %v781_v35 }
  0xdc   : > { %v794_v40 = vadd.f32 %v1287_v27, %v758_v36  ;;  %v802_v41 = vadd.f32 %v1287_v27, %v766_v37 }
  0xdd   : > { %841 = vst [vmem:[%s1294_s24 + $0xa8] sm:$0xff] %v809_v38 }
  0xde   : > { %849 = vst [vmem:[%s1294_s24 + $0xe8] sm:$0xff] %v817_v39 }
  0xdf   : > { %826 = vst [vmem:[%s1294_s24 + $0x30] sm:$0xff] %v794_v40 }
  0xe0   : > { %v624_v42 = vpop.f32.mrf.mxu2  ;;  %v644_v43 = vpop.f32.mrf.mxu3  ;;  %834 = vst [vmem:[%s1294_s24 + $0x70] sm:$0xff] %v802_v41 }
  0xe1   : > { %v586_v44 = vpop.f32.mrf.mxu0  ;;  %v606_v45 = vpop.f32.mrf.mxu1  ;;  %v774_v46 = vmul.f32 %v1281_v24, %v624_v42  ;;  %v782_v47 = vmul.f32 %v1281_v24, %v644_v43 }
  0xe2   : > { %v759_v48 = vmul.f32 %v1281_v24, %v586_v44  ;;  %v767_v49 = vmul.f32 %v1281_v24, %v606_v45 }
  0xe3   : > { %v810_v50 = vadd.f32 %v1287_v27, %v774_v46  ;;  %v818_v51 = vadd.f32 %v1287_v27, %v782_v47 }
  0xe4   : > { %v795_v52 = vadd.f32 %v1287_v27, %v759_v48  ;;  %v803_v53 = vadd.f32 %v1287_v27, %v767_v49 }
  0xe5   : > { %842 = vst [vmem:[%s1294_s24 + $0xb0] sm:$0xff] %v810_v50 }
  0xe6   : > { %850 = vst [vmem:[%s1294_s24 + $0xf0] sm:$0xff] %v818_v51 }
  0xe7   : > { %827 = vst [vmem:[%s1294_s24 + $0x38] sm:$0xff] %v795_v52 }
  0xe8   : > { %v626_v54 = vpop.f32.mrf.mxu2  ;;  %v646_v55 = vpop.f32.mrf.mxu3  ;;  %835 = vst [vmem:[%s1294_s24 + $0x78] sm:$0xff] %v803_v53 }
  0xe9   : > { %v775_v56 = vmul.f32 %v1281_v24, %v626_v54  ;;  %v783_v57 = vmul.f32 %v1281_v24, %v646_v55 }
  0xeb   : > { %v811_v58 = vadd.f32 %v1287_v27, %v775_v56  ;;  %v819_v59 = vadd.f32 %v1287_v27, %v783_v57 }
  0xed   : > { %843 = vst [vmem:[%s1294_s24 + $0xb8] sm:$0xff] %v811_v58 }
  0xee   : > { %851 = vst [vmem:[%s1294_s24 + $0xf8] sm:$0xff] %v819_v59 }
  0xef PF: > { %s14_s17 = sadd.s32 1, %s1182_s17   ;;  %s1404_s15 = smov %s1178_s16 }
  0xf0   : > { %p11_p5 = scmp.ge.s32.totalorder %s14_s17, 4   ;;  %s1405_s16 = smov %s1407_s18 }
  0xf2   :  { %13 = sbr.rel (!%p11_p5) target bundleno = 2 (0x2), region = 83 }

</bundles_post_ra>
